<compile_context>
chip_gen: v5e
topology: v5e:2x2
jax: 0.10.0
libtpu: 0.0.40
codegen_flags: <defaults>
</compile_context>

<pallas_src>
import functools
import math

import jax
import jax.numpy as jnp
import numpy as np
from jax.experimental import pallas as pl
from jax.experimental.pallas import tpu as pltpu

_BN_EPS = 1e-5   # PyTorch BatchNorm2d default eps


# ---------------------------------------------------------------------------
# In-kernel helpers (VMEM-resident values; layout-safe ops only).
# ---------------------------------------------------------------------------
def _conv(a, w_ref, kh):
    """a: (R, Win*Cin) f32, rows=(sample, image row).  w_ref: bf16 block-
    Toeplitz weights (kh, Win*Cin, Wo*Cout).  The im2col is just kh contiguous
    row-window slices; rows shrink by kh-1 (per-sample pitch bookkeeping stays
    valid because valid_rows + kh - 1 <= pitch at every layer)."""
    r_out = a.shape[0] - kh + 1
    z = jnp.dot(a[0:r_out, :].astype(jnp.bfloat16), w_ref[0],
                preferred_element_type=jnp.float32)
    for i in range(1, kh):
        z = z + jnp.dot(a[i:i + r_out, :].astype(jnp.bfloat16), w_ref[i],
                        preferred_element_type=jnp.float32)
    return z


def _gelu_bn(y, gb_ref, tile_ref, gsum_ref, valid_ref, cnt):
    """tanh-GELU + training-mode BatchNorm on the packed (row, (w,c)) layout.
    Stats are masked to valid image rows and kept entirely in f32."""
    # TODO(synk): PyTorch nn.GELU() defaults to exact erf-GELU; tanh approx is
    # used because lax.erf lowering in Mosaic is not guaranteed (~1e-3 diff).
    y = jax.nn.gelu(y, approximate=True)
    ym = y * valid_ref[...]                                   # zero garbage rows
    s1 = jnp.dot(jnp.sum(ym, axis=0, keepdims=True), gsum_ref[...],
                 preferred_element_type=jnp.float32)          # (1, C) sums
    s2 = jnp.dot(jnp.sum(ym * y, axis=0, keepdims=True), gsum_ref[...],
                 preferred_element_type=jnp.float32)          # (1, C) sum sq
    mean = s1 / cnt
    var = jnp.maximum(s2 / cnt - mean * mean, 0.0)            # biased, clamped
    scale = gb_ref[0:1, :] * jax.lax.rsqrt(var + _BN_EPS)
    shift = gb_ref[1:2, :] - mean * scale
    # One fused M=2 broadcast matmul: (scale; shift) @ tile -> packed lanes.
    ss = jnp.dot(jnp.concatenate([scale, shift], axis=0), tile_ref[...],
                 preferred_element_type=jnp.float32)          # (2, Wo*C)
    return y * ss[0:1, :] + ss[1:2, :]


def _maxpool(y, selw_ref, selh_ref, wo, cout):
    """MaxPool2d(2).  W direction: adjacent lane-group max + host 0/1 column
    selection.  H direction: adjacent row max + RECTANGULAR host 0/1 row
    selection that also compacts the per-sample row pitch (32->16->8)."""
    r = y.shape[0]
    mw = jnp.maximum(y[:, 0:(wo - 1) * cout], y[:, cout:wo * cout])
    yw = jnp.dot(mw.astype(jnp.bfloat16), selw_ref[...],
                 preferred_element_type=jnp.float32)
    mh = jnp.maximum(yw[0:r - 1, :], yw[1:r, :])
    return jnp.dot(selh_ref[...], mh.astype(jnp.bfloat16),
                   preferred_element_type=jnp.float32)


def _mnist_fused_kernel(x_ref,
                        w1, w2, w3, w4, w5,
                        gb1, gb2, gb3, gb4,
                        t1, t2, t3, t4,
                        g1, g2, g3, g4,
                        v1, v2, v3, v4,
                        sw1, sh1, sw2, sh2,
                        wfc_ref, bfc_ref,
                        o_ref, fc_ref, *, batch):
    a = x_ref[...]                                   # (N*32, 28) rows=(n,h) lanes=(w,c)

    a = _conv(a, w1, 3)                              # (N*32-2, 26*8)
    a = _gelu_bn(a, gb1, t1, g1, v1, float(batch * 26 * 26))
    a = _conv(a, w2, 3)                              # (N*32-4, 24*16)
    a = _gelu_bn(a, gb2, t2, g2, v2, float(batch * 24 * 24))
    a = _maxpool(a, sw1, sh1, 24, 16)                # (N*16, 12*16)  pitch 32 -> 16
    a = _conv(a, w3, 3)                              # (N*16-2, 10*32)
    a = _gelu_bn(a, gb3, t3, g3, v3, float(batch * 10 * 10))
    a = _maxpool(a, sw2, sh2, 10, 32)                # (N*8, 5*32)    pitch 16 -> 8
    a = _conv(a, w4, 3)                              # (N*8-2, 3*32)
    a = _gelu_bn(a, gb4, t4, g4, v4, float(batch * 3 * 3))
    a = _conv(a, w5, 2)                              # (N*8-3, 2*32)

    # FC: the two valid image rows per sample sit at rows n*8+{0,1}.  Spill to
    # VMEM scratch and gather them with strided reads (stride = row pitch).
    # The NCHW flatten order is folded into the FC weight layout.
    fc_ref[...] = a
    logits = bfc_ref[...]                            # (1, 10) f32
    for h in range(2):
        rows = fc_ref[pl.ds(h, batch, stride=8), :]  # (N, 64)
        logits = logits + jnp.dot(rows.astype(jnp.bfloat16), wfc_ref[h],
                                  preferred_element_type=jnp.float32)
    z = logits - jnp.max(logits, axis=1, keepdims=True)
    o_ref[...] = z - jnp.log(jnp.sum(jnp.exp(z), axis=1, keepdims=True))


# ---------------------------------------------------------------------------
# Host-side constant builders (weight re-layout + static 0/1 selections only;
# activations never round-trip HBM).
# ---------------------------------------------------------------------------
def _block_toeplitz_weights(w_hwio, w_in):
    """HWIO conv weight -> bf16 (kh, W_in*Cin, Wo*Cout) matrices B such that
    packed_out = sum_i packed_in[i : i + R_out, :] @ B[i]."""
    kh, kw, cin, cout = w_hwio.shape
    wo = w_in - kw + 1
    place = np.zeros((kw, w_in, wo), np.float32)     # place[j, w, v] = (w == v + j)
    for j in range(kw):
        place[j, j:j + wo, :] = np.eye(wo, dtype=np.float32)
    b = jnp.einsum("jwv,ijco->iwcvo", jnp.asarray(place), w_hwio)
    return b.reshape(kh, w_in * cin, wo * cout).astype(jnp.bfloat16)


def _tile_mat(c, wo):
    """(C, Wo*C) f32: broadcast a per-channel row vector to packed (w,c) lanes."""
    return jnp.asarray(np.tile(np.eye(c, dtype=np.float32), (1, wo)))


def _group_mat(c, wo):
    """(Wo*C, C) f32: sum packed (w,c) lanes over w per channel (BN stats)."""
    return jnp.asarray(np.tile(np.eye(c, dtype=np.float32), (wo, 1)))


def _valid_mask(rows, pitch, ho):
    """(R, 1) f32: 1 for valid image rows of each per-sample block, else 0."""
    return jnp.asarray(
        (np.arange(rows) % pitch < ho).astype(np.float32).reshape(rows, 1))


def _pool_w_mat(wo, c):
    """((Wo-1)*C, (Wo//2)*C) bf16: keep every even packed lane group."""
    wp = wo // 2
    m = np.zeros(((wo - 1) * c, wp * c), np.float32)
    for p in range(wp):
        m[2 * p * c:(2 * p + 1) * c, p * c:(p + 1) * c] = np.eye(c)
    return jnp.asarray(m, dtype=jnp.bfloat16)


def _pool_h_mat(batch, in_pitch, out_pitch, hp, in_rows):
    """(batch*out_pitch, in_rows) bf16: row n*out_pitch+h picks adjacent-row-max
    row n*in_pitch+2h for h < hp (all-zero for pad rows) -> compacts the pitch."""
    m = np.zeros((batch * out_pitch, in_rows), np.float32)
    for n in range(batch):
        for h in range(hp):
            m[n * out_pitch + h, n * in_pitch + 2 * h] = 1.0
    return jnp.asarray(m, dtype=jnp.bfloat16)


def mnist_net_forward(x_nchw, params):
    n = x_nchw.shape[0]
    # Pack NCHW input: rows = (sample, image row) at a 32-row pitch, lanes = (w, c).
    x = x_nchw[:, 0, :, :].astype(jnp.float32)                  # (N, 28, 28)
    x = jnp.pad(x, ((0, 0), (0, 32 - 28), (0, 0)))              # (N, 32, 28)
    x_packed = x.reshape(n * 32, 28)

    cw = params["conv"]
    w1 = _block_toeplitz_weights(cw[0], 28)    # (3,  28, 208)
    w2 = _block_toeplitz_weights(cw[1], 26)    # (3, 208, 384)
    w3 = _block_toeplitz_weights(cw[2], 12)    # (3, 192, 320)
    w4 = _block_toeplitz_weights(cw[3], 5)     # (3, 160,  96)
    w5 = _block_toeplitz_weights(cw[4], 3)     # (2,  96,  64)

    gbs = [jnp.stack([g, b], axis=0) for (g, b) in params["bn"]]   # (2, C) each

    tiles = [_tile_mat(8, 26), _tile_mat(16, 24), _tile_mat(32, 10), _tile_mat(32, 3)]
    gsums = [_group_mat(8, 26), _group_mat(16, 24), _group_mat(32, 10), _group_mat(32, 3)]
    valids = [_valid_mask(n * 32 - 2, 32, 26),
              _valid_mask(n * 32 - 4, 32, 24),
              _valid_mask(n * 16 - 2, 16, 10),
              _valid_mask(n * 8 - 2, 8, 3)]

    sw1 = _pool_w_mat(24, 16)                      # (368, 192)
    sh1 = _pool_h_mat(n, 32, 16, 12, n * 32 - 5)   # (N*16, N*32-5)
    sw2 = _pool_w_mat(10, 32)                      # (288, 160)
    sh2 = _pool_h_mat(n, 16, 8, 5, n * 16 - 3)     # (N*8,  N*16-3)

    # Fold the NCHW flatten order (c, h, w) into the FC weight layout so the
    # last conv's packed output feeds the FC directly (no transpose glue).
    wfc = jnp.transpose(params["fc_w"].reshape(32, 2, 2, 10), (1, 2, 0, 3))
    wfc = wfc.reshape(2, 2 * 32, 10).astype(jnp.bfloat16)       # [h][w*32 + c][k]
    bfc = params["fc_b"].reshape(1, 10).astype(jnp.float32)

    inputs = ([x_packed, w1, w2, w3, w4, w5] + gbs + tiles + gsums + valids
              + [sw1, sh1, sw2, sh2, wfc, bfc])

    # No grid -> single invocation, whole arrays resident in VMEM, no pointless
    # double-buffering of the (tiny) weight / constant inputs.
    vmem = pl.BlockSpec(memory_space=pltpu.MemorySpace.VMEM)
    return pl.pallas_call(
        functools.partial(_mnist_fused_kernel, batch=n),
        out_shape=jax.ShapeDtypeStruct((n, 10), jnp.float32),
        in_specs=[vmem] * len(inputs),
        out_specs=vmem,
        scratch_shapes=[pltpu.VMEM((n * 8 - 3, 2 * 32), jnp.float32)],
        compiler_params=pltpu.CompilerParams(vmem_limit_bytes=32 * 1024 * 1024),
    )(*inputs)


# ---------------------------------------------------------------------------
# Parameters + pure-XLA f32 reference (loose self-check only).
# ---------------------------------------------------------------------------
def init_params(key):
    conv_shapes = [(3, 3, 1, 8), (3, 3, 8, 16), (3, 3, 16, 32),
                   (3, 3, 32, 32), (2, 2, 32, 32)]
    keys = jax.random.split(key, len(conv_shapes) + 2)
    conv_ws = []
    for k_, s in zip(keys[:len(conv_shapes)], conv_shapes):
        fan_in = s[0] * s[1] * s[2]
        conv_ws.append(jax.random.normal(k_, s, jnp.float32) / math.sqrt(fan_in))
    bn = [(jnp.ones((c,), jnp.float32), jnp.zeros((c,), jnp.float32))
          for c in (8, 16, 32, 32)]
    fc_w = jax.random.normal(keys[-2], (32 * 2 * 2, 10), jnp.float32) / math.sqrt(128)
    fc_b = jax.random.normal(keys[-1], (10,), jnp.float32) * 0.01
    return {"conv": conv_ws, "bn": bn, "fc_w": fc_w, "fc_b": fc_b}


def _reference_forward(x_nchw, params):
    """Plain-XLA f32 reference of the same math (im2col conv, tanh-GELU,
    batch-stat BN, maxpool, channel-major flatten, FC, log_softmax)."""
    x = jnp.transpose(x_nchw, (0, 2, 3, 1)).astype(jnp.float32)

    def im2col(x, kh, kw):
        n, h, w, c = x.shape
        ho, wo = h - kh + 1, w - kw + 1
        cols = [x[:, i:i + ho, j:j + wo, :] for i in range(kh) for j in range(kw)]
        return (jnp.concatenate(cols, axis=-1).reshape(n * ho * wo, kh * kw * c),
                (n, ho, wo))

    def conv_block(x, w_hwio, gamma, beta, gelu_bn):
        kh, kw, cin, cout = w_hwio.shape
        p, (n, ho, wo) = im2col(x, kh, kw)
        y = p @ w_hwio.reshape(kh * kw * cin, cout)
        if gelu_bn:
            y = jax.nn.gelu(y, approximate=True)
            mu = jnp.mean(y, axis=0, keepdims=True)
            var = jnp.mean(jnp.square(y - mu), axis=0, keepdims=True)
            y = (y - mu) * jax.lax.rsqrt(var + _BN_EPS) * gamma + beta
        return y.reshape(n, ho, wo, cout)

    def pool(x):
        n, h, w, c = x.shape
        return jnp.max(x.reshape(n, h // 2, 2, w // 2, 2, c), axis=(2, 4))

    cw, bn = params["conv"], params["bn"]
    x = conv_block(x, cw[0], *bn[0], True)
    x = conv_block(x, cw[1], *bn[1], True)
    x = pool(x)
    x = conv_block(x, cw[2], *bn[2], True)
    x = pool(x)
    x = conv_block(x, cw[3], *bn[3], True)
    x = conv_block(x, cw[4], jnp.ones((32,), jnp.float32),
                   jnp.zeros((32,), jnp.float32), False)
    n = x.shape[0]
    x = jnp.transpose(x, (0, 3, 1, 2)).reshape(n, -1)
    logits = x @ params["fc_w"] + params["fc_b"]
    return jax.nn.log_softmax(logits, axis=1)


if __name__ == "__main__":
    key = jax.random.PRNGKey(0)
    k_x, k_p = jax.random.split(key)
    # 28x28 input is required by the module: the conv stack flattens to 32*2*2 = 128.
    x = jax.random.normal(k_x, (2, 1, 28, 28), jnp.float32)
    params = init_params(k_p)

    out = jax.block_until_ready(jax.jit(mnist_net_forward)(x, params))
    assert out.shape == (2, 10), out.shape
    # log_softmax rows must exponentiate-sum to 1 (computed in f32 in-kernel).
    assert bool(jnp.all(jnp.abs(jnp.sum(jnp.exp(out), axis=1) - 1.0) < 1e-3))
    # Loose cross-check against the pure-XLA f32 reference; tolerance covers
    # bf16 MXU operands + accumulation-order differences.
    ref = jax.block_until_ready(jax.jit(_reference_forward)(x, params))
    assert float(jnp.max(jnp.abs(out - ref))) < 1e-1, "mismatch vs XLA reference"
    print("KERNEL_OK")
</pallas_src>

<mosaic_0001>
module attributes {stable_mosaic.version = 11 : i64} {
  func.func @_mnist_fused_kernel(%arg0: memref<64x28xf32, #tpu.memory_space<vmem>>, %arg1: memref<3x28x208xbf16, #tpu.memory_space<vmem>>, %arg2: memref<3x208x384xbf16, #tpu.memory_space<vmem>>, %arg3: memref<3x192x320xbf16, #tpu.memory_space<vmem>>, %arg4: memref<3x160x96xbf16, #tpu.memory_space<vmem>>, %arg5: memref<2x96x64xbf16, #tpu.memory_space<vmem>>, %arg6: memref<2x8xf32, #tpu.memory_space<vmem>>, %arg7: memref<2x16xf32, #tpu.memory_space<vmem>>, %arg8: memref<2x32xf32, #tpu.memory_space<vmem>>, %arg9: memref<2x32xf32, #tpu.memory_space<vmem>>, %arg10: memref<8x208xf32, #tpu.memory_space<vmem>>, %arg11: memref<16x384xf32, #tpu.memory_space<vmem>>, %arg12: memref<32x320xf32, #tpu.memory_space<vmem>>, %arg13: memref<32x96xf32, #tpu.memory_space<vmem>>, %arg14: memref<208x8xf32, #tpu.memory_space<vmem>>, %arg15: memref<384x16xf32, #tpu.memory_space<vmem>>, %arg16: memref<320x32xf32, #tpu.memory_space<vmem>>, %arg17: memref<96x32xf32, #tpu.memory_space<vmem>>, %arg18: memref<62x1xf32, #tpu.memory_space<vmem>>, %arg19: memref<60x1xf32, #tpu.memory_space<vmem>>, %arg20: memref<30x1xf32, #tpu.memory_space<vmem>>, %arg21: memref<14x1xf32, #tpu.memory_space<vmem>>, %arg22: memref<368x192xbf16, #tpu.memory_space<vmem>>, %arg23: memref<32x59xbf16, #tpu.memory_space<vmem>>, %arg24: memref<288x160xbf16, #tpu.memory_space<vmem>>, %arg25: memref<16x29xbf16, #tpu.memory_space<vmem>>, %arg26: memref<2x64x10xbf16, #tpu.memory_space<vmem>>, %arg27: memref<1x10xf32, #tpu.memory_space<vmem>>, %arg28: memref<2x10xf32, #tpu.memory_space<vmem>>, %arg29: memref<13x64xf32, #tpu.memory_space<vmem>>) attributes {dimension_semantics = [], scalar_prefetch = 0 : i64, scratch_operands = 1 : i64, tpu.core_type = #tpu.core_type<tc>} {
    %c0 = arith.constant 0 : index
    %c0_0 = arith.constant 0 : index
    %0 = vector.load %arg0[%c0, %c0_0] : memref<64x28xf32, #tpu.memory_space<vmem>>, vector<64x28xf32>
    %1 = vector.extract_strided_slice %0 {offsets = [0, 0], sizes = [62, 28], strides = [1, 1]} : vector<64x28xf32> to vector<62x28xf32>
    %2 = arith.truncf %1 : vector<62x28xf32> to vector<62x28xbf16>
    %c0_1 = arith.constant 0 : index
    %c0_2 = arith.constant 0 : index
    %c0_3 = arith.constant 0 : index
    %3 = vector.load %arg1[%c0_1, %c0_2, %c0_3] : memref<3x28x208xbf16, #tpu.memory_space<vmem>>, vector<1x28x208xbf16>
    %4 = vector.shape_cast %3 : vector<1x28x208xbf16> to vector<28x208xbf16>
    %cst = arith.constant dense<0.000000e+00> : vector<62x208xf32>
    %5 = tpu.matmul %2, %4, %cst {dimension_numbers = #tpu.dot_dimension_numbers<[1], [0], [0], [1], [0, 0, 1, 1], [], []>} : vector<62x28xbf16>, vector<28x208xbf16>, vector<62x208xf32> -> vector<62x208xf32>
    %6 = vector.extract_strided_slice %0 {offsets = [1, 0], sizes = [62, 28], strides = [1, 1]} : vector<64x28xf32> to vector<62x28xf32>
    %7 = arith.truncf %6 : vector<62x28xf32> to vector<62x28xbf16>
    %c1 = arith.constant 1 : index
    %c0_4 = arith.constant 0 : index
    %c0_5 = arith.constant 0 : index
    %8 = vector.load %arg1[%c1, %c0_4, %c0_5] : memref<3x28x208xbf16, #tpu.memory_space<vmem>>, vector<1x28x208xbf16>
    %9 = vector.shape_cast %8 : vector<1x28x208xbf16> to vector<28x208xbf16>
    %cst_6 = arith.constant dense<0.000000e+00> : vector<62x208xf32>
    %10 = tpu.matmul %7, %9, %cst_6 {dimension_numbers = #tpu.dot_dimension_numbers<[1], [0], [0], [1], [0, 0, 1, 1], [], []>} : vector<62x28xbf16>, vector<28x208xbf16>, vector<62x208xf32> -> vector<62x208xf32>
    %11 = arith.addf %5, %10 : vector<62x208xf32>
    %12 = vector.extract_strided_slice %0 {offsets = [2, 0], sizes = [62, 28], strides = [1, 1]} : vector<64x28xf32> to vector<62x28xf32>
    %13 = arith.truncf %12 : vector<62x28xf32> to vector<62x28xbf16>
    %c2 = arith.constant 2 : index
    %c0_7 = arith.constant 0 : index
    %c0_8 = arith.constant 0 : index
    %14 = vector.load %arg1[%c2, %c0_7, %c0_8] : memref<3x28x208xbf16, #tpu.memory_space<vmem>>, vector<1x28x208xbf16>
    %15 = vector.shape_cast %14 : vector<1x28x208xbf16> to vector<28x208xbf16>
    %cst_9 = arith.constant dense<0.000000e+00> : vector<62x208xf32>
    %16 = tpu.matmul %13, %15, %cst_9 {dimension_numbers = #tpu.dot_dimension_numbers<[1], [0], [0], [1], [0, 0, 1, 1], [], []>} : vector<62x28xbf16>, vector<28x208xbf16>, vector<62x208xf32> -> vector<62x208xf32>
    %17 = arith.addf %11, %16 : vector<62x208xf32>
    %18 = arith.mulf %17, %17 : vector<62x208xf32>
    %19 = arith.mulf %17, %18 : vector<62x208xf32>
    %cst_10 = arith.constant 4.471500e-02 : f32
    %20 = vector.broadcast %cst_10 : f32 to vector<62x208xf32>
    %21 = arith.mulf %20, %19 : vector<62x208xf32>
    %22 = arith.addf %17, %21 : vector<62x208xf32>
    %cst_11 = arith.constant 0.797884583 : f32
    %23 = vector.broadcast %cst_11 : f32 to vector<62x208xf32>
    %24 = arith.mulf %23, %22 : vector<62x208xf32>
    %25 = math.tanh %24 : vector<62x208xf32>
    %cst_12 = arith.constant 1.000000e+00 : f32
    %26 = vector.broadcast %cst_12 : f32 to vector<62x208xf32>
    %27 = arith.addf %26, %25 : vector<62x208xf32>
    %cst_13 = arith.constant 5.000000e-01 : f32
    %28 = vector.broadcast %cst_13 : f32 to vector<62x208xf32>
    %29 = arith.mulf %28, %27 : vector<62x208xf32>
    %30 = arith.mulf %17, %29 : vector<62x208xf32>
    %c0_14 = arith.constant 0 : index
    %c0_15 = arith.constant 0 : index
    %31 = vector.load %arg18[%c0_14, %c0_15] : memref<62x1xf32, #tpu.memory_space<vmem>>, vector<62x1xf32>
    %32 = vector.broadcast %31 : vector<62x1xf32> to vector<62x208xf32>
    %33 = arith.mulf %30, %32 : vector<62x208xf32>
    %cst_16 = arith.constant dense<0.000000e+00> : vector<208xf32>
    %34 = vector.multi_reduction <add>, %33, %cst_16 [0] : vector<62x208xf32> to vector<208xf32>
    %35 = vector.shape_cast %34 : vector<208xf32> to vector<1x208xf32>
    %c0_17 = arith.constant 0 : index
    %c0_18 = arith.constant 0 : index
    %36 = vector.load %arg14[%c0_17, %c0_18] : memref<208x8xf32, #tpu.memory_space<vmem>>, vector<208x8xf32>
    %cst_19 = arith.constant dense<0.000000e+00> : vector<1x8xf32>
    %37 = tpu.matmul %35, %36, %cst_19 {dimension_numbers = #tpu.dot_dimension_numbers<[1], [0], [0], [1], [0, 0, 1, 1], [], []>} : vector<1x208xf32>, vector<208x8xf32>, vector<1x8xf32> -> vector<1x8xf32>
    %38 = arith.mulf %33, %30 : vector<62x208xf32>
    %cst_20 = arith.constant dense<0.000000e+00> : vector<208xf32>
    %39 = vector.multi_reduction <add>, %38, %cst_20 [0] : vector<62x208xf32> to vector<208xf32>
    %40 = vector.shape_cast %39 : vector<208xf32> to vector<1x208xf32>
    %c0_21 = arith.constant 0 : index
    %c0_22 = arith.constant 0 : index
    %41 = vector.load %arg14[%c0_21, %c0_22] : memref<208x8xf32, #tpu.memory_space<vmem>>, vector<208x8xf32>
    %cst_23 = arith.constant dense<0.000000e+00> : vector<1x8xf32>
    %42 = tpu.matmul %40, %41, %cst_23 {dimension_numbers = #tpu.dot_dimension_numbers<[1], [0], [0], [1], [0, 0, 1, 1], [], []>} : vector<1x208xf32>, vector<208x8xf32>, vector<1x8xf32> -> vector<1x8xf32>
    %cst_24 = arith.constant 1.352000e+03 : f32
    %43 = vector.broadcast %cst_24 : f32 to vector<1x8xf32>
    %44 = arith.divf %37, %43 : vector<1x8xf32>
    %cst_25 = arith.constant 1.352000e+03 : f32
    %45 = vector.broadcast %cst_25 : f32 to vector<1x8xf32>
    %46 = arith.divf %42, %45 : vector<1x8xf32>
    %47 = arith.mulf %44, %44 : vector<1x8xf32>
    %48 = arith.subf %46, %47 : vector<1x8xf32>
    %cst_26 = arith.constant 0.000000e+00 : f32
    %49 = vector.broadcast %cst_26 : f32 to vector<1x8xf32>
    %50 = arith.maximumf %48, %49 : vector<1x8xf32>
    %c0_27 = arith.constant 0 : index
    %c0_28 = arith.constant 0 : index
    %51 = vector.load %arg6[%c0_27, %c0_28] : memref<2x8xf32, #tpu.memory_space<vmem>>, vector<1x8xf32>
    %cst_29 = arith.constant 9.99999974E-6 : f32
    %52 = vector.broadcast %cst_29 : f32 to vector<1x8xf32>
    %53 = arith.addf %50, %52 : vector<1x8xf32>
    %54 = math.rsqrt %53 : vector<1x8xf32>
    %55 = arith.mulf %51, %54 : vector<1x8xf32>
    %c1_30 = arith.constant 1 : index
    %c0_31 = arith.constant 0 : index
    %56 = vector.load %arg6[%c1_30, %c0_31] : memref<2x8xf32, #tpu.memory_space<vmem>>, vector<1x8xf32>
    %57 = arith.mulf %44, %55 : vector<1x8xf32>
    %58 = arith.subf %56, %57 : vector<1x8xf32>
    %59 = tpu.concatenate %55, %58 in 0 : vector<1x8xf32>, vector<1x8xf32> -> vector<2x8xf32>
    %c0_32 = arith.constant 0 : index
    %c0_33 = arith.constant 0 : index
    %60 = vector.load %arg10[%c0_32, %c0_33] : memref<8x208xf32, #tpu.memory_space<vmem>>, vector<8x208xf32>
    %cst_34 = arith.constant dense<0.000000e+00> : vector<2x208xf32>
    %61 = tpu.matmul %59, %60, %cst_34 {dimension_numbers = #tpu.dot_dimension_numbers<[1], [0], [0], [1], [0, 0, 1, 1], [], []>} : vector<2x8xf32>, vector<8x208xf32>, vector<2x208xf32> -> vector<2x208xf32>
    %62 = vector.extract_strided_slice %61 {offsets = [0, 0], sizes = [1, 208], strides = [1, 1]} : vector<2x208xf32> to vector<1x208xf32>
    %63 = vector.broadcast %62 : vector<1x208xf32> to vector<62x208xf32>
    %64 = arith.mulf %30, %63 : vector<62x208xf32>
    %65 = vector.extract_strided_slice %61 {offsets = [1, 0], sizes = [1, 208], strides = [1, 1]} : vector<2x208xf32> to vector<1x208xf32>
    %66 = vector.broadcast %65 : vector<1x208xf32> to vector<62x208xf32>
    %67 = arith.addf %64, %66 : vector<62x208xf32>
    %68 = vector.extract_strided_slice %67 {offsets = [0, 0], sizes = [60, 208], strides = [1, 1]} : vector<62x208xf32> to vector<60x208xf32>
    %69 = arith.truncf %68 : vector<60x208xf32> to vector<60x208xbf16>
    %c0_35 = arith.constant 0 : index
    %c0_36 = arith.constant 0 : index
    %c0_37 = arith.constant 0 : index
    %70 = vector.load %arg2[%c0_35, %c0_36, %c0_37] : memref<3x208x384xbf16, #tpu.memory_space<vmem>>, vector<1x208x384xbf16>
    %71 = vector.shape_cast %70 : vector<1x208x384xbf16> to vector<208x384xbf16>
    %cst_38 = arith.constant dense<0.000000e+00> : vector<60x384xf32>
    %72 = tpu.matmul %69, %71, %cst_38 {dimension_numbers = #tpu.dot_dimension_numbers<[1], [0], [0], [1], [0, 0, 1, 1], [], []>} : vector<60x208xbf16>, vector<208x384xbf16>, vector<60x384xf32> -> vector<60x384xf32>
    %73 = vector.extract_strided_slice %67 {offsets = [1, 0], sizes = [60, 208], strides = [1, 1]} : vector<62x208xf32> to vector<60x208xf32>
    %74 = arith.truncf %73 : vector<60x208xf32> to vector<60x208xbf16>
    %c1_39 = arith.constant 1 : index
    %c0_40 = arith.constant 0 : index
    %c0_41 = arith.constant 0 : index
    %75 = vector.load %arg2[%c1_39, %c0_40, %c0_41] : memref<3x208x384xbf16, #tpu.memory_space<vmem>>, vector<1x208x384xbf16>
    %76 = vector.shape_cast %75 : vector<1x208x384xbf16> to vector<208x384xbf16>
    %cst_42 = arith.constant dense<0.000000e+00> : vector<60x384xf32>
    %77 = tpu.matmul %74, %76, %cst_42 {dimension_numbers = #tpu.dot_dimension_numbers<[1], [0], [0], [1], [0, 0, 1, 1], [], []>} : vector<60x208xbf16>, vector<208x384xbf16>, vector<60x384xf32> -> vector<60x384xf32>
    %78 = arith.addf %72, %77 : vector<60x384xf32>
    %79 = vector.extract_strided_slice %67 {offsets = [2, 0], sizes = [60, 208], strides = [1, 1]} : vector<62x208xf32> to vector<60x208xf32>
    %80 = arith.truncf %79 : vector<60x208xf32> to vector<60x208xbf16>
    %c2_43 = arith.constant 2 : index
    %c0_44 = arith.constant 0 : index
    %c0_45 = arith.constant 0 : index
    %81 = vector.load %arg2[%c2_43, %c0_44, %c0_45] : memref<3x208x384xbf16, #tpu.memory_space<vmem>>, vector<1x208x384xbf16>
    %82 = vector.shape_cast %81 : vector<1x208x384xbf16> to vector<208x384xbf16>
    %cst_46 = arith.constant dense<0.000000e+00> : vector<60x384xf32>
    %83 = tpu.matmul %80, %82, %cst_46 {dimension_numbers = #tpu.dot_dimension_numbers<[1], [0], [0], [1], [0, 0, 1, 1], [], []>} : vector<60x208xbf16>, vector<208x384xbf16>, vector<60x384xf32> -> vector<60x384xf32>
    %84 = arith.addf %78, %83 : vector<60x384xf32>
    %85 = arith.mulf %84, %84 : vector<60x384xf32>
    %86 = arith.mulf %84, %85 : vector<60x384xf32>
    %cst_47 = arith.constant 4.471500e-02 : f32
    %87 = vector.broadcast %cst_47 : f32 to vector<60x384xf32>
    %88 = arith.mulf %87, %86 : vector<60x384xf32>
    %89 = arith.addf %84, %88 : vector<60x384xf32>
    %cst_48 = arith.constant 0.797884583 : f32
    %90 = vector.broadcast %cst_48 : f32 to vector<60x384xf32>
    %91 = arith.mulf %90, %89 : vector<60x384xf32>
    %92 = math.tanh %91 : vector<60x384xf32>
    %cst_49 = arith.constant 1.000000e+00 : f32
    %93 = vector.broadcast %cst_49 : f32 to vector<60x384xf32>
    %94 = arith.addf %93, %92 : vector<60x384xf32>
    %cst_50 = arith.constant 5.000000e-01 : f32
    %95 = vector.broadcast %cst_50 : f32 to vector<60x384xf32>
    %96 = arith.mulf %95, %94 : vector<60x384xf32>
    %97 = arith.mulf %84, %96 : vector<60x384xf32>
    %c0_51 = arith.constant 0 : index
    %c0_52 = arith.constant 0 : index
    %98 = vector.load %arg19[%c0_51, %c0_52] : memref<60x1xf32, #tpu.memory_space<vmem>>, vector<60x1xf32>
    %99 = vector.broadcast %98 : vector<60x1xf32> to vector<60x384xf32>
    %100 = arith.mulf %97, %99 : vector<60x384xf32>
    %cst_53 = arith.constant dense<0.000000e+00> : vector<384xf32>
    %101 = vector.multi_reduction <add>, %100, %cst_53 [0] : vector<60x384xf32> to vector<384xf32>
    %102 = vector.shape_cast %101 : vector<384xf32> to vector<1x384xf32>
    %c0_54 = arith.constant 0 : index
    %c0_55 = arith.constant 0 : index
    %103 = vector.load %arg15[%c0_54, %c0_55] : memref<384x16xf32, #tpu.memory_space<vmem>>, vector<384x16xf32>
    %cst_56 = arith.constant dense<0.000000e+00> : vector<1x16xf32>
    %104 = tpu.matmul %102, %103, %cst_56 {dimension_numbers = #tpu.dot_dimension_numbers<[1], [0], [0], [1], [0, 0, 1, 1], [], []>} : vector<1x384xf32>, vector<384x16xf32>, vector<1x16xf32> -> vector<1x16xf32>
    %105 = arith.mulf %100, %97 : vector<60x384xf32>
    %cst_57 = arith.constant dense<0.000000e+00> : vector<384xf32>
    %106 = vector.multi_reduction <add>, %105, %cst_57 [0] : vector<60x384xf32> to vector<384xf32>
    %107 = vector.shape_cast %106 : vector<384xf32> to vector<1x384xf32>
    %c0_58 = arith.constant 0 : index
    %c0_59 = arith.constant 0 : index
    %108 = vector.load %arg15[%c0_58, %c0_59] : memref<384x16xf32, #tpu.memory_space<vmem>>, vector<384x16xf32>
    %cst_60 = arith.constant dense<0.000000e+00> : vector<1x16xf32>
    %109 = tpu.matmul %107, %108, %cst_60 {dimension_numbers = #tpu.dot_dimension_numbers<[1], [0], [0], [1], [0, 0, 1, 1], [], []>} : vector<1x384xf32>, vector<384x16xf32>, vector<1x16xf32> -> vector<1x16xf32>
    %cst_61 = arith.constant 1.152000e+03 : f32
    %110 = vector.broadcast %cst_61 : f32 to vector<1x16xf32>
    %111 = arith.divf %104, %110 : vector<1x16xf32>
    %cst_62 = arith.constant 1.152000e+03 : f32
    %112 = vector.broadcast %cst_62 : f32 to vector<1x16xf32>
    %113 = arith.divf %109, %112 : vector<1x16xf32>
    %114 = arith.mulf %111, %111 : vector<1x16xf32>
    %115 = arith.subf %113, %114 : vector<1x16xf32>
    %cst_63 = arith.constant 0.000000e+00 : f32
    %116 = vector.broadcast %cst_63 : f32 to vector<1x16xf32>
    %117 = arith.maximumf %115, %116 : vector<1x16xf32>
    %c0_64 = arith.constant 0 : index
    %c0_65 = arith.constant 0 : index
    %118 = vector.load %arg7[%c0_64, %c0_65] : memref<2x16xf32, #tpu.memory_space<vmem>>, vector<1x16xf32>
    %cst_66 = arith.constant 9.99999974E-6 : f32
    %119 = vector.broadcast %cst_66 : f32 to vector<1x16xf32>
    %120 = arith.addf %117, %119 : vector<1x16xf32>
    %121 = math.rsqrt %120 : vector<1x16xf32>
    %122 = arith.mulf %118, %121 : vector<1x16xf32>
    %c1_67 = arith.constant 1 : index
    %c0_68 = arith.constant 0 : index
    %123 = vector.load %arg7[%c1_67, %c0_68] : memref<2x16xf32, #tpu.memory_space<vmem>>, vector<1x16xf32>
    %124 = arith.mulf %111, %122 : vector<1x16xf32>
    %125 = arith.subf %123, %124 : vector<1x16xf32>
    %126 = tpu.concatenate %122, %125 in 0 : vector<1x16xf32>, vector<1x16xf32> -> vector<2x16xf32>
    %c0_69 = arith.constant 0 : index
    %c0_70 = arith.constant 0 : index
    %127 = vector.load %arg11[%c0_69, %c0_70] : memref<16x384xf32, #tpu.memory_space<vmem>>, vector<16x384xf32>
    %cst_71 = arith.constant dense<0.000000e+00> : vector<2x384xf32>
    %128 = tpu.matmul %126, %127, %cst_71 {dimension_numbers = #tpu.dot_dimension_numbers<[1], [0], [0], [1], [0, 0, 1, 1], [], []>} : vector<2x16xf32>, vector<16x384xf32>, vector<2x384xf32> -> vector<2x384xf32>
    %129 = vector.extract_strided_slice %128 {offsets = [0, 0], sizes = [1, 384], strides = [1, 1]} : vector<2x384xf32> to vector<1x384xf32>
    %130 = vector.broadcast %129 : vector<1x384xf32> to vector<60x384xf32>
    %131 = arith.mulf %97, %130 : vector<60x384xf32>
    %132 = vector.extract_strided_slice %128 {offsets = [1, 0], sizes = [1, 384], strides = [1, 1]} : vector<2x384xf32> to vector<1x384xf32>
    %133 = vector.broadcast %132 : vector<1x384xf32> to vector<60x384xf32>
    %134 = arith.addf %131, %133 : vector<60x384xf32>
    %135 = vector.extract_strided_slice %134 {offsets = [0, 0], sizes = [60, 368], strides = [1, 1]} : vector<60x384xf32> to vector<60x368xf32>
    %136 = vector.extract_strided_slice %134 {offsets = [0, 16], sizes = [60, 368], strides = [1, 1]} : vector<60x384xf32> to vector<60x368xf32>
    %137 = arith.maximumf %135, %136 : vector<60x368xf32>
    %138 = arith.truncf %137 : vector<60x368xf32> to vector<60x368xbf16>
    %c0_72 = arith.constant 0 : index
    %c0_73 = arith.constant 0 : index
    %139 = vector.load %arg22[%c0_72, %c0_73] : memref<368x192xbf16, #tpu.memory_space<vmem>>, vector<368x192xbf16>
    %cst_74 = arith.constant dense<0.000000e+00> : vector<60x192xf32>
    %140 = tpu.matmul %138, %139, %cst_74 {dimension_numbers = #tpu.dot_dimension_numbers<[1], [0], [0], [1], [0, 0, 1, 1], [], []>} : vector<60x368xbf16>, vector<368x192xbf16>, vector<60x192xf32> -> vector<60x192xf32>
    %141 = vector.extract_strided_slice %140 {offsets = [0, 0], sizes = [59, 192], strides = [1, 1]} : vector<60x192xf32> to vector<59x192xf32>
    %142 = vector.extract_strided_slice %140 {offsets = [1, 0], sizes = [59, 192], strides = [1, 1]} : vector<60x192xf32> to vector<59x192xf32>
    %143 = arith.maximumf %141, %142 : vector<59x192xf32>
    %c0_75 = arith.constant 0 : index
    %c0_76 = arith.constant 0 : index
    %144 = vector.load %arg23[%c0_75, %c0_76] : memref<32x59xbf16, #tpu.memory_space<vmem>>, vector<32x59xbf16>
    %145 = arith.truncf %143 : vector<59x192xf32> to vector<59x192xbf16>
    %cst_77 = arith.constant dense<0.000000e+00> : vector<32x192xf32>
    %146 = tpu.matmul %144, %145, %cst_77 {dimension_numbers = #tpu.dot_dimension_numbers<[1], [0], [0], [1], [0, 0, 1, 1], [], []>} : vector<32x59xbf16>, vector<59x192xbf16>, vector<32x192xf32> -> vector<32x192xf32>
    %147 = vector.extract_strided_slice %146 {offsets = [0, 0], sizes = [30, 192], strides = [1, 1]} : vector<32x192xf32> to vector<30x192xf32>
    %148 = arith.truncf %147 : vector<30x192xf32> to vector<30x192xbf16>
    %c0_78 = arith.constant 0 : index
    %c0_79 = arith.constant 0 : index
    %c0_80 = arith.constant 0 : index
    %149 = vector.load %arg3[%c0_78, %c0_79, %c0_80] : memref<3x192x320xbf16, #tpu.memory_space<vmem>>, vector<1x192x320xbf16>
    %150 = vector.shape_cast %149 : vector<1x192x320xbf16> to vector<192x320xbf16>
    %cst_81 = arith.constant dense<0.000000e+00> : vector<30x320xf32>
    %151 = tpu.matmul %148, %150, %cst_81 {dimension_numbers = #tpu.dot_dimension_numbers<[1], [0], [0], [1], [0, 0, 1, 1], [], []>} : vector<30x192xbf16>, vector<192x320xbf16>, vector<30x320xf32> -> vector<30x320xf32>
    %152 = vector.extract_strided_slice %146 {offsets = [1, 0], sizes = [30, 192], strides = [1, 1]} : vector<32x192xf32> to vector<30x192xf32>
    %153 = arith.truncf %152 : vector<30x192xf32> to vector<30x192xbf16>
    %c1_82 = arith.constant 1 : index
    %c0_83 = arith.constant 0 : index
    %c0_84 = arith.constant 0 : index
    %154 = vector.load %arg3[%c1_82, %c0_83, %c0_84] : memref<3x192x320xbf16, #tpu.memory_space<vmem>>, vector<1x192x320xbf16>
    %155 = vector.shape_cast %154 : vector<1x192x320xbf16> to vector<192x320xbf16>
    %cst_85 = arith.constant dense<0.000000e+00> : vector<30x320xf32>
    %156 = tpu.matmul %153, %155, %cst_85 {dimension_numbers = #tpu.dot_dimension_numbers<[1], [0], [0], [1], [0, 0, 1, 1], [], []>} : vector<30x192xbf16>, vector<192x320xbf16>, vector<30x320xf32> -> vector<30x320xf32>
    %157 = arith.addf %151, %156 : vector<30x320xf32>
    %158 = vector.extract_strided_slice %146 {offsets = [2, 0], sizes = [30, 192], strides = [1, 1]} : vector<32x192xf32> to vector<30x192xf32>
    %159 = arith.truncf %158 : vector<30x192xf32> to vector<30x192xbf16>
    %c2_86 = arith.constant 2 : index
    %c0_87 = arith.constant 0 : index
    %c0_88 = arith.constant 0 : index
    %160 = vector.load %arg3[%c2_86, %c0_87, %c0_88] : memref<3x192x320xbf16, #tpu.memory_space<vmem>>, vector<1x192x320xbf16>
    %161 = vector.shape_cast %160 : vector<1x192x320xbf16> to vector<192x320xbf16>
    %cst_89 = arith.constant dense<0.000000e+00> : vector<30x320xf32>
    %162 = tpu.matmul %159, %161, %cst_89 {dimension_numbers = #tpu.dot_dimension_numbers<[1], [0], [0], [1], [0, 0, 1, 1], [], []>} : vector<30x192xbf16>, vector<192x320xbf16>, vector<30x320xf32> -> vector<30x320xf32>
    %163 = arith.addf %157, %162 : vector<30x320xf32>
    %164 = arith.mulf %163, %163 : vector<30x320xf32>
    %165 = arith.mulf %163, %164 : vector<30x320xf32>
    %cst_90 = arith.constant 4.471500e-02 : f32
    %166 = vector.broadcast %cst_90 : f32 to vector<30x320xf32>
    %167 = arith.mulf %166, %165 : vector<30x320xf32>
    %168 = arith.addf %163, %167 : vector<30x320xf32>
    %cst_91 = arith.constant 0.797884583 : f32
    %169 = vector.broadcast %cst_91 : f32 to vector<30x320xf32>
    %170 = arith.mulf %169, %168 : vector<30x320xf32>
    %171 = math.tanh %170 : vector<30x320xf32>
    %cst_92 = arith.constant 1.000000e+00 : f32
    %172 = vector.broadcast %cst_92 : f32 to vector<30x320xf32>
    %173 = arith.addf %172, %171 : vector<30x320xf32>
    %cst_93 = arith.constant 5.000000e-01 : f32
    %174 = vector.broadcast %cst_93 : f32 to vector<30x320xf32>
    %175 = arith.mulf %174, %173 : vector<30x320xf32>
    %176 = arith.mulf %163, %175 : vector<30x320xf32>
    %c0_94 = arith.constant 0 : index
    %c0_95 = arith.constant 0 : index
    %177 = vector.load %arg20[%c0_94, %c0_95] : memref<30x1xf32, #tpu.memory_space<vmem>>, vector<30x1xf32>
    %178 = vector.broadcast %177 : vector<30x1xf32> to vector<30x320xf32>
    %179 = arith.mulf %176, %178 : vector<30x320xf32>
    %cst_96 = arith.constant dense<0.000000e+00> : vector<320xf32>
    %180 = vector.multi_reduction <add>, %179, %cst_96 [0] : vector<30x320xf32> to vector<320xf32>
    %181 = vector.shape_cast %180 : vector<320xf32> to vector<1x320xf32>
    %c0_97 = arith.constant 0 : index
    %c0_98 = arith.constant 0 : index
    %182 = vector.load %arg16[%c0_97, %c0_98] : memref<320x32xf32, #tpu.memory_space<vmem>>, vector<320x32xf32>
    %cst_99 = arith.constant dense<0.000000e+00> : vector<1x32xf32>
    %183 = tpu.matmul %181, %182, %cst_99 {dimension_numbers = #tpu.dot_dimension_numbers<[1], [0], [0], [1], [0, 0, 1, 1], [], []>} : vector<1x320xf32>, vector<320x32xf32>, vector<1x32xf32> -> vector<1x32xf32>
    %184 = arith.mulf %179, %176 : vector<30x320xf32>
    %cst_100 = arith.constant dense<0.000000e+00> : vector<320xf32>
    %185 = vector.multi_reduction <add>, %184, %cst_100 [0] : vector<30x320xf32> to vector<320xf32>
    %186 = vector.shape_cast %185 : vector<320xf32> to vector<1x320xf32>
    %c0_101 = arith.constant 0 : index
    %c0_102 = arith.constant 0 : index
    %187 = vector.load %arg16[%c0_101, %c0_102] : memref<320x32xf32, #tpu.memory_space<vmem>>, vector<320x32xf32>
    %cst_103 = arith.constant dense<0.000000e+00> : vector<1x32xf32>
    %188 = tpu.matmul %186, %187, %cst_103 {dimension_numbers = #tpu.dot_dimension_numbers<[1], [0], [0], [1], [0, 0, 1, 1], [], []>} : vector<1x320xf32>, vector<320x32xf32>, vector<1x32xf32> -> vector<1x32xf32>
    %cst_104 = arith.constant 2.000000e+02 : f32
    %189 = vector.broadcast %cst_104 : f32 to vector<1x32xf32>
    %190 = arith.divf %183, %189 : vector<1x32xf32>
    %cst_105 = arith.constant 2.000000e+02 : f32
    %191 = vector.broadcast %cst_105 : f32 to vector<1x32xf32>
    %192 = arith.divf %188, %191 : vector<1x32xf32>
    %193 = arith.mulf %190, %190 : vector<1x32xf32>
    %194 = arith.subf %192, %193 : vector<1x32xf32>
    %cst_106 = arith.constant 0.000000e+00 : f32
    %195 = vector.broadcast %cst_106 : f32 to vector<1x32xf32>
    %196 = arith.maximumf %194, %195 : vector<1x32xf32>
    %c0_107 = arith.constant 0 : index
    %c0_108 = arith.constant 0 : index
    %197 = vector.load %arg8[%c0_107, %c0_108] : memref<2x32xf32, #tpu.memory_space<vmem>>, vector<1x32xf32>
    %cst_109 = arith.constant 9.99999974E-6 : f32
    %198 = vector.broadcast %cst_109 : f32 to vector<1x32xf32>
    %199 = arith.addf %196, %198 : vector<1x32xf32>
    %200 = math.rsqrt %199 : vector<1x32xf32>
    %201 = arith.mulf %197, %200 : vector<1x32xf32>
    %c1_110 = arith.constant 1 : index
    %c0_111 = arith.constant 0 : index
    %202 = vector.load %arg8[%c1_110, %c0_111] : memref<2x32xf32, #tpu.memory_space<vmem>>, vector<1x32xf32>
    %203 = arith.mulf %190, %201 : vector<1x32xf32>
    %204 = arith.subf %202, %203 : vector<1x32xf32>
    %205 = tpu.concatenate %201, %204 in 0 : vector<1x32xf32>, vector<1x32xf32> -> vector<2x32xf32>
    %c0_112 = arith.constant 0 : index
    %c0_113 = arith.constant 0 : index
    %206 = vector.load %arg12[%c0_112, %c0_113] : memref<32x320xf32, #tpu.memory_space<vmem>>, vector<32x320xf32>
    %cst_114 = arith.constant dense<0.000000e+00> : vector<2x320xf32>
    %207 = tpu.matmul %205, %206, %cst_114 {dimension_numbers = #tpu.dot_dimension_numbers<[1], [0], [0], [1], [0, 0, 1, 1], [], []>} : vector<2x32xf32>, vector<32x320xf32>, vector<2x320xf32> -> vector<2x320xf32>
    %208 = vector.extract_strided_slice %207 {offsets = [0, 0], sizes = [1, 320], strides = [1, 1]} : vector<2x320xf32> to vector<1x320xf32>
    %209 = vector.broadcast %208 : vector<1x320xf32> to vector<30x320xf32>
    %210 = arith.mulf %176, %209 : vector<30x320xf32>
    %211 = vector.extract_strided_slice %207 {offsets = [1, 0], sizes = [1, 320], strides = [1, 1]} : vector<2x320xf32> to vector<1x320xf32>
    %212 = vector.broadcast %211 : vector<1x320xf32> to vector<30x320xf32>
    %213 = arith.addf %210, %212 : vector<30x320xf32>
    %214 = vector.extract_strided_slice %213 {offsets = [0, 0], sizes = [30, 288], strides = [1, 1]} : vector<30x320xf32> to vector<30x288xf32>
    %215 = vector.extract_strided_slice %213 {offsets = [0, 32], sizes = [30, 288], strides = [1, 1]} : vector<30x320xf32> to vector<30x288xf32>
    %216 = arith.maximumf %214, %215 : vector<30x288xf32>
    %217 = arith.truncf %216 : vector<30x288xf32> to vector<30x288xbf16>
    %c0_115 = arith.constant 0 : index
    %c0_116 = arith.constant 0 : index
    %218 = vector.load %arg24[%c0_115, %c0_116] : memref<288x160xbf16, #tpu.memory_space<vmem>>, vector<288x160xbf16>
    %cst_117 = arith.constant dense<0.000000e+00> : vector<30x160xf32>
    %219 = tpu.matmul %217, %218, %cst_117 {dimension_numbers = #tpu.dot_dimension_numbers<[1], [0], [0], [1], [0, 0, 1, 1], [], []>} : vector<30x288xbf16>, vector<288x160xbf16>, vector<30x160xf32> -> vector<30x160xf32>
    %220 = vector.extract_strided_slice %219 {offsets = [0, 0], sizes = [29, 160], strides = [1, 1]} : vector<30x160xf32> to vector<29x160xf32>
    %221 = vector.extract_strided_slice %219 {offsets = [1, 0], sizes = [29, 160], strides = [1, 1]} : vector<30x160xf32> to vector<29x160xf32>
    %222 = arith.maximumf %220, %221 : vector<29x160xf32>
    %c0_118 = arith.constant 0 : index
    %c0_119 = arith.constant 0 : index
    %223 = vector.load %arg25[%c0_118, %c0_119] : memref<16x29xbf16, #tpu.memory_space<vmem>>, vector<16x29xbf16>
    %224 = arith.truncf %222 : vector<29x160xf32> to vector<29x160xbf16>
    %cst_120 = arith.constant dense<0.000000e+00> : vector<16x160xf32>
    %225 = tpu.matmul %223, %224, %cst_120 {dimension_numbers = #tpu.dot_dimension_numbers<[1], [0], [0], [1], [0, 0, 1, 1], [], []>} : vector<16x29xbf16>, vector<29x160xbf16>, vector<16x160xf32> -> vector<16x160xf32>
    %226 = vector.extract_strided_slice %225 {offsets = [0, 0], sizes = [14, 160], strides = [1, 1]} : vector<16x160xf32> to vector<14x160xf32>
    %227 = arith.truncf %226 : vector<14x160xf32> to vector<14x160xbf16>
    %c0_121 = arith.constant 0 : index
    %c0_122 = arith.constant 0 : index
    %c0_123 = arith.constant 0 : index
    %228 = vector.load %arg4[%c0_121, %c0_122, %c0_123] : memref<3x160x96xbf16, #tpu.memory_space<vmem>>, vector<1x160x96xbf16>
    %229 = vector.shape_cast %228 : vector<1x160x96xbf16> to vector<160x96xbf16>
    %cst_124 = arith.constant dense<0.000000e+00> : vector<14x96xf32>
    %230 = tpu.matmul %227, %229, %cst_124 {dimension_numbers = #tpu.dot_dimension_numbers<[1], [0], [0], [1], [0, 0, 1, 1], [], []>} : vector<14x160xbf16>, vector<160x96xbf16>, vector<14x96xf32> -> vector<14x96xf32>
    %231 = vector.extract_strided_slice %225 {offsets = [1, 0], sizes = [14, 160], strides = [1, 1]} : vector<16x160xf32> to vector<14x160xf32>
    %232 = arith.truncf %231 : vector<14x160xf32> to vector<14x160xbf16>
    %c1_125 = arith.constant 1 : index
    %c0_126 = arith.constant 0 : index
    %c0_127 = arith.constant 0 : index
    %233 = vector.load %arg4[%c1_125, %c0_126, %c0_127] : memref<3x160x96xbf16, #tpu.memory_space<vmem>>, vector<1x160x96xbf16>
    %234 = vector.shape_cast %233 : vector<1x160x96xbf16> to vector<160x96xbf16>
    %cst_128 = arith.constant dense<0.000000e+00> : vector<14x96xf32>
    %235 = tpu.matmul %232, %234, %cst_128 {dimension_numbers = #tpu.dot_dimension_numbers<[1], [0], [0], [1], [0, 0, 1, 1], [], []>} : vector<14x160xbf16>, vector<160x96xbf16>, vector<14x96xf32> -> vector<14x96xf32>
    %236 = arith.addf %230, %235 : vector<14x96xf32>
    %237 = vector.extract_strided_slice %225 {offsets = [2, 0], sizes = [14, 160], strides = [1, 1]} : vector<16x160xf32> to vector<14x160xf32>
    %238 = arith.truncf %237 : vector<14x160xf32> to vector<14x160xbf16>
    %c2_129 = arith.constant 2 : index
    %c0_130 = arith.constant 0 : index
    %c0_131 = arith.constant 0 : index
    %239 = vector.load %arg4[%c2_129, %c0_130, %c0_131] : memref<3x160x96xbf16, #tpu.memory_space<vmem>>, vector<1x160x96xbf16>
    %240 = vector.shape_cast %239 : vector<1x160x96xbf16> to vector<160x96xbf16>
    %cst_132 = arith.constant dense<0.000000e+00> : vector<14x96xf32>
    %241 = tpu.matmul %238, %240, %cst_132 {dimension_numbers = #tpu.dot_dimension_numbers<[1], [0], [0], [1], [0, 0, 1, 1], [], []>} : vector<14x160xbf16>, vector<160x96xbf16>, vector<14x96xf32> -> vector<14x96xf32>
    %242 = arith.addf %236, %241 : vector<14x96xf32>
    %243 = arith.mulf %242, %242 : vector<14x96xf32>
    %244 = arith.mulf %242, %243 : vector<14x96xf32>
    %cst_133 = arith.constant 4.471500e-02 : f32
    %245 = vector.broadcast %cst_133 : f32 to vector<14x96xf32>
    %246 = arith.mulf %245, %244 : vector<14x96xf32>
    %247 = arith.addf %242, %246 : vector<14x96xf32>
    %cst_134 = arith.constant 0.797884583 : f32
    %248 = vector.broadcast %cst_134 : f32 to vector<14x96xf32>
    %249 = arith.mulf %248, %247 : vector<14x96xf32>
    %250 = math.tanh %249 : vector<14x96xf32>
    %cst_135 = arith.constant 1.000000e+00 : f32
    %251 = vector.broadcast %cst_135 : f32 to vector<14x96xf32>
    %252 = arith.addf %251, %250 : vector<14x96xf32>
    %cst_136 = arith.constant 5.000000e-01 : f32
    %253 = vector.broadcast %cst_136 : f32 to vector<14x96xf32>
    %254 = arith.mulf %253, %252 : vector<14x96xf32>
    %255 = arith.mulf %242, %254 : vector<14x96xf32>
    %c0_137 = arith.constant 0 : index
    %c0_138 = arith.constant 0 : index
    %256 = vector.load %arg21[%c0_137, %c0_138] : memref<14x1xf32, #tpu.memory_space<vmem>>, vector<14x1xf32>
    %257 = vector.broadcast %256 : vector<14x1xf32> to vector<14x96xf32>
    %258 = arith.mulf %255, %257 : vector<14x96xf32>
    %cst_139 = arith.constant dense<0.000000e+00> : vector<96xf32>
    %259 = vector.multi_reduction <add>, %258, %cst_139 [0] : vector<14x96xf32> to vector<96xf32>
    %260 = vector.shape_cast %259 : vector<96xf32> to vector<1x96xf32>
    %c0_140 = arith.constant 0 : index
    %c0_141 = arith.constant 0 : index
    %261 = vector.load %arg17[%c0_140, %c0_141] : memref<96x32xf32, #tpu.memory_space<vmem>>, vector<96x32xf32>
    %cst_142 = arith.constant dense<0.000000e+00> : vector<1x32xf32>
    %262 = tpu.matmul %260, %261, %cst_142 {dimension_numbers = #tpu.dot_dimension_numbers<[1], [0], [0], [1], [0, 0, 1, 1], [], []>} : vector<1x96xf32>, vector<96x32xf32>, vector<1x32xf32> -> vector<1x32xf32>
    %263 = arith.mulf %258, %255 : vector<14x96xf32>
    %cst_143 = arith.constant dense<0.000000e+00> : vector<96xf32>
    %264 = vector.multi_reduction <add>, %263, %cst_143 [0] : vector<14x96xf32> to vector<96xf32>
    %265 = vector.shape_cast %264 : vector<96xf32> to vector<1x96xf32>
    %c0_144 = arith.constant 0 : index
    %c0_145 = arith.constant 0 : index
    %266 = vector.load %arg17[%c0_144, %c0_145] : memref<96x32xf32, #tpu.memory_space<vmem>>, vector<96x32xf32>
    %cst_146 = arith.constant dense<0.000000e+00> : vector<1x32xf32>
    %267 = tpu.matmul %265, %266, %cst_146 {dimension_numbers = #tpu.dot_dimension_numbers<[1], [0], [0], [1], [0, 0, 1, 1], [], []>} : vector<1x96xf32>, vector<96x32xf32>, vector<1x32xf32> -> vector<1x32xf32>
    %cst_147 = arith.constant 1.800000e+01 : f32
    %268 = vector.broadcast %cst_147 : f32 to vector<1x32xf32>
    %269 = arith.divf %262, %268 : vector<1x32xf32>
    %cst_148 = arith.constant 1.800000e+01 : f32
    %270 = vector.broadcast %cst_148 : f32 to vector<1x32xf32>
    %271 = arith.divf %267, %270 : vector<1x32xf32>
    %272 = arith.mulf %269, %269 : vector<1x32xf32>
    %273 = arith.subf %271, %272 : vector<1x32xf32>
    %cst_149 = arith.constant 0.000000e+00 : f32
    %274 = vector.broadcast %cst_149 : f32 to vector<1x32xf32>
    %275 = arith.maximumf %273, %274 : vector<1x32xf32>
    %c0_150 = arith.constant 0 : index
    %c0_151 = arith.constant 0 : index
    %276 = vector.load %arg9[%c0_150, %c0_151] : memref<2x32xf32, #tpu.memory_space<vmem>>, vector<1x32xf32>
    %cst_152 = arith.constant 9.99999974E-6 : f32
    %277 = vector.broadcast %cst_152 : f32 to vector<1x32xf32>
    %278 = arith.addf %275, %277 : vector<1x32xf32>
    %279 = math.rsqrt %278 : vector<1x32xf32>
    %280 = arith.mulf %276, %279 : vector<1x32xf32>
    %c1_153 = arith.constant 1 : index
    %c0_154 = arith.constant 0 : index
    %281 = vector.load %arg9[%c1_153, %c0_154] : memref<2x32xf32, #tpu.memory_space<vmem>>, vector<1x32xf32>
    %282 = arith.mulf %269, %280 : vector<1x32xf32>
    %283 = arith.subf %281, %282 : vector<1x32xf32>
    %284 = tpu.concatenate %280, %283 in 0 : vector<1x32xf32>, vector<1x32xf32> -> vector<2x32xf32>
    %c0_155 = arith.constant 0 : index
    %c0_156 = arith.constant 0 : index
    %285 = vector.load %arg13[%c0_155, %c0_156] : memref<32x96xf32, #tpu.memory_space<vmem>>, vector<32x96xf32>
    %cst_157 = arith.constant dense<0.000000e+00> : vector<2x96xf32>
    %286 = tpu.matmul %284, %285, %cst_157 {dimension_numbers = #tpu.dot_dimension_numbers<[1], [0], [0], [1], [0, 0, 1, 1], [], []>} : vector<2x32xf32>, vector<32x96xf32>, vector<2x96xf32> -> vector<2x96xf32>
    %287 = vector.extract_strided_slice %286 {offsets = [0, 0], sizes = [1, 96], strides = [1, 1]} : vector<2x96xf32> to vector<1x96xf32>
    %288 = vector.broadcast %287 : vector<1x96xf32> to vector<14x96xf32>
    %289 = arith.mulf %255, %288 : vector<14x96xf32>
    %290 = vector.extract_strided_slice %286 {offsets = [1, 0], sizes = [1, 96], strides = [1, 1]} : vector<2x96xf32> to vector<1x96xf32>
    %291 = vector.broadcast %290 : vector<1x96xf32> to vector<14x96xf32>
    %292 = arith.addf %289, %291 : vector<14x96xf32>
    %293 = vector.extract_strided_slice %292 {offsets = [0, 0], sizes = [13, 96], strides = [1, 1]} : vector<14x96xf32> to vector<13x96xf32>
    %294 = arith.truncf %293 : vector<13x96xf32> to vector<13x96xbf16>
    %c0_158 = arith.constant 0 : index
    %c0_159 = arith.constant 0 : index
    %c0_160 = arith.constant 0 : index
    %295 = vector.load %arg5[%c0_158, %c0_159, %c0_160] : memref<2x96x64xbf16, #tpu.memory_space<vmem>>, vector<1x96x64xbf16>
    %296 = vector.shape_cast %295 : vector<1x96x64xbf16> to vector<96x64xbf16>
    %cst_161 = arith.constant dense<0.000000e+00> : vector<13x64xf32>
    %297 = tpu.matmul %294, %296, %cst_161 {dimension_numbers = #tpu.dot_dimension_numbers<[1], [0], [0], [1], [0, 0, 1, 1], [], []>} : vector<13x96xbf16>, vector<96x64xbf16>, vector<13x64xf32> -> vector<13x64xf32>
    %298 = vector.extract_strided_slice %292 {offsets = [1, 0], sizes = [13, 96], strides = [1, 1]} : vector<14x96xf32> to vector<13x96xf32>
    %299 = arith.truncf %298 : vector<13x96xf32> to vector<13x96xbf16>
    %c1_162 = arith.constant 1 : index
    %c0_163 = arith.constant 0 : index
    %c0_164 = arith.constant 0 : index
    %300 = vector.load %arg5[%c1_162, %c0_163, %c0_164] : memref<2x96x64xbf16, #tpu.memory_space<vmem>>, vector<1x96x64xbf16>
    %301 = vector.shape_cast %300 : vector<1x96x64xbf16> to vector<96x64xbf16>
    %cst_165 = arith.constant dense<0.000000e+00> : vector<13x64xf32>
    %302 = tpu.matmul %299, %301, %cst_165 {dimension_numbers = #tpu.dot_dimension_numbers<[1], [0], [0], [1], [0, 0, 1, 1], [], []>} : vector<13x96xbf16>, vector<96x64xbf16>, vector<13x64xf32> -> vector<13x64xf32>
    %303 = arith.addf %297, %302 : vector<13x64xf32>
    %c0_166 = arith.constant 0 : index
    %c0_167 = arith.constant 0 : index
    %304 = vector.load %arg29[%c0_166, %c0_167] : memref<13x64xf32, #tpu.memory_space<vmem>>, vector<13x64xf32>
    tpu.vector_store %arg29[%c0_166, %c0_167], %303 {strides = array<i32>} : memref<13x64xf32, #tpu.memory_space<vmem>>, vector<13x64xf32>,
    %c0_168 = arith.constant 0 : index
    %c0_169 = arith.constant 0 : index
    %305 = vector.load %arg27[%c0_168, %c0_169] : memref<1x10xf32, #tpu.memory_space<vmem>>, vector<1x10xf32>
    %c0_170 = arith.constant 0 : index
    %c0_171 = arith.constant 0 : index
    %306 = tpu.strided_load %arg29[%c0_170, %c0_171] {strides = array<i32: 8, 1>} : memref<13x64xf32, #tpu.memory_space<vmem>>, vector<2x64xf32>
    %307 = arith.truncf %306 : vector<2x64xf32> to vector<2x64xbf16>
    %c0_172 = arith.constant 0 : index
    %c0_173 = arith.constant 0 : index
    %c0_174 = arith.constant 0 : index
    %308 = vector.load %arg26[%c0_172, %c0_173, %c0_174] : memref<2x64x10xbf16, #tpu.memory_space<vmem>>, vector<1x64x10xbf16>
    %309 = vector.shape_cast %308 : vector<1x64x10xbf16> to vector<64x10xbf16>
    %cst_175 = arith.constant dense<0.000000e+00> : vector<2x10xf32>
    %310 = tpu.matmul %307, %309, %cst_175 {dimension_numbers = #tpu.dot_dimension_numbers<[1], [0], [0], [1], [0, 0, 1, 1], [], []>} : vector<2x64xbf16>, vector<64x10xbf16>, vector<2x10xf32> -> vector<2x10xf32>
    %311 = vector.broadcast %305 : vector<1x10xf32> to vector<2x10xf32>
    %312 = arith.addf %311, %310 : vector<2x10xf32>
    %c1_176 = arith.constant 1 : index
    %c0_177 = arith.constant 0 : index
    %313 = tpu.strided_load %arg29[%c1_176, %c0_177] {strides = array<i32: 8, 1>} : memref<13x64xf32, #tpu.memory_space<vmem>>, vector<2x64xf32>
    %314 = arith.truncf %313 : vector<2x64xf32> to vector<2x64xbf16>
    %c1_178 = arith.constant 1 : index
    %c0_179 = arith.constant 0 : index
    %c0_180 = arith.constant 0 : index
    %315 = vector.load %arg26[%c1_178, %c0_179, %c0_180] : memref<2x64x10xbf16, #tpu.memory_space<vmem>>, vector<1x64x10xbf16>
    %316 = vector.shape_cast %315 : vector<1x64x10xbf16> to vector<64x10xbf16>
    %cst_181 = arith.constant dense<0.000000e+00> : vector<2x10xf32>
    %317 = tpu.matmul %314, %316, %cst_181 {dimension_numbers = #tpu.dot_dimension_numbers<[1], [0], [0], [1], [0, 0, 1, 1], [], []>} : vector<2x64xbf16>, vector<64x10xbf16>, vector<2x10xf32> -> vector<2x10xf32>
    %318 = arith.addf %312, %317 : vector<2x10xf32>
    %cst_182 = arith.constant dense<0xFF800000> : vector<2xf32>
    %319 = vector.multi_reduction <maximumf>, %318, %cst_182 [1] : vector<2x10xf32> to vector<2xf32>
    %320 = vector.shape_cast %319 : vector<2xf32> to vector<2x1xf32>
    %321 = vector.broadcast %320 : vector<2x1xf32> to vector<2x10xf32>
    %322 = arith.subf %318, %321 : vector<2x10xf32>
    %323 = math.exp %322 : vector<2x10xf32>
    %cst_183 = arith.constant dense<0.000000e+00> : vector<2xf32>
    %324 = vector.multi_reduction <add>, %323, %cst_183 [1] : vector<2x10xf32> to vector<2xf32>
    %325 = vector.shape_cast %324 : vector<2xf32> to vector<2x1xf32>
    %326 = math.log %325 : vector<2x1xf32>
    %327 = vector.broadcast %326 : vector<2x1xf32> to vector<2x10xf32>
    %328 = arith.subf %322, %327 : vector<2x10xf32>
    %c0_184 = arith.constant 0 : index
    %c0_185 = arith.constant 0 : index
    %329 = vector.load %arg28[%c0_184, %c0_185] : memref<2x10xf32, #tpu.memory_space<vmem>>, vector<2x10xf32>
    tpu.vector_store %arg28[%c0_184, %c0_185], %328 {strides = array<i32>} : memref<2x10xf32, #tpu.memory_space<vmem>>, vector<2x10xf32>,
    return
  }
}

</mosaic_0001>

<bundles_post_ra>
// kernel: mnist_net_forward.1
= control target key start
LH: loop header
LB: loop body
LE: loop exit
PB: predicated region body
PF: predicated region fallthrough
CT: control target
= control target key end

     0   :  { %s14068_s0 = inlined_call_operand.vmem [shape: f32[64,28], index: 0, kind: input, shape index: {}]   ;;  %s14069_s1 = inlined_call_operand.vmem [shape: bf16[3,28,208], index: 1, kind: input, shape index: {}]   ;;  %s14070_s2 = inlined_call_operand.vmem [shape: bf16[3,208,384], index: 2, kind: input, shape index: {}]   ;;  %s14071_s3 = inlined_call_operand.vmem [shape: bf16[3,192,320], index: 3, kind: input, shape index: {}]   ;;  %s14072_s4 = inlined_call_operand.vmem [shape: bf16[3,160,96], index: 4, kind: input, shape index: {}]   ;;  %s14073_s5 = inlined_call_operand.vmem [shape: bf16[2,96,64], index: 5, kind: input, shape index: {}]   ;;  %s14074_s6 = inlined_call_operand.vmem [shape: f32[2,8], index: 6, kind: input, shape index: {}]   ;;  %s14075_s7 = inlined_call_operand.vmem [shape: f32[2,16], index: 7, kind: input, shape index: {}]   ;;  %s14076_s8 = inlined_call_operand.vmem [shape: f32[2,32], index: 8, kind: input, shape index: {}]   ;;  %s14077_s9 = inlined_call_operand.vmem [shape: f32[2,32], index: 9, kind: input, shape index: {}]   ;;  %s14078_s10 = inlined_call_operand.vmem [shape: f32[8,208], index: 10, kind: input, shape index: {}]   ;;  %s14079_s11 = inlined_call_operand.vmem [shape: f32[16,384], index: 11, kind: input, shape index: {}]   ;;  %s14080_s12 = inlined_call_operand.vmem [shape: f32[32,320], index: 12, kind: input, shape index: {}]   ;;  %s14081_s13 = inlined_call_operand.vmem [shape: f32[32,96], index: 13, kind: input, shape index: {}]   ;;  %s14082_s14 = inlined_call_operand.vmem [shape: f32[208,8], index: 14, kind: input, shape index: {}]   ;;  %s14083_s15 = inlined_call_operand.vmem [shape: f32[384,16], index: 15, kind: input, shape index: {}]   ;;  %s14084_s16 = inlined_call_operand.vmem [shape: f32[320,32], index: 16, kind: input, shape index: {}]   ;;  %s14085_s17 = inlined_call_operand.vmem [shape: f32[96,32], index: 17, kind: input, shape index: {}]   ;;  %s14086_s18 = inlined_call_operand.vmem [shape: f32[62,1], index: 18, kind: input, shape index: {}]   ;;  %s14087_s19 = inlined_call_operand.vmem [shape: f32[60,1], index: 19, kind: input, shape index: {}]   ;;  %s14088_s20 = inlined_call_operand.vmem [shape: f32[30,1], index: 20, kind: input, shape index: {}]   ;;  %s14089_s21 = inlined_call_operand.vmem [shape: f32[14,1], index: 21, kind: input, shape index: {}]   ;;  %s14090_s22 = inlined_call_operand.vmem [shape: bf16[368,192], index: 22, kind: input, shape index: {}]   ;;  %s14091_s23 = inlined_call_operand.vmem [shape: bf16[32,59], index: 23, kind: input, shape index: {}]   ;;  %s14092_s24 = inlined_call_operand.vmem [shape: bf16[288,160], index: 24, kind: input, shape index: {}]   ;;  %s14093_s25 = inlined_call_operand.vmem [shape: bf16[16,29], index: 25, kind: input, shape index: {}]   ;;  %s14094_s26 = inlined_call_operand.vmem [shape: bf16[2,64,10], index: 26, kind: input, shape index: {}]   ;;  %s14095_s27 = inlined_call_operand.vmem [shape: f32[1,10], index: 27, kind: input, shape index: {}]   ;;  %s14096_s28 = inlined_call_operand.hbm [shape: f32[2,10], index: 28, kind: output, shape index: {}]  }
   0x1   :  { %14112 = sst [smem:[#allocation8_spill]] %s14068_s0 }
   0x2   :  { %14113 = sst [smem:[#allocation9_spill]] %s14069_s1 }
   0x3   :  { %14114 = sst [smem:[#allocation10_spill]] %s14070_s2 }
   0x4   :  { %14115 = sst [smem:[#allocation11_spill]] %s14071_s3 }
   0x5   :  { %14116 = sst [smem:[#allocation12_spill]] %s14072_s4 }
   0x6   :  { %14117 = sst [smem:[#allocation13_spill]] %s14073_s5 }
   0x7   :  { %14118 = sst [smem:[#allocation14_spill]] %s14074_s6 }
   0x8   :  { %14119 = sst [smem:[#allocation15_spill]] %s14075_s7 }
   0x9   :  { %14120 = sst [smem:[#allocation16_spill]] %s14076_s8 }
   0xa   :  { %14121 = sst [smem:[#allocation17_spill]] %s14077_s9 }
   0xb   :  { %14122 = sst [smem:[#allocation18_spill]] %s14078_s10 }
   0xc   :  { %14123 = sst [smem:[#allocation19_spill]] %s14079_s11 }
   0xd   :  { %14124 = sst [smem:[#allocation20_spill]] %s14080_s12 }
   0xe   :  { %s14125_s9 = sld [smem:[#allocation9_spill]]  ;;  %vm175_vm0 = vcmask 1045504  }
   0xf   :  { %s14126_s0 = sld [smem:[#allocation8_spill]] }
  0x14   :  { %v6922_v0 = vld [vmem:[%s14125_s9 + $0x30] sm:$0xf]  ;;  %v8789_v1 = vld [vmem:[%s14125_s9 + $0x34] sm:$0x30]  ;;  %v8788_v4 = vld [vmem:[%s14125_s9 + $0x34] sm:$0xf] }
  0x15   :  { %v91_v2 = vld [vmem:[%s14126_s0] sm:$0xff]  ;;  %v6923_v3 = vor.u32 %v8789_v1, %v6922_v0  ;;  %v6924_v5 = vld [vmem:[%s14125_s9 + $0x38] sm:$0x30]  ;;  %v6946_v6 = vld [vmem:[%s14125_s9 + $0x10] sm:$0xf] }
  0x16   :  { %v6927_v7 = vor.u32 %v8788_v4, %v6924_v5  ;;  %v8785_v8 = vld [vmem:[%s14125_s9 + $0x14] sm:$0x30]  ;;  %v8784_v9 = vld [vmem:[%s14125_s9 + $0x14] sm:$0xf]  ;;  %v6948_v10 = vld [vmem:[%s14125_s9 + $0x18] sm:$0x30] }
  0x17   :  { %v177_v11 = vsel %vm175_vm0, %v6923_v3, 0  ;;  %v6947_v12 = vor.u32 %v8785_v8, %v6946_v6  ;;  %v6951_v13 = vor.u32 %v8784_v9, %v6948_v10  ;;  %v6914_v14 = vld [vmem:[%s14125_s9 + $0x20] sm:$0xf]  ;;  %v8787_v15 = vld [vmem:[%s14125_s9 + $0x24] sm:$0xf0]  ;;  %v93_v21 = vld [vmem:[%s14126_s0 + $0x10] sm:$0xff] }
  0x18   :  { %v92_v16 = vld [vmem:[%s14126_s0 + $0x8] sm:$0xff]  ;;  %188 = vmatpush.bf16.msra.mxu0 %v177_v11  ;;  %v180_v17 = vsel %vm175_vm0, %v6927_v7, 0  ;;  %v6915_v18 = vor.u32 %v8787_v15, %v6914_v14  ;;  %v8786_v19 = vld [vmem:[%s14125_s9 + $0x24] sm:$0xf]  ;;  %v6938_v26 = vld [vmem:[%s14125_s9] sm:$0xf] }
  0x19   :  { %v6916_v20 = vld [vmem:[%s14125_s9 + $0x28] sm:$0xf0]  ;;  %v9612_v22 = vpack.c.bf16 %v92_v16, %v91_v2  ;;  %217 = vmatpush.bf16.msra.mxu1 %v180_v17  ;;  %v267_v23 = vsel %vm175_vm0, %v6947_v12, 0  ;;  %v270_v24 = vsel %vm175_vm0, %v6951_v13, 0  ;;  %v8783_v27 = vld [vmem:[%s14125_s9 + $0x4] sm:$0xf0] }
  0x1a   :  { %v6919_v25 = vor.u32 %v8786_v19, %v6916_v20  ;;  %278 = vmatpush.bf16.msra.mxu2 %v267_v23  ;;  %307 = vmatpush.bf16.msra.mxu3 %v270_v24  ;;  %v6939_v28 = vor.u32 %v8783_v27, %v6938_v26  ;;  %v8782_v29 = vld [vmem:[%s14125_s9 + $0x4] sm:$0xf]  ;;  %v6940_v30 = vld [vmem:[%s14125_s9 + $0x8] sm:$0xf0]  ;;  %v94_v31 = vld [vmem:[%s14126_s0 + $0x18] sm:$0xff] }
  0x1b   :  { %v6943_v32 = vor.u32 %v8782_v29, %v6940_v30  ;;  %v9631_v33 = vpack.c.bf16 %v94_v31, %v93_v21  ;;  %v114_v34 = vshrl.u32 %v9612_v22, 16  ;;  %v116_v35 = vshll.u32 %v9612_v22, 16 }
  0x1c   :  { %189 = vmatpush.bf16.msra.mxu0 %v6915_v18 }
  0x1d   :  { %33 = vsyncpa [#allocation4], 0  ;;  %218 = vmatpush.bf16.msra.mxu1 %v6919_v25  ;;  %v118_v36 = vrot.slane %v116_v35, 1  ;;  %v121_v37 = vshll.u32 %v9631_v33, 16  ;;  %vm112_vm1 = vsmask.f32 7424 }
  0x1e   :  { %279 = vmatpush.bf16.msra.mxu2 %v6939_v28  ;;  %308 = vmatpush.bf16.msra.mxu3 %v6943_v32  ;;  %vm162_vm2 = vcmask 228352   ;;  %v95_v40 = vld [vmem:[%s14126_s0 + $0x20] sm:$0xff]  ;;  %v96_v41 = vld [vmem:[%s14126_s0 + $0x28] sm:$0xff]  ;;  %v125_v44 = vshrl.u32 %v9631_v33, 16  ;;  %v97_v49 = vld [vmem:[%s14126_s0 + $0x30] sm:$0xff]  ;;  %vm339_vm3 = vcmask 1046528  }
  0x1f   :  { %v119_v38 = vor.u32 %v118_v36, %v114_v34  ;;  %v123_v39 = vrot.slane %v121_v37, 1  ;;  %v101_v43 = vpack.c.bf16 %v96_v41, %v95_v40  ;;  %v98_v50 = vld [vmem:[%s14126_s0 + $0x38] sm:$0xff]  ;;  %v6974_v51 = vld [vmem:[%s14125_s9 + $0x50] sm:$0xf]  ;;  %v8792_v53 = vld [vmem:[%s14125_s9 + $0x54] sm:$0xf] }
  0x20   :  { %v8793_v52 = vld [vmem:[%s14125_s9 + $0x54] sm:$0x30]  ;;  %v102_v54 = vpack.c.bf16 %v98_v50, %v97_v49  ;;  %v6976_v56 = vld [vmem:[%s14125_s9 + $0x58] sm:$0x30]  ;;  %v6966_v57 = vld [vmem:[%s14125_s9 + $0x40] sm:$0xf] }
  0x21   :  { %v124_v42 = vsel %vm112_vm1, %v119_v38, %v123_v39  ;;  %6952 = vmatmul.msk.bf16.vlgmr.msra.gmra.mxu2 %vm162_vm2, %v9612_v22  ;;  %6956 = vmatmul.msk.bf16.vlgmr.msra.gmra.mxu3 %vm162_vm2, %v9612_v22  ;;  %v129_v45 = vshll.u32 %v101_v43, 16  ;;  %v127_v46 = vor.u32 %v125_v44, %v123_v39  ;;  %v6975_v55 = vor.u32 %v8793_v52, %v6974_v51  ;;  %v8791_v58 = vld [vmem:[%s14125_s9 + $0x44] sm:$0xf0]  ;;  %v8790_v60 = vld [vmem:[%s14125_s9 + $0x44] sm:$0xf]  ;;  %v603_v19 = vld [vmem:[%s14086_s18 + $0x10] sm:$0xff] }
  0x22   :  { %6928 = vmatmul.msk.bf16.vlgmr.msra.gmra.mxu0 %vm162_vm2, %v124_v42  ;;  %6932 = vmatmul.msk.bf16.vlgmr.msra.gmra.mxu1 %vm162_vm2, %v124_v42  ;;  %v6979_v59 = vor.u32 %v8792_v53, %v6976_v56  ;;  %v6968_v61 = vld [vmem:[%s14125_s9 + $0x48] sm:$0xf0]  ;;  %v340_v62 = vrot.slane %v9612_v22, 1  ;;  %v341_v0 = vrot.slane %v9631_v33, 1  ;;  %v6967_v2 = vor.u32 %v8791_v58, %v6966_v57  ;;  %v601_v14 = vld [vmem:[%s14086_s18] sm:$0xff]  ;;  %v607_v20 = vld [vmem:[%s14086_s18 + $0x30] sm:$0xff] }
  0x23   :  { %v131_v47 = vrot.slane %v129_v45, 1  ;;  %v378_v63 = vsel %vm175_vm0, %v6975_v55, 0  ;;  %v133_v3 = vshrl.u32 %v101_v43, 16  ;;  %v137_v4 = vshll.u32 %v102_v54, 16  ;;  %v602_v18 = vld [vmem:[%s14086_s18 + $0x8] sm:$0xff]  ;;  %v604_v21 = vld [vmem:[%s14086_s18 + $0x18] sm:$0xff] }
  0x24   :  { %389 = vmatpush.bf16.msrb.mxu0 %v378_v63  ;;  %v381_v1 = vsel %vm175_vm0, %v6979_v59, 0  ;;  %v6971_v5 = vor.u32 %v8790_v60, %v6968_v61  ;;  %v342_v6 = vsel %vm339_vm3, %v340_v62, %v341_v0  ;;  %v343_v10 = vrot.slane %v101_v43, 1  ;;  %v2657_v22 = vld [vmem:[%s14087_s19 + $0x8] sm:$0xff]  ;;  %v608_v23 = vld [vmem:[%s14086_s18 + $0x38] sm:$0x3f]  ;;  %v2660_v24 = vld [vmem:[%s14087_s19 + $0x20] sm:$0xff] }
  0x25   :  { %v132_v48 = vsel %vm112_vm1, %v127_v46, %v131_v47  ;;  %418 = vmatpush.bf16.msrb.mxu1 %v381_v1  ;;  %v135_v7 = vor.u32 %v133_v3, %v131_v47  ;;  %v139_v8 = vrot.slane %v137_v4, 1  ;;  %v141_v12 = vshrl.u32 %v102_v54, 16  ;;  %v2658_v25 = vld [vmem:[%s14087_s19 + $0x10] sm:$0xff]  ;;  %v605_v26 = vld [vmem:[%s14086_s18 + $0x20] sm:$0xff]  ;;  %v2663_v27 = vld [vmem:[%s14087_s19 + $0x38] sm:$0xf] }
  0x26   :  { %v344_v11 = vsel %vm339_vm3, %v341_v0, %v343_v10  ;;  %v345_v15 = vrot.slane %v102_v54, 1  ;;  %v9411_v16 = vmov 0   ;;  %v2661_v28 = vld [vmem:[%s14087_s19 + $0x28] sm:$0xff]  ;;  %v2656_v30 = vld [vmem:[%s14087_s19] sm:$0xff]  ;;  %v2662_v36 = vld [vmem:[%s14087_s19 + $0x30] sm:$0xff]  ;;  %vm679_vm4 = vcmask 654336  }
  0x27   :  { %v140_v9 = vsel %vm112_vm1, %v135_v7, %v139_v8  ;;  %v143_v13 = vor.u32 %v141_v12, %v139_v8  ;;  %9163 = vset.pattern.permute.xlu0 %v9411_v16  ;;  %9164 = vset.pattern.permute.xlu1 %v9411_v16  ;;  %v606_v29 = vld [vmem:[%s14086_s18 + $0x28] sm:$0xff]  ;;  %vm693_vm5 = vcmask 652288   ;;  %s14127_s4 = sld [smem:[#allocation18_spill]]  ;;  %vm896_vm10 = vcmask 1040384   ;;  %s9414_s30 = smov 112  }
  0x28   :  { %390 = vmatpush.bf16.msrb.mxu0 %v6967_v2  ;;  %611 = vperm.xlu0 %9163, %v601_v14   ;;  %v346_v17 = vsel %vm339_vm3, %v343_v10, %v345_v15  ;;  %v9794_v10 = vld [vmem:[%s14082_s14 + $0x78] sm:$0xff]  ;;  %s14128_s3 = sld [smem:[#allocation10_spill]]  ;;  %vm900_vm11 = vcmask 64512   ;;  %vm2734_vm12 = vcmask 1043456   ;;  %s9417_s18 = smov 96  }
  0x29   :  { %419 = vmatpush.bf16.msrb.mxu1 %v6971_v5  ;;  %9165 = vset.pattern.permute.xlu2 %v9411_v16  ;;  %v9802_v16 = vld [vmem:[%s14082_s14 + $0x70] sm:$0xff]  ;;  %s14129_s5 = sld [smem:[#allocation14_spill]] }
  0x2a   :  { %621 = vperm.xlu1 %9164, %v603_v19   ;;  %631 = vperm.xlu2 %9165, %v605_v26   ;;  %s14132_s10 = sld [smem:[#allocation19_spill]] }
  0x2b   :  { %731 = vmatpush.msrb.mxu2 %v9794_v10  ;;  %s14133_s8 = sld [smem:[#allocation15_spill]] }
  0x2c   :  { %s14138_s11 = sld [smem:[#allocation16_spill]] }
  0x2d   :  { %732 = vmatpush.msrb.mxu2 %v9802_v16  ;;  %s14140_s29 = sld [smem:[#allocation13_spill]] }
  0x30   :  { %616 = vperm.xlu0 %9163, %v602_v18  }
  0x31   :  { %6953 = vmatmul.msk.bf16.gmra.mxu2 %vm162_vm2, %v9631_v33  ;;  %6957 = vmatmul.msk.bf16.gmra.mxu3 %vm162_vm2, %v9631_v33  ;;  %v2659_v33 = vld [vmem:[%s14087_s19 + $0x18] sm:$0xff]  ;;  %s14139_s19 = sld [smem:[#allocation12_spill]] }
  0x32   :  { %6929 = vmatmul.msk.bf16.gmra.mxu0 %vm162_vm2, %v132_v48  ;;  %6933 = vmatmul.msk.bf16.gmra.mxu1 %vm162_vm2, %v132_v48 }
  0x33   :  { %626 = vperm.xlu1 %9164, %v604_v21   ;;  %636 = vperm.xlu2 %9165, %v606_v29   ;;  %v9811_v21 = vld [vmem:[%s14082_s14 + $0x68] sm:$0xff] }
  0x34   :  { %733 = vmatpush.msrb.mxu2 %v9811_v21 }
  0x38   :  { %641 = vperm.xlu0 %9163, %v607_v20  }
  0x3b   :  { %646 = vperm.xlu1 %9164, %v608_v23   ;;  %2666 = vperm.xlu2 %9165, %v2656_v30  }
  0x40   :  { %2671 = vperm.xlu0 %9163, %v2657_v22  }
  0x41   :  { %6954 = vmatmul.msk.bf16.gmra.mxu2 %vm162_vm2, %v101_v43  ;;  %6958 = vmatmul.msk.bf16.gmra.mxu3 %vm162_vm2, %v101_v43 }
  0x42   :  { %6930 = vmatmul.msk.bf16.gmra.mxu0 %vm162_vm2, %v140_v9  ;;  %6934 = vmatmul.msk.bf16.gmra.mxu1 %vm162_vm2, %v140_v9 }
  0x43   :  { %2676 = vperm.xlu1 %9164, %v2658_v25   ;;  %2681 = vperm.xlu2 %9165, %v2659_v33  }
  0x48   :  { %2686 = vperm.xlu0 %9163, %v2660_v24  }
  0x4b   :  { %2691 = vperm.xlu1 %9164, %v2661_v28   ;;  %2696 = vperm.xlu2 %9165, %v2662_v36   ;;  %v9822_v28 = vld [vmem:[%s14082_s14 + $0x60] sm:$0xff] }
  0x4c   :  { %734 = vmatpush.msrb.mxu2 %v9822_v28 }
  0x50   :  { %2701 = vperm.xlu0 %9163, %v2663_v27  }
  0x51   :  { %6955 = vmatmul.msk.bf16.gmra.mxu2 %vm162_vm2, %v102_v54  ;;  %6959 = vmatmul.msk.bf16.gmra.mxu3 %vm162_vm2, %v102_v54 }
  0x52   :  { %6931 = vmatmul.msk.bf16.gmra.mxu0 %vm162_vm2, %v143_v13  ;;  %6935 = vmatmul.msk.bf16.gmra.mxu1 %vm162_vm2, %v143_v13 }
  0x62   :  { %6980 = vmatmul.msk.bf16.vlgmr.msrb.gmra.mxu0 %vm162_vm2, %v342_v6  ;;  %6984 = vmatmul.msk.bf16.vlgmr.msrb.gmra.mxu1 %vm162_vm2, %v342_v6 }
  0x72   :  { %6981 = vmatmul.msk.bf16.gmra.mxu0 %vm162_vm2, %v344_v11  ;;  %6985 = vmatmul.msk.bf16.gmra.mxu1 %vm162_vm2, %v344_v11 }
  0x82   :  { %6982 = vmatmul.msk.bf16.gmra.mxu0 %vm162_vm2, %v346_v17  ;;  %6986 = vmatmul.msk.bf16.gmra.mxu1 %vm162_vm2, %v346_v17 }
  0x92   :  { %6983 = vmatmul.msk.bf16.gmra.mxu0 %vm162_vm2, %v345_v15  ;;  %6987 = vmatmul.msk.bf16.gmra.mxu1 %vm162_vm2, %v345_v15 }
  0x9f   :  { %v191_v31 = vpop.f32.mrf.mxu0  ;;  %v220_v32 = vpop.f32.mrf.mxu1 }
  0xa4   :  { %v281_v45 = vpop.f32.mrf.mxu2  ;;  %v310_v46 = vpop.f32.mrf.mxu3 }
  0xa5   :  { %v282_v57 = vadd.f32 %v281_v45, %v191_v31  ;;  %v311_v58 = vadd.f32 %v310_v46, %v220_v32 }
  0xa7   :  { %v193_v34 = vpop.f32.mrf.mxu0  ;;  %v222_v35 = vpop.f32.mrf.mxu1 }
  0xac   :  { %v283_v49 = vpop.f32.mrf.mxu2  ;;  %v312_v50 = vpop.f32.mrf.mxu3 }
  0xad   :  { %v284_v63 = vadd.f32 %v283_v49, %v193_v34  ;;  %v313_v2 = vadd.f32 %v312_v50, %v222_v35  ;;  %v9830_v35 = vld [vmem:[%s14082_s14 + $0x58] sm:$0xff] }
  0xae   :  { %735 = vmatpush.msrb.mxu2 %v9830_v35 }
  0xaf   :  { %v196_v37 = vpop.f32.mrf.mxu0  ;;  %v225_v38 = vpop.f32.mrf.mxu1 }
  0xb4   :  { %v286_v55 = vpop.f32.mrf.mxu2  ;;  %v315_v56 = vpop.f32.mrf.mxu3 }
  0xb5   :  { %v316_v13 = vadd.f32 %v315_v56, %v225_v38  ;;  %v287_v20 = vadd.f32 %v286_v55, %v196_v37 }
  0xb7   :  { %v198_v39 = vpop.f32.mrf.mxu0  ;;  %v227_v40 = vpop.f32.mrf.mxu1 }
  0xbc   :  { %v288_v3 = vpop.f32.mrf.mxu2  ;;  %v317_v4 = vpop.f32.mrf.mxu3 }
  0xbd   :  { %v289_v29 = vadd.f32 %v288_v3, %v198_v39  ;;  %v318_v32 = vadd.f32 %v317_v4, %v227_v40  ;;  %v9842_v40 = vld [vmem:[%s14082_s14 + $0x50] sm:$0xff] }
  0xbe   :  { %736 = vmatpush.msrb.mxu2 %v9842_v40 }
  0xbf   :  { %v9759_v41 = vpop.f32.mrf.mxu0  ;;  %v9761_v42 = vpop.f32.mrf.mxu1 }
  0xc4   :  { %v291_v22 = vpop.f32.mrf.mxu2  ;;  %v320_v23 = vpop.f32.mrf.mxu3 }
  0xc7   :  { %v9763_v43 = vpop.f32.mrf.mxu0  ;;  %v9765_v44 = vpop.f32.mrf.mxu1 }
  0xcf   :  { %v9767_v47 = vpop.f32.mrf.mxu0  ;;  %v9769_v48 = vpop.f32.mrf.mxu1 }
  0xd7   :  { %v9771_v51 = vpop.f32.mrf.mxu0  ;;  %v9773_v52 = vpop.f32.mrf.mxu1 }
  0xdf   :  { %v392_v53 = vpop.f32.mrf.mxu0  ;;  %v421_v54 = vpop.f32.mrf.mxu1 }
  0xe0   :  { %v9775_v59 = vadd.f32 %v392_v53, %v282_v57  ;;  %v9777_v60 = vadd.f32 %v421_v54, %v311_v58  ;;  %v9852_v54 = vld [vmem:[%s14082_s14 + $0x48] sm:$0xff]  ;;  %v9862_v58 = vld [vmem:[%s14082_s14 + $0x40] sm:$0xff] }
  0xe1   :  { %737 = vmatpush.msrb.mxu2 %v9852_v54 }
  0xe2   :  { %v457_v0 = vmul.f32 %v9775_v59, %v9775_v59  ;;  %v458_v1 = vmul.f32 %v9777_v60, %v9777_v60 }
  0xe3   :  { %738 = vmatpush.msrb.mxu2 %v9862_v58 }
  0xe4   :  { %v473_v6 = vmul.f32 %v457_v0, %v9775_v59  ;;  %v474_v8 = vmul.f32 %v458_v1, %v9777_v60  ;;  %v322_v0 = vpop.f32.mrf.mxu3 }
  0xe6   :  { %v489_v14 = vmul.f32 0.044715, %v473_v6  ;;  %v490_v17 = vmul.f32 0.044715, %v474_v8  ;;  %v9871_v8 = vld [vmem:[%s14082_s14 + $0x38] sm:$0xff] }
  0xe7   :  { %v394_v61 = vpop.f32.mrf.mxu0  ;;  %v423_v62 = vpop.f32.mrf.mxu1  ;;  %739 = vmatpush.msrb.mxu2 %v9871_v8 }
  0xe8   :  { %v9783_v5 = vadd.f32 %v394_v61, %v284_v63  ;;  %v9786_v7 = vadd.f32 %v423_v62, %v313_v2  ;;  %v505_v24 = vadd.f32 %v489_v14, %v9775_v59  ;;  %v506_v26 = vadd.f32 %v490_v17, %v9777_v60  ;;  %v293_v63 = vpop.f32.mrf.mxu2 }
  0xe9   :  { %v292_v61 = vadd.f32 %v291_v22, %v9759_v41  ;;  %v321_v62 = vadd.f32 %v320_v23, %v9761_v42  ;;  %v9893_v23 = vld [vmem:[%s14082_s14 + $0x28] sm:$0xff] }
  0xea   :  { %v459_v9 = vmul.f32 %v9783_v5, %v9783_v5  ;;  %v460_v15 = vmul.f32 %v9786_v7, %v9786_v7  ;;  %v521_v36 = vmul.f32 0.7978846, %v505_v24  ;;  %v522_v39 = vmul.f32 0.7978846, %v506_v26 }
  0xec   :  { %v475_v18 = vmul.f32 %v459_v9, %v9783_v5  ;;  %v476_v25 = vmul.f32 %v460_v15, %v9786_v7  ;;  %9257 = vtanh.f32 %v521_v36  ;;  %v294_v36 = vadd.f32 %v293_v63, %v9763_v43 }
  0xed   :  { %9259 = vtanh.f32 %v522_v39 }
  0xee   :  { %v491_v30 = vmul.f32 0.044715, %v475_v18  ;;  %v492_v37 = vmul.f32 0.044715, %v476_v25 }
  0xef   :  { %v397_v11 = vpop.f32.mrf.mxu0  ;;  %v426_v12 = vpop.f32.mrf.mxu1 }
  0xf0   :  { %v9806_v19 = vadd.f32 %v426_v12, %v316_v13  ;;  %v9817_v27 = vadd.f32 %v397_v11, %v287_v20  ;;  %v507_v49 = vadd.f32 %v491_v30, %v9783_v5  ;;  %v508_v55 = vadd.f32 %v492_v37, %v9786_v7  ;;  %v9882_v13 = vld [vmem:[%s14082_s14 + $0x30] sm:$0xff] }
  0xf1   :  { %740 = vmatpush.msrb.mxu2 %v9882_v13  ;;  %v323_v37 = vadd.f32 %v322_v0, %v9765_v44 }
  0xf2   :  { %v462_v31 = vmul.f32 %v9806_v19, %v9806_v19  ;;  %v461_v45 = vmul.f32 %v9817_v27, %v9817_v27  ;;  %v523_v1 = vmul.f32 0.7978846, %v507_v49  ;;  %v524_v9 = vmul.f32 0.7978846, %v508_v55  ;;  %v9258_v14 = vpop.eup %9257 }
  0xf3   :  { %v9260_v20 = vpop.eup %9259  ;;  %741 = vmatpush.msrb.mxu2 %v9893_v23  ;;  %v553_v30 = vadd.f32 1.0, %v9258_v14 }
  0xf4   :  { %v478_v50 = vmul.f32 %v462_v31, %v9806_v19  ;;  %v477_v57 = vmul.f32 %v461_v45, %v9817_v27  ;;  %9261 = vtanh.f32 %v523_v1  ;;  %v9902_v31 = vld [vmem:[%s14082_s14 + $0x20] sm:$0xff]  ;;  %v9928_v1 = vld [vmem:[%s14082_s14 + $0x10] sm:$0xff] }
  0xf5   :  { %9263 = vtanh.f32 %v524_v9  ;;  %742 = vmatpush.msrb.mxu2 %v9902_v31 }
  0xf6   :  { %v494_v2 = vmul.f32 0.044715, %v478_v50  ;;  %v493_v12 = vmul.f32 0.044715, %v477_v57  ;;  %v9911_v50 = vld [vmem:[%s14082_s14 + $0x18] sm:$0xff]  ;;  %v325_v57 = vpop.f32.mrf.mxu3 }
  0xf7   :  { %v399_v33 = vpop.f32.mrf.mxu0  ;;  %v428_v34 = vpop.f32.mrf.mxu1  ;;  %743 = vmatpush.msrb.mxu2 %v9911_v50 }
  0xf8   :  { %v9832_v38 = vadd.f32 %v399_v33, %v289_v29  ;;  %v9837_v46 = vadd.f32 %v428_v34, %v318_v32  ;;  %v510_v15 = vadd.f32 %v494_v2, %v9806_v19  ;;  %v509_v29 = vadd.f32 %v493_v12, %v9817_v27  ;;  %v9933_v2 = vld [vmem:[%s14082_s14 + $0xc0] sm:$0xff] }
  0xf9   :  { %v554_v33 = vadd.f32 1.0, %v9260_v20  ;;  %744 = vmatpush.msrb.mxu2 %v9928_v1 }
  0xfa   :  { %v464_v53 = vmul.f32 %v9837_v46, %v9837_v46  ;;  %v463_v56 = vmul.f32 %v9832_v38, %v9832_v38  ;;  %v526_v32 = vmul.f32 0.7978846, %v510_v15  ;;  %v9262_v55 = vpop.eup %9261  ;;  %v9945_v15 = vld [vmem:[%s14082_s14 + $0x8] sm:$0xff] }
  0xfb   :  { %745 = vmatpush.msrb.mxu2 %v9945_v15 }
  0xfc   :  { %v480_v3 = vmul.f32 %v464_v53, %v9837_v46  ;;  %v479_v41 = vmul.f32 %v463_v56, %v9832_v38  ;;  %v9916_v53 = vld [vmem:[%s14082_s14 + $0xc8] sm:$0xff]  ;;  %v296_v56 = vpop.f32.mrf.mxu2  ;;  %9265 = vtanh.f32 %v526_v32 }
  0xfd   :  { %757 = vmatpush.msrb.mxu3 %v9916_v53  ;;  %v297_v32 = vadd.f32 %v296_v56, %v9767_v47  ;;  %v9981_v47 = vld [vmem:[%s14082_s14 + $0xa8] sm:$0xff] }
  0xfe   :  { %v496_v22 = vmul.f32 0.044715, %v480_v3  ;;  %v495_v24 = vmul.f32 0.044715, %v479_v41  ;;  %v9264_v3 = vpop.eup %9263  ;;  %v555_v41 = vadd.f32 1.0, %v9262_v55 }
  0xff   :  { %v402_v4 = vpop.f32.mrf.mxu0  ;;  %v431_v6 = vpop.f32.mrf.mxu1  ;;  %758 = vmatpush.msrb.mxu3 %v9933_v2 }
 0x100   :  { %v9874_v11 = vadd.f32 %v402_v4, %v292_v61  ;;  %v9876_v42 = vadd.f32 %v431_v6, %v321_v62  ;;  %v512_v39 = vadd.f32 %v496_v22, %v9837_v46  ;;  %v511_v43 = vadd.f32 %v495_v24, %v9832_v38 }
 0x101   :  { %v525_v61 = vmul.f32 0.7978846, %v509_v29  ;;  %v569_v62 = vmul.f32 0.5, %v553_v30  ;;  %v570_v4 = vmul.f32 0.5, %v554_v33  ;;  %v9962_v29 = vld [vmem:[%s14082_s14] sm:$0xff]  ;;  %v9967_v30 = vld [vmem:[%s14082_s14 + $0xb0] sm:$0xff] }
 0x102   :  { %v465_v17 = vmul.f32 %v9874_v11, %v9874_v11  ;;  %v466_v18 = vmul.f32 %v9876_v42, %v9876_v42  ;;  %v528_v9 = vmul.f32 0.7978846, %v512_v39  ;;  %v527_v20 = vmul.f32 0.7978846, %v511_v43  ;;  %746 = vmatpush.msrb.mxu2 %v9962_v29 }
 0x103   :  { %9267 = vtanh.f32 %v525_v61  ;;  %v9955_v24 = vmul.f32 %v569_v62, %v9775_v59  ;;  %v9971_v59 = vmul.f32 %v570_v4, %v9777_v60  ;;  %v9266_v60 = vpop.eup %9265 }
 0x104   :  { %v481_v25 = vmul.f32 %v465_v17, %v9874_v11  ;;  %v482_v26 = vmul.f32 %v466_v18, %v9876_v42  ;;  %v9950_v17 = vld [vmem:[%s14082_s14 + $0xb8] sm:$0xff]  ;;  %v612_v18 = vpop.permute.xlu0 %611  ;;  %9269 = vtanh.f32 %v528_v9  ;;  %825 = vmatpush.msra.mxu2 %v9794_v10  ;;  %v9996_v10 = vld [vmem:[%s14082_s14 + $0xa0] sm:$0xff]  ;;  %v298_v62 = vpop.f32.mrf.mxu2 }
 0x105   :  { %759 = vmatpush.msrb.mxu3 %v9950_v17  ;;  %9271 = vtanh.f32 %v527_v20  ;;  %v650_v4 = vmul.f32 %v612_v18, %v9971_v59 }
 0x106   :  { %v498_v34 = vmul.f32 0.044715, %v482_v26  ;;  %v497_v44 = vmul.f32 0.044715, %v481_v25  ;;  %v556_v25 = vadd.f32 1.0, %v9264_v3  ;;  %826 = vmatpush.msra.mxu2 %v9802_v16  ;;  %v327_v3 = vpop.f32.mrf.mxu3  ;;  %v558_v16 = vadd.f32 1.0, %v9266_v60 }
 0x107   :  { %v404_v45 = vpop.f32.mrf.mxu0  ;;  %v433_v49 = vpop.f32.mrf.mxu1  ;;  %760 = vmatpush.msrb.mxu3 %v9967_v30 }
 0x108   :  { %v9920_v63 = vadd.f32 %v404_v45, %v294_v36  ;;  %v9922_v0 = vadd.f32 %v433_v49, %v323_v37  ;;  %v514_v6 = vadd.f32 %v498_v34, %v9876_v42  ;;  %v513_v22 = vadd.f32 %v497_v44, %v9874_v11  ;;  %827 = vmatpush.msra.mxu2 %v9811_v21  ;;  %v10025_v21 = vld [vmem:[%s14082_s14 + $0x90] sm:$0xff] }
 0x109   :  { %v326_v36 = vadd.f32 %v325_v57, %v9769_v48  ;;  %v571_v37 = vmul.f32 0.5, %v555_v41  ;;  %v9986_v48 = vmul.f32 %v612_v18, %v9955_v24  ;;  %v572_v57 = vmul.f32 0.5, %v556_v25  ;;  %761 = vmatpush.msrb.mxu3 %v9981_v47  ;;  %v9268_v41 = vpop.eup %9267  ;;  %v10010_v18 = vld [vmem:[%s14082_s14 + $0x98] sm:$0xff] }
 0x10a   :  { %v467_v12 = vmul.f32 %v9920_v63, %v9920_v63  ;;  %v468_v14 = vmul.f32 %v9922_v0, %v9922_v0  ;;  %v530_v33 = vmul.f32 0.7978846, %v514_v6  ;;  %v529_v55 = vmul.f32 0.7978846, %v513_v22  ;;  %828 = vmatpush.msra.mxu2 %v9822_v28 }
 0x10b   :  { %762 = vmatpush.msrb.mxu3 %v9996_v10  ;;  %v10038_v28 = vsel %vm679_vm4, %v650_v4, 0.0 }
 0x10c   :  { %v483_v26 = vmul.f32 %v467_v12, %v9920_v63  ;;  %v484_v34 = vmul.f32 %v468_v14, %v9922_v0  ;;  %9273 = vtanh.f32 %v530_v33  ;;  %v10003_v12 = vmul.f32 %v571_v37, %v9783_v5  ;;  %v9270_v5 = vpop.eup %9269  ;;  %829 = vmatpush.msra.mxu2 %v9830_v35 }
 0x10d   :  { %9275 = vtanh.f32 %v529_v55  ;;  %v10018_v33 = vmul.f32 %v572_v57, %v9786_v7  ;;  %763 = vmatpush.msrb.mxu3 %v10010_v18  ;;  %v557_v37 = vadd.f32 1.0, %v9268_v41  ;;  %v10035_v7 = vld [vmem:[%s14082_s14 + $0x88] sm:$0xff]  ;;  %v560_v57 = vadd.f32 1.0, %v9270_v5 }
 0x10e   :  { %v499_v39 = vmul.f32 0.044715, %v483_v26  ;;  %v500_v56 = vmul.f32 0.044715, %v484_v34  ;;  %v299_v26 = vadd.f32 %v298_v62, %v9771_v51  ;;  %v9272_v34 = vpop.eup %9271  ;;  %v772_v51 = vmul.f32 %v650_v4, %v9971_v59  ;;  %830 = vmatpush.msra.mxu2 %v9842_v40 }
 0x10f   :  { %v407_v45 = vpop.f32.mrf.mxu0  ;;  %v436_v49 = vpop.f32.mrf.mxu1  ;;  %764 = vmatpush.msrb.mxu3 %v10025_v21 }
 0x110   :  { %v9983_v43 = vadd.f32 %v407_v45, %v297_v32  ;;  %v515_v44 = vadd.f32 %v499_v39, %v9920_v63  ;;  %v9989_v61 = vadd.f32 %v436_v49, %v326_v36  ;;  %v516_v6 = vadd.f32 %v500_v56, %v9922_v0  ;;  %831 = vmatpush.msra.mxu2 %v9852_v54 }
 0x111   :  { %v328_v32 = vadd.f32 %v327_v3, %v9773_v52  ;;  %v10029_v36 = vmul.f32 %v9986_v48, %v9955_v24  ;;  %v617_v52 = vpop.permute.xlu0 %616  ;;  %v574_v39 = vmul.f32 0.5, %v558_v16  ;;  %v10049_v3 = vld [vmem:[%s14082_s14 + $0x80] sm:$0xff]  ;;  %765 = vmatpush.msrb.mxu3 %v10035_v7 }
 0x112   :  { %v469_v9 = vmul.f32 %v9983_v43, %v9983_v43  ;;  %v531_v14 = vmul.f32 0.7978846, %v515_v44  ;;  %v532_v20 = vmul.f32 0.7978846, %v516_v6  ;;  %v470_v25 = vmul.f32 %v9989_v61, %v9989_v61  ;;  %v9274_v55 = vpop.eup %9273  ;;  %v622_v6 = vpop.permute.xlu1 %621  ;;  %832 = vmatpush.msra.mxu2 %v9862_v58 }
 0x113   :  { %v651_v56 = vmul.f32 %v617_v52, %v10003_v12  ;;  %v652_v4 = vmul.f32 %v617_v52, %v10018_v33  ;;  %v9276_v16 = vpop.eup %9275  ;;  %v10061_v5 = vmul.f32 %v574_v39, %v9806_v19  ;;  %766 = vmatpush.msrb.mxu3 %v10049_v3 }
 0x114   :  { %v485_v22 = vmul.f32 %v469_v9, %v9983_v43  ;;  %9277 = vtanh.f32 %v532_v20  ;;  %v486_v44 = vmul.f32 %v470_v25, %v9989_v61  ;;  %v559_v9 = vadd.f32 1.0, %v9272_v34  ;;  %833 = vmatpush.msra.mxu2 %v9871_v8 }
 0x115   :  { %9279 = vtanh.f32 %v531_v14  ;;  %v801_v14 = vsel %vm679_vm4, %v772_v51, 0.0  ;;  %v573_v20 = vmul.f32 0.5, %v557_v37  ;;  %v10067_v51 = vadd.f32 %v651_v56, %v9986_v48  ;;  %851 = vmatpush.msra.mxu3 %v9916_v53 }
 0x116   :  { %v501_v45 = vmul.f32 0.044715, %v485_v22  ;;  %v502_v22 = vmul.f32 0.044715, %v486_v44  ;;  %v773_v37 = vmul.f32 %v651_v56, %v10003_v12  ;;  %v774_v40 = vmul.f32 %v652_v4, %v10018_v33  ;;  %834 = vmatpush.msra.mxu2 %v9882_v13 }
 0x117   :  { %v409_v49 = vpop.f32.mrf.mxu0  ;;  %v438_v60 = vpop.f32.mrf.mxu1  ;;  %v561_v39 = vadd.f32 1.0, %v9276_v16  ;;  %852 = vmatpush.msra.mxu3 %v9933_v2  ;;  %v681_v54 = vsel %vm679_vm4, %v652_v4, 0.0  ;;  %v654_v53 = vmul.f32 %v622_v6, %v10061_v5 }
 0x118   :  { %v10044_v62 = vadd.f32 %v409_v49, %v299_v26  ;;  %v517_v41 = vadd.f32 %v501_v45, %v9983_v43  ;;  %v10053_v35 = vadd.f32 %v438_v60, %v328_v32  ;;  %v562_v26 = vadd.f32 1.0, %v9274_v55  ;;  %835 = vmatpush.msra.mxu2 %v9893_v23 }
 0x119   :  { %v576_v45 = vmul.f32 0.5, %v560_v57  ;;  %v518_v49 = vadd.f32 %v502_v22, %v9989_v61  ;;  %v575_v60 = vmul.f32 0.5, %v559_v9  ;;  %v10075_v55 = vmul.f32 %v573_v20, %v9817_v27  ;;  %v632_v57 = vpop.permute.xlu2 %631  ;;  %853 = vmatpush.msra.mxu3 %v9950_v17 }
 0x11a   :  { %v471_v25 = vmul.f32 %v10044_v62, %v10044_v62  ;;  %v533_v34 = vmul.f32 0.7978846, %v517_v41  ;;  %v472_v32 = vmul.f32 %v10053_v35, %v10053_v35  ;;  %v9278_v52 = vpop.eup %9277  ;;  %v578_v41 = vmul.f32 0.5, %v562_v26  ;;  %836 = vmatpush.msra.mxu2 %v9902_v31 }
 0x11b   :  { %v9280_v19 = vpop.eup %9279  ;;  %v564_v48 = vadd.f32 1.0, %v9278_v52  ;;  %v534_v44 = vmul.f32 0.7978846, %v518_v49  ;;  %v10084_v16 = vmul.f32 %v576_v45, %v9837_v46  ;;  %v787_v58 = vadd.f32 %v773_v37, %v10029_v36  ;;  %854 = vmatpush.msra.mxu3 %v9967_v30 }
 0x11c   :  { %9281 = vtanh.f32 %v533_v34  ;;  %v487_v56 = vmul.f32 %v471_v25, %v10044_v62  ;;  %v488_v9 = vmul.f32 %v472_v32, %v10053_v35  ;;  %v563_v27 = vadd.f32 1.0, %v9280_v19  ;;  %v627_v32 = vpop.permute.xlu1 %626  ;;  %837 = vmatpush.msra.mxu2 %v9911_v50 }
 0x11d   :  { %9283 = vtanh.f32 %v534_v44  ;;  %v577_v2 = vmul.f32 0.5, %v561_v39  ;;  %v10090_v4 = vmul.f32 %v575_v60, %v9832_v38  ;;  %v802_v25 = vsel %vm679_vm4, %v774_v40, 0.0  ;;  %855 = vmatpush.msra.mxu3 %v9981_v47 }
 0x11e   :  { %v503_v20 = vmul.f32 0.044715, %v487_v56  ;;  %v504_v22 = vmul.f32 0.044715, %v488_v9  ;;  %v653_v26 = vmul.f32 %v622_v6, %v10075_v55  ;;  %v580_v46 = vmul.f32 0.5, %v564_v48  ;;  %838 = vmatpush.msra.mxu2 %v9928_v1 }
 0x11f   :  { %v682_v17 = vadd.f32 %v681_v54, %v10038_v28  ;;  %v776_v36 = vmul.f32 %v654_v53, %v10061_v5  ;;  %v10100_v38 = vmul.f32 %v578_v41, %v9876_v42  ;;  %v656_v6 = vmul.f32 %v627_v32, %v10084_v16  ;;  %856 = vmatpush.msra.mxu3 %v9996_v10 }
 0x120   :  { %v519_v34 = vadd.f32 %v503_v20, %v10044_v62  ;;  %v520_v52 = vadd.f32 %v504_v22, %v10053_v35  ;;  %v579_v37 = vmul.f32 0.5, %v563_v27  ;;  %v803_v13 = vadd.f32 %v802_v25, %v801_v14  ;;  %v642_v20 = vpop.permute.xlu0 %641  ;;  %839 = vmatpush.msra.mxu2 %v9945_v15 }
 0x121   :  { %v10107_v30 = vmul.f32 %v577_v2, %v9874_v11  ;;  %v655_v28 = vmul.f32 %v627_v32, %v10090_v4  ;;  %v775_v40 = vmul.f32 %v653_v26, %v10075_v55  ;;  %v10112_v39 = vmul.f32 %v580_v46, %v9922_v0  ;;  %857 = vmatpush.msra.mxu3 %v10010_v18  ;;  %v637_v54 = vpop.permute.xlu2 %636 }
 0x122   :  { %v9282_v8 = vpop.eup %9281  ;;  %v535_v49 = vmul.f32 0.7978846, %v519_v34  ;;  %v536_v42 = vmul.f32 0.7978846, %v520_v52  ;;  %v683_v23 = vsel %vm679_vm4, %v654_v53, 0.0  ;;  %v658_v11 = vmul.f32 %v632_v57, %v10100_v38  ;;  %840 = vmatpush.msra.mxu2 %v9962_v29 }
 0x123   :  { %v565_v45 = vadd.f32 1.0, %v9282_v8  ;;  %v9284_v19 = vpop.eup %9283  ;;  %v666_v14 = vadd.f32 %v10067_v51, %v653_v26  ;;  %v804_v48 = vsel %vm679_vm4, %v776_v36, 0.0  ;;  %v778_v44 = vmul.f32 %v656_v6, %v10084_v16  ;;  %858 = vmatpush.msra.mxu3 %v10025_v21 }
 0x124   :  { %9285 = vtanh.f32 %v535_v49  ;;  %v566_v47 = vadd.f32 1.0, %v9284_v19  ;;  %v10122_v0 = vmul.f32 %v579_v37, %v9920_v63  ;;  %v657_v31 = vmul.f32 %v632_v57, %v10107_v30 }
 0x125   :  { %v581_v60 = vmul.f32 0.5, %v565_v45  ;;  %9287 = vtanh.f32 %v536_v42  ;;  %v685_v10 = vsel %vm679_vm4, %v656_v6, 0.0  ;;  %v777_v56 = vmul.f32 %v655_v28, %v10090_v4  ;;  %859 = vmatpush.msra.mxu3 %v10035_v7 }
 0x126   :  { %v582_v53 = vmul.f32 0.5, %v566_v47  ;;  %v684_v51 = vadd.f32 %v683_v23, %v682_v17  ;;  %v660_v41 = vmul.f32 %v637_v54, %v10112_v39  ;;  %v788_v50 = vadd.f32 %v787_v58, %v775_v40  ;;  %v647_v40 = vpop.permute.xlu1 %646 }
 0x127   :  { %v10131_v9 = vmul.f32 %v581_v60, %v9983_v43  ;;  %v805_v63 = vadd.f32 %v804_v48, %v803_v13  ;;  %v780_v18 = vmul.f32 %v658_v11, %v10100_v38  ;;  %v667_v2 = vadd.f32 %v666_v14, %v655_v28  ;;  %860 = vmatpush.msra.mxu3 %v10049_v3 }
 0x128   :  { %v10137_v57 = vmul.f32 %v582_v53, %v9989_v61  ;;  %v686_v22 = vadd.f32 %v685_v10, %v684_v51  ;;  %v806_v25 = vsel %vm679_vm4, %v778_v44, 0.0  ;;  %v659_v43 = vmul.f32 %v637_v54, %v10122_v0 }
 0x129   :  { %v779_v21 = vmul.f32 %v657_v31, %v10107_v30  ;;  %v789_v58 = vadd.f32 %v788_v50, %v777_v56  ;;  %v687_v46 = vsel %vm679_vm4, %v658_v11, 0.0  ;;  %v782_v34 = vmul.f32 %v660_v41, %v10112_v39 }
 0x12a   :  { %v9286_v27 = vpop.eup %9285  ;;  %v662_v26 = vmul.f32 %v642_v20, %v10137_v57  ;;  %v661_v8 = vmul.f32 %v642_v20, %v10131_v9  ;;  %v808_v15 = vsel %vm679_vm4, %v780_v18, 0.0  ;;  %v807_v7 = vadd.f32 %v806_v25, %v805_v63 }
 0x12b   :  { %v9288_v1 = vpop.eup %9287  ;;  %v567_v61 = vadd.f32 1.0, %v9286_v27  ;;  %v668_v36 = vadd.f32 %v667_v2, %v657_v31  ;;  %v689_v52 = vsel %vm679_vm4, %v660_v41, 0.0  ;;  %v781_v6 = vmul.f32 %v659_v43, %v10122_v0 }
 0x12c   :  { %v568_v17 = vadd.f32 1.0, %v9288_v1  ;;  %v784_v37 = vmul.f32 %v662_v26, %v10137_v57  ;;  %v688_v13 = vadd.f32 %v687_v46, %v686_v22  ;;  %v790_v28 = vadd.f32 %v789_v58, %v779_v21 }
 0x12d   :  { %v583_v32 = vmul.f32 0.5, %v567_v61  ;;  %v669_v49 = vadd.f32 %v668_v36, %v659_v43  ;;  %v810_v29 = vsel %vm679_vm4, %v782_v34, 0.0  ;;  %v783_v3 = vmul.f32 %v661_v8, %v10131_v9 }
 0x12e   :  { %v584_v45 = vmul.f32 0.5, %v568_v17  ;;  %v691_v19 = vsel %vm679_vm4, %v662_v26, 0.0  ;;  %v690_v23 = vadd.f32 %v689_v52, %v688_v13  ;;  %v809_v11 = vadd.f32 %v808_v15, %v807_v7 }
 0x12f   :  { %v10155_v42 = vmul.f32 %v583_v32, %v10044_v62  ;;  %v791_v14 = vadd.f32 %v790_v28, %v781_v6  ;;  %v812_v48 = vsel %vm679_vm4, %v784_v37, 0.0  ;;  %v670_v44 = vadd.f32 %v669_v49, %v661_v8 }
 0x130   :  { %v10161_v60 = vmul.f32 %v584_v45, %v10053_v35  ;;  %v811_v31 = vadd.f32 %v810_v29, %v809_v11  ;;  %v692_v54 = vadd.f32 %v691_v19, %v690_v23 }
 0x131   :  { %v663_v47 = vmul.f32 %v647_v40, %v10155_v42  ;;  %v792_v53 = vadd.f32 %v791_v14, %v783_v3  ;;  %v9412_v3 = vmov 1352.0  }
 0x132   :  { %v664_v62 = vmul.f32 %v647_v40, %v10161_v60  ;;  %v813_v50 = vadd.f32 %v812_v48, %v811_v31  ;;  %9289 = vrcp.f32 %v9412_v3 }
 0x133   :  { %v671_v10 = vsel %vm175_vm0, %v663_v47, 0.0  ;;  %v785_v56 = vmul.f32 %v663_v47, %v10155_v42 }
 0x134   :  { %v786_v35 = vmul.f32 %v664_v62, %v10161_v60  ;;  %v672_v51 = vadd.f32 %v671_v10, %v670_v44  ;;  %v694_v41 = vsel %vm693_vm5, %v664_v62, 0.0  ;;  %v898_v62 = vld [vmem:[%s14127_s4] sm:$0xff] }
 0x135   :  { %v695_v63 = vadd.f32 %v694_v41, %v692_v54  ;;  %v793_v18 = vsel %vm175_vm0, %v785_v56, 0.0 }
 0x136   :  { %v673_v27 = vrot.slane %v672_v51, 4  ;;  %v814_v20 = vsel %vm693_vm5, %v786_v35, 0.0  ;;  %v794_v2 = vadd.f32 %v793_v18, %v792_v53  ;;  %vm3233_vm5 = vcmask 916480  }
 0x137   :  { %v696_v22 = vrot.slane %v695_v63, 4  ;;  %v815_v25 = vadd.f32 %v814_v20, %v813_v50  ;;  %v899_v50 = vld [vmem:[%s14127_s4 + $0x8] sm:$0xff] }
 0x138   :  { %v674_v43 = vadd.f32 %v673_v27, %v672_v51  ;;  %v795_v1 = vrot.slane %v794_v2, 4  ;;  %v9290_v19 = vpop.eup %9289  ;;  %v7130_v27 = vld [vmem:[%s14128_s3 + $0x1e0] sm:$0xf]  ;;  %v8855_v20 = vld [vmem:[%s14128_s3 + $0x1e8] sm:$0xf0] }
 0x139   :  { %v697_v21 = vadd.f32 %v696_v22, %v695_v63  ;;  %v816_v58 = vrot.slane %v815_v25, 4  ;;  %v866_v40 = vmul.f32 1352.0, %v9290_v19  ;;  %vm870_vm6 = vweird.f32 %v9290_v19 }
 0x13a   :  { %v675_v26 = vrot.slane %v674_v43, 2  ;;  %v796_v61 = vadd.f32 %v795_v1, %v794_v2  ;;  %v8854_v2 = vld [vmem:[%s14128_s3 + $0x1e4] sm:$0xf]  ;;  %v7131_v22 = vor.u32 %v8855_v20, %v7130_v27  ;;  %v8852_v1 = vld [vmem:[%s14128_s3 + $0x1d0] sm:$0xf0] }
 0x13b   :  { %v698_v46 = vrot.slane %v697_v21, 2  ;;  %v817_v34 = vadd.f32 %v816_v58, %v815_v25  ;;  %v867_v23 = vsub.f32 1.0, %v866_v40  ;;  %v7132_v25 = vld [vmem:[%s14128_s3 + $0x1ec] sm:$0xf0]  ;;  %v8851_v58 = vld [vmem:[%s14128_s3 + $0x1cc] sm:$0xf] }
 0x13c   :  { %v676_v8 = vadd.f32 %v675_v26, %v674_v43  ;;  %v797_v17 = vrot.slane %v796_v61, 2  ;;  %v7118_v43 = vld [vmem:[%s14128_s3 + $0x1c8] sm:$0xf]  ;;  %v7120_v26 = vld [vmem:[%s14128_s3 + $0x1d4] sm:$0xf0]  ;;  %1379 = vmatpush.bf16.msra.mxu0 %v7131_v22 }
 0x13d   :  { %v699_v15 = vadd.f32 %v698_v46, %v697_v21  ;;  %v818_v7 = vrot.slane %v817_v34, 2  ;;  %v868_v11 = vmul.f32 %v9290_v19, %v867_v23  ;;  %v7135_v21 = vor.u32 %v8854_v2, %v7132_v25  ;;  %v8870_v27 = vld [vmem:[%s14128_s3 + $0x260] sm:$0xf0]  ;;  %v8839_v20 = vld [vmem:[%s14128_s3 + $0x16c] sm:$0xf] }
 0x13e   :  { %v677_v36 = vrot.slane %v676_v8, 1  ;;  %v798_v6 = vadd.f32 %v797_v17, %v796_v61  ;;  %v7119_v46 = vor.u32 %v8852_v1, %v7118_v43  ;;  %v7106_v17 = vld [vmem:[%s14128_s3 + $0x1b0] sm:$0xf]  ;;  %v7072_v2 = vld [vmem:[%s14128_s3 + $0x174] sm:$0xf0] }
 0x13f   :  { %v700_v32 = vrot.slane %v699_v15, 1  ;;  %v819_v45 = vadd.f32 %v818_v7, %v817_v34  ;;  %v869_v48 = vadd.f32 %v9290_v19, %v868_v11  ;;  %1437 = vmatpush.bf16.msra.mxu1 %v7135_v21  ;;  %v8848_v7 = vld [vmem:[%s14128_s3 + $0x1b4] sm:$0xf]  ;;  %v7075_v25 = vor.u32 %v8839_v20, %v7072_v2  ;;  %v8869_v43 = vld [vmem:[%s14128_s3 + $0x25c] sm:$0xf] }
 0x140   :  { %v678_v52 = vadd.f32 %v677_v36, %v676_v8  ;;  %v799_v49 = vrot.slane %v798_v6, 1  ;;  %v7123_v8 = vor.u32 %v8851_v58, %v7120_v26  ;;  %v7108_v36 = vld [vmem:[%s14128_s3 + $0x1bc] sm:$0xf0]  ;;  %1380 = vmatpush.bf16.msra.mxu0 %v7119_v46  ;;  %v7192_v1 = vld [vmem:[%s14128_s3 + $0x264] sm:$0xf0] }
 0x141   :  { %v701_v37 = vadd.f32 %v700_v32, %v699_v15  ;;  %v820_v13 = vrot.slane %v819_v45, 1  ;;  %v871_v31 = vsel %vm870_vm6, %v9290_v19, %v869_v48  ;;  %v8849_v15 = vld [vmem:[%s14128_s3 + $0x1b8] sm:$0xf0]  ;;  %v877_v19 = vld [vmem:[%s14129_s5] sm:$0x1]  ;;  %v7195_v21 = vor.u32 %v8869_v43, %v7192_v1 }
 0x142   :  { %747 = vmatmul.f32.vlgmr.msrb.gmra.mxu2 %v678_v52  ;;  %v800_v28 = vadd.f32 %v799_v49, %v798_v6  ;;  %v7107_v52 = vor.u32 %v8849_v15, %v7106_v17  ;;  %v8846_v49 = vld [vmem:[%s14128_s3 + $0x1a0] sm:$0xf0]  ;;  %v7058_v58 = vld [vmem:[%s14128_s3 + $0x150] sm:$0xf]  ;;  %v8837_v26 = vld [vmem:[%s14128_s3 + $0x158] sm:$0xf0] }
 0x143   :  { %6988 = vmatmul.msk.f32.vlgmr.msrb.gmra.mxu3 %vm679_vm4, %v701_v37  ;;  %v821_v29 = vadd.f32 %v820_v13, %v819_v45  ;;  %1438 = vmatpush.bf16.msra.mxu1 %v7123_v8  ;;  %v7111_v37 = vor.u32 %v8848_v7, %v7108_v36  ;;  %v7094_v45 = vld [vmem:[%s14128_s3 + $0x198] sm:$0xf]  ;;  %v8845_v13 = vld [vmem:[%s14128_s3 + $0x19c] sm:$0xf]  ;;  %v7059_v46 = vor.u32 %v8837_v26, %v7058_v58  ;;  %v8836_v8 = vld [vmem:[%s14128_s3 + $0x154] sm:$0xf] }
 0x144   :  { %919 = vmatpush.msrb.mxu3 %v898_v62  ;;  %1381 = vmatpush.bf16.msra.mxu0 %v7107_v52  ;;  %v7095_v3 = vor.u32 %v8846_v49, %v7094_v45  ;;  %v7060_v17 = vld [vmem:[%s14128_s3 + $0x15c] sm:$0xf0]  ;;  %v8866_v36 = vld [vmem:[%s14128_s3 + $0x244] sm:$0xf]  ;;  %v7046_v52 = vld [vmem:[%s14128_s3 + $0x138] sm:$0xf] }
 0x145   :  { %v7063_v7 = vor.u32 %v8836_v8, %v7060_v17  ;;  %v7166_v45 = vld [vmem:[%s14128_s3 + $0x228] sm:$0xf]  ;;  %v8864_v49 = vld [vmem:[%s14128_s3 + $0x230] sm:$0xf0]  ;;  %vm3880_vm6 = vcmask 1044480  }
 0x147   :  { %1439 = vmatpush.bf16.msra.mxu1 %v7111_v37  ;;  %v8834_v37 = vld [vmem:[%s14128_s3 + $0x140] sm:$0xf0] }
 0x148   :  { %1382 = vmatpush.bf16.msra.mxu0 %v7095_v3  ;;  %v7048_v3 = vld [vmem:[%s14128_s3 + $0x144] sm:$0xf0] }
 0x14a   :  { %841 = vmatmul.f32.vlgmr.msra.gmra.mxu2 %v800_v28  ;;  %v7096_v28 = vld [vmem:[%s14128_s3 + $0x1a4] sm:$0xf0] }
 0x14b   :  { %6989 = vmatmul.msk.f32.vlgmr.msra.gmra.mxu3 %vm679_vm4, %v821_v29  ;;  %v7099_v23 = vor.u32 %v8845_v13, %v7096_v28  ;;  %v7047_v13 = vor.u32 %v8834_v37, %v7046_v52  ;;  %v7167_v28 = vor.u32 %v8864_v49, %v7166_v45  ;;  %v7286_v49 = vld [vmem:[%s14128_s3 + $0x90] sm:$0xf] }
 0x14c   :  { %939 = vmatpush.msra.mxu3 %v899_v50  ;;  %v8840_v50 = vld [vmem:[%s14128_s3 + $0x170] sm:$0xf0] }
 0x14d   :  { %1440 = vmatpush.bf16.msra.mxu1 %v7099_v23  ;;  %v7168_v23 = vld [vmem:[%s14128_s3 + $0x234] sm:$0xf0] }
 0x1c5   :  { %v748_v47 = vpop.f32.mrf.mxu2 }
 0x1c6   :  { %v768_v14 = vpop.f32.mrf.mxu3 }
 0x1c7   :  { %v769_v44 = vadd.f32 %v768_v14, %v748_v47  ;;  %v890_v14 = vld [vmem:[%s14129_s5 + $0x1] sm:$0x1]  ;;  %s6899_s5 = sshll.u32 %s14096_s28, 4  ;;  %s6900_s5 = int_to_ptr.hbm [resolvable:$true] %s6899_s5 }
 0x1c9   :  { %v872_v10 = vmul.f32 %v871_v31, %v769_v44 }
 0x1cb   :  { %v874_v35 = vmul.f32 %v872_v10, %v872_v10 }
 0x1cd   :  { %v842_v56 = vpop.f32.mrf.mxu2 }
 0x1ce   :  { %v862_v54 = vpop.f32.mrf.mxu3 }
 0x1cf   :  { %v863_v53 = vadd.f32 %v862_v54, %v842_v56  ;;  %v7082_v56 = vld [vmem:[%s14128_s3 + $0x180] sm:$0xf]  ;;  %v8843_v54 = vld [vmem:[%s14128_s3 + $0x188] sm:$0xf0] }
 0x1d1   :  { %v873_v51 = vmul.f32 %v871_v31, %v863_v53  ;;  %v7083_v53 = vor.u32 %v8843_v54, %v7082_v56  ;;  %v8858_v56 = vld [vmem:[%s14128_s3 + $0x200] sm:$0xf0] }
 0x1d3   :  { %v875_v41 = vsub.f32 %v873_v51, %v874_v35  ;;  %v7084_v35 = vld [vmem:[%s14128_s3 + $0x18c] sm:$0xf0]  ;;  %1383 = vmatpush.bf16.msra.mxu0 %v7083_v53  ;;  %v7144_v53 = vld [vmem:[%s14128_s3 + $0x204] sm:$0xf0] }
 0x1d5   :  { %v876_v63 = vmax.f32 %v875_v41, 0.0  ;;  %v7070_v41 = vld [vmem:[%s14128_s3 + $0x168] sm:$0xf] }
 0x1d7   :  { %v878_v18 = vadd.f32 1e-05, %v876_v63  ;;  %v7190_v63 = vld [vmem:[%s14128_s3 + $0x258] sm:$0xf] }
 0x1d8   :  { %v7191_v22 = vor.u32 %v8870_v27, %v7190_v63 }
 0x1d9   :  { %9291 = vrsqrt.f32 %v878_v18  ;;  %vm885_vm8 = vweird.f32 %v878_v18 }
 0x1da   :  { %1411 = vmatpush.bf16.msrb.mxu2 %v7191_v22 }
 0x1df   :  { %v9292_v61 = vpop.eup %9291 }
 0x1e0   :  { %v880_v34 = vmul.f32 %v9292_v61, %v878_v18  ;;  %vm886_vm7 = vweird.f32 %v9292_v61  ;;  %v7071_v18 = vor.u32 %v8840_v50, %v7070_v41 }
 0x1e1   :  { %vm887_vm9 = vmor %vm885_vm8, %vm886_vm7  ;;  %vm3873_vm7 = vcmask 482304   ;;  %vm4252_vm8 = vcmask 523264  }
 0x1e2   :  { %v881_v32 = vmul.f32 %v9292_v61, %v880_v34  ;;  %1384 = vmatpush.bf16.msra.mxu0 %v7071_v18  ;;  %v8867_v34 = vld [vmem:[%s14128_s3 + $0x248] sm:$0xf0] }
 0x1e4   :  { %v882_v6 = vmul.f32 0.5, %v881_v32  ;;  %v7180_v32 = vld [vmem:[%s14128_s3 + $0x24c] sm:$0xf0] }
 0x1e6   :  { %v883_v29 = vsub.f32 1.5, %v882_v6  ;;  %1385 = vmatpush.bf16.msra.mxu0 %v7059_v46  ;;  %v7183_v6 = vor.u32 %v8866_v36, %v7180_v32 }
 0x1e8   :  { %v884_v40 = vmul.f32 %v9292_v61, %v883_v29  ;;  %v8833_v29 = vld [vmem:[%s14128_s3 + $0x13c] sm:$0xf] }
 0x1ea   :  { %v888_v11 = vsel %vm887_vm9, %v9292_v61, %v884_v40  ;;  %v7178_v61 = vld [vmem:[%s14128_s3 + $0x240] sm:$0xf]  ;;  %v7051_v40 = vor.u32 %v8833_v29, %v7048_v3  ;;  %1386 = vmatpush.bf16.msra.mxu0 %v7047_v13 }
 0x1eb   :  { %v889_v47 = vmul.f32 %v888_v11, %v877_v19  ;;  %v7179_v15 = vor.u32 %v8867_v34, %v7178_v61  ;;  %v8863_v19 = vld [vmem:[%s14128_s3 + $0x22c] sm:$0xf] }
 0x1ec   :  { %v7171_v11 = vor.u32 %v8863_v19, %v7168_v23  ;;  %v8813_v19 = vld [vmem:[%s14128_s3 + $0x98] sm:$0xf0] }
 0x1ed   :  { %v891_v48 = vmul.f32 %v889_v47, %v872_v10  ;;  %v8842_v10 = vld [vmem:[%s14128_s3 + $0x184] sm:$0xf]  ;;  %1412 = vmatpush.bf16.msrb.mxu2 %v7179_v15 }
 0x1ee   :  { %v7087_v51 = vor.u32 %v8842_v10, %v7084_v35  ;;  %v8857_v10 = vld [vmem:[%s14128_s3 + $0x1fc] sm:$0xf] }
 0x1ef   :  { %v892_v62 = vsub.f32 %v890_v14, %v891_v48  ;;  %v8861_v14 = vld [vmem:[%s14128_s3 + $0x218] sm:$0xf0]  ;;  %v8860_v48 = vld [vmem:[%s14128_s3 + $0x214] sm:$0xf] }
 0x1f0   :  { %1441 = vmatpush.bf16.msra.mxu1 %v7087_v51  ;;  %v7147_v51 = vor.u32 %v8857_v10, %v7144_v53  ;;  %v7274_v53 = vld [vmem:[%s14128_s3 + $0x78] sm:$0xf] }
 0x1f1   :  { %v894_v44 = vrot.slane %v892_v62, 7  ;;  %1413 = vmatpush.bf16.msrb.mxu2 %v7167_v28 }
 0x1f3   :  { %v897_v31 = vsel %vm896_vm10, %v889_v47, %v894_v44  ;;  %v7154_v47 = vld [vmem:[%s14128_s3 + $0x210] sm:$0xf]  ;;  %v7156_v44 = vld [vmem:[%s14128_s3 + $0x21c] sm:$0xf0] }
 0x1f4   :  { %6990 = vmatmul.msk.f32.vlgmr.msrb.gmra.mxu3 %vm900_vm11, %v897_v31  ;;  %1442 = vmatpush.bf16.msra.mxu1 %v7075_v25  ;;  %v7155_v62 = vor.u32 %v8861_v14, %v7154_v47  ;;  %v7159_v54 = vor.u32 %v8860_v48, %v7156_v44  ;;  %v7287_v48 = vor.u32 %v8813_v19, %v7286_v49  ;;  %v7102_v49 = vld [vmem:[%s14128_s3 + $0x1a0] sm:$0xf] }
 0x1f5   :  { %1469 = vmatpush.bf16.msrb.mxu3 %v7195_v21 }
 0x1f6   :  { %1414 = vmatpush.bf16.msrb.mxu2 %v7155_v62 }
 0x1f8   :  { %1443 = vmatpush.bf16.msra.mxu1 %v7063_v7 }
 0x1f9   :  { %1470 = vmatpush.bf16.msrb.mxu3 %v7183_v6 }
 0x1fc   :  { %6991 = vmatmul.msk.f32.vlgmr.msra.gmra.mxu3 %vm900_vm11, %v897_v31  ;;  %1444 = vmatpush.bf16.msra.mxu1 %v7051_v40  ;;  %v7142_v31 = vld [vmem:[%s14128_s3 + $0x1f8] sm:$0xf] }
 0x1fd   :  { %1471 = vmatpush.bf16.msrb.mxu3 %v7171_v11  ;;  %v7143_v35 = vor.u32 %v8858_v56, %v7142_v31 }
 0x1ff   :  { %1415 = vmatpush.bf16.msrb.mxu2 %v7143_v35 }
 0x201   :  { %1472 = vmatpush.bf16.msrb.mxu3 %v7159_v54 }
 0x205   :  { %1473 = vmatpush.bf16.msrb.mxu3 %v7147_v51 }
 0x277   :  { %v921_v41 = vpop.f32.mrf.mxu3 }
 0x278   :  { %v10343_v50 = vperm.slane %v921_v41, 0  ;;  %v10345_v63 = vperm.slane %v921_v41, 1 }
 0x27a   :  { %v946_v18 = vmul.f32 %v10343_v50, %v9955_v24  ;;  %v948_v27 = vmul.f32 %v10343_v50, %v10003_v12  ;;  %v950_v20 = vmul.f32 %v10343_v50, %v10075_v55  ;;  %v952_v2 = vmul.f32 %v10343_v50, %v10090_v4 }
 0x27b   :  { %v954_v36 = vmul.f32 %v10343_v50, %v10107_v30  ;;  %v956_v32 = vmul.f32 %v10343_v50, %v10122_v0  ;;  %v7298_v30 = vld [vmem:[%s14128_s3 + $0xa8] sm:$0xf]  ;;  %v8816_v0 = vld [vmem:[%s14128_s3 + $0xb0] sm:$0xf0] }
 0x27c   :  { %v964_v22 = vadd.f32 %v10345_v63, %v946_v18  ;;  %v966_v25 = vadd.f32 %v10345_v63, %v948_v27  ;;  %v968_v43 = vadd.f32 %v10345_v63, %v950_v20  ;;  %v970_v1 = vadd.f32 %v10345_v63, %v952_v2  ;;  %v8810_v18 = vld [vmem:[%s14128_s3 + $0x80] sm:$0xf0]  ;;  %v7126_v27 = vld [vmem:[%s14128_s3 + $0x1d0] sm:$0xf] }
 0x27d   :  { %v972_v28 = vadd.f32 %v10345_v63, %v954_v36  ;;  %v974_v29 = vadd.f32 %v10345_v63, %v956_v32  ;;  %v7299_v3 = vor.u32 %v8816_v0, %v7298_v30  ;;  %v958_v20 = vmul.f32 %v10343_v50, %v10131_v9  ;;  %v7114_v36 = vld [vmem:[%s14128_s3 + $0x1b8] sm:$0xf]  ;;  %v7250_v32 = vld [vmem:[%s14128_s3 + $0x48] sm:$0xf] }
 0x27e   :  { %v10359_v21 = vpack.c.bf16 %v966_v25, %v964_v22  ;;  %v10361_v24 = vpack.c.bf16 %v970_v1, %v968_v43  ;;  %v960_v2 = vmul.f32 %v10343_v50, %v10155_v42  ;;  %v7275_v22 = vor.u32 %v8810_v18, %v7274_v53  ;;  %v8853_v25 = vld [vmem:[%s14128_s3 + $0x1d8] sm:$0xf0]  ;;  %v7262_v43 = vld [vmem:[%s14128_s3 + $0x60] sm:$0xf]  ;;  %v8807_v1 = vld [vmem:[%s14128_s3 + $0x68] sm:$0xf0] }
 0x27f   :  { %v941_v58 = vpop.f32.mrf.mxu3  ;;  %1769 = vmatpush.bf16.msrb.mxu0 %v7299_v3  ;;  %v10416_v31 = vpack.c.bf16 %v974_v29, %v972_v28  ;;  %v7127_v9 = vor.u32 %v8853_v25, %v7126_v27  ;;  %v7358_v42 = vld [vmem:[%s14128_s3 + $0x120] sm:$0xf]  ;;  %v8831_v50 = vld [vmem:[%s14128_s3 + $0x128] sm:$0xf0]  ;;  %v7090_v53 = vld [vmem:[%s14128_s3 + $0x188] sm:$0xf] }
 0x280   :  { %v10363_v12 = vperm.slane %v941_v58, 0  ;;  %v1096_v55 = vshll.u32 %v10359_v21, 16  ;;  %v10366_v26 = vperm.slane %v941_v58, 1  ;;  %v1094_v4 = vshrl.u32 %v10359_v21, 16  ;;  %v7198_v28 = vld [vmem:[%s14128_s3 + $0x260] sm:$0xf] }
 0x281   :  { %v1101_v61 = vshll.u32 %v10361_v24, 16  ;;  %v1117_v35 = vshrl.u32 %v10361_v24, 16  ;;  %v1121_v51 = vshll.u32 %v10416_v31, 16  ;;  %v7226_v18 = vld [vmem:[%s14128_s3 + $0x18] sm:$0xf] }
 0x282   :  { %v1098_v46 = vrot.slane %v1096_v55, 1  ;;  %v947_v34 = vmul.f32 %v10363_v12, %v9971_v59  ;;  %v949_v8 = vmul.f32 %v10363_v12, %v10018_v33  ;;  %v951_v17 = vmul.f32 %v10363_v12, %v10061_v5  ;;  %v8798_v27 = vld [vmem:[%s14128_s3 + $0x20] sm:$0xf0] }
 0x283   :  { %v1103_v15 = vrot.slane %v1101_v61, 1  ;;  %v953_v7 = vmul.f32 %v10363_v12, %v10084_v16  ;;  %v955_v23 = vmul.f32 %v10363_v12, %v10100_v38  ;;  %v957_v14 = vmul.f32 %v10363_v12, %v10112_v39  ;;  %1770 = vmatpush.bf16.msrb.mxu0 %v7287_v48  ;;  %v7138_v38 = vld [vmem:[%s14128_s3 + $0x1e8] sm:$0xf]  ;;  %v8856_v39 = vld [vmem:[%s14128_s3 + $0x1f0] sm:$0xf0] }
 0x284   :  { %v1099_v52 = vor.u32 %v1098_v46, %v1094_v4  ;;  %v965_v6 = vadd.f32 %v10366_v26, %v947_v34  ;;  %v967_v59 = vadd.f32 %v10366_v26, %v949_v8  ;;  %v969_v33 = vadd.f32 %v10366_v26, %v951_v17  ;;  %v8822_v25 = vld [vmem:[%s14128_s3 + $0xe0] sm:$0xf0] }
 0x285   :  { %v971_v37 = vadd.f32 %v10366_v26, %v953_v7  ;;  %v973_v54 = vadd.f32 %v10366_v26, %v955_v23  ;;  %v975_v10 = vadd.f32 %v10366_v26, %v957_v14  ;;  %v7139_v41 = vor.u32 %v8856_v39, %v7138_v38  ;;  %v8871_v23 = vld [vmem:[%s14128_s3 + $0x268] sm:$0xf0] }
 0x286   :  { %v10387_v5 = vsel %vm112_vm1, %v1099_v52, %v1103_v15  ;;  %v10389_v45 = vpack.c.bf16 %v967_v59, %v965_v6  ;;  %v1119_v58 = vor.u32 %v1117_v35, %v1103_v15  ;;  %v7359_v4 = vor.u32 %v8831_v50, %v7358_v42  ;;  %v8804_v6 = vld [vmem:[%s14128_s3 + $0x50] sm:$0xf0]  ;;  %v7346_v59 = vld [vmem:[%s14128_s3 + $0x108] sm:$0xf]  ;;  %v8841_v42 = vld [vmem:[%s14128_s3 + $0x178] sm:$0xf0] }
 0x287   :  { %1387 = vmatmul.bf16.vlgmr.msra.gmra.mxu0 %v10387_v5  ;;  %1445 = vmatmul.bf16.vlgmr.msra.gmra.mxu1 %v10387_v5  ;;  %v10393_v16 = vpack.c.bf16 %v971_v37, %v969_v33  ;;  %v10457_v55 = vpack.c.bf16 %v975_v10, %v973_v54  ;;  %v10465_v61 = vrot.slane %v1121_v51, 1  ;;  %v7263_v46 = vor.u32 %v8807_v1, %v7262_v43  ;;  %v8828_v33 = vld [vmem:[%s14128_s3 + $0x110] sm:$0xf0]  ;;  %v7186_v51 = vld [vmem:[%s14128_s3 + $0x248] sm:$0xf] }
 0x288   :  { %v1108_v13 = vshll.u32 %v10389_v45, 16  ;;  %v1106_v11 = vshrl.u32 %v10389_v45, 16  ;;  %1495 = vmatpush.bf16.msra.mxu2 %v7139_v41  ;;  %1771 = vmatpush.bf16.msrb.mxu0 %v7275_v22  ;;  %v976_v34 = vadd.f32 %v10345_v63, %v958_v20  ;;  %v978_v8 = vadd.f32 %v10345_v63, %v960_v2  ;;  %v8850_v63 = vld [vmem:[%s14128_s3 + $0x1c0] sm:$0xf0]  ;;  %v8844_v35 = vld [vmem:[%s14128_s3 + $0x190] sm:$0xf0] }
 0x289   :  { %v1113_v40 = vshll.u32 %v10393_v16, 16  ;;  %1801 = vmatpush.bf16.msrb.mxu1 %v7359_v4  ;;  %v10471_v17 = vsel %vm112_vm1, %v1119_v58, %v10465_v61  ;;  %v1125_v15 = vshrl.u32 %v10393_v16, 16  ;;  %v1129_v7 = vshll.u32 %v10457_v55, 16  ;;  %v8868_v41 = vld [vmem:[%s14128_s3 + $0x250] sm:$0xf0] }
 0x28a   :  { %v1110_v47 = vrot.slane %v1108_v13, 1  ;;  %v7115_v52 = vor.u32 %v8850_v63, %v7114_v36  ;;  %v10495_v37 = vpack.c.bf16 %v978_v8, %v976_v34  ;;  %v7251_v30 = vor.u32 %v8804_v6, %v7250_v32  ;;  %v8847_v13 = vld [vmem:[%s14128_s3 + $0x1a8] sm:$0xf0]  ;;  %v7322_v22 = vld [vmem:[%s14128_s3 + $0xd8] sm:$0xf] }
 0x28b   :  { %v1115_v44 = vrot.slane %v1113_v40, 1  ;;  %v7347_v0 = vor.u32 %v8828_v33, %v7346_v59  ;;  %v959_v3 = vmul.f32 %v10363_v12, %v10137_v57  ;;  %v961_v19 = vmul.f32 %v10363_v12, %v10161_v60  ;;  %v7334_v57 = vld [vmem:[%s14128_s3 + $0xf0] sm:$0xf]  ;;  %v8825_v60 = vld [vmem:[%s14128_s3 + $0xf8] sm:$0xf0] }
 0x28c   :  { %v1111_v62 = vor.u32 %v1110_v47, %v1106_v11  ;;  %1496 = vmatpush.bf16.msra.mxu2 %v7127_v9  ;;  %1772 = vmatpush.bf16.msrb.mxu0 %v7263_v46  ;;  %v7103_v40 = vor.u32 %v8847_v13, %v7102_v49  ;;  %v7238_v11 = vld [vmem:[%s14128_s3 + $0x30] sm:$0xf]  ;;  %v8801_v47 = vld [vmem:[%s14128_s3 + $0x38] sm:$0xf0]  ;;  %v7199_v14 = vor.u32 %v8871_v23, %v7198_v28  ;;  %v10525_v12 = vrot.slane %v1129_v7, 1 }
 0x28d   :  { %v1127_v29 = vor.u32 %v1125_v15, %v1115_v44  ;;  %1802 = vmatpush.bf16.msrb.mxu1 %v7347_v0  ;;  %v7239_v48 = vor.u32 %v8801_v47, %v7238_v11  ;;  %v1137_v10 = vshll.u32 %v10495_v37, 16  ;;  %v977_v38 = vadd.f32 %v10366_v26, %v959_v3  ;;  %v7078_v43 = vld [vmem:[%s14128_s3 + $0x170] sm:$0xf]  ;;  %v8865_v4 = vld [vmem:[%s14128_s3 + $0x238] sm:$0xf0] }
 0x28e   :  { %v10419_v56 = vsel %vm112_vm1, %v1111_v62, %v1115_v44  ;;  %v7335_v62 = vor.u32 %v8825_v60, %v7334_v57  ;;  %v1133_v44 = vshrl.u32 %v10416_v31, 16  ;;  %1527 = vmatpush.bf16.msra.mxu3 %v7199_v14  ;;  %v979_v39 = vadd.f32 %v10366_v26, %v961_v19  ;;  %v7174_v50 = vld [vmem:[%s14128_s3 + $0x230] sm:$0xf]  ;;  %v8795_v34 = vld [vmem:[%s14128_s3 + $0x8] sm:$0xf0] }
 0x28f   :  { %7200 = vmatmul.msk.bf16.vlgmr.msrb.gmra.mxu2 %vm679_vm4, %v10419_v56  ;;  %7204 = vmatmul.msk.bf16.vlgmr.msrb.gmra.mxu3 %vm679_vm4, %v10419_v56  ;;  %v10530_v54 = vsel %vm112_vm1, %v1127_v29, %v10525_v12  ;;  %v7091_v26 = vor.u32 %v8844_v35, %v7090_v53  ;;  %v7187_v20 = vor.u32 %v8868_v41, %v7186_v51  ;;  %v7310_v8 = vld [vmem:[%s14128_s3 + $0xc0] sm:$0xf]  ;;  %v1139_v15 = vrot.slane %v1137_v10, 1  ;;  %v8819_v63 = vld [vmem:[%s14128_s3 + $0xc8] sm:$0xf0] }
 0x290   :  { %1497 = vmatpush.bf16.msra.mxu2 %v7115_v52  ;;  %1773 = vmatpush.bf16.msrb.mxu0 %v7251_v30  ;;  %v7227_v2 = vor.u32 %v8798_v27, %v7226_v18  ;;  %v1135_v1 = vor.u32 %v1133_v44, %v10465_v61  ;;  %v10567_v58 = vpack.c.bf16 %v979_v39, %v977_v38  ;;  %v7214_v61 = vld [vmem:[%s14128_s3] sm:$0xf]  ;;  %v1141_v6 = vshrl.u32 %v10457_v55, 16  ;;  %v7066_v33 = vld [vmem:[%s14128_s3 + $0x158] sm:$0xf] }
 0x291   :  { %1803 = vmatpush.bf16.msrb.mxu1 %v7335_v62  ;;  %v7323_v9 = vor.u32 %v8822_v25, %v7322_v22  ;;  %v7079_v46 = vor.u32 %v8841_v42, %v7078_v43  ;;  %v7175_v7 = vor.u32 %v8865_v4, %v7174_v50  ;;  %v7215_v36 = vor.u32 %v8795_v34, %v7214_v61  ;;  %v8838_v30 = vld [vmem:[%s14128_s3 + $0x160] sm:$0xf0]  ;;  %v7162_v0 = vld [vmem:[%s14128_s3 + $0x218] sm:$0xf]  ;;  %v7054_v28 = vld [vmem:[%s14128_s3 + $0x140] sm:$0xf] }
 0x292   :  { %1528 = vmatpush.bf16.msra.mxu3 %v7187_v20  ;;  %v7311_v32 = vor.u32 %v8819_v63, %v7310_v8  ;;  %v10591_v52 = vsel %vm112_vm1, %v1135_v1, %v1139_v15  ;;  %v1145_v59 = vshll.u32 %v10567_v58, 16  ;;  %v7067_v49 = vor.u32 %v8838_v30, %v7066_v33  ;;  %v8862_v13 = vld [vmem:[%s14128_s3 + $0x220] sm:$0xf0]  ;;  %v8835_v29 = vld [vmem:[%s14128_s3 + $0x148] sm:$0xf0] }
 0x293   :  { %v7163_v3 = vor.u32 %v8862_v13, %v7162_v0  ;;  %v7150_v19 = vld [vmem:[%s14128_s3 + $0x200] sm:$0xf]  ;;  %v1143_v23 = vor.u32 %v1141_v6, %v10525_v12  ;;  %v7055_v11 = vor.u32 %v8835_v29, %v7054_v28  ;;  %v1149_v60 = vshrl.u32 %v10495_v37, 16  ;;  %v7306_v44 = vld [vmem:[%s14128_s3 + $0xb0] sm:$0xf] }
 0x294   :  { %1498 = vmatpush.bf16.msra.mxu2 %v7103_v40  ;;  %1774 = vmatpush.bf16.msrb.mxu0 %v7239_v48  ;;  %v8859_v40 = vld [vmem:[%s14128_s3 + $0x208] sm:$0xf0]  ;;  %v1147_v47 = vrot.slane %v1145_v59, 1  ;;  %v1152_v12 = vshrl.u32 %v10567_v58, 16  ;;  %v8817_v10 = vld [vmem:[%s14128_s3 + $0xb8] sm:$0xf0] }
 0x295   :  { %1804 = vmatpush.bf16.msrb.mxu1 %v7323_v9  ;;  %v7151_v14 = vor.u32 %v8859_v40, %v7150_v19  ;;  %v10630_v48 = vor.u32 %v1149_v60, %v1139_v15  ;;  %v7294_v38 = vld [vmem:[%s14128_s3 + $0x98] sm:$0xf]  ;;  %v7307_v39 = vor.u32 %v8817_v10, %v7306_v44  ;;  %v8814_v53 = vld [vmem:[%s14128_s3 + $0xa0] sm:$0xf0]  ;;  %v8815_v51 = vld [vmem:[%s14128_s3 + $0xac] sm:$0xf] }
 0x296   :  { %1529 = vmatpush.bf16.msra.mxu3 %v7175_v7  ;;  %v10623_v57 = vsel %vm112_vm1, %v1143_v23, %v1147_v47  ;;  %v10635_v62 = vor.u32 %v1152_v12, %v1147_v47  ;;  %v7295_v35 = vor.u32 %v8814_v53, %v7294_v38  ;;  %v7282_v41 = vld [vmem:[%s14128_s3 + $0x80] sm:$0xf]  ;;  %v8808_v22 = vld [vmem:[%s14128_s3 + $0x70] sm:$0xf0]  ;;  %v7366_v25 = vld [vmem:[%s14128_s3 + $0x128] sm:$0xf] }
 0x297   :  { %1392 = vmatmul.bf16.gmra.mxu0 %v10471_v17  ;;  %1450 = vmatmul.bf16.gmra.mxu1 %v10471_v17  ;;  %v7288_v27 = vld [vmem:[%s14128_s3 + $0x9c] sm:$0xf0]  ;;  %v8832_v1 = vld [vmem:[%s14128_s3 + $0x130] sm:$0xf0]  ;;  %v8809_v50 = vld [vmem:[%s14128_s3 + $0x7c] sm:$0xf] }
 0x298   :  { %1499 = vmatpush.bf16.msra.mxu2 %v7091_v26  ;;  %1775 = vmatpush.bf16.msrb.mxu0 %v7227_v2  ;;  %v7300_v26 = vld [vmem:[%s14128_s3 + $0xb4] sm:$0xf0]  ;;  %v7270_v2 = vld [vmem:[%s14128_s3 + $0x68] sm:$0xf]  ;;  %v7367_v9 = vor.u32 %v8832_v1, %v7366_v25  ;;  %v8805_v34 = vld [vmem:[%s14128_s3 + $0x58] sm:$0xf0] }
 0x299   :  { %1805 = vmatpush.bf16.msrb.mxu1 %v7311_v32  ;;  %v7303_v18 = vor.u32 %v8815_v51, %v7300_v26  ;;  %v7271_v42 = vor.u32 %v8808_v22, %v7270_v2  ;;  %v7276_v4 = vld [vmem:[%s14128_s3 + $0x84] sm:$0xf0]  ;;  %v7354_v8 = vld [vmem:[%s14128_s3 + $0x110] sm:$0xf]  ;;  %v8829_v15 = vld [vmem:[%s14128_s3 + $0x118] sm:$0xf0] }
 0x29a   :  { %1530 = vmatpush.bf16.msra.mxu3 %v7163_v3  ;;  %v7279_v61 = vor.u32 %v8809_v50, %v7276_v4  ;;  %v8806_v63 = vld [vmem:[%s14128_s3 + $0x64] sm:$0xf]  ;;  %v7264_v32 = vld [vmem:[%s14128_s3 + $0x6c] sm:$0xf0]  ;;  %v7246_v30 = vld [vmem:[%s14128_s3 + $0x38] sm:$0xf] }
 0x29b   :  { %v8830_v6 = vld [vmem:[%s14128_s3 + $0x124] sm:$0xf]  ;;  %v7267_v59 = vor.u32 %v8806_v63, %v7264_v32  ;;  %v7360_v33 = vld [vmem:[%s14128_s3 + $0x12c] sm:$0xf0]  ;;  %v7342_v13 = vld [vmem:[%s14128_s3 + $0xf8] sm:$0xf] }
 0x29c   :  { %1500 = vmatpush.bf16.msra.mxu2 %v7079_v46  ;;  %1776 = vmatpush.bf16.msrb.mxu0 %v7215_v36  ;;  %v7258_v46 = vld [vmem:[%s14128_s3 + $0x50] sm:$0xf]  ;;  %v7355_v36 = vor.u32 %v8829_v15, %v7354_v8  ;;  %v8802_v0 = vld [vmem:[%s14128_s3 + $0x40] sm:$0xf0]  ;;  %v8803_v19 = vld [vmem:[%s14128_s3 + $0x4c] sm:$0xf] }
 0x29d   :  { %1917 = vmatpush.bf16.msra.mxu1 %v7367_v9  ;;  %v7259_v7 = vor.u32 %v8805_v34, %v7258_v46  ;;  %v8826_v28 = vld [vmem:[%s14128_s3 + $0x100] sm:$0xf0]  ;;  %v7247_v29 = vor.u32 %v8802_v0, %v7246_v30  ;;  %v7252_v40 = vld [vmem:[%s14128_s3 + $0x54] sm:$0xf0]  ;;  %v8827_v23 = vld [vmem:[%s14128_s3 + $0x10c] sm:$0xf] }
 0x29e   :  { %1531 = vmatpush.bf16.msra.mxu3 %v7151_v14  ;;  %v7343_v3 = vor.u32 %v8826_v28, %v7342_v13  ;;  %v8799_v47 = vld [vmem:[%s14128_s3 + $0x28] sm:$0xf0]  ;;  %v7330_v12 = vld [vmem:[%s14128_s3 + $0xe0] sm:$0xf]  ;;  %v8800_v38 = vld [vmem:[%s14128_s3 + $0x34] sm:$0xf] }
 0x29f   :  { %7201 = vmatmul.msk.bf16.gmra.mxu2 %vm679_vm4, %v10530_v54  ;;  %7205 = vmatmul.msk.bf16.gmra.mxu3 %vm679_vm4, %v10530_v54  ;;  %v8823_v44 = vld [vmem:[%s14128_s3 + $0xe8] sm:$0xf0]  ;;  %v8824_v53 = vld [vmem:[%s14128_s3 + $0xf4] sm:$0xf]  ;;  %v7336_v51 = vld [vmem:[%s14128_s3 + $0xfc] sm:$0xf0] }
 0x2a0   :  { %1501 = vmatpush.bf16.msra.mxu2 %v7067_v49  ;;  %1885 = vmatpush.bf16.msra.mxu0 %v7307_v39  ;;  %v7363_v49 = vor.u32 %v8830_v6, %v7360_v33  ;;  %v7331_v10 = vor.u32 %v8823_v44, %v7330_v12  ;;  %v7240_v39 = vld [vmem:[%s14128_s3 + $0x3c] sm:$0xf0]  ;;  %v7222_v26 = vld [vmem:[%s14128_s3 + $0x8] sm:$0xf]  ;;  %v8797_v2 = vld [vmem:[%s14128_s3 + $0x1c] sm:$0xf] }
 0x2a1   :  { %1918 = vmatpush.bf16.msra.mxu1 %v7355_v36  ;;  %v7228_v22 = vld [vmem:[%s14128_s3 + $0x24] sm:$0xf0]  ;;  %v8821_v25 = vld [vmem:[%s14128_s3 + $0xdc] sm:$0xf]  ;;  %v7216_v50 = vld [vmem:[%s14128_s3 + $0xc] sm:$0xf0] }
 0x2a2   :  { %1859 = vmatpush.bf16.msrb.mxu3 %v7363_v49  ;;  %v7324_v1 = vld [vmem:[%s14128_s3 + $0xe4] sm:$0xf0]  ;;  %v8818_v4 = vld [vmem:[%s14128_s3 + $0xc4] sm:$0xf]  ;;  %v7508_v63 = vld [vmem:[%s14128_s3 + $0x30c] sm:$0xf0] }
 0x2a3   :  { %v7327_v9 = vor.u32 %v8821_v25, %v7324_v1  ;;  %v7518_v6 = vld [vmem:[%s14128_s3 + $0x318] sm:$0xf]  ;;  %v8887_v33 = vld [vmem:[%s14128_s3 + $0x2ec] sm:$0xf]  ;;  %v7482_v25 = vld [vmem:[%s14128_s3 + $0x2d0] sm:$0xf] }
 0x2a4   :  { %1502 = vmatpush.bf16.msra.mxu2 %v7055_v11  ;;  %1886 = vmatpush.bf16.msra.mxu0 %v7295_v35  ;;  %v7255_v11 = vor.u32 %v8803_v19, %v7252_v40  ;;  %v7243_v35 = vor.u32 %v8800_v38, %v7240_v39  ;;  %v7496_v0 = vld [vmem:[%s14128_s3 + $0x2f4] sm:$0xf0]  ;;  %v8888_v38 = vld [vmem:[%s14128_s3 + $0x2f0] sm:$0xf0]  ;;  %v8881_v39 = vld [vmem:[%s14128_s3 + $0x2bc] sm:$0xf] }
 0x2a5   :  { %1919 = vmatpush.bf16.msra.mxu1 %v7343_v3  ;;  %v7499_v49 = vor.u32 %v8887_v33, %v7496_v0  ;;  %v7578_v1 = vld [vmem:[%s14128_s3 + $0x390] sm:$0xf]  ;;  %v7544_v33 = vld [vmem:[%s14128_s3 + $0x354] sm:$0xf0] }
 0x2a7   :  { %1397 = vmatmul.bf16.gmra.mxu0 %v10591_v52  ;;  %1455 = vmatmul.bf16.gmra.mxu1 %v10591_v52 }
 0x2a8   :  { %1827 = vmatpush.bf16.msrb.mxu2 %v7303_v18  ;;  %v7339_v18 = vor.u32 %v8824_v53, %v7336_v51  ;;  %v8905_v51 = vld [vmem:[%s14128_s3 + $0x37c] sm:$0xf] }
 0x2a9   :  { %1920 = vmatpush.bf16.msra.mxu1 %v7331_v10  ;;  %v7494_v10 = vld [vmem:[%s14128_s3 + $0x2e8] sm:$0xf] }
 0x2aa   :  { %v7495_v53 = vor.u32 %v8888_v38, %v7494_v10  ;;  %v8896_v10 = vld [vmem:[%s14128_s3 + $0x334] sm:$0xf]  ;;  %v7532_v38 = vld [vmem:[%s14128_s3 + $0x33c] sm:$0xf0] }
 0x2af   :  { %7202 = vmatmul.msk.bf16.gmra.mxu2 %vm679_vm4, %v10623_v57  ;;  %7206 = vmatmul.msk.bf16.gmra.mxu3 %vm679_vm4, %v10623_v57 }
 0x2b7   :  { %1402 = vmatmul.bf16.gmra.mxu0 %v10630_v48  ;;  %1460 = vmatmul.bf16.gmra.mxu1 %v10630_v48 }
 0x2bf   :  { %7203 = vmatmul.msk.bf16.gmra.mxu2 %vm679_vm4, %v10635_v62  ;;  %7207 = vmatmul.msk.bf16.gmra.mxu3 %vm679_vm4, %v10635_v62 }
 0x2c7   :  { %1777 = vmatmul.bf16.vlgmr.msrb.gmra.mxu0 %v10359_v21  ;;  %7368 = vmatmul.msk.bf16.vlgmr.msrb.gmra.mxu1 %vm679_vm4, %v10389_v45 }
 0x2cf   :  { %1503 = vmatmul.bf16.vlgmr.msra.gmra.mxu2 %v10387_v5  ;;  %7208 = vmatmul.msk.bf16.vlgmr.msra.gmra.mxu3 %vm679_vm4, %v10419_v56  ;;  %v8811_v5 = vld [vmem:[%s14128_s3 + $0x88] sm:$0xf0]  ;;  %v8812_v56 = vld [vmem:[%s14128_s3 + $0x94] sm:$0xf] }
 0x2d0   :  { %v7283_v20 = vor.u32 %v8811_v5, %v7282_v41  ;;  %v7291_v43 = vor.u32 %v8812_v56, %v7288_v27  ;;  %v8796_v41 = vld [vmem:[%s14128_s3 + $0x10] sm:$0xf0]  ;;  %v7318_v56 = vld [vmem:[%s14128_s3 + $0xc8] sm:$0xf] }
 0x2d1   :  { %v7223_v5 = vor.u32 %v8796_v41, %v7222_v26  ;;  %v8820_v27 = vld [vmem:[%s14128_s3 + $0xd0] sm:$0xf0]  ;;  %v7568_v26 = vld [vmem:[%s14128_s3 + $0x384] sm:$0xf0] }
 0x2d2   :  { %1887 = vmatpush.bf16.msra.mxu0 %v7283_v20  ;;  %1828 = vmatpush.bf16.msrb.mxu2 %v7291_v43  ;;  %v7319_v20 = vor.u32 %v8820_v27, %v7318_v56  ;;  %v7231_v43 = vor.u32 %v8797_v2, %v7228_v22 }
 0x2d4   :  { %1921 = vmatpush.bf16.msra.mxu1 %v7319_v20 }
 0x2d6   :  { %1888 = vmatpush.bf16.msra.mxu0 %v7271_v42  ;;  %1829 = vmatpush.bf16.msrb.mxu2 %v7279_v61  ;;  %v8794_v42 = vld [vmem:[%s14128_s3 + $0x4] sm:$0xf]  ;;  %v7312_v61 = vld [vmem:[%s14128_s3 + $0xcc] sm:$0xf0] }
 0x2d7   :  { %1782 = vmatmul.bf16.gmra.mxu0 %v10361_v24  ;;  %7369 = vmatmul.msk.bf16.gmra.mxu1 %vm679_vm4, %v10393_v16  ;;  %v7219_v46 = vor.u32 %v8794_v42, %v7216_v50  ;;  %v7315_v34 = vor.u32 %v8818_v4, %v7312_v61  ;;  %v8909_v42 = vld [vmem:[%s14128_s3 + $0x398] sm:$0xf0]  ;;  %v8878_v50 = vld [vmem:[%s14128_s3 + $0x2a4] sm:$0xf]  ;;  %v7460_v4 = vld [vmem:[%s14128_s3 + $0x2ac] sm:$0xf0] }
 0x2d8   :  { %v7463_v61 = vor.u32 %v8878_v50, %v7460_v4  ;;  %v8897_v4 = vld [vmem:[%s14128_s3 + $0x338] sm:$0xf0] }
 0x2da   :  { %1889 = vmatpush.bf16.msra.mxu0 %v7259_v7  ;;  %1830 = vmatpush.bf16.msrb.mxu2 %v7267_v59  ;;  %v8894_v59 = vld [vmem:[%s14128_s3 + $0x320] sm:$0xf0] }
 0x2db   :  { %v7519_v30 = vor.u32 %v8894_v59, %v7518_v6  ;;  %v8899_v59 = vld [vmem:[%s14128_s3 + $0x34c] sm:$0xf] }
 0x2de   :  { %1890 = vmatpush.bf16.msra.mxu0 %v7247_v29  ;;  %1831 = vmatpush.bf16.msrb.mxu2 %v7255_v11  ;;  %v8891_v11 = vld [vmem:[%s14128_s3 + $0x308] sm:$0xf0] }
 0x2df   :  { %1508 = vmatmul.bf16.gmra.mxu2 %v10471_v17  ;;  %7209 = vmatmul.msk.bf16.gmra.mxu3 %vm679_vm4, %v10530_v54  ;;  %v7348_v17 = vld [vmem:[%s14128_s3 + $0x114] sm:$0xf0]  ;;  %v7234_v54 = vld [vmem:[%s14128_s3 + $0x20] sm:$0xf] }
 0x2e0   :  { %v7351_v14 = vor.u32 %v8827_v23, %v7348_v17  ;;  %v7235_v60 = vor.u32 %v8799_v47, %v7234_v54  ;;  %v7506_v23 = vld [vmem:[%s14128_s3 + $0x300] sm:$0xf]  ;;  %v8884_v17 = vld [vmem:[%s14128_s3 + $0x2d4] sm:$0xf] }
 0x2e1   :  { %v7507_v54 = vor.u32 %v8891_v11, %v7506_v23  ;;  %v7484_v47 = vld [vmem:[%s14128_s3 + $0x2dc] sm:$0xf0] }
 0x2e2   :  { %1860 = vmatpush.bf16.msrb.mxu3 %v7351_v14  ;;  %1891 = vmatpush.bf16.msra.mxu0 %v7235_v60  ;;  %v8908_v14 = vld [vmem:[%s14128_s3 + $0x394] sm:$0xf]  ;;  %v7580_v60 = vld [vmem:[%s14128_s3 + $0x39c] sm:$0xf0]  ;;  %v7487_v12 = vor.u32 %v8884_v17, %v7484_v47  ;;  %v8903_v47 = vld [vmem:[%s14128_s3 + $0x368] sm:$0xf0] }
 0x2e3   :  { %1832 = vmatpush.bf16.msrb.mxu2 %v7243_v35  ;;  %v7583_v44 = vor.u32 %v8908_v14, %v7580_v60  ;;  %v7472_v35 = vld [vmem:[%s14128_s3 + $0x2c4] sm:$0xf0]  ;;  %v7458_v17 = vld [vmem:[%s14128_s3 + $0x2a0] sm:$0xf]  ;;  %v8872_v14 = vld [vmem:[%s14128_s3 + $0x274] sm:$0xf] }
 0x2e4   :  { %v7475_v41 = vor.u32 %v8881_v39, %v7472_v35  ;;  %v7436_v60 = vld [vmem:[%s14128_s3 + $0x27c] sm:$0xf0]  ;;  %v7446_v39 = vld [vmem:[%s14128_s3 + $0x288] sm:$0xf] }
 0x2e5   :  { %2332 = vmatpush.bf16.msrb.mxu1 %v7583_v44  ;;  %v7439_v44 = vor.u32 %v8872_v14, %v7436_v60  ;;  %v7526_v60 = vld [vmem:[%s14128_s3 + $0x320] sm:$0xf] }
 0x2e6   :  { %1861 = vmatpush.bf16.msrb.mxu3 %v7339_v18  ;;  %1892 = vmatpush.bf16.msra.mxu0 %v7223_v5  ;;  %v7571_v18 = vor.u32 %v8905_v51, %v7568_v26  ;;  %v7535_v51 = vor.u32 %v8896_v10, %v7532_v38  ;;  %v8876_v26 = vld [vmem:[%s14128_s3 + $0x290] sm:$0xf0] }
 0x2e7   :  { %1787 = vmatmul.bf16.gmra.mxu0 %v10416_v31  ;;  %7370 = vmatmul.msk.bf16.gmra.mxu1 %vm679_vm4, %v10457_v55 }
 0x2e8   :  { %1833 = vmatpush.bf16.msrb.mxu2 %v7231_v43  ;;  %v8885_v43 = vld [vmem:[%s14128_s3 + $0x2d8] sm:$0xf0] }
 0x2e9   :  { %2333 = vmatpush.bf16.msrb.mxu1 %v7571_v18  ;;  %v8900_v18 = vld [vmem:[%s14128_s3 + $0x350] sm:$0xf0] }
 0x2ea   :  { %1862 = vmatpush.bf16.msrb.mxu3 %v7327_v9  ;;  %v7483_v9 = vor.u32 %v8885_v43, %v7482_v25  ;;  %v7447_v25 = vor.u32 %v8876_v26, %v7446_v39  ;;  %v2010_v39 = vrot.slane %v10416_v31, 1 }
 0x2ec   :  { %1834 = vmatpush.bf16.msrb.mxu2 %v7219_v46  ;;  %v7579_v46 = vor.u32 %v8909_v42, %v7578_v1  ;;  %v7530_v42 = vld [vmem:[%s14128_s3 + $0x330] sm:$0xf] }
 0x2ee   :  { %1863 = vmatpush.bf16.msrb.mxu3 %v7315_v34  ;;  %v8902_v34 = vld [vmem:[%s14128_s3 + $0x364] sm:$0xf] }
 0x2ef   :  { %1513 = vmatmul.bf16.gmra.mxu2 %v10591_v52  ;;  %7210 = vmatmul.msk.bf16.gmra.mxu3 %vm679_vm4, %v10623_v57  ;;  %v8893_v52 = vld [vmem:[%s14128_s3 + $0x31c] sm:$0xf]  ;;  %v7520_v57 = vld [vmem:[%s14128_s3 + $0x324] sm:$0xf0] }
 0x2f0   :  { %v7523_v7 = vor.u32 %v8893_v52, %v7520_v57  ;;  %2242 = vmatpush.bf16.msra.mxu2 %v7519_v30  ;;  %v7470_v52 = vld [vmem:[%s14128_s3 + $0x2b8] sm:$0xf]  ;;  %v8882_v57 = vld [vmem:[%s14128_s3 + $0x2c0] sm:$0xf0] }
 0x2f2   :  { %2300 = vmatpush.bf16.msrb.mxu0 %v7523_v7  ;;  %v7566_v7 = vld [vmem:[%s14128_s3 + $0x378] sm:$0xf]  ;;  %2274 = vmatpush.bf16.msra.mxu3 %v7579_v46  ;;  %v7531_v46 = vor.u32 %v8897_v4, %v7530_v42 }
 0x2f4   :  { %2243 = vmatpush.bf16.msra.mxu2 %v7507_v54 }
 0x2f7   :  { %1792 = vmatmul.bf16.gmra.mxu0 %v10495_v37  ;;  %7371 = vmatmul.msk.bf16.gmra.mxu1 %vm679_vm4, %v10567_v58 }
 0x2f8   :  { %2244 = vmatpush.bf16.msra.mxu2 %v7495_v53 }
 0x2fc   :  { %2245 = vmatpush.bf16.msra.mxu2 %v7483_v9 }
 0x2ff   :  { %1518 = vmatmul.bf16.gmra.mxu2 %v10630_v48  ;;  %7211 = vmatmul.msk.bf16.gmra.mxu3 %vm679_vm4, %v10635_v62  ;;  %v8890_v62 = vld [vmem:[%s14128_s3 + $0x304] sm:$0xf] }
 0x300   :  { %v7511_v32 = vor.u32 %v8890_v62, %v7508_v63  ;;  %v8875_v62 = vld [vmem:[%s14128_s3 + $0x28c] sm:$0xf]  ;;  %v7448_v63 = vld [vmem:[%s14128_s3 + $0x294] sm:$0xf0] }
 0x301   :  { %v7451_v6 = vor.u32 %v8875_v62, %v7448_v63 }
 0x302   :  { %2301 = vmatpush.bf16.msrb.mxu0 %v7511_v32 }
 0x304   :  { %v1388_v8 = vpop.f32.mrf.mxu0  ;;  %v1446_v15 = vpop.f32.mrf.mxu1 }
 0x306   :  { %2302 = vmatpush.bf16.msrb.mxu0 %v7499_v49  ;;  %v7547_v49 = vor.u32 %v8899_v59, %v7544_v33  ;;  %v2004_v33 = vrot.slane %v10359_v21, 1 }
 0x307   :  { %1893 = vmatmul.bf16.vlgmr.msra.gmra.mxu0 %v10359_v21  ;;  %7376 = vmatmul.msk.bf16.vlgmr.msra.gmra.mxu1 %vm679_vm4, %v10389_v45 }
 0x30a   :  { %2303 = vmatpush.bf16.msrb.mxu0 %v7487_v12 }
 0x30c   :  { %v1390_v48 = vpop.f32.mrf.mxu0  ;;  %v1448_v36 = vpop.f32.mrf.mxu1 }
 0x30e   :  { %2304 = vmatpush.bf16.msrb.mxu0 %v7475_v41  ;;  %v7542_v41 = vld [vmem:[%s14128_s3 + $0x348] sm:$0xf] }
 0x30f   :  { %1835 = vmatmul.bf16.vlgmr.msrb.gmra.mxu2 %v10359_v21  ;;  %7372 = vmatmul.msk.bf16.vlgmr.msrb.gmra.mxu3 %vm679_vm4, %v10389_v45  ;;  %v7543_v9 = vor.u32 %v8900_v18, %v7542_v41 }
 0x312   :  { %v1417_v13 = vpop.f32.mrf.mxu2  ;;  %v1475_v28 = vpop.f32.mrf.mxu3  ;;  %2305 = vmatpush.bf16.msrb.mxu0 %v7463_v61 }
 0x313   :  { %v10851_v29 = vadd.f32 %v1417_v13, %v1388_v8  ;;  %v10853_v3 = vadd.f32 %v1475_v28, %v1446_v15  ;;  %v7556_v8 = vld [vmem:[%s14128_s3 + $0x36c] sm:$0xf0] }
 0x314   :  { %v10855_v19 = vpop.f32.mrf.mxu0  ;;  %v10857_v40 = vpop.f32.mrf.mxu1  ;;  %v7559_v15 = vor.u32 %v8902_v34, %v7556_v8 }
 0x316   :  { %2334 = vmatpush.bf16.msrb.mxu1 %v7559_v15  ;;  %2306 = vmatpush.bf16.msrb.mxu0 %v7451_v6 }
 0x317   :  { %1898 = vmatmul.bf16.gmra.mxu0 %v10361_v24  ;;  %7377 = vmatmul.msk.bf16.gmra.mxu1 %vm679_vm4, %v10393_v16 }
 0x31a   :  { %v1419_v5 = vpop.f32.mrf.mxu2  ;;  %v1477_v56 = vpop.f32.mrf.mxu3  ;;  %2335 = vmatpush.bf16.msrb.mxu1 %v7547_v49  ;;  %2307 = vmatpush.bf16.msrb.mxu0 %v7439_v44  ;;  %v2008_v49 = vrot.slane %v10393_v16, 1 }
 0x31b   :  { %v10898_v27 = vadd.f32 %v1419_v5, %v1390_v48  ;;  %v10900_v20 = vadd.f32 %v1477_v56, %v1448_v36  ;;  %v7471_v48 = vor.u32 %v8882_v57, %v7470_v52  ;;  %v8906_v36 = vld [vmem:[%s14128_s3 + $0x380] sm:$0xf0] }
 0x31c   :  { %v10902_v2 = vpop.f32.mrf.mxu0  ;;  %v10904_v22 = vpop.f32.mrf.mxu1  ;;  %v7567_v32 = vor.u32 %v8906_v36, %v7566_v7 }
 0x31d   :  { %2246 = vmatpush.bf16.msra.mxu2 %v7471_v48 }
 0x31e   :  { %2275 = vmatpush.bf16.msra.mxu3 %v7567_v32  ;;  %2336 = vmatpush.bf16.msrb.mxu1 %v7535_v51 }
 0x31f   :  { %1840 = vmatmul.bf16.gmra.mxu2 %v10361_v24  ;;  %7373 = vmatmul.msk.bf16.gmra.mxu3 %vm679_vm4, %v10393_v16 }
 0x322   :  { %v1422_v30 = vpop.f32.mrf.mxu2  ;;  %v1480_v0 = vpop.f32.mrf.mxu3 }
 0x323   :  { %v10958_v13 = vadd.f32 %v1422_v30, %v10855_v19  ;;  %v10961_v28 = vadd.f32 %v1480_v0, %v10857_v40  ;;  %v8879_v19 = vld [vmem:[%s14128_s3 + $0x2a8] sm:$0xf0]  ;;  %v7554_v40 = vld [vmem:[%s14128_s3 + $0x360] sm:$0xf]  ;;  %v2005_v30 = vrot.slane %v10361_v24, 1  ;;  %v2007_v0 = vrot.slane %v10389_v45, 1 }
 0x324   :  { %v1398_v23 = vpop.f32.mrf.mxu0  ;;  %v1456_v11 = vpop.f32.mrf.mxu1  ;;  %v7459_v54 = vor.u32 %v8879_v19, %v7458_v17  ;;  %v7555_v12 = vor.u32 %v8903_v47, %v7554_v40 }
 0x325   :  { %v11050_v40 = vsel %vm339_vm3, %v2004_v33, %v2005_v30  ;;  %v11084_v41 = vsel %vm339_vm3, %v2005_v30, %v2010_v39 }
 0x326   :  { %2247 = vmatpush.bf16.msra.mxu2 %v7459_v54  ;;  %2276 = vmatpush.bf16.msra.mxu3 %v7555_v12  ;;  %v11053_v54 = vsel %vm339_vm3, %v2007_v0, %v2008_v49  ;;  %v8895_v12 = vld [vmem:[%s14128_s3 + $0x328] sm:$0xf0]  ;;  %v11137_v0 = vrot.slane %v10495_v37, 1 }
 0x327   :  { %1903 = vmatmul.bf16.gmra.mxu0 %v10416_v31  ;;  %7378 = vmatmul.msk.bf16.gmra.mxu1 %vm679_vm4, %v10457_v55  ;;  %v7527_v44 = vor.u32 %v8895_v12, %v7526_v60 }
 0x32a   :  { %v1424_v53 = vpop.f32.mrf.mxu2  ;;  %v1482_v35 = vpop.f32.mrf.mxu3  ;;  %2248 = vmatpush.bf16.msra.mxu2 %v7447_v25  ;;  %2277 = vmatpush.bf16.msra.mxu3 %v7543_v9  ;;  %v7502_v25 = vld [vmem:[%s14128_s3 + $0x2f0] sm:$0xf] }
 0x32b   :  { %v11003_v5 = vadd.f32 %v1424_v53, %v10902_v2  ;;  %v11006_v56 = vadd.f32 %v1482_v35, %v10904_v22  ;;  %v7434_v2 = vld [vmem:[%s14128_s3 + $0x270] sm:$0xf]  ;;  %v8873_v22 = vld [vmem:[%s14128_s3 + $0x278] sm:$0xf0]  ;;  %v2012_v53 = vrot.slane %v10457_v55, 1 }
 0x32c   :  { %v1400_v43 = vpop.f32.mrf.mxu0  ;;  %v1458_v1 = vpop.f32.mrf.mxu1  ;;  %v7435_v50 = vor.u32 %v8873_v22, %v7434_v2 }
 0x32d   :  { %v11087_v18 = vsel %vm339_vm3, %v2008_v49, %v2012_v53  ;;  %v11140_v49 = vrot.slane %v10567_v58, 1 }
 0x32e   :  { %2249 = vmatpush.bf16.msra.mxu2 %v7435_v50  ;;  %2278 = vmatpush.bf16.msra.mxu3 %v7531_v46 }
 0x32f   :  { %1845 = vmatmul.bf16.gmra.mxu2 %v10416_v31  ;;  %7374 = vmatmul.msk.bf16.gmra.mxu3 %vm679_vm4, %v10457_v55  ;;  %v7514_v31 = vld [vmem:[%s14128_s3 + $0x308] sm:$0xf]  ;;  %v8892_v55 = vld [vmem:[%s14128_s3 + $0x310] sm:$0xf0] }
 0x332   :  { %v1427_v61 = vpop.f32.mrf.mxu2  ;;  %v1485_v34 = vpop.f32.mrf.mxu3  ;;  %2358 = vmatpush.bf16.msrb.mxu2 %v7527_v44 }
 0x333   :  { %v11023_v8 = vadd.f32 %v1427_v61, %v1398_v23  ;;  %v11025_v15 = vadd.f32 %v1485_v34, %v1456_v11  ;;  %v7490_v34 = vld [vmem:[%s14128_s3 + $0x2d8] sm:$0xf] }
 0x334   :  { %v1403_v52 = vpop.f32.mrf.mxu0  ;;  %v1461_v57 = vpop.f32.mrf.mxu1 }
 0x337   :  { %1908 = vmatmul.bf16.gmra.mxu0 %v10495_v37  ;;  %7379 = vmatmul.msk.bf16.gmra.mxu1 %vm679_vm4, %v10567_v58 }
 0x33a   :  { %v1429_v7 = vpop.f32.mrf.mxu2  ;;  %v1487_v48 = vpop.f32.mrf.mxu3 }
 0x33b   :  { %v11030_v36 = vadd.f32 %v1429_v7, %v1400_v43  ;;  %v11032_v62 = vadd.f32 %v1487_v48, %v1458_v1  ;;  %v7515_v43 = vor.u32 %v8892_v55, %v7514_v31  ;;  %v8889_v1 = vld [vmem:[%s14128_s3 + $0x2f8] sm:$0xf0]  ;;  %v8910_v7 = vld [vmem:[%s14128_s3 + $0x3a0] sm:$0xf0]  ;;  %v7478_v48 = vld [vmem:[%s14128_s3 + $0x2c0] sm:$0xf] }
 0x33c   :  { %v1405_v63 = vpop.f32.mrf.mxu0  ;;  %v1463_v32 = vpop.f32.mrf.mxu1  ;;  %v7503_v22 = vor.u32 %v8889_v1, %v7502_v25  ;;  %v8904_v31 = vld [vmem:[%s14128_s3 + $0x370] sm:$0xf0]  ;;  %v7454_v55 = vld [vmem:[%s14128_s3 + $0x290] sm:$0xf]  ;;  %v8877_v25 = vld [vmem:[%s14128_s3 + $0x298] sm:$0xf0] }
 0x33d   :  { %2359 = vmatpush.bf16.msrb.mxu2 %v7515_v43  ;;  %v7550_v1 = vld [vmem:[%s14128_s3 + $0x350] sm:$0xf] }
 0x33f   :  { %1850 = vmatmul.bf16.gmra.mxu2 %v10495_v37  ;;  %7375 = vmatmul.msk.bf16.gmra.mxu3 %vm679_vm4, %v10567_v58  ;;  %v11155_v37 = vsel %vm339_vm3, %v2012_v53, %v11140_v49  ;;  %v7466_v58 = vld [vmem:[%s14128_s3 + $0x2a8] sm:$0xf] }
 0x341   :  { %2360 = vmatpush.bf16.msrb.mxu2 %v7503_v22 }
 0x342   :  { %v1432_v6 = vpop.f32.mrf.mxu2  ;;  %v1490_v59 = vpop.f32.mrf.mxu3 }
 0x343   :  { %v11041_v23 = vadd.f32 %v1432_v6, %v1403_v52  ;;  %v11043_v11 = vadd.f32 %v1490_v59, %v1461_v57  ;;  %v8886_v52 = vld [vmem:[%s14128_s3 + $0x2e0] sm:$0xf0]  ;;  %v7574_v6 = vld [vmem:[%s14128_s3 + $0x380] sm:$0xf]  ;;  %v8907_v59 = vld [vmem:[%s14128_s3 + $0x388] sm:$0xf0] }
 0x344   :  { %v11045_v17 = vpop.f32.mrf.mxu0  ;;  %v11047_v19 = vpop.f32.mrf.mxu1  ;;  %v7491_v57 = vor.u32 %v8886_v52, %v7490_v34  ;;  %v7575_v44 = vor.u32 %v8907_v59, %v7574_v6 }
 0x346   :  { %2361 = vmatpush.bf16.msrb.mxu2 %v7491_v57 }
 0x347   :  { %2308 = vmatmul.bf16.vlgmr.msrb.gmra.mxu0 %v11050_v40  ;;  %7592 = vmatmul.msk.bf16.vlgmr.msrb.gmra.mxu1 %vm679_vm4, %v11053_v54 }
 0x34a   :  { %v1434_v21 = vpop.f32.mrf.mxu2  ;;  %v1492_v24 = vpop.f32.mrf.mxu3 }
 0x34b   :  { %v11058_v45 = vadd.f32 %v1434_v21, %v1405_v63  ;;  %v11060_v16 = vadd.f32 %v1492_v24, %v1463_v32  ;;  %v8883_v63 = vld [vmem:[%s14128_s3 + $0x2c8] sm:$0xf0] }
 0x34c   :  { %v11062_v47 = vpop.f32.mrf.mxu0  ;;  %v11064_v14 = vpop.f32.mrf.mxu1  ;;  %v7479_v21 = vor.u32 %v8883_v63, %v7478_v48  ;;  %v8874_v48 = vld [vmem:[%s14128_s3 + $0x280] sm:$0xf0] }
 0x34e   :  { %2362 = vmatpush.bf16.msrb.mxu2 %v7479_v21 }
 0x34f   :  { %2250 = vmatmul.bf16.vlgmr.msra.gmra.mxu2 %v11050_v40  ;;  %7588 = vmatmul.msk.bf16.vlgmr.msra.gmra.mxu3 %vm679_vm4, %v11053_v54 }
 0x352   :  { %v1504_v10 = vpop.f32.mrf.mxu2  ;;  %v1533_v38 = vpop.f32.mrf.mxu3 }
 0x353   :  { %v11077_v35 = vadd.f32 %v1533_v38, %v1504_v10  ;;  %v11151_v38 = vsel %vm339_vm3, %v2010_v39, %v11137_v0  ;;  %v7562_v39 = vld [vmem:[%s14128_s3 + $0x368] sm:$0xf] }
 0x354   :  { %v11079_v51 = vpop.f32.mrf.mxu0  ;;  %v11081_v26 = vpop.f32.mrf.mxu1  ;;  %v7563_v43 = vor.u32 %v8904_v31, %v7562_v39 }
 0x357   :  { %2313 = vmatmul.bf16.gmra.mxu0 %v11084_v41  ;;  %7593 = vmatmul.msk.bf16.gmra.mxu1 %vm679_vm4, %v11087_v18 }
 0x35a   :  { %v1506_v9 = vpop.f32.mrf.mxu2  ;;  %v1535_v2 = vpop.f32.mrf.mxu3 }
 0x35b   :  { %v11104_v42 = vadd.f32 %v1535_v2, %v1506_v9  ;;  %v8901_v9 = vld [vmem:[%s14128_s3 + $0x358] sm:$0xf0] }
 0x35c   :  { %v1785_v50 = vpop.f32.mrf.mxu0  ;;  %v1814_v4 = vpop.f32.mrf.mxu1  ;;  %v7551_v52 = vor.u32 %v8901_v9, %v7550_v1 }
 0x35d   :  { %v1786_v46 = vadd.f32 %v1785_v50, %v11003_v5  ;;  %v7586_v5 = vld [vmem:[%s14128_s3 + $0x398] sm:$0xf]  ;;  %v7455_v50 = vor.u32 %v8877_v25, %v7454_v55 }
 0x35e   :  { %v7587_v32 = vor.u32 %v8910_v7, %v7586_v5  ;;  %v7442_v7 = vld [vmem:[%s14128_s3 + $0x278] sm:$0xf] }
 0x35f   :  { %v11107_v61 = vadd.f32 %v1814_v4, %v1786_v46  ;;  %2255 = vmatmul.bf16.gmra.mxu2 %v11084_v41  ;;  %7589 = vmatmul.msk.bf16.gmra.mxu3 %vm679_vm4, %v11087_v18  ;;  %v7443_v63 = vor.u32 %v8874_v48, %v7442_v7 }
 0x360   :  { %2390 = vmatpush.bf16.msrb.mxu3 %v7587_v32  ;;  %v8898_v32 = vld [vmem:[%s14128_s3 + $0x340] sm:$0xf0] }
 0x362   :  { %v1509_v33 = vpop.f32.mrf.mxu2  ;;  %v1538_v30 = vpop.f32.mrf.mxu3 }
 0x363   :  { %v11142_v24 = vadd.f32 %v1538_v30, %v1509_v33 }
 0x364   :  { %v1788_v60 = vpop.f32.mrf.mxu0  ;;  %v11144_v12 = vpop.f32.mrf.mxu1  ;;  %2391 = vmatpush.bf16.msrb.mxu3 %v7575_v44 }
 0x365   :  { %v11147_v10 = vadd.f32 %v1788_v60, %v11023_v8  ;;  %v8880_v8 = vld [vmem:[%s14128_s3 + $0x2b0] sm:$0xf0] }
 0x366   :  { %v7467_v53 = vor.u32 %v8880_v8, %v7466_v58 }
 0x367   :  { %2318 = vmatmul.bf16.gmra.mxu0 %v11151_v38  ;;  %7594 = vmatmul.msk.bf16.gmra.mxu1 %vm679_vm4, %v11155_v37 }
 0x368   :  { %2363 = vmatpush.bf16.msrb.mxu2 %v7467_v53  ;;  %2392 = vmatpush.bf16.msrb.mxu3 %v7563_v43 }
 0x36a   :  { %v1511_v2 = vpop.f32.mrf.mxu2  ;;  %v1540_v22 = vpop.f32.mrf.mxu3 }
 0x36b   :  { %v1541_v4 = vadd.f32 %v1540_v22, %v1511_v2 }
 0x36c   :  { %v1790_v46 = vpop.f32.mrf.mxu0  ;;  %v1819_v34 = vpop.f32.mrf.mxu1  ;;  %2364 = vmatpush.bf16.msrb.mxu2 %v7455_v50  ;;  %2393 = vmatpush.bf16.msrb.mxu3 %v7551_v52 }
 0x36d   :  { %v1791_v5 = vadd.f32 %v1790_v46, %v11030_v36  ;;  %v7538_v36 = vld [vmem:[%s14128_s3 + $0x338] sm:$0xf]  ;;  %s14141_s3 = sld [smem:[#allocation17_spill]] }
 0x36e   :  { %v7539_v6 = vor.u32 %v8898_v32, %v7538_v36 }
 0x36f   :  { %v11185_v57 = vadd.f32 %v1819_v34, %v1791_v5  ;;  %2260 = vmatmul.bf16.gmra.mxu2 %v11151_v38  ;;  %7590 = vmatmul.msk.bf16.gmra.mxu3 %vm679_vm4, %v11155_v37 }
 0x370   :  { %2365 = vmatpush.bf16.msrb.mxu2 %v7443_v63  ;;  %2394 = vmatpush.bf16.msrb.mxu3 %v7539_v6 }
 0x372   :  { %v1514_v59 = vpop.f32.mrf.mxu2  ;;  %v1543_v33 = vpop.f32.mrf.mxu3 }
 0x373   :  { %v1544_v30 = vadd.f32 %v1543_v33, %v1514_v59 }
 0x374   :  { %v1793_v21 = vpop.f32.mrf.mxu0  ;;  %v11202_v60 = vpop.f32.mrf.mxu1 }
 0x375   :  { %v11205_v44 = vadd.f32 %v1793_v21, %v11041_v23 }
 0x377   :  { %2323 = vmatmul.bf16.gmra.mxu0 %v11137_v0  ;;  %7595 = vmatmul.msk.bf16.gmra.mxu1 %vm679_vm4, %v11140_v49 }
 0x37a   :  { %v1516_v58 = vpop.f32.mrf.mxu2  ;;  %v1545_v8 = vpop.f32.mrf.mxu3 }
 0x37b   :  { %v1546_v39 = vadd.f32 %v1545_v8, %v1516_v58 }
 0x37c   :  { %v1795_v53 = vpop.f32.mrf.mxu0  ;;  %v1824_v31 = vpop.f32.mrf.mxu1 }
 0x37d   :  { %v1796_v55 = vadd.f32 %v1795_v53, %v11058_v45 }
 0x37f   :  { %v11211_v25 = vadd.f32 %v1824_v31, %v1796_v55  ;;  %2265 = vmatmul.bf16.gmra.mxu2 %v11137_v0  ;;  %7591 = vmatmul.msk.bf16.gmra.mxu3 %vm679_vm4, %v11140_v49 }
 0x382   :  { %v1519_v23 = vpop.f32.mrf.mxu2  ;;  %v1548_v43 = vpop.f32.mrf.mxu3 }
 0x383   :  { %v1549_v1 = vadd.f32 %v1548_v43, %v1519_v23 }
 0x384   :  { %v1894_v9 = vpop.f32.mrf.mxu0  ;;  %v11216_v2 = vpop.f32.mrf.mxu1 }
 0x385   :  { %v11219_v22 = vadd.f32 %v1894_v9, %v11077_v35 }
 0x38a   :  { %v1521_v50 = vpop.f32.mrf.mxu2  ;;  %v1550_v46 = vpop.f32.mrf.mxu3 }
 0x38b   :  { %v1551_v34 = vadd.f32 %v1550_v46, %v1521_v50 }
 0x38c   :  { %v1896_v45 = vpop.f32.mrf.mxu0  ;;  %v1925_v52 = vpop.f32.mrf.mxu1 }
 0x38d   :  { %v1897_v5 = vadd.f32 %v1896_v45, %v11104_v42 }
 0x38f   :  { %v11222_v7 = vadd.f32 %v1925_v52, %v1897_v5  ;;  %2366 = vmatmul.bf16.vlgmr.msrb.gmra.mxu2 %v11050_v40  ;;  %7596 = vmatmul.msk.bf16.vlgmr.msrb.gmra.mxu3 %vm679_vm4, %v11053_v54 }
 0x392   :  { %v1836_v48 = vpop.f32.mrf.mxu2  ;;  %v1865_v36 = vpop.f32.mrf.mxu3 }
 0x394   :  { %v1899_v63 = vpop.f32.mrf.mxu0  ;;  %v11227_v32 = vpop.f32.mrf.mxu1 }
 0x395   :  { %v11230_v35 = vadd.f32 %v1899_v63, %v11142_v24 }
 0x39a   :  { %v1838_v6 = vpop.f32.mrf.mxu2  ;;  %v1867_v59 = vpop.f32.mrf.mxu3 }
 0x39b   :  { %v1839_v33 = vadd.f32 %v1838_v6, %v10900_v20 }
 0x39c   :  { %v1901_v42 = vpop.f32.mrf.mxu0  ;;  %v1930_v21 = vpop.f32.mrf.mxu1 }
 0x39d   :  { %v1868_v58 = vadd.f32 %v1867_v59, %v1839_v33  ;;  %v1902_v8 = vadd.f32 %v1901_v42, %v1541_v4 }
 0x39f   :  { %v11233_v40 = vadd.f32 %v1930_v21, %v1902_v8  ;;  %2371 = vmatmul.bf16.gmra.mxu2 %v11084_v41  ;;  %7597 = vmatmul.msk.bf16.gmra.mxu3 %vm679_vm4, %v11087_v18 }
 0x3a2   :  { %v1841_v54 = vpop.f32.mrf.mxu2  ;;  %v1870_v53 = vpop.f32.mrf.mxu3 }
 0x3a4   :  { %v1904_v31 = vpop.f32.mrf.mxu0  ;;  %v11238_v24 = vpop.f32.mrf.mxu1 }
 0x3a5   :  { %v11240_v55 = vadd.f32 %v1904_v31, %v1544_v30 }
 0x3aa   :  { %v1843_v23 = vpop.f32.mrf.mxu2  ;;  %v1872_v20 = vpop.f32.mrf.mxu3 }
 0x3ab   :  { %v1844_v43 = vadd.f32 %v1843_v23, %v11006_v56  ;;  %v1837_v23 = vadd.f32 %v1836_v48, %v10853_v3  ;;  %v1779_v3 = vadd.f32 %v11045_v17, %v10851_v29 }
 0x3ac   :  { %v1906_v9 = vpop.f32.mrf.mxu0  ;;  %v1935_v4 = vpop.f32.mrf.mxu1 }
 0x3ad   :  { %v1873_v50 = vadd.f32 %v1872_v20, %v1844_v43  ;;  %v1907_v46 = vadd.f32 %v1906_v9, %v1546_v39  ;;  %v1866_v9 = vadd.f32 %v1865_v36, %v1837_v23 }
 0x3af   :  { %v11243_v45 = vadd.f32 %v1935_v4, %v1907_v46  ;;  %2376 = vmatmul.bf16.gmra.mxu2 %v11151_v38  ;;  %7598 = vmatmul.msk.bf16.gmra.mxu3 %vm679_vm4, %v11155_v37 }
 0x3b2   :  { %v1846_v41 = vpop.f32.mrf.mxu2  ;;  %v11248_v18 = vpop.f32.mrf.mxu3 }
 0x3b4   :  { %v1909_v30 = vpop.f32.mrf.mxu0  ;;  %v11250_v52 = vpop.f32.mrf.mxu1 }
 0x3b5   :  { %v11252_v5 = vadd.f32 %v1909_v30, %v1549_v1 }
 0x3ba   :  { %v1848_v56 = vpop.f32.mrf.mxu2  ;;  %v1877_v63 = vpop.f32.mrf.mxu3 }
 0x3bb   :  { %v1849_v6 = vadd.f32 %v1848_v56, %v11032_v62 }
 0x3bc   :  { %v1911_v39 = vpop.f32.mrf.mxu0  ;;  %v1940_v59 = vpop.f32.mrf.mxu1 }
 0x3bd   :  { %v11255_v33 = vadd.f32 %v1877_v63, %v1849_v6  ;;  %v1912_v38 = vadd.f32 %v1911_v39, %v1551_v34  ;;  %v1842_v6 = vadd.f32 %v1841_v54, %v10961_v28  ;;  %v1808_v28 = vadd.f32 %v11047_v19, %v1779_v3 }
 0x3bf   :  { %v11257_v42 = vadd.f32 %v1940_v59, %v1912_v38  ;;  %2381 = vmatmul.bf16.gmra.mxu2 %v11137_v0  ;;  %7599 = vmatmul.msk.bf16.gmra.mxu3 %vm679_vm4, %v11140_v49  ;;  %v1871_v36 = vadd.f32 %v1870_v53, %v1842_v6  ;;  %vm3043_vm4 = vcmask 130048  }
 0x3c2   :  { %v11262_v37 = vpop.f32.mrf.mxu2  ;;  %v11264_v1 = vpop.f32.mrf.mxu3 }
 0x3c4   :  { %v2309_v21 = vpop.f32.mrf.mxu0  ;;  %v2338_v8 = vpop.f32.mrf.mxu1 }
 0x3c5   :  { %v2339_v43 = vadd.f32 %v2338_v8, %v2309_v21 }
 0x3c7   :  { %v11271_v4 = vadd.f32 %v2339_v43, %v1866_v9 }
 0x3c9   :  { %v2441_v39 = vmul.f32 %v11271_v4, %v11271_v4 }
 0x3ca   :  { %v11266_v31 = vpop.f32.mrf.mxu2  ;;  %v11268_v62 = vpop.f32.mrf.mxu3 }
 0x3cb   :  { %v2465_v38 = vmul.f32 %v2441_v39, %v11271_v4 }
 0x3cc   :  { %v2311_v34 = vpop.f32.mrf.mxu0  ;;  %v2340_v20 = vpop.f32.mrf.mxu1 }
 0x3cd   :  { %v2341_v0 = vadd.f32 %v2340_v20, %v2311_v34  ;;  %v2489_v9 = vmul.f32 0.044715, %v2465_v38 }
 0x3cf   :  { %v11273_v30 = vadd.f32 %v2341_v0, %v1868_v58  ;;  %v1781_v0 = vadd.f32 %v11062_v47, %v10898_v27  ;;  %v2513_v19 = vadd.f32 %v2489_v9, %v11271_v4 }
 0x3d1   :  { %v2444_v48 = vmul.f32 %v11273_v30, %v11273_v30  ;;  %v1810_v27 = vadd.f32 %v11064_v14, %v1781_v0 }
 0x3d2   :  { %v2251_v49 = vpop.f32.mrf.mxu2  ;;  %v2280_v46 = vpop.f32.mrf.mxu3 }
 0x3d3   :  { %v2281_v21 = vadd.f32 %v2280_v46, %v2251_v49  ;;  %v2468_v54 = vmul.f32 %v2444_v48, %v11273_v30  ;;  %v1847_v46 = vadd.f32 %v1846_v41, %v11025_v15 }
 0x3d4   :  { %v2314_v56 = vpop.f32.mrf.mxu0  ;;  %v2343_v63 = vpop.f32.mrf.mxu1 }
 0x3d5   :  { %v2344_v59 = vadd.f32 %v2343_v63, %v2314_v56  ;;  %v11287_v29 = vadd.f32 %v2281_v21, %v1808_v28  ;;  %v2492_v49 = vmul.f32 0.044715, %v2468_v54  ;;  %v1876_v48 = vadd.f32 %v11248_v18, %v1847_v46 }
 0x3d6   :  { %v2537_v21 = vmul.f32 0.7978846, %v2513_v19 }
 0x3d7   :  { %v11283_v23 = vadd.f32 %v2344_v59, %v1871_v36  ;;  %v2440_v56 = vmul.f32 %v11287_v29, %v11287_v29  ;;  %v1784_v59 = vadd.f32 %v11079_v51, %v10958_v13  ;;  %v2516_v15 = vadd.f32 %v2492_v49, %v11273_v30 }
 0x3d8   :  { %9293 = vtanh.f32 %v2537_v21 }
 0x3d9   :  { %v2447_v17 = vmul.f32 %v11283_v23, %v11283_v23  ;;  %v1813_v13 = vadd.f32 %v11081_v26, %v1784_v59  ;;  %v2540_v14 = vmul.f32 0.7978846, %v2516_v15 }
 0x3da   :  { %v2253_v58 = vpop.f32.mrf.mxu2  ;;  %v2282_v8 = vpop.f32.mrf.mxu3 }
 0x3db   :  { %v2283_v63 = vadd.f32 %v2282_v8, %v2253_v58  ;;  %v2464_v58 = vmul.f32 %v2440_v56, %v11287_v29  ;;  %9295 = vtanh.f32 %v2540_v14 }
 0x3dc   :  { %v2316_v34 = vpop.f32.mrf.mxu0  ;;  %v2345_v20 = vpop.f32.mrf.mxu1 }
 0x3dd   :  { %v2346_v43 = vadd.f32 %v2345_v20, %v2316_v34  ;;  %v11308_v8 = vadd.f32 %v2283_v63, %v1810_v27  ;;  %v2488_v20 = vmul.f32 0.044715, %v2464_v58 }
 0x3df   :  { %v11291_v53 = vadd.f32 %v2346_v43, %v1873_v50  ;;  %v2471_v50 = vmul.f32 %v2447_v17, %v11283_v23  ;;  %v2443_v43 = vmul.f32 %v11308_v8, %v11308_v8 }
 0x3e1   :  { %v2450_v3 = vmul.f32 %v11291_v53, %v11291_v53  ;;  %v2495_v51 = vmul.f32 0.044715, %v2471_v50  ;;  %v2802_v50 = vld [vmem:[%s14083_s15 + $0xf8] sm:$0xff]  ;;  %v2467_v27 = vmul.f32 %v2443_v43, %v11308_v8 }
 0x3e2   :  { %v2256_v6 = vpop.f32.mrf.mxu2  ;;  %v2285_v39 = vpop.f32.mrf.mxu3  ;;  %2839 = vmatpush.msra.mxu1 %v2802_v50  ;;  %2965 = vmatpush.msra.mxu2 %v2802_v50 }
 0x3e3   :  { %v2286_v36 = vadd.f32 %v2285_v39, %v2256_v6  ;;  %v2474_v28 = vmul.f32 %v2450_v3, %v11291_v53  ;;  %v2519_v26 = vadd.f32 %v2495_v51, %v11283_v23  ;;  %v2512_v3 = vadd.f32 %v2488_v20, %v11287_v29 }
 0x3e4   :  { %v2319_v47 = vpop.f32.mrf.mxu0  ;;  %v2348_v41 = vpop.f32.mrf.mxu1 }
 0x3e5   :  { %v2349_v38 = vadd.f32 %v2348_v41, %v2319_v47  ;;  %v11314_v34 = vadd.f32 %v2286_v36, %v1813_v13  ;;  %v2498_v0 = vmul.f32 0.044715, %v2474_v28  ;;  %v2543_v15 = vmul.f32 0.7978846, %v2519_v26  ;;  %v2800_v13 = vld [vmem:[%s14083_s15 + $0xe8] sm:$0xff] }
 0x3e6   :  { %v1852_v36 = vadd.f32 %v11262_v37, %v11043_v11  ;;  %v1818_v11 = vadd.f32 %v11144_v12, %v11147_v10  ;;  %v2536_v37 = vmul.f32 0.7978846, %v2512_v3  ;;  %v2491_v28 = vmul.f32 0.044715, %v2467_v27 }
 0x3e7   :  { %v11312_v54 = vadd.f32 %v2349_v38, %v1876_v48  ;;  %v2446_v63 = vmul.f32 %v11314_v34, %v11314_v34  ;;  %v2522_v47 = vadd.f32 %v2498_v0, %v11291_v53  ;;  %v9294_v48 = vpop.eup %9293  ;;  %9297 = vtanh.f32 %v2543_v15 }
 0x3e8   :  { %v9296_v51 = vpop.eup %9295  ;;  %v1881_v26 = vadd.f32 %v11264_v1, %v1852_v36  ;;  %v2585_v0 = vadd.f32 1.0, %v9294_v48  ;;  %v1854_v1 = vadd.f32 %v11266_v31, %v11060_v16  ;;  %9299 = vtanh.f32 %v2536_v37 }
 0x3e9   :  { %v2453_v18 = vmul.f32 %v11312_v54, %v11312_v54  ;;  %v2470_v58 = vmul.f32 %v2446_v63, %v11314_v34  ;;  %v2546_v20 = vmul.f32 0.7978846, %v2522_v47  ;;  %v2588_v50 = vadd.f32 1.0, %v9296_v51 }
 0x3ea   :  { %v2258_v9 = vpop.f32.mrf.mxu2  ;;  %v2287_v17 = vpop.f32.mrf.mxu3  ;;  %v2515_v3 = vadd.f32 %v2491_v28, %v11308_v8  ;;  %v2609_v48 = vmul.f32 0.5, %v2585_v0  ;;  %v1883_v37 = vadd.f32 %v11268_v62, %v1854_v1 }
 0x3eb   :  { %v2477_v49 = vmul.f32 %v2453_v18, %v11312_v54  ;;  %v2288_v46 = vadd.f32 %v2287_v17, %v2258_v9  ;;  %v2799_v17 = vld [vmem:[%s14083_s15 + $0xe0] sm:$0xff]  ;;  %9301 = vtanh.f32 %v2546_v20 }
 0x3ec   :  { %v2321_v19 = vpop.f32.mrf.mxu0  ;;  %v2350_v56 = vpop.f32.mrf.mxu1  ;;  %v2539_v28 = vmul.f32 0.7978846, %v2515_v3  ;;  %v2795_v20 = vld [vmem:[%s14083_s15 + $0xc0] sm:$0xff] }
 0x3ed   :  { %v2501_v6 = vmul.f32 0.044715, %v2477_v49  ;;  %v11325_v39 = vadd.f32 %v2288_v46, %v11107_v61  ;;  %v2351_v59 = vadd.f32 %v2350_v56, %v2321_v19  ;;  %v2801_v61 = vld [vmem:[%s14083_s15 + $0xf0] sm:$0xff]  ;;  %v2494_v19 = vmul.f32 0.044715, %v2470_v58  ;;  %v9298_v31 = vpop.eup %9297 }
 0x3ee   :  { %2840 = vmatpush.msra.mxu1 %v2801_v61  ;;  %2966 = vmatpush.msra.mxu2 %v2801_v61  ;;  %v2797_v61 = vld [vmem:[%s14083_s15 + $0xd0] sm:$0xff] }
 0x3ef   :  { %v11334_v41 = vadd.f32 %v2351_v59, %v11255_v33  ;;  %v2525_v38 = vadd.f32 %v2501_v6, %v11312_v54  ;;  %v2449_v21 = vmul.f32 %v11325_v39, %v11325_v39  ;;  %v2798_v59 = vld [vmem:[%s14083_s15 + $0xd8] sm:$0xff]  ;;  %v2518_v36 = vadd.f32 %v2494_v19, %v11314_v34 }
 0x3f0   :  { %2841 = vmatpush.msra.mxu1 %v2800_v13  ;;  %2967 = vmatpush.msra.mxu2 %v2800_v13  ;;  %v2612_v13 = vmul.f32 0.5, %v2588_v50  ;;  %v11400_v50 = vpop.permute.xlu2 %2666 }
 0x3f1   :  { %v2456_v33 = vmul.f32 %v11334_v41, %v11334_v41  ;;  %v2549_v49 = vmul.f32 0.7978846, %v2525_v38  ;;  %v2473_v12 = vmul.f32 %v2449_v21, %v11325_v39 }
 0x3f2   :  { %v2261_v14 = vpop.f32.mrf.mxu2  ;;  %v2290_v18 = vpop.f32.mrf.mxu3  ;;  %2842 = vmatpush.msra.mxu1 %v2799_v17  ;;  %2968 = vmatpush.msra.mxu2 %v2799_v17  ;;  %v2591_v17 = vadd.f32 1.0, %v9298_v31 }
 0x3f3   :  { %v2480_v43 = vmul.f32 %v2456_v33, %v11334_v41  ;;  %v2291_v9 = vadd.f32 %v2290_v18, %v2261_v14  ;;  %9303 = vtanh.f32 %v2549_v49  ;;  %v2497_v16 = vmul.f32 0.044715, %v2473_v12  ;;  %v2796_v33 = vld [vmem:[%s14083_s15 + $0xc8] sm:$0xff] }
 0x3f4   :  { %v2324_v10 = vpop.f32.mrf.mxu0  ;;  %v2353_v46 = vpop.f32.mrf.mxu1  ;;  %2843 = vmatpush.msra.mxu1 %v2798_v59  ;;  %2969 = vmatpush.msra.mxu2 %v2798_v59 }
 0x3f5   :  { %v2504_v56 = vmul.f32 0.044715, %v2480_v43  ;;  %v11358_v63 = vadd.f32 %v2291_v9, %v1818_v11  ;;  %v2354_v6 = vadd.f32 %v2353_v46, %v2324_v10  ;;  %v9300_v43 = vpop.eup %9299  ;;  %v11387_v9 = vmul.f32 %v2609_v48, %v11271_v4 }
 0x3f6   :  { %2844 = vmatpush.msra.mxu1 %v2797_v61  ;;  %2970 = vmatpush.msra.mxu2 %v2797_v61  ;;  %v9302_v62 = vpop.eup %9301  ;;  %v2542_v10 = vmul.f32 0.7978846, %v2518_v36  ;;  %v11394_v4 = vmul.f32 %v2612_v13, %v11273_v30  ;;  %v2584_v3 = vadd.f32 1.0, %v9300_v43  ;;  %v2793_v30 = vld [vmem:[%s14083_s15 + $0xb0] sm:$0xff]  ;;  %v2615_v61 = vmul.f32 0.5, %v2591_v17 }
 0x3f7   :  { %v2528_v27 = vadd.f32 %v2504_v56, %v11334_v41  ;;  %v2452_v15 = vmul.f32 %v11358_v63, %v11358_v63  ;;  %v11369_v47 = vadd.f32 %v2354_v6, %v1881_v26  ;;  %v2521_v26 = vadd.f32 %v2497_v16, %v11325_v39  ;;  %v2794_v56 = vld [vmem:[%s14083_s15 + $0xb8] sm:$0xff] }
 0x3f8   :  { %2845 = vmatpush.msra.mxu1 %v2796_v33  ;;  %2971 = vmatpush.msra.mxu2 %v2796_v33  ;;  %v2594_v48 = vadd.f32 1.0, %v9302_v62 }
 0x3f9   :  { %v2552_v38 = vmul.f32 0.7978846, %v2528_v27  ;;  %v2476_v21 = vmul.f32 %v2452_v15, %v11358_v63  ;;  %v2459_v58 = vmul.f32 %v11369_v47, %v11369_v47  ;;  %v9304_v6 = vpop.eup %9303  ;;  %v2545_v16 = vmul.f32 0.7978846, %v2521_v26 }
 0x3fa   :  { %v2263_v51 = vpop.f32.mrf.mxu2  ;;  %v2292_v11 = vpop.f32.mrf.mxu3  ;;  %2846 = vmatpush.msra.mxu1 %v2795_v20  ;;  %2972 = vmatpush.msra.mxu2 %v2795_v20  ;;  %v2597_v31 = vadd.f32 1.0, %v9304_v6  ;;  %v2618_v20 = vmul.f32 0.5, %v2594_v48 }
 0x3fb   :  { %v2500_v14 = vmul.f32 0.044715, %v2476_v21  ;;  %v2483_v18 = vmul.f32 %v2459_v58, %v11369_v47  ;;  %v2293_v0 = vadd.f32 %v2292_v11, %v2263_v51  ;;  %9305 = vtanh.f32 %v2552_v38  ;;  %v2792_v21 = vld [vmem:[%s14083_s15 + $0xa8] sm:$0xff] }
 0x3fc   :  { %v2326_v49 = vpop.f32.mrf.mxu0  ;;  %v2355_v12 = vpop.f32.mrf.mxu1  ;;  %2847 = vmatpush.msra.mxu1 %v2794_v56  ;;  %2973 = vmatpush.msra.mxu2 %v2794_v56  ;;  %9307 = vtanh.f32 %v2539_v28  ;;  %v1823_v58 = vadd.f32 %v11202_v60, %v11205_v44  ;;  %v11420_v28 = vmul.f32 %v11400_v50, %v11387_v9  ;;  %v2791_v60 = vld [vmem:[%s14083_s15 + $0xa0] sm:$0xff]  ;;  %v11451_v48 = vmul.f32 %v2618_v20, %v11291_v53 }
 0x3fd   :  { %v2507_v46 = vmul.f32 0.044715, %v2483_v18  ;;  %v2356_v19 = vadd.f32 %v2355_v12, %v2326_v49  ;;  %v2524_v59 = vadd.f32 %v2500_v14, %v11358_v63  ;;  %v11398_v1 = vadd.f32 %v2293_v0, %v11185_v57  ;;  %v11426_v44 = vpop.permute.xlu0 %2671 }
 0x3fe   :  { %2848 = vmatpush.msra.mxu1 %v2793_v30  ;;  %2974 = vmatpush.msra.mxu2 %v2793_v30  ;;  %9309 = vtanh.f32 %v2542_v10  ;;  %v2608_v14 = vmul.f32 0.5, %v2584_v3  ;;  %v2708_v0 = vmul.f32 %v11426_v44, %v11394_v4  ;;  %v11431_v49 = vmul.f32 %v2615_v61, %v11283_v23  ;;  %v2790_v10 = vld [vmem:[%s14083_s15 + $0x98] sm:$0xff]  ;;  %v2789_v23 = vld [vmem:[%s14083_s15 + $0x90] sm:$0xff] }
 0x3ff   :  { %v2531_v27 = vadd.f32 %v2507_v46, %v11369_v47  ;;  %v11403_v15 = vadd.f32 %v2356_v19, %v1883_v37  ;;  %v2455_v57 = vmul.f32 %v11398_v1, %v11398_v1  ;;  %v2548_v33 = vmul.f32 0.7978846, %v2524_v59  ;;  %v11439_v59 = vpop.permute.xlu1 %2676 }
 0x400   :  { %2849 = vmatpush.msra.mxu1 %v2792_v21  ;;  %2975 = vmatpush.msra.mxu2 %v2792_v21  ;;  %v2621_v12 = vmul.f32 0.5, %v2597_v31  ;;  %v11448_v30 = vmul.f32 %v2608_v14, %v11287_v29  ;;  %v2883_v31 = vmul.f32 %v2708_v0, %v11394_v4  ;;  %v2788_v29 = vld [vmem:[%s14083_s15 + $0x88] sm:$0xff]  ;;  %v2711_v53 = vmul.f32 %v11439_v59, %v11431_v49  ;;  %v2786_v14 = vld [vmem:[%s14083_s15 + $0x78] sm:$0xff] }
 0x401   :  { %v2555_v36 = vmul.f32 0.7978846, %v2531_v27  ;;  %v2462_v38 = vmul.f32 %v11403_v15, %v11403_v15  ;;  %v2479_v13 = vmul.f32 %v2455_v57, %v11398_v1  ;;  %v9306_v37 = vpop.eup %9305  ;;  %v2880_v27 = vmul.f32 %v11420_v28, %v11387_v9  ;;  %v11453_v57 = vpop.permute.xlu2 %2681  ;;  %2819 = vmatpush.msra.mxu0 %v2786_v14 }
 0x402   :  { %v2266_v51 = vpop.f32.mrf.mxu2  ;;  %v2295_v11 = vpop.f32.mrf.mxu3  ;;  %2850 = vmatpush.msra.mxu1 %v2791_v60  ;;  %2976 = vmatpush.msra.mxu2 %v2791_v60  ;;  %v2600_v46 = vadd.f32 1.0, %v9306_v37 }
 0x403   :  { %9311 = vtanh.f32 %v2555_v36  ;;  %v2486_v18 = vmul.f32 %v2462_v38, %v11403_v15  ;;  %v2503_v43 = vmul.f32 0.044715, %v2479_v13  ;;  %v2296_v17 = vadd.f32 %v2295_v11, %v2266_v51  ;;  %v9308_v26 = vpop.eup %9307 }
 0x404   :  { %9313 = vtanh.f32 %v2545_v16  ;;  %2851 = vmatpush.msra.mxu1 %v2790_v10  ;;  %v9310_v6 = vpop.eup %9309  ;;  %2977 = vmatpush.msra.mxu2 %v2790_v10  ;;  %v2587_v61 = vadd.f32 1.0, %v9308_v26  ;;  %v11464_v13 = vmul.f32 %v2621_v12, %v11312_v54  ;;  %v2624_v51 = vmul.f32 0.5, %v2600_v46 }
 0x405   :  { %v2510_v62 = vmul.f32 0.044715, %v2486_v18  ;;  %9315 = vtanh.f32 %v2548_v33  ;;  %v2527_v19 = vadd.f32 %v2503_v43, %v11398_v1  ;;  %v11437_v56 = vadd.f32 %v2296_v17, %v1823_v58  ;;  %v2787_v43 = vld [vmem:[%s14083_s15 + $0x80] sm:$0xff] }
 0x406   :  { %2852 = vmatpush.msra.mxu1 %v2789_v23  ;;  %2978 = vmatpush.msra.mxu2 %v2789_v23  ;;  %v2590_v33 = vadd.f32 1.0, %v9310_v6  ;;  %14130 = vst [vmem:[#allocation6_spill] sm:$0xff] %v11464_v13  ;;  %v11475_v17 = vmul.f32 %v11400_v50, %v11448_v30  ;;  %v2611_v26 = vmul.f32 0.5, %v2587_v61  ;;  %v2714_v12 = vmul.f32 %v11453_v57, %v11451_v48 }
 0x407   :  { %v2534_v3 = vadd.f32 %v2510_v62, %v11403_v15  ;;  %v2551_v36 = vmul.f32 0.7978846, %v2527_v19  ;;  %v2458_v21 = vmul.f32 %v11437_v56, %v11437_v56  ;;  %v2785_v62 = vld [vmem:[%s14083_s15 + $0x70] sm:$0xff]  ;;  %v2743_v23 = vadd.f32 %v2708_v0, %v11420_v28 }
 0x408   :  { %2853 = vmatpush.msra.mxu1 %v2788_v29  ;;  %2979 = vmatpush.msra.mxu2 %v2788_v29  ;;  %v2886_v61 = vmul.f32 %v2711_v53, %v11431_v49  ;;  %v2917_v0 = vadd.f32 %v2883_v31, %v2880_v27 }
 0x409   :  { %v9312_v16 = vpop.eup %9311  ;;  %v2558_v38 = vmul.f32 0.7978846, %v2534_v3  ;;  %9317 = vtanh.f32 %v2551_v36  ;;  %v2482_v60 = vmul.f32 %v2458_v21, %v11437_v56  ;;  %2820 = vmatpush.msra.mxu0 %v2785_v62  ;;  %v11485_v3 = vpop.permute.xlu0 %2686  ;;  %v11490_v36 = vmul.f32 %v2624_v51, %v11334_v41  ;;  %v2783_v51 = vld [vmem:[%s14083_s15 + $0x60] sm:$0xff] }
 0x40a   :  { %v9314_v58 = vpop.eup %9313  ;;  %v2268_v11 = vpop.f32.mrf.mxu2  ;;  %v2603_v18 = vadd.f32 1.0, %v9312_v16  ;;  %2854 = vmatpush.msra.mxu1 %v2787_v43  ;;  %v2614_v16 = vmul.f32 0.5, %v2590_v33  ;;  %2980 = vmatpush.msra.mxu2 %v2787_v43  ;;  %v11502_v41 = vmul.f32 %v11475_v17, %v11448_v30 }
 0x40b   :  { %v2297_v37 = vpop.f32.mrf.mxu3  ;;  %v9316_v54 = vpop.eup %9315  ;;  %9319 = vtanh.f32 %v2558_v38  ;;  %v2593_v10 = vadd.f32 1.0, %v9314_v58  ;;  %v2506_v19 = vmul.f32 0.044715, %v2482_v60  ;;  %v2784_v38 = vld [vmem:[%s14083_s15 + $0x68] sm:$0xff]  ;;  %v11505_v58 = vmul.f32 %v2611_v26, %v11308_v8 }
 0x40c   :  { %v2298_v20 = vadd.f32 %v2297_v37, %v2268_v11  ;;  %v2627_v46 = vmul.f32 0.5, %v2603_v18  ;;  %2945 = vmatpush.msrb.mxu1 %v2786_v14  ;;  %v2596_v21 = vadd.f32 1.0, %v9316_v54  ;;  %2821 = vmatpush.msra.mxu0 %v2784_v38  ;;  %v11513_v37 = vpop.permute.xlu1 %2691  ;;  %v2889_v14 = vmul.f32 %v2714_v12, %v11451_v48 }
 0x40d   :  { %v2530_v29 = vadd.f32 %v2506_v19, %v11437_v56  ;;  %v2617_v27 = vmul.f32 0.5, %v2593_v10  ;;  %v2744_v60 = vadd.f32 %v2743_v23, %v2711_v53  ;;  %v2720_v43 = vmul.f32 %v11513_v37, %v11490_v36  ;;  %v11529_v10 = vpop.permute.xlu2 %2696 }
 0x40e   :  { %v11483_v6 = vadd.f32 %v2298_v20, %v11211_v25  ;;  %v2717_v25 = vmul.f32 %v11485_v3, %v11464_v13  ;;  %2946 = vmatpush.msrb.mxu1 %v2785_v62  ;;  %v11508_v33 = vmul.f32 %v2627_v46, %v11369_v47  ;;  %2822 = vmatpush.msra.mxu0 %v2783_v51  ;;  %v2782_v62 = vld [vmem:[%s14083_s15 + $0x58] sm:$0xff]  ;;  %v2620_v53 = vmul.f32 0.5, %v2596_v21 }
 0x40f   :  { %v9318_v11 = vpop.eup %9317  ;;  %v2554_v31 = vmul.f32 0.7978846, %v2530_v29  ;;  %v2918_v20 = vadd.f32 %v2917_v0, %v2886_v61  ;;  %v11518_v47 = vmul.f32 %v2614_v16, %v11314_v34  ;;  %v2745_v34 = vadd.f32 %v2744_v60, %v2714_v12 }
 0x410   :  { %v2461_v28 = vmul.f32 %v11483_v6, %v11483_v6  ;;  %14131 = vst [vmem:[#allocation7_spill] sm:$0xff] %v11508_v33  ;;  %2947 = vmatpush.msrb.mxu1 %v2784_v38  ;;  %v2892_v46 = vmul.f32 %v2717_v25, %v11464_v13  ;;  %2823 = vmatpush.msra.mxu0 %v2782_v62  ;;  %v2599_v61 = vadd.f32 1.0, %v9318_v11  ;;  %v2781_v38 = vld [vmem:[%s14083_s15 + $0x50] sm:$0xff] }
 0x411   :  { %v9320_v8 = vpop.eup %9319  ;;  %9321 = vtanh.f32 %v2554_v31  ;;  %v2723_v23 = vmul.f32 %v11529_v10, %v11508_v33  ;;  %v2707_v29 = vmul.f32 %v11426_v44, %v11505_v58  ;;  %v11540_v21 = vmul.f32 %v2617_v27, %v11325_v39  ;;  %v11555_v27 = vpop.permute.xlu0 %2701 }
 0x412   :  { %v2485_v18 = vmul.f32 %v2461_v28, %v11483_v6  ;;  %v11522_v54 = vpop.f32.mrf.mxu2  ;;  %v2606_v19 = vadd.f32 1.0, %v9320_v8  ;;  %2948 = vmatpush.msrb.mxu1 %v2783_v51  ;;  %v2919_v28 = vadd.f32 %v2918_v20, %v2889_v14  ;;  %2824 = vmatpush.msra.mxu0 %v2781_v38  ;;  %v2710_v12 = vmul.f32 %v11439_v59, %v11518_v47 }
 0x413   :  { %v11524_v26 = vpop.f32.mrf.mxu3  ;;  %v2746_v51 = vadd.f32 %v2745_v34, %v2717_v25  ;;  %v2895_v11 = vmul.f32 %v2720_v43, %v11490_v36  ;;  %v11550_v14 = vmul.f32 %v2620_v53, %v11358_v63  ;;  %v2898_v60 = vmul.f32 %v2723_v23, %v11508_v33 }
 0x414   :  { %v2509_v16 = vmul.f32 0.044715, %v2485_v18  ;;  %v2630_v0 = vmul.f32 0.5, %v2606_v19  ;;  %2949 = vmatpush.msrb.mxu1 %v2782_v62  ;;  %v2780_v18 = vld [vmem:[%s14083_s15 + $0x48] sm:$0xff]  ;;  %v2920_v8 = vadd.f32 %v2919_v28, %v2892_v46  ;;  %v2623_v20 = vmul.f32 0.5, %v2599_v61  ;;  %v2779_v46 = vld [vmem:[%s14083_s15 + $0x40] sm:$0xff] }
 0x415   :  { %2825 = vmatpush.msra.mxu0 %v2780_v18  ;;  %v2747_v25 = vadd.f32 %v2746_v51, %v2720_v43  ;;  %v2882_v63 = vmul.f32 %v2707_v29, %v11505_v58  ;;  %v2778_v28 = vld [vmem:[%s14083_s15 + $0x38] sm:$0xff]  ;;  %v2716_v51 = vmul.f32 %v11485_v3, %v11550_v14 }
 0x416   :  { %v2533_v31 = vadd.f32 %v2509_v16, %v11483_v6  ;;  %v11553_v39 = vmul.f32 %v2630_v0, %v11403_v15  ;;  %2950 = vmatpush.msrb.mxu1 %v2781_v38  ;;  %v2713_v15 = vmul.f32 %v11453_v57, %v11540_v21  ;;  %v2921_v43 = vadd.f32 %v2920_v8, %v2895_v11 }
 0x417   :  { %v9322_v19 = vpop.eup %9321  ;;  %2826 = vmatpush.msra.mxu0 %v2779_v46  ;;  %v2748_v34 = vadd.f32 %v2747_v25, %v2723_v23  ;;  %v2885_v0 = vmul.f32 %v2710_v12, %v11518_v47  ;;  %v11575_v11 = vmul.f32 %v2623_v20, %v11398_v1  ;;  %v2777_v25 = vld [vmem:[%s14083_s15 + $0x30] sm:$0xff] }
 0x418   :  { %v2557_v62 = vmul.f32 0.7978846, %v2533_v31  ;;  %v2726_v53 = vmul.f32 %v11555_v27, %v11553_v39  ;;  %2951 = vmatpush.msrb.mxu1 %v2780_v18  ;;  %v2602_v16 = vadd.f32 1.0, %v9322_v19  ;;  %v2922_v23 = vadd.f32 %v2921_v43, %v2898_v60 }
 0x419   :  { %2827 = vmatpush.msra.mxu0 %v2778_v28  ;;  %v2903_v19 = vadd.f32 %v2882_v63, %v11502_v41  ;;  %v2891_v41 = vmul.f32 %v2716_v51, %v11550_v14 }
 0x41a   :  { %9323 = vtanh.f32 %v2557_v62  ;;  %v2369_v61 = vpop.f32.mrf.mxu2  ;;  %v2749_v31 = vsel %vm2734_vm12, %v2726_v53, 0.0  ;;  %v2901_v33 = vmul.f32 %v2726_v53, %v11553_v39  ;;  %2952 = vmatpush.msrb.mxu1 %v2779_v46  ;;  %v2626_v18 = vmul.f32 0.5, %v2602_v16  ;;  %v2776_v53 = vld [vmem:[%s14083_s15 + $0x28] sm:$0xff] }
 0x41b   :  { %v2398_v38 = vpop.f32.mrf.mxu3  ;;  %v2750_v8 = vadd.f32 %v2749_v31, %v2748_v34  ;;  %v2728_v62 = vadd.f32 %v2707_v29, %v11475_v17  ;;  %2828 = vmatpush.msra.mxu0 %v2777_v25  ;;  %v2888_v46 = vmul.f32 %v2713_v15, %v11540_v21  ;;  %v2904_v34 = vadd.f32 %v2903_v19, %v2885_v0 }
 0x41c   :  { %v2923_v13 = vsel %vm2734_vm12, %v2901_v33, 0.0  ;;  %2953 = vmatpush.msrb.mxu1 %v2778_v28  ;;  %v11585_v60 = vmul.f32 %v2626_v18, %v11437_v56  ;;  %v2719_v33 = vmul.f32 %v11513_v37, %v11575_v11  ;;  %v2775_v56 = vld [vmem:[%s14083_s15 + $0x20] sm:$0xff] }
 0x41d   :  { %v2751_v1 = vrot.slane %v2750_v8, 4  ;;  %v2924_v20 = vadd.f32 %v2923_v13, %v2922_v23  ;;  %v2729_v43 = vadd.f32 %v2728_v62, %v2710_v12  ;;  %2829 = vmatpush.msra.mxu0 %v2776_v53  ;;  %v2905_v12 = vadd.f32 %v2904_v34, %v2888_v46 }
 0x41e   :  { %2954 = vmatpush.msrb.mxu1 %v2777_v25  ;;  %v2722_v28 = vmul.f32 %v11529_v10, %v11585_v60  ;;  %v2894_v19 = vmul.f32 %v2719_v33, %v11575_v11  ;;  %v2399_v34 = vadd.f32 %v2398_v38, %v2369_v61 }
 0x41f   :  { %v2752_v29 = vadd.f32 %v2751_v1, %v2750_v8  ;;  %v2925_v63 = vrot.slane %v2924_v20, 4  ;;  %v2730_v13 = vadd.f32 %v2729_v43, %v2713_v15  ;;  %2830 = vmatpush.msra.mxu0 %v2775_v56  ;;  %v2774_v8 = vld [vmem:[%s14083_s15 + $0x18] sm:$0xff]  ;;  %v2906_v15 = vadd.f32 %v2905_v12, %v2891_v41 }
 0x420   :  { %v9324_v17 = vpop.eup %9323  ;;  %2955 = vmatpush.msrb.mxu1 %v2776_v53  ;;  %v2773_v53 = vld [vmem:[%s14083_s15 + $0x10] sm:$0xff] }
 0x421   :  { %v2605_v16 = vadd.f32 1.0, %v9324_v17  ;;  %v2753_v23 = vrot.slane %v2752_v29, 2  ;;  %v2926_v18 = vadd.f32 %v2925_v63, %v2924_v20  ;;  %v2731_v25 = vadd.f32 %v2730_v13, %v2716_v51  ;;  %2831 = vmatpush.msra.mxu0 %v2774_v8 }
 0x422   :  { %v2372_v0 = vpop.f32.mrf.mxu2  ;;  %2956 = vmatpush.msrb.mxu1 %v2775_v56  ;;  %v2397_v20 = vadd.f32 %v11524_v26, %v11522_v54  ;;  %v2897_v17 = vmul.f32 %v2722_v28, %v11585_v60  ;;  %v1924_v56 = vadd.f32 %v11216_v2, %v11219_v22  ;;  %v2907_v54 = vadd.f32 %v2906_v15, %v2894_v19 }
 0x423   :  { %v2401_v31 = vpop.f32.mrf.mxu3  ;;  %v2629_v62 = vmul.f32 0.5, %v2605_v16  ;;  %v2754_v1 = vadd.f32 %v2753_v23, %v2752_v29  ;;  %v2927_v46 = vrot.slane %v2926_v18, 2  ;;  %2832 = vmatpush.msra.mxu0 %v2773_v53  ;;  %v2732_v51 = vadd.f32 %v2731_v25, %v2719_v33  ;;  %v2772_v29 = vld [vmem:[%s14083_s15 + $0x8] sm:$0xff]  ;;  %v2771_v33 = vld [vmem:[%s14083_s15] sm:$0xff] }
 0x424   :  { %2957 = vmatpush.msrb.mxu1 %v2774_v8  ;;  %v2402_v13 = vadd.f32 %v2401_v31, %v2372_v0  ;;  %v1929_v16 = vadd.f32 %v11227_v32, %v11230_v35  ;;  %v11626_v22 = vadd.f32 %v2399_v34, %v11222_v7  ;;  %v2908_v0 = vadd.f32 %v2907_v54, %v2897_v17 }
 0x425   :  { %v11606_v43 = vmul.f32 %v2629_v62, %v11483_v6  ;;  %v2755_v41 = vrot.slane %v2754_v1, 1  ;;  %v2928_v63 = vadd.f32 %v2927_v46, %v2926_v18  ;;  %2833 = vmatpush.msra.mxu0 %v2772_v29  ;;  %v2733_v26 = vadd.f32 %v2732_v51, %v2722_v28 }
 0x426   :  { %2958 = vmatpush.msrb.mxu1 %v2773_v53  ;;  %v11628_v28 = vadd.f32 %v2397_v20, %v1924_v56  ;;  %v11631_v32 = vadd.f32 %v2402_v13, %v1929_v16  ;;  %v2445_v15 = vmul.f32 %v11626_v22, %v11626_v22 }
 0x427   :  { %v2725_v6 = vmul.f32 %v11555_v27, %v11606_v43  ;;  %v2756_v61 = vadd.f32 %v2755_v41, %v2754_v1  ;;  %v2929_v38 = vrot.slane %v2928_v63, 1  ;;  %2834 = vmatpush.msra.mxu0 %v2771_v33 }
 0x428   :  { %2959 = vmatpush.msrb.mxu1 %v2772_v29  ;;  %v2442_v19 = vmul.f32 %v11628_v28, %v11628_v28  ;;  %v2448_v20 = vmul.f32 %v11631_v32, %v11631_v32  ;;  %v2469_v17 = vmul.f32 %v2445_v15, %v11626_v22 }
 0x429   :  { %v2735_v12 = vsel %vm2734_vm12, %v2725_v6, 0.0  ;;  %v2900_v2 = vmul.f32 %v2725_v6, %v11606_v43  ;;  %2855 = vmatmul.f32.vlgmr.msra.gmra.mxu1 %v2756_v61  ;;  %v2930_v18 = vadd.f32 %v2929_v38, %v2928_v63 }
 0x42a   :  { %v2374_v31 = vpop.f32.mrf.mxu2  ;;  %v2736_v8 = vadd.f32 %v2735_v12, %v2733_v26  ;;  %2960 = vmatpush.msrb.mxu1 %v2771_v33  ;;  %v2466_v41 = vmul.f32 %v2442_v19, %v11628_v28  ;;  %v2472_v54 = vmul.f32 %v2448_v20, %v11631_v32  ;;  %v2493_v33 = vmul.f32 0.044715, %v2469_v17 }
 0x42b   :  { %v2403_v23 = vpop.f32.mrf.mxu3  ;;  %v2909_v25 = vsel %vm2734_vm12, %v2900_v2, 0.0  ;;  %2981 = vmatmul.f32.vlgmr.msra.gmra.mxu2 %v2930_v18 }
 0x42c   :  { %v2404_v35 = vadd.f32 %v2403_v23, %v2374_v31  ;;  %v2737_v62 = vrot.slane %v2736_v8, 4  ;;  %v2910_v7 = vadd.f32 %v2909_v25, %v2908_v0  ;;  %v2490_v12 = vmul.f32 0.044715, %v2466_v41 }
 0x42d   :  { %v2496_v23 = vmul.f32 0.044715, %v2472_v54 }
 0x42e   :  { %v11638_v1 = vadd.f32 %v2404_v35, %v11233_v40  ;;  %v2738_v46 = vadd.f32 %v2737_v62, %v2736_v8  ;;  %v2911_v53 = vrot.slane %v2910_v7, 4  ;;  %v1934_v40 = vadd.f32 %v11238_v24, %v11240_v55 }
 0x42f   :  { %v2517_v24 = vadd.f32 %v2493_v33, %v11626_v22  ;;  %v2514_v25 = vadd.f32 %v2490_v12, %v11628_v28  ;;  %v2520_v15 = vadd.f32 %v2496_v23, %v11631_v32 }
 0x430   :  { %v2739_v34 = vrot.slane %v2738_v46, 2  ;;  %v2912_v51 = vadd.f32 %v2911_v53, %v2910_v7  ;;  %v2451_v63 = vmul.f32 %v11638_v1, %v11638_v1 }
 0x431   :  { %v2541_v53 = vmul.f32 0.7978846, %v2517_v24  ;;  %v2544_v17 = vmul.f32 0.7978846, %v2520_v15  ;;  %v2817_v24 = vld [vmem:[%s14083_s15 + $0x170] sm:$0xff]  ;;  %v2816_v15 = vld [vmem:[%s14083_s15 + $0x168] sm:$0xff] }
 0x432   :  { %v2377_v29 = vpop.f32.mrf.mxu2  ;;  %v2740_v6 = vadd.f32 %v2739_v34, %v2738_v46  ;;  %v2913_v13 = vrot.slane %v2912_v51, 2  ;;  %v2475_v2 = vmul.f32 %v2451_v63, %v11638_v1  ;;  %v2538_v34 = vmul.f32 0.7978846, %v2514_v25 }
 0x433   :  { %v2406_v56 = vpop.f32.mrf.mxu3  ;;  %9325 = vtanh.f32 %v2541_v53 }
 0x434   :  { %v2407_v26 = vadd.f32 %v2406_v56, %v2377_v29  ;;  %v2741_v61 = vrot.slane %v2740_v6, 1  ;;  %v2914_v38 = vadd.f32 %v2913_v13, %v2912_v51  ;;  %v2499_v35 = vmul.f32 0.044715, %v2475_v2 }
 0x435   :  { %9327 = vtanh.f32 %v2538_v34 }
 0x436   :  { %v11649_v16 = vadd.f32 %v2407_v26, %v1934_v40  ;;  %v2742_v0 = vadd.f32 %v2741_v61, %v2740_v6  ;;  %v2915_v31 = vrot.slane %v2914_v38, 1  ;;  %v2523_v51 = vadd.f32 %v2499_v35, %v11638_v1 }
 0x437   :  { %9329 = vtanh.f32 %v2544_v17 }
 0x438   :  { %v2454_v18 = vmul.f32 %v11649_v16, %v11649_v16  ;;  %2835 = vmatmul.f32.vlgmr.msra.gmra.mxu0 %v2742_v0  ;;  %v2916_v8 = vadd.f32 %v2915_v31, %v2914_v38  ;;  %v2547_v56 = vmul.f32 0.7978846, %v2523_v51  ;;  %v2815_v51 = vld [vmem:[%s14083_s15 + $0x160] sm:$0xff] }
 0x439   :  { %v9326_v33 = vpop.eup %9325 }
 0x43a   :  { %v2478_v55 = vmul.f32 %v2454_v18, %v11649_v16  ;;  %2961 = vmatmul.f32.vlgmr.msrb.gmra.mxu1 %v2916_v8  ;;  %v2379_v62 = vpop.f32.mrf.mxu2  ;;  %9331 = vtanh.f32 %v2547_v56  ;;  %v2818_v8 = vld [vmem:[%s14083_s15 + $0x178] sm:$0xff] }
 0x43b   :  { %v2408_v7 = vpop.f32.mrf.mxu3  ;;  %v9328_v0 = vpop.eup %9327  ;;  %2859 = vmatpush.msrb.mxu0 %v2818_v8  ;;  %2985 = vmatpush.msra.mxu3 %v2818_v8 }
 0x43c   :  { %v2409_v19 = vadd.f32 %v2408_v7, %v2379_v62  ;;  %v2502_v46 = vmul.f32 0.044715, %v2478_v55  ;;  %v2586_v62 = vadd.f32 1.0, %v9328_v0 }
 0x43d   :  { %v9330_v31 = vpop.eup %9329  ;;  %2860 = vmatpush.msrb.mxu0 %v2817_v24  ;;  %2986 = vmatpush.msra.mxu3 %v2817_v24 }
 0x43e   :  { %v11659_v20 = vadd.f32 %v2409_v19, %v11243_v45  ;;  %v2526_v63 = vadd.f32 %v2502_v46, %v11649_v16  ;;  %v1939_v45 = vadd.f32 %v11250_v52, %v11252_v5  ;;  %v2589_v52 = vadd.f32 1.0, %v9326_v33 }
 0x43f   :  { %v2592_v7 = vadd.f32 1.0, %v9330_v31  ;;  %2861 = vmatpush.msrb.mxu0 %v2816_v15  ;;  %2987 = vmatpush.msra.mxu3 %v2816_v15  ;;  %v2610_v56 = vmul.f32 0.5, %v2586_v62  ;;  %v2808_v15 = vld [vmem:[%s14083_s15 + $0x128] sm:$0xff] }
 0x440   :  { %v2457_v41 = vmul.f32 %v11659_v20, %v11659_v20  ;;  %v2550_v26 = vmul.f32 0.7978846, %v2526_v63  ;;  %v9332_v35 = vpop.eup %9331  ;;  %v2613_v34 = vmul.f32 0.5, %v2589_v52 }
 0x441   :  { %v2595_v17 = vadd.f32 1.0, %v9332_v35  ;;  %2862 = vmatpush.msrb.mxu0 %v2815_v51  ;;  %2988 = vmatpush.msra.mxu3 %v2815_v51 }
 0x442   :  { %v2481_v29 = vmul.f32 %v2457_v41, %v11659_v20  ;;  %v2382_v6 = vpop.f32.mrf.mxu2  ;;  %9333 = vtanh.f32 %v2550_v26 }
 0x443   :  { %v2411_v13 = vpop.f32.mrf.mxu3  ;;  %v2619_v26 = vmul.f32 0.5, %v2595_v17 }
 0x444   :  { %v2505_v40 = vmul.f32 0.044715, %v2481_v29  ;;  %v2412_v54 = vadd.f32 %v2411_v13, %v2382_v6  ;;  %v2616_v6 = vmul.f32 0.5, %v2592_v7 }
 0x446   :  { %v2529_v61 = vadd.f32 %v2505_v40, %v11659_v20  ;;  %v11669_v38 = vadd.f32 %v2412_v54, %v1939_v45  ;;  %v11697_v40 = vmul.f32 %v2613_v34, %v11626_v22  ;;  %v2813_v54 = vld [vmem:[%s14083_s15 + $0x150] sm:$0xff]  ;;  %v2812_v22 = vld [vmem:[%s14083_s15 + $0x148] sm:$0xff] }
 0x448   :  { %v2553_v12 = vmul.f32 0.7978846, %v2529_v61  ;;  %v2460_v2 = vmul.f32 %v11669_v38, %v11669_v38  ;;  %v9334_v53 = vpop.eup %9333 }
 0x449   :  { %v2598_v13 = vadd.f32 1.0, %v9334_v53 }
 0x44a   :  { %v2484_v23 = vmul.f32 %v2460_v2, %v11669_v38  ;;  %9335 = vtanh.f32 %v2553_v12  ;;  %v2384_v5 = vpop.f32.mrf.mxu2  ;;  %v11703_v12 = vmul.f32 %v2610_v56, %v11628_v28  ;;  %v11706_v2 = vmul.f32 %v2616_v6, %v11631_v32  ;;  %v2811_v28 = vld [vmem:[%s14083_s15 + $0x140] sm:$0xff] }
 0x44b   :  { %v2413_v18 = vpop.f32.mrf.mxu3  ;;  %v2622_v0 = vmul.f32 0.5, %v2598_v13  ;;  %v11718_v32 = vmul.f32 %v2619_v26, %v11638_v1 }
 0x44c   :  { %v2508_v55 = vmul.f32 0.044715, %v2484_v23  ;;  %v2414_v25 = vadd.f32 %v2413_v18, %v2384_v5  ;;  %v2709_v23 = vmul.f32 %v11426_v44, %v11697_v40  ;;  %v2706_v8 = vmul.f32 %v11400_v50, %v11703_v12  ;;  %v2810_v44 = vld [vmem:[%s14083_s15 + $0x138] sm:$0xff]  ;;  %v2809_v50 = vld [vmem:[%s14083_s15 + $0x130] sm:$0xff] }
 0x44d   :  { %v2712_v24 = vmul.f32 %v11439_v59, %v11706_v2  ;;  %v2715_v59 = vmul.f32 %v11453_v57, %v11718_v32 }
 0x44e   :  { %v2532_v19 = vadd.f32 %v2508_v55, %v11669_v38  ;;  %v11685_v46 = vadd.f32 %v2414_v25, %v11257_v42  ;;  %v2814_v42 = vld [vmem:[%s14083_s15 + $0x158] sm:$0xff]  ;;  %v11728_v25 = vmul.f32 %v2622_v0, %v11649_v16  ;;  %v2884_v1 = vmul.f32 %v2709_v23, %v11697_v40 }
 0x44f   :  { %2863 = vmatpush.msrb.mxu0 %v2814_v42  ;;  %2989 = vmatpush.msra.mxu3 %v2814_v42  ;;  %v2881_v16 = vmul.f32 %v2706_v8, %v11703_v12  ;;  %v2887_v7 = vmul.f32 %v2712_v24, %v11706_v2 }
 0x450   :  { %v2556_v41 = vmul.f32 0.7978846, %v2532_v19  ;;  %v2463_v63 = vmul.f32 %v11685_v46, %v11685_v46  ;;  %v9336_v29 = vpop.eup %9335  ;;  %v2757_v19 = vadd.f32 %v2709_v23, %v2706_v8  ;;  %v2718_v53 = vmul.f32 %v11485_v3, %v11728_v25  ;;  %v2803_v23 = vld [vmem:[%s14083_s15 + $0x100] sm:$0xff] }
 0x451   :  { %v2601_v61 = vadd.f32 1.0, %v9336_v29  ;;  %2864 = vmatpush.msrb.mxu0 %v2813_v54  ;;  %2990 = vmatpush.msra.mxu3 %v2813_v54  ;;  %v2931_v57 = vadd.f32 %v2884_v1, %v2881_v16 }
 0x452   :  { %9337 = vtanh.f32 %v2556_v41  ;;  %v2487_v45 = vmul.f32 %v2463_v63, %v11685_v46  ;;  %v2758_v17 = vadd.f32 %v2757_v19, %v2712_v24  ;;  %v2890_v41 = vmul.f32 %v2715_v59, %v11718_v32 }
 0x453   :  { %v2625_v5 = vmul.f32 0.5, %v2601_v61  ;;  %2865 = vmatpush.msrb.mxu0 %v2812_v22  ;;  %2991 = vmatpush.msra.mxu3 %v2812_v22  ;;  %v2932_v3 = vadd.f32 %v2931_v57, %v2887_v7  ;;  %v2893_v6 = vmul.f32 %v2718_v53, %v11728_v25 }
 0x454   :  { %v2511_v33 = vmul.f32 0.044715, %v2487_v45  ;;  %v2759_v56 = vadd.f32 %v2758_v17, %v2715_v59 }
 0x455   :  { %2866 = vmatpush.msrb.mxu0 %v2811_v28  ;;  %2992 = vmatpush.msra.mxu3 %v2811_v28  ;;  %v11737_v62 = vmul.f32 %v2625_v5, %v11659_v20  ;;  %v2807_v20 = vld [vmem:[%s14083_s15 + $0x120] sm:$0xff]  ;;  %v2933_v45 = vadd.f32 %v2932_v3, %v2890_v41 }
 0x456   :  { %v2535_v31 = vadd.f32 %v2511_v33, %v11685_v46  ;;  %v2760_v54 = vadd.f32 %v2759_v56, %v2718_v53 }
 0x457   :  { %2867 = vmatpush.msrb.mxu0 %v2810_v44  ;;  %2993 = vmatpush.msra.mxu3 %v2810_v44  ;;  %v2721_v63 = vmul.f32 %v11513_v37, %v11737_v62  ;;  %v2805_v37 = vld [vmem:[%s14083_s15 + $0x110] sm:$0xff]  ;;  %v2934_v33 = vadd.f32 %v2933_v45, %v2893_v6 }
 0x458   :  { %v9338_v52 = vpop.eup %9337  ;;  %v2559_v18 = vmul.f32 0.7978846, %v2535_v31 }
 0x459   :  { %v2604_v55 = vadd.f32 1.0, %v9338_v52  ;;  %2868 = vmatpush.msrb.mxu0 %v2809_v50  ;;  %2994 = vmatpush.msra.mxu3 %v2809_v50  ;;  %v2896_v26 = vmul.f32 %v2721_v63, %v11737_v62  ;;  %v2761_v22 = vadd.f32 %v2760_v54, %v2721_v63  ;;  %v3038_v54 = vld [vmem:[%s14132_s10 + $0x8] sm:$0xff] }
 0x45a   :  { %9339 = vtanh.f32 %v2559_v18 }
 0x45b   :  { %v2628_v35 = vmul.f32 0.5, %v2604_v55  ;;  %2869 = vmatpush.msrb.mxu0 %v2808_v15  ;;  %2995 = vmatpush.msra.mxu3 %v2808_v15  ;;  %v2935_v28 = vadd.f32 %v2934_v33, %v2896_v26 }
 0x45d   :  { %v11747_v34 = vmul.f32 %v2628_v35, %v11669_v38  ;;  %v2806_v38 = vld [vmem:[%s14083_s15 + $0x118] sm:$0xff]  ;;  %2870 = vmatpush.msrb.mxu0 %v2807_v20  ;;  %2996 = vmatpush.msra.mxu3 %v2807_v20  ;;  %v9413_v20 = vmov 1152.0  }
 0x45e   :  { %9341 = vrcp.f32 %v9413_v20 }
 0x45f   :  { %v2724_v42 = vmul.f32 %v11529_v10, %v11747_v34  ;;  %2871 = vmatpush.msrb.mxu0 %v2806_v38  ;;  %2997 = vmatpush.msra.mxu3 %v2806_v38  ;;  %v2804_v10 = vld [vmem:[%s14083_s15 + $0x108] sm:$0xff]  ;;  %s14137_s15 = sld [smem:[#allocation20_spill]] }
 0x460   :  { %v9340_v51 = vpop.eup %9339 }
 0x461   :  { %v2607_v29 = vadd.f32 1.0, %v9340_v51  ;;  %v2899_v0 = vmul.f32 %v2724_v42, %v11747_v34  ;;  %2872 = vmatpush.msrb.mxu0 %v2805_v37  ;;  %2998 = vmatpush.msra.mxu3 %v2805_v37  ;;  %v3037_v37 = vld [vmem:[%s14132_s10] sm:$0xff] }
 0x463   :  { %v2631_v13 = vmul.f32 0.5, %v2607_v29  ;;  %2873 = vmatpush.msrb.mxu0 %v2804_v10  ;;  %2999 = vmatpush.msra.mxu3 %v2804_v10  ;;  %v2936_v18 = vadd.f32 %v2935_v28, %v2899_v0 }
 0x464   :  { %v9342_v51 = vpop.eup %9341 }
 0x465   :  { %v11766_v61 = vmul.f32 %v2631_v13, %v11685_v46  ;;  %v2762_v46 = vadd.f32 %v2761_v22, %v2724_v42  ;;  %2874 = vmatpush.msrb.mxu0 %v2803_v23  ;;  %3000 = vmatpush.msra.mxu3 %v2803_v23  ;;  %v3006_v17 = vmul.f32 1152.0, %v9342_v51  ;;  %vm3010_vm13 = vweird.f32 %v9342_v51  ;;  %v3040_v42 = vld [vmem:[%s14132_s10 + $0x18] sm:$0xff]  ;;  %v3041_v13 = vld [vmem:[%s14132_s10 + $0x20] sm:$0xff] }
 0x466   :  { %3081 = vmatpush.msra.mxu1 %v3041_v13 }
 0x467   :  { %v2727_v31 = vmul.f32 %v11555_v27, %v11766_v61  ;;  %v3007_v63 = vsub.f32 1.0, %v3006_v17  ;;  %3061 = vmatpush.msra.mxu0 %v3040_v42 }
 0x468   :  { %3082 = vmatpush.msra.mxu1 %v3038_v54 }
 0x469   :  { %v2763_v52 = vsel %vm2734_vm12, %v2727_v31, 0.0  ;;  %v2902_v5 = vmul.f32 %v2727_v31, %v11766_v61  ;;  %v3008_v29 = vmul.f32 %v9342_v51, %v3007_v63  ;;  %3062 = vmatpush.msra.mxu0 %v3037_v37 }
 0x46a   :  { %v2764_v8 = vadd.f32 %v2763_v52, %v2762_v46 }
 0x46b   :  { %v2937_v24 = vsel %vm2734_vm12, %v2902_v5, 0.0  ;;  %v3009_v56 = vadd.f32 %v9342_v51, %v3008_v29  ;;  %v3042_v5 = vld [vmem:[%s14132_s10 + $0x28] sm:$0xff] }
 0x46c   :  { %v2765_v55 = vrot.slane %v2764_v8, 4  ;;  %v2938_v27 = vadd.f32 %v2937_v24, %v2936_v18  ;;  %v3039_v18 = vld [vmem:[%s14132_s10 + $0x10] sm:$0xff] }
 0x46d   :  { %v3011_v10 = vsel %vm3010_vm13, %v9342_v51, %v3009_v56 }
 0x46e   :  { %v2766_v44 = vadd.f32 %v2765_v55, %v2764_v8  ;;  %v2939_v1 = vrot.slane %v2938_v27, 4 }
 0x470   :  { %v2767_v35 = vrot.slane %v2766_v44, 2  ;;  %v2940_v50 = vadd.f32 %v2939_v1, %v2938_v27 }
 0x472   :  { %v2768_v59 = vadd.f32 %v2767_v35, %v2766_v44  ;;  %v2941_v16 = vrot.slane %v2940_v50, 2 }
 0x474   :  { %v2769_v7 = vrot.slane %v2768_v59, 1  ;;  %v2942_v15 = vadd.f32 %v2941_v16, %v2940_v50 }
 0x476   :  { %v2770_v19 = vadd.f32 %v2769_v7, %v2768_v59  ;;  %v2943_v53 = vrot.slane %v2942_v15, 1  ;;  %v3017_v59 = vld [vmem:[%s14133_s8] sm:$0x1] }
 0x478   :  { %2875 = vmatmul.f32.vlgmr.msrb.gmra.mxu0 %v2770_v19  ;;  %v2944_v57 = vadd.f32 %v2943_v53, %v2942_v15  ;;  %v3030_v15 = vld [vmem:[%s14133_s8 + $0x1] sm:$0x1] }
 0x479   :  { %3101 = vmatpush.msrb.mxu0 %v3042_v5 }
 0x47a   :  { %3001 = vmatmul.f32.vlgmr.msra.gmra.mxu3 %v2944_v57 }
 0x47b   :  { %3102 = vmatpush.msrb.mxu0 %v3039_v18 }
 0x4a6   :  { %v2856_v3 = vpop.f32.mrf.mxu1 }
 0x4ae   :  { %v2982_v33 = vpop.f32.mrf.mxu2 }
 0x4b5   :  { %v2836_v41 = vpop.f32.mrf.mxu0 }
 0x4b6   :  { %v2857_v6 = vadd.f32 %v2856_v3, %v2836_v41 }
 0x4b7   :  { %v2962_v26 = vpop.f32.mrf.mxu1 }
 0x4b8   :  { %v2983_v22 = vadd.f32 %v2982_v33, %v2962_v26 }
 0x4f5   :  { %v2876_v38 = vpop.f32.mrf.mxu0 }
 0x4f6   :  { %v2877_v45 = vadd.f32 %v2876_v38, %v2857_v6 }
 0x4f8   :  { %v3012_v0 = vmul.f32 %v3011_v10, %v2877_v45 }
 0x4fa   :  { %v3014_v28 = vmul.f32 %v3012_v0, %v3012_v0 }
 0x4fd   :  { %v3002_v31 = vpop.f32.mrf.mxu3 }
 0x4fe   :  { %v3003_v23 = vadd.f32 %v3002_v31, %v2983_v22 }
 0x500   :  { %v3013_v46 = vmul.f32 %v3011_v10, %v3003_v23 }
 0x502   :  { %v3015_v52 = vsub.f32 %v3013_v46, %v3014_v28 }
 0x504   :  { %v3016_v8 = vmax.f32 %v3015_v52, 0.0 }
 0x506   :  { %v3018_v24 = vadd.f32 1e-05, %v3016_v8 }
 0x508   :  { %9343 = vrsqrt.f32 %v3018_v24  ;;  %vm3025_vm15 = vweird.f32 %v3018_v24 }
 0x50e   :  { %v9344_v55 = vpop.eup %9343 }
 0x50f   :  { %v3020_v27 = vmul.f32 %v9344_v55, %v3018_v24  ;;  %vm3026_vm14 = vweird.f32 %v9344_v55 }
 0x510   :  { %vm3027_vm2 = vmor %vm3025_vm15, %vm3026_vm14  ;;  %vm5501_vm14 = vcmask 261120   ;;  %vm5631_vm15 = vcmask 785408  }
 0x511   :  { %v3021_v44 = vmul.f32 %v9344_v55, %v3020_v27 }
 0x513   :  { %v3022_v1 = vmul.f32 0.5, %v3021_v44 }
 0x515   :  { %v3023_v35 = vsub.f32 1.5, %v3022_v1 }
 0x517   :  { %v3024_v50 = vmul.f32 %v9344_v55, %v3023_v35 }
 0x519   :  { %v3028_v16 = vsel %vm3027_vm2, %v9344_v55, %v3024_v50 }
 0x51a   :  { %v3029_v7 = vmul.f32 %v3028_v16, %v3017_v59 }
 0x51c   :  { %v3031_v19 = vmul.f32 %v3029_v7, %v3012_v0 }
 0x51e   :  { %v3032_v53 = vsub.f32 %v3030_v15, %v3031_v19  ;;  %v14135_v15 = vld [vmem:[#allocation7_spill] sm:$0xff] }
 0x520   :  { %v3034_v57 = vrot.slane %v3032_v53, 7 }
 0x522   :  { %v3036_v20 = vsel %vm896_vm10, %v3029_v7, %v3034_v57 }
 0x523   :  { %7600 = vmatmul.msk.f32.vlgmr.msra.gmra.mxu0 %vm3043_vm4, %v3036_v20  ;;  %7601 = vmatmul.msk.f32.vlgmr.msra.gmra.mxu1 %vm3043_vm4, %v3036_v20 }
 0x52b   :  { %7602 = vmatmul.msk.f32.vlgmr.msrb.gmra.mxu0 %vm3043_vm4, %v3036_v20 }
 0x5a0   :  { %v3064_v51 = vpop.f32.mrf.mxu0  ;;  %v3084_v17 = vpop.f32.mrf.mxu1 }
 0x5a1   :  { %v3107_v41 = vperm.slane %v3064_v51, 0  ;;  %v3108_v63 = vperm.slane %v3084_v17, 0  ;;  %v3134_v3 = vperm.slane %v3064_v51, 1  ;;  %v3135_v29 = vperm.slane %v3084_v17, 1 }
 0x5a3   :  { %v3113_v38 = vmul.f32 %v3107_v41, %v11505_v58  ;;  %v3114_v56 = vmul.f32 %v3108_v63, %v11394_v4  ;;  %v3110_v6 = vmul.f32 %v3107_v41, %v11448_v30  ;;  %v3111_v42 = vmul.f32 %v3108_v63, %v11387_v9 }
 0x5a4   :  { %v3119_v26 = vmul.f32 %v3107_v41, %v11540_v21  ;;  %v3120_v10 = vmul.f32 %v3108_v63, %v11451_v48  ;;  %v3116_v58 = vmul.f32 %v3107_v41, %v11518_v47  ;;  %v3117_v30 = vmul.f32 %v3108_v63, %v11431_v49 }
 0x5a5   :  { %v11809_v13 = vadd.f32 %v3134_v3, %v3113_v38  ;;  %v11811_v37 = vadd.f32 %v3135_v29, %v3114_v56  ;;  %v11813_v45 = vadd.f32 %v3134_v3, %v3110_v6  ;;  %v11815_v54 = vadd.f32 %v3135_v29, %v3111_v42  ;;  %v5177_v6 = vld [vmem:[%s14088_s20 + $0x8] sm:$0xff]  ;;  %v5179_v42 = vld [vmem:[%s14088_s20 + $0x18] sm:$0x3f] }
 0x5a6   :  { %v11827_v21 = vadd.f32 %v3134_v3, %v3119_v26  ;;  %v11829_v48 = vadd.f32 %v3135_v29, %v3120_v10  ;;  %v11831_v47 = vadd.f32 %v3134_v3, %v3116_v58  ;;  %v11833_v31 = vadd.f32 %v3135_v29, %v3117_v30  ;;  %v5178_v26 = vld [vmem:[%s14088_s20 + $0x10] sm:$0xff]  ;;  %v8926_v58 = vld [vmem:[%s14090_s22 + $0x74] sm:$0xf0]  ;;  %v7663_v30 = vld [vmem:[%s14090_s22 + $0x78] sm:$0xf0] }
 0x5a7   :  { %v9171_v4 = vpack.i.bf16 %v11811_v37, %v11809_v13  ;;  %v9166_v9 = vpack.i.bf16 %v11815_v54, %v11813_v45  ;;  %v3125_v5 = vmul.f32 %v3107_v41, %v11575_v11  ;;  %v3126_v18 = vmul.f32 %v3108_v63, %v11490_v36  ;;  %v7661_v10 = vld [vmem:[%s14090_s22 + $0x70] sm:$0xf] }
 0x5a8   :  { %v3104_v33 = vpop.f32.mrf.mxu0  ;;  %v9186_v52 = vpack.i.bf16 %v11829_v48, %v11827_v21  ;;  %v9181_v8 = vpack.i.bf16 %v11833_v31, %v11831_v47  ;;  %v3128_v7 = vmul.f32 %v3107_v41, %v11585_v60  ;;  %v3129_v19 = vmul.f32 %v3108_v63, %v14135_v15  ;;  %v8920_v15 = vld [vmem:[%s14090_s22 + $0x44] sm:$0xf0] }
 0x5a9   :  { %v3109_v22 = vperm.slane %v3104_v33, 0  ;;  %9172 = vrot.lane.b32.xlu2 %v9171_v4, %s9414_s30  ;;  %9167 = vrot.lane.b32.xlu1 %v9166_v9, %s9414_s30  ;;  %v3136_v0 = vperm.slane %v3104_v33, 1  ;;  %v11856_v36 = vadd.f32 %v3134_v3, %v3125_v5  ;;  %v11858_v11 = vadd.f32 %v3135_v29, %v3126_v18  ;;  %v8925_v4 = vld [vmem:[%s14090_s22 + $0x74] sm:$0xf]  ;;  %v7653_v33 = vld [vmem:[%s14090_s22 + $0x60] sm:$0xf] }
 0x5aa   :  { %v11887_v60 = vadd.f32 %v3134_v3, %v3128_v7  ;;  %v11889_v51 = vadd.f32 %v3135_v29, %v3129_v19  ;;  %v7662_v9 = vor.u32 %v8926_v58, %v7661_v10  ;;  %v7645_v18 = vld [vmem:[%s14090_s22 + $0x50] sm:$0xf]  ;;  %v7717_v19 = vld [vmem:[%s14090_s22 + $0xe0] sm:$0xf]  ;;  %v8938_v10 = vld [vmem:[%s14090_s22 + $0xd4] sm:$0xf0] }
 0x5ab   :  { %v3112_v23 = vmul.f32 %v3109_v22, %v11703_v12  ;;  %v3115_v49 = vmul.f32 %v3109_v22, %v11697_v40  ;;  %v3122_v12 = vmul.f32 %v3107_v41, %v11550_v14  ;;  %v14134_v40 = vld [vmem:[#allocation6_spill] sm:$0xff]  ;;  %v3118_v27 = vmul.f32 %v3109_v22, %v11706_v2 }
 0x5ac   :  { %v3123_v55 = vmul.f32 %v3108_v63, %v14134_v40  ;;  %v3121_v44 = vmul.f32 %v3109_v22, %v11718_v32  ;;  %v3131_v2 = vmul.f32 %v3107_v41, %v11606_v43  ;;  %v3132_v32 = vmul.f32 %v3108_v63, %v11553_v39  ;;  %3598 = vmatpush.bf16.msrb.mxu1 %v7662_v9  ;;  %v8942_v40 = vld [vmem:[%s14090_s22 + $0xf4] sm:$0xf0]  ;;  %v8917_v58 = vld [vmem:[%s14090_s22 + $0x34] sm:$0xf] }
 0x5ad   :  { %v11837_v28 = vadd.f32 %v3136_v0, %v3112_v23  ;;  %v11839_v46 = vadd.f32 %v3136_v0, %v3115_v49  ;;  %v11860_v1 = vadd.f32 %v3134_v3, %v3122_v12  ;;  %v11864_v14 = vadd.f32 %v3136_v0, %v3118_v27  ;;  %v8923_v23 = vld [vmem:[%s14090_s22 + $0x64] sm:$0xf]  ;;  %v7655_v49 = vld [vmem:[%s14090_s22 + $0x68] sm:$0xf0]  ;;  %v7647_v27 = vld [vmem:[%s14090_s22 + $0x58] sm:$0xf0] }
 0x5ae   :  { %v11862_v35 = vadd.f32 %v3135_v29, %v3123_v55  ;;  %v11866_v50 = vadd.f32 %v3136_v0, %v3121_v44  ;;  %v9201_v59 = vpack.i.bf16 %v11858_v11, %v11856_v36  ;;  %v3124_v57 = vmul.f32 %v3109_v22, %v11728_v25  ;;  %v8921_v55 = vld [vmem:[%s14090_s22 + $0x54] sm:$0xf] }
 0x5af   :  { %v9176_v24 = vpack.i.bf16 %v11839_v46, %v11837_v28  ;;  %v3127_v20 = vmul.f32 %v3109_v22, %v11737_v62  ;;  %v11883_v39 = vadd.f32 %v3134_v3, %v3131_v2  ;;  %v11885_v43 = vadd.f32 %v3135_v29, %v3132_v32  ;;  %v7781_v32 = vld [vmem:[%s14090_s22 + $0x160] sm:$0xf] }
 0x5b0   :  { %v9196_v16 = vpack.i.bf16 %v11862_v35, %v11860_v1  ;;  %v9191_v53 = vpack.i.bf16 %v11866_v50, %v11864_v14  ;;  %v11891_v17 = vadd.f32 %v3136_v0, %v3124_v57  ;;  %v9211_v62 = vpack.i.bf16 %v11889_v51, %v11887_v60 }
 0x5b1   :  { %9187 = vrot.lane.b32.xlu2 %v9186_v52, %s9414_s30  ;;  %9182 = vrot.lane.b32.xlu1 %v9181_v8, %s9414_s30  ;;  %v11893_v41 = vadd.f32 %v3136_v0, %v3127_v20  ;;  %v9216_v25 = vpack.i.bf16 %v11885_v43, %v11883_v39  ;;  %v3130_v38 = vmul.f32 %v3109_v22, %v11747_v34  ;;  %v5176_v34 = vld [vmem:[%s14088_s20] sm:$0xff]  ;;  %v8922_v8 = vld [vmem:[%s14090_s22 + $0x54] sm:$0xf0]  ;;  %s14136_s20 = sld [smem:[#allocation11_spill]] }
 0x5b2   :  { %9177 = vrot.lane.b32.xlu0 %v9176_v24, %s9414_s30  ;;  %v3133_v3 = vmul.f32 %v3109_v22, %v11766_v61  ;;  %v8924_v22 = vld [vmem:[%s14090_s22 + $0x64] sm:$0xf0]  ;;  %v7658_v5 = vor.u32 %v8923_v23, %v7655_v49  ;;  %v7725_v24 = vld [vmem:[%s14090_s22 + $0xf0] sm:$0xf]  ;;  %v7646_v12 = vor.u32 %v8922_v8, %v7645_v18  ;;  %v7650_v2 = vor.u32 %v8921_v55, %v7647_v27  ;;  %v8950_v27 = vld [vmem:[%s14090_s22 + $0x134] sm:$0xf0] }
 0x5b3   :  { %v9206_v63 = vpack.i.bf16 %v11893_v41, %v11891_v17  ;;  %v11906_v29 = vadd.f32 %v3136_v0, %v3130_v38  ;;  %v7654_v52 = vor.u32 %v8924_v22, %v7653_v33  ;;  %v7726_v44 = vor.u32 %v8942_v40, %v7725_v24  ;;  %v7765_v33 = vld [vmem:[%s14090_s22 + $0x140] sm:$0xf]  ;;  %v8952_v22 = vld [vmem:[%s14090_s22 + $0x144] sm:$0xf0]  ;;  %v8915_v24 = vld [vmem:[%s14090_s22 + $0x24] sm:$0xf] }
 0x5b4   :  { %v11908_v56 = vadd.f32 %v3136_v0, %v3133_v3  ;;  %v7666_v0 = vor.u32 %v8925_v4, %v7663_v30  ;;  %v8954_v3 = vld [vmem:[%s14090_s22 + $0x154] sm:$0xf0]  ;;  %v7631_v4 = vld [vmem:[%s14090_s22 + $0x38] sm:$0xf0]  ;;  %v7766_v23 = vor.u32 %v8952_v22, %v7765_v33  ;;  %v8916_v49 = vld [vmem:[%s14090_s22 + $0x24] sm:$0xf0] }
 0x5b5   :  { %3599 = vmatpush.bf16.msrb.mxu1 %v7654_v52  ;;  %3627 = vmatpush.bf16.msra.mxu0 %v7726_v44  ;;  %v7634_v30 = vor.u32 %v8917_v58, %v7631_v4  ;;  %v7701_v52 = vld [vmem:[%s14090_s22 + $0xc0] sm:$0xf]  ;;  %v7757_v40 = vld [vmem:[%s14090_s22 + $0x130] sm:$0xf]  ;;  %v8946_v4 = vld [vmem:[%s14090_s22 + $0x114] sm:$0xf0] }
 0x5b6   :  { %v9221_v61 = vpack.i.bf16 %v11908_v56, %v11906_v29  ;;  %3685 = vmatpush.bf16.msrb.mxu3 %v7666_v0  ;;  %v7621_v0 = vld [vmem:[%s14090_s22 + $0x20] sm:$0xf]  ;;  %v7758_v44 = vor.u32 %v8950_v27, %v7757_v40  ;;  %v8930_v33 = vld [vmem:[%s14090_s22 + $0x94] sm:$0xf0] }
 0x5b7   :  { %v7622_v18 = vor.u32 %v8916_v49, %v7621_v0  ;;  %v7733_v22 = vld [vmem:[%s14090_s22 + $0x100] sm:$0xf] }
 0x5b8   :  { %v7669_v49 = vld [vmem:[%s14090_s22 + $0x80] sm:$0xf] }
 0x5b9   :  { %9202 = vrot.lane.b32.xlu2 %v9201_v59, %s9414_s30  ;;  %9197 = vrot.lane.b32.xlu1 %v9196_v16, %s9414_s30  ;;  %v8956_v59 = vld [vmem:[%s14090_s22 + $0x164] sm:$0xf0]  ;;  %v7637_v16 = vld [vmem:[%s14090_s22 + $0x40] sm:$0xf] }
 0x5ba   :  { %9192 = vrot.lane.b32.xlu0 %v9191_v53, %s9414_s30  ;;  %3686 = vmatpush.bf16.msrb.mxu3 %v7658_v5  ;;  %v7782_v7 = vor.u32 %v8956_v59, %v7781_v32  ;;  %v8940_v53 = vld [vmem:[%s14090_s22 + $0xe4] sm:$0xf0]  ;;  %v7638_v57 = vor.u32 %v8920_v15, %v7637_v16  ;;  %v8914_v32 = vld [vmem:[%s14090_s22 + $0x14] sm:$0xf0]  ;;  %v7693_v59 = vld [vmem:[%s14090_s22 + $0xb0] sm:$0xf] }
 0x5bb   :  { %3600 = vmatpush.bf16.msrb.mxu1 %v7646_v12  ;;  %v7718_v20 = vor.u32 %v8940_v53, %v7717_v19  ;;  %v8936_v5 = vld [vmem:[%s14090_s22 + $0xc4] sm:$0xf0]  ;;  %v7623_v12 = vld [vmem:[%s14090_s22 + $0x28] sm:$0xf0]  ;;  %v8913_v15 = vld [vmem:[%s14090_s22 + $0x14] sm:$0xf] }
 0x5bc   :  { %3657 = vmatpush.bf16.msrb.mxu2 %v7782_v7  ;;  %v7702_v8 = vor.u32 %v8936_v5, %v7701_v52  ;;  %v7626_v55 = vor.u32 %v8915_v24, %v7623_v12  ;;  %v8934_v7 = vld [vmem:[%s14090_s22 + $0xb4] sm:$0xf0]  ;;  %v7615_v19 = vld [vmem:[%s14090_s22 + $0x18] sm:$0xf0]  ;;  %v8928_v52 = vld [vmem:[%s14090_s22 + $0x84] sm:$0xf0] }
 0x5bd   :  { %3628 = vmatpush.bf16.msra.mxu0 %v7718_v20  ;;  %v7694_v53 = vor.u32 %v8934_v7, %v7693_v59  ;;  %v7749_v20 = vld [vmem:[%s14090_s22 + $0x120] sm:$0xf] }
 0x5be   :  { %3687 = vmatpush.bf16.msrb.mxu3 %v7650_v2  ;;  %v7613_v2 = vld [vmem:[%s14090_s22 + $0x10] sm:$0xf] }
 0x5bf   :  { %3601 = vmatpush.bf16.msrb.mxu1 %v7638_v57  ;;  %v7614_v16 = vor.u32 %v8914_v32, %v7613_v2  ;;  %v7618_v57 = vor.u32 %v8913_v15, %v7615_v19  ;;  %v8941_v19 = vld [vmem:[%s14090_s22 + $0xf4] sm:$0xf] }
 0x5c1   :  { %9217 = vrot.lane.b32.xlu2 %v9216_v25, %s9414_s30  ;;  %9212 = vrot.lane.b32.xlu1 %v9211_v62, %s9414_s30  ;;  %v8919_v25 = vld [vmem:[%s14090_s22 + $0x44] sm:$0xf]  ;;  %v7639_v62 = vld [vmem:[%s14090_s22 + $0x48] sm:$0xf0] }
 0x5c2   :  { %9207 = vrot.lane.b32.xlu0 %v9206_v63, %s9414_s30  ;;  %v7773_v63 = vld [vmem:[%s14090_s22 + $0x150] sm:$0xf]  ;;  %v7642_v38 = vor.u32 %v8919_v25, %v7639_v62  ;;  %v8948_v25 = vld [vmem:[%s14090_s22 + $0x124] sm:$0xf0]  ;;  %v7605_v62 = vld [vmem:[%s14090_s22] sm:$0xf] }
 0x5c4   :  { %3688 = vmatpush.bf16.msrb.mxu3 %v7642_v38  ;;  %v8912_v38 = vld [vmem:[%s14090_s22 + $0x4] sm:$0xf0] }
 0x5c8   :  { %3689 = vmatpush.bf16.msrb.mxu3 %v7634_v30  ;;  %v7677_v30 = vld [vmem:[%s14090_s22 + $0x90] sm:$0xf] }
 0x5c9   :  { %5187 = vperm.xlu2 %9165, %v5177_v6   ;;  %5182 = vperm.xlu1 %9164, %v5176_v34   ;;  %v7774_v6 = vor.u32 %v8954_v3, %v7773_v63  ;;  %v7629_v34 = vld [vmem:[%s14090_s22 + $0x30] sm:$0xf]  ;;  %v7750_v63 = vor.u32 %v8948_v25, %v7749_v20  ;;  %v7685_v3 = vld [vmem:[%s14090_s22 + $0xa0] sm:$0xf]  ;;  %v7678_v0 = vor.u32 %v8930_v33, %v7677_v30 }
 0x5ca   :  { %9222 = vrot.lane.b32.xlu0 %v9221_v61, %s9414_s30  ;;  %v8918_v61 = vld [vmem:[%s14090_s22 + $0x34] sm:$0xf0] }
 0x5cb   :  { %3658 = vmatpush.bf16.msrb.mxu2 %v7774_v6  ;;  %v8932_v6 = vld [vmem:[%s14090_s22 + $0xa4] sm:$0xf0] }
 0x5cc   :  { %3690 = vmatpush.bf16.msrb.mxu3 %v7626_v55 }
 0x5cf   :  { %3659 = vmatpush.bf16.msrb.mxu2 %v7766_v23  ;;  %v8944_v23 = vld [vmem:[%s14090_s22 + $0x104] sm:$0xf0] }
 0x5d0   :  { %3691 = vmatpush.bf16.msrb.mxu3 %v7618_v57  ;;  %v7734_v5 = vor.u32 %v8944_v23, %v7733_v22  ;;  %v8939_v57 = vld [vmem:[%s14090_s22 + $0xe4] sm:$0xf] }
 0x5d1   :  { %5197 = vperm.xlu1 %9164, %v5179_v42   ;;  %v7709_v42 = vld [vmem:[%s14090_s22 + $0xd0] sm:$0xf]  ;;  %v8935_v22 = vld [vmem:[%s14090_s22 + $0xc4] sm:$0xf] }
 0x5d2   :  { %5192 = vperm.xlu0 %9163, %v5178_v26   ;;  %v7630_v26 = vor.u32 %v8918_v61, %v7629_v34  ;;  %v7710_v9 = vor.u32 %v8938_v10, %v7709_v42  ;;  %v7606_v34 = vor.u32 %v8912_v38, %v7605_v62  ;;  %v7686_v61 = vor.u32 %v8932_v6, %v7685_v3  ;;  %v8911_v42 = vld [vmem:[%s14090_s22 + $0x4] sm:$0xf]  ;;  %v7741_v10 = vld [vmem:[%s14090_s22 + $0x110] sm:$0xf]  ;;  %v7719_v62 = vld [vmem:[%s14090_s22 + $0xe8] sm:$0xf0] }
 0x5d3   :  { %3660 = vmatpush.bf16.msrb.mxu2 %v7758_v44  ;;  %v7722_v3 = vor.u32 %v8939_v57, %v7719_v62 }
 0x5d4   :  { %3602 = vmatpush.bf16.msrb.mxu1 %v7630_v26  ;;  %3629 = vmatpush.bf16.msra.mxu0 %v7710_v9  ;;  %v7607_v26 = vld [vmem:[%s14090_s22 + $0x8] sm:$0xf0]  ;;  %v7742_v9 = vor.u32 %v8946_v4, %v7741_v10 }
 0x5d5   :  { %v7610_v58 = vor.u32 %v8911_v42, %v7607_v26 }
 0x5d7   :  { %3661 = vmatpush.bf16.msrb.mxu2 %v7750_v63  ;;  %3692 = vmatpush.bf16.msrb.mxu3 %v7610_v58 }
 0x5d8   :  { %3603 = vmatpush.bf16.msrb.mxu1 %v7622_v18  ;;  %3630 = vmatpush.bf16.msra.mxu0 %v7702_v8  ;;  %v7670_v18 = vor.u32 %v8928_v52, %v7669_v49  ;;  %v7703_v49 = vld [vmem:[%s14090_s22 + $0xc8] sm:$0xf0]  ;;  %v8955_v52 = vld [vmem:[%s14090_s22 + $0x164] sm:$0xf] }
 0x5db   :  { %3662 = vmatpush.bf16.msrb.mxu2 %v7742_v9 }
 0x5dc   :  { %3604 = vmatpush.bf16.msrb.mxu1 %v7614_v16  ;;  %3631 = vmatpush.bf16.msra.mxu0 %v7694_v53  ;;  %v7727_v53 = vld [vmem:[%s14090_s22 + $0xf8] sm:$0xf0] }
 0x5dd   :  { %v7730_v25 = vor.u32 %v8941_v19, %v7727_v53 }
 0x5df   :  { %3663 = vmatpush.bf16.msrb.mxu2 %v7734_v5  ;;  %v7783_v5 = vld [vmem:[%s14090_s22 + $0x168] sm:$0xf0] }
 0x5e0   :  { %3605 = vmatpush.bf16.msrb.mxu1 %v7606_v34  ;;  %3632 = vmatpush.bf16.msra.mxu0 %v7686_v61 }
 0x5e4   :  { %3633 = vmatpush.bf16.msra.mxu0 %v7678_v0  ;;  %3714 = vmatpush.bf16.msra.mxu1 %v7730_v25 }
 0x5e8   :  { %3634 = vmatpush.bf16.msra.mxu0 %v7670_v18  ;;  %3715 = vmatpush.bf16.msra.mxu1 %v7722_v3  ;;  %v7786_v18 = vor.u32 %v8955_v52, %v7783_v5 }
 0x5ec   :  { %3744 = vmatpush.bf16.msrb.mxu0 %v7786_v18 }
 0x603   :  { %v9173_v8 = vpop.permute.xlu2 %9172 }
 0x604   :  { %v9175_v24 = vunpack.i.h.bf16 %v9173_v8  ;;  %v9174_v12 = vunpack.i.l.bf16 %v9173_v8 }
 0x606   :  { %v3236_v55 = vsel %vm3233_vm5, %v9174_v12, %v9175_v24 }
 0x607   :  { %v3277_v32 = vmax.f32 %v11809_v13, %v3236_v55 }
 0x60b   :  { %v9188_v13 = vpop.permute.xlu2 %9187 }
 0x60c   :  { %v9190_v26 = vunpack.i.h.bf16 %v9188_v13  ;;  %v9189_v10 = vunpack.i.l.bf16 %v9188_v13  ;;  %v7687_v13 = vld [vmem:[%s14090_s22 + $0xa8] sm:$0xf0] }
 0x61b   :  { %v9168_v40 = vpop.permute.xlu1 %9167 }
 0x61c   :  { %v9170_v27 = vunpack.i.h.bf16 %v9168_v40  ;;  %v9169_v44 = vunpack.i.l.bf16 %v9168_v40 }
 0x61e   :  { %v3234_v2 = vsel %vm3233_vm5, %v9169_v44, %v9170_v27 }
 0x61f   :  { %v3274_v59 = vmax.f32 %v11813_v45, %v3234_v2  ;;  %v8933_v2 = vld [vmem:[%s14090_s22 + $0xb4] sm:$0xf] }
 0x621   :  { %v3298_v16 = vpack.c.bf16 %v3277_v32, %v3274_v59  ;;  %v7695_v32 = vld [vmem:[%s14090_s22 + $0xb8] sm:$0xf0] }
 0x622   :  { %v7698_v59 = vor.u32 %v8933_v2, %v7695_v32 }
 0x623   :  { %v9183_v7 = vpop.permute.xlu1 %9182  ;;  %3606 = vmatmul.bf16.vlgmr.msrb.gmra.mxu1 %v3298_v16  ;;  %3693 = vmatmul.bf16.vlgmr.msrb.gmra.mxu3 %v3298_v16  ;;  %v7775_v16 = vld [vmem:[%s14090_s22 + $0x158] sm:$0xf0] }
 0x624   :  { %v9178_v15 = vpop.permute.xlu0 %9177  ;;  %v9185_v63 = vunpack.i.h.bf16 %v9183_v7  ;;  %v9184_v38 = vunpack.i.l.bf16 %v9183_v7  ;;  %v8931_v7 = vld [vmem:[%s14090_s22 + $0xa4] sm:$0xf] }
 0x625   :  { %v9180_v20 = vunpack.i.h.bf16 %v9178_v15  ;;  %v9179_v45 = vunpack.i.l.bf16 %v9178_v15  ;;  %v9203_v15 = vpop.permute.xlu2 %9202 }
 0x626   :  { %v3238_v30 = vsel %vm3233_vm5, %v9184_v38, %v9185_v63  ;;  %v9205_v38 = vunpack.i.h.bf16 %v9203_v15  ;;  %v9204_v3 = vunpack.i.l.bf16 %v9203_v15 }
 0x627   :  { %v3237_v6 = vsel %vm3233_vm5, %v9175_v24, %v9180_v20  ;;  %v3279_v34 = vmax.f32 %v11839_v46, %v9180_v20  ;;  %v3235_v61 = vsel %vm3233_vm5, %v9170_v27, %v9179_v45  ;;  %v3276_v42 = vmax.f32 %v11837_v28, %v9179_v45  ;;  %v8951_v20 = vld [vmem:[%s14090_s22 + $0x144] sm:$0xf]  ;;  %v7767_v45 = vld [vmem:[%s14090_s22 + $0x148] sm:$0xf0] }
 0x628   :  { %v3278_v58 = vmax.f32 %v11811_v37, %v3237_v6  ;;  %v3275_v4 = vmax.f32 %v11815_v54, %v3235_v61  ;;  %v3240_v46 = vsel %vm3233_vm5, %v9189_v10, %v9190_v26  ;;  %v8937_v37 = vld [vmem:[%s14090_s22 + $0xd4] sm:$0xf]  ;;  %v7711_v54 = vld [vmem:[%s14090_s22 + $0xd8] sm:$0xf0]  ;;  %v3280_v0 = vmax.f32 %v11831_v47, %v3238_v30 }
 0x629   :  { %v12133_v9 = vpack.c.bf16 %v3279_v34, %v3276_v42  ;;  %v7714_v23 = vor.u32 %v8937_v37, %v7711_v54  ;;  %v3283_v12 = vmax.f32 %v11827_v21, %v3240_v46  ;;  %v7706_v47 = vor.u32 %v8935_v22, %v7703_v49  ;;  %v8953_v21 = vld [vmem:[%s14090_s22 + $0x154] sm:$0xf]  ;;  %v7679_v10 = vld [vmem:[%s14090_s22 + $0x98] sm:$0xf0]  ;;  %v7671_v37 = vld [vmem:[%s14090_s22 + $0x88] sm:$0xf0] }
 0x62a   :  { %v12136_v33 = vpack.c.bf16 %v3278_v58, %v3275_v4  ;;  %v7778_v57 = vor.u32 %v8953_v21, %v7775_v16  ;;  %v7690_v6 = vor.u32 %v8931_v7, %v7687_v13  ;;  %v8949_v58 = vld [vmem:[%s14090_s22 + $0x134] sm:$0xf]  ;;  %v7759_v46 = vld [vmem:[%s14090_s22 + $0x138] sm:$0xf0]  ;;  %v8947_v22 = vld [vmem:[%s14090_s22 + $0x124] sm:$0xf] }
 0x62b   :  { %7787 = vmatmul.msk.bf16.vlgmr.msrb.gmra.mxu2 %vm3233_vm5, %v12133_v9  ;;  %3716 = vmatpush.bf16.msra.mxu1 %v7714_v23  ;;  %v3301_v40 = vpack.c.bf16 %v3283_v12, %v3280_v0  ;;  %v9198_v55 = vpop.permute.xlu1 %9197  ;;  %v7762_v54 = vor.u32 %v8949_v58, %v7759_v46  ;;  %v8943_v16 = vld [vmem:[%s14090_s22 + $0x104] sm:$0xf]  ;;  %v7735_v7 = vld [vmem:[%s14090_s22 + $0x108] sm:$0xf0] }
 0x62c   :  { %v9193_v28 = vpop.permute.xlu0 %9192  ;;  %3635 = vmatmul.bf16.vlgmr.msra.gmra.mxu0 %v12136_v33  ;;  %v9200_v25 = vunpack.i.h.bf16 %v9198_v55  ;;  %v9199_v62 = vunpack.i.l.bf16 %v9198_v55 }
 0x62d   :  { %v9195_v8 = vunpack.i.h.bf16 %v9193_v28  ;;  %v9194_v24 = vunpack.i.l.bf16 %v9193_v28  ;;  %3745 = vmatpush.bf16.msrb.mxu0 %v7778_v57  ;;  %v8927_v28 = vld [vmem:[%s14090_s22 + $0x84] sm:$0xf]  ;;  %v9218_v55 = vpop.permute.xlu2 %9217 }
 0x62e   :  { %v3242_v61 = vsel %vm3233_vm5, %v9199_v62, %v9200_v25  ;;  %v7674_v52 = vor.u32 %v8927_v28, %v7671_v37  ;;  %v9220_v15 = vunpack.i.h.bf16 %v9218_v55 }
 0x62f   :  { %v3241_v27 = vsel %vm3233_vm5, %v9190_v26, %v9195_v8  ;;  %v3239_v44 = vsel %vm3233_vm5, %v9185_v63, %v9194_v24  ;;  %3717 = vmatpush.bf16.msra.mxu1 %v7706_v47  ;;  %v3285_v19 = vmax.f32 %v11866_v50, %v9195_v8  ;;  %v3282_v53 = vmax.f32 %v11864_v14, %v9194_v24  ;;  %v8945_v47 = vld [vmem:[%s14090_s22 + $0x114] sm:$0xf] }
 0x630   :  { %v3281_v63 = vmax.f32 %v11833_v31, %v3239_v44  ;;  %v3284_v50 = vmax.f32 %v11829_v48, %v3241_v27  ;;  %v7770_v14 = vor.u32 %v8951_v20, %v7767_v45  ;;  %v3244_v31 = vsel %vm3233_vm5, %v9204_v3, %v9205_v38  ;;  %v8929_v48 = vld [vmem:[%s14090_s22 + $0x94] sm:$0xf] }
 0x631   :  { %v12192_v34 = vpack.c.bf16 %v3285_v19, %v3282_v53  ;;  %v3286_v4 = vmax.f32 %v11860_v1, %v3242_v61  ;;  %v7682_v30 = vor.u32 %v8929_v48, %v7679_v10  ;;  %v7751_v1 = vld [vmem:[%s14090_s22 + $0x128] sm:$0xf0]  ;;  %v3289_v49 = vmax.f32 %v11856_v36, %v3244_v31  ;;  %v7743_v36 = vld [vmem:[%s14090_s22 + $0x118] sm:$0xf0] }
 0x632   :  { %v12195_v42 = vpack.c.bf16 %v3284_v50, %v3281_v63  ;;  %3746 = vmatpush.bf16.msrb.mxu0 %v7770_v14  ;;  %v7754_v5 = vor.u32 %v8947_v22, %v7751_v1  ;;  %v9219_v19 = vunpack.i.l.bf16 %v9218_v55  ;;  %v7738_v53 = vor.u32 %v8943_v16, %v7735_v7 }
 0x633   :  { %3611 = vmatmul.bf16.gmra.mxu1 %v3301_v40  ;;  %3698 = vmatmul.bf16.gmra.mxu3 %v3301_v40  ;;  %v3304_v18 = vpack.c.bf16 %v3289_v49, %v3286_v4  ;;  %v9213_v8 = vpop.permute.xlu1 %9212  ;;  %v7746_v40 = vor.u32 %v8945_v47, %v7743_v36 }
 0x634   :  { %3718 = vmatpush.bf16.msra.mxu1 %v7698_v59  ;;  %v9208_v26 = vpop.permute.xlu0 %9207  ;;  %v9215_v2 = vunpack.i.h.bf16 %v9213_v8  ;;  %v9214_v32 = vunpack.i.l.bf16 %v9213_v8 }
 0x635   :  { %v9210_v0 = vunpack.i.h.bf16 %v9208_v26  ;;  %v9209_v23 = vunpack.i.l.bf16 %v9208_v26 }
 0x636   :  { %3747 = vmatpush.bf16.msrb.mxu0 %v7762_v54 }
 0x637   :  { %v3245_v24 = vsel %vm3233_vm5, %v9205_v38, %v9210_v0  ;;  %v3243_v12 = vsel %vm3233_vm5, %v9200_v25, %v9209_v23  ;;  %v3291_v27 = vmax.f32 %v11893_v41, %v9210_v0  ;;  %v3288_v44 = vmax.f32 %v11891_v17, %v9209_v23 }
 0x638   :  { %3719 = vmatpush.bf16.msra.mxu1 %v7690_v6  ;;  %v3287_v21 = vmax.f32 %v11862_v35, %v3243_v12  ;;  %v3290_v59 = vmax.f32 %v11858_v11, %v3245_v24  ;;  %v3246_v17 = vsel %vm3233_vm5, %v9214_v32, %v9215_v2  ;;  %v3248_v11 = vsel %vm3233_vm5, %v9219_v19, %v9220_v15 }
 0x639   :  { %v3306_v41 = vpack.c.bf16 %v3291_v27, %v3288_v44  ;;  %v3292_v13 = vmax.f32 %v11887_v60, %v3246_v17  ;;  %v3295_v25 = vmax.f32 %v11883_v39, %v3248_v11 }
 0x63a   :  { %3748 = vmatpush.bf16.msrb.mxu0 %v7754_v5  ;;  %v3305_v57 = vpack.c.bf16 %v3290_v59, %v3287_v21 }
 0x63b   :  { %7788 = vmatmul.msk.bf16.gmra.mxu2 %vm3233_vm5, %v12192_v34  ;;  %v3307_v62 = vpack.c.bf16 %v3295_v25, %v3292_v13 }
 0x63c   :  { %3640 = vmatmul.bf16.gmra.mxu0 %v12195_v42  ;;  %3720 = vmatpush.bf16.msra.mxu1 %v7682_v30  ;;  %v9223_v35 = vpop.permute.xlu0 %9222 }
 0x63d   :  { %v9225_v20 = vunpack.i.h.bf16 %v9223_v35  ;;  %v9224_v45 = vunpack.i.l.bf16 %v9223_v35 }
 0x63e   :  { %3749 = vmatpush.bf16.msrb.mxu0 %v7746_v40 }
 0x63f   :  { %v3249_v63 = vsel %vm3233_vm5, %v9220_v15, %v9225_v20  ;;  %v3247_v50 = vsel %vm3233_vm5, %v9215_v2, %v9224_v45  ;;  %v3297_v14 = vmax.f32 %v11908_v56, %v9225_v20  ;;  %v3294_v38 = vmax.f32 %v11906_v29, %v9224_v45 }
 0x640   :  { %3721 = vmatpush.bf16.msra.mxu1 %v7674_v52  ;;  %v3293_v3 = vmax.f32 %v11889_v51, %v3247_v50  ;;  %v3296_v60 = vmax.f32 %v11885_v43, %v3249_v63  ;;  %v9415_v15 = vmov 65535  }
 0x641   :  { %v3309_v6 = vpack.c.bf16 %v3297_v14, %v3294_v38  ;;  %v3881_v19 = vsel %vm3880_vm6, 4294967295, %v9415_v15 }
 0x642   :  { %3750 = vmatpush.bf16.msrb.mxu0 %v7738_v53  ;;  %v3308_v61 = vpack.c.bf16 %v3296_v60, %v3293_v3  ;;  %v12282_v25 = vsel %vm175_vm0, %v3881_v19, 0 }
 0x643   :  { %3616 = vmatmul.bf16.gmra.mxu1 %v3304_v18  ;;  %3703 = vmatmul.bf16.gmra.mxu3 %v3304_v18 }
 0x64b   :  { %7789 = vmatmul.msk.bf16.gmra.mxu2 %vm3233_vm5, %v3306_v41 }
 0x64c   :  { %3645 = vmatmul.bf16.gmra.mxu0 %v3305_v57 }
 0x653   :  { %3621 = vmatmul.bf16.gmra.mxu1 %v3307_v62  ;;  %3708 = vmatmul.bf16.gmra.mxu3 %v3307_v62 }
 0x65b   :  { %7790 = vmatmul.msk.bf16.gmra.mxu2 %vm3233_vm5, %v3309_v6 }
 0x65c   :  { %3650 = vmatmul.bf16.gmra.mxu0 %v3308_v61 }
 0x663   :  { %3722 = vmatmul.bf16.vlgmr.msra.gmra.mxu1 %v12136_v33 }
 0x66c   :  { %7791 = vmatmul.msk.bf16.vlgmr.msrb.gmra.mxu0 %vm3233_vm5, %v12133_v9 }
 0x673   :  { %3727 = vmatmul.bf16.gmra.mxu1 %v12195_v42 }
 0x67c   :  { %7792 = vmatmul.msk.bf16.gmra.mxu0 %vm3233_vm5, %v12192_v34 }
 0x683   :  { %3732 = vmatmul.bf16.gmra.mxu1 %v3305_v57 }
 0x68c   :  { %7793 = vmatmul.msk.bf16.gmra.mxu0 %vm3233_vm5, %v3306_v41 }
 0x693   :  { %3737 = vmatmul.bf16.gmra.mxu1 %v3308_v61 }
 0x69c   :  { %7794 = vmatmul.msk.bf16.gmra.mxu0 %vm3233_vm5, %v3309_v6 }
 0x6a0   :  { %v3607_v39 = vpop.f32.mrf.mxu1 }
 0x6a6   :  { %v12267_v0 = vpop.f32.mrf.mxu3 }
 0x6a8   :  { %v3609_v43 = vpop.f32.mrf.mxu1 }
 0x6a9   :  { %v3636_v51 = vpop.f32.mrf.mxu0 }
 0x6aa   :  { %v3637_v29 = vadd.f32 %v3636_v51, %v3607_v39 }
 0x6ae   :  { %v3665_v56 = vpop.f32.mrf.mxu2  ;;  %v12271_v18 = vpop.f32.mrf.mxu3 }
 0x6af   :  { %v12265_v33 = vadd.f32 %v3665_v56, %v3637_v29 }
 0x6b0   :  { %v3612_v31 = vpop.f32.mrf.mxu1 }
 0x6b1   :  { %v3638_v9 = vpop.f32.mrf.mxu0 }
 0x6b2   :  { %v3639_v11 = vadd.f32 %v3638_v9, %v3609_v43 }
 0x6b6   :  { %v3667_v26 = vpop.f32.mrf.mxu2  ;;  %v12279_v13 = vpop.f32.mrf.mxu3 }
 0x6b7   :  { %v3668_v50 = vadd.f32 %v3667_v26, %v3639_v11  ;;  %v3789_v26 = vrot.slane %v12265_v33, 1 }
 0x6b8   :  { %v3614_v42 = vpop.f32.mrf.mxu1 }
 0x6b9   :  { %v3641_v48 = vpop.f32.mrf.mxu0  ;;  %v3790_v29 = vrot.slane %v3668_v50, 1 }
 0x6ba   :  { %v3642_v7 = vadd.f32 %v3641_v48, %v3612_v31 }
 0x6be   :  { %v3670_v10 = vpop.f32.mrf.mxu2 }
 0x6bf   :  { %v3671_v20 = vadd.f32 %v3670_v10, %v3642_v7  ;;  %v3701_v10 = vpop.f32.mrf.mxu3 }
 0x6c0   :  { %v3617_v34 = vpop.f32.mrf.mxu1 }
 0x6c1   :  { %v3643_v58 = vpop.f32.mrf.mxu0  ;;  %v3795_v61 = vrot.slane %v3671_v20, 1 }
 0x6c2   :  { %v3644_v2 = vadd.f32 %v3643_v58, %v3614_v42 }
 0x6c3   :  { %v3796_v42 = vsel %vm339_vm3, %v3790_v29, %v3795_v61 }
 0x6c6   :  { %v3672_v4 = vpop.f32.mrf.mxu2 }
 0x6c7   :  { %v3673_v41 = vadd.f32 %v3672_v4, %v3644_v2 }
 0x6c8   :  { %v3619_v30 = vpop.f32.mrf.mxu1 }
 0x6c9   :  { %v3646_v46 = vpop.f32.mrf.mxu0  ;;  %v3799_v14 = vrot.slane %v3673_v41, 1 }
 0x6ca   :  { %v3647_v36 = vadd.f32 %v3646_v46, %v3617_v34  ;;  %v3791_v34 = vsel %vm339_vm3, %v3789_v26, %v3790_v29 }
 0x6cb   :  { %v3800_v56 = vsel %vm339_vm3, %v3795_v61, %v3799_v14 }
 0x6cc   :  { %v3839_v48 = vmax.f32 %v3671_v20, %v3800_v56 }
 0x6ce   :  { %v3675_v28 = vpop.f32.mrf.mxu2 }
 0x6cf   :  { %v3676_v32 = vadd.f32 %v3675_v28, %v3647_v36  ;;  %v3835_v28 = vmax.f32 %v12265_v33, %v3791_v34  ;;  %v8958_v33 = vld [vmem:[%s14091_s23 + $0x8] sm:$0xff] }
 0x6d0   :  { %v3622_v37 = vpop.f32.mrf.mxu1 }
 0x6d1   :  { %v3648_v54 = vpop.f32.mrf.mxu0  ;;  %v3803_v45 = vrot.slane %v3676_v32, 1 }
 0x6d2   :  { %v3649_v24 = vadd.f32 %v3648_v54, %v3619_v30  ;;  %v3837_v30 = vmax.f32 %v3668_v50, %v3796_v42  ;;  %v12298_v54 = vld [vmem:[%s14091_s23] sm:$0xff] }
 0x6d3   :  { %v3804_v43 = vsel %vm339_vm3, %v3799_v14, %v3803_v45 }
 0x6d4   :  { %v3841_v9 = vmax.f32 %v3673_v41, %v3804_v43 }
 0x6d6   :  { %v3677_v22 = vpop.f32.mrf.mxu2  ;;  %v3857_v4 = vpack.c.bf16 %v3841_v9, %v3839_v48 }
 0x6d7   :  { %v3678_v55 = vadd.f32 %v3677_v22, %v3649_v24 }
 0x6d8   :  { %v3624_v1 = vpop.f32.mrf.mxu1 }
 0x6d9   :  { %v3651_v23 = vpop.f32.mrf.mxu0  ;;  %v3807_v53 = vrot.slane %v3678_v55, 1 }
 0x6da   :  { %v3652_v8 = vadd.f32 %v3651_v23, %v3622_v37  ;;  %v3855_v37 = vpack.c.bf16 %v3837_v30, %v3835_v28  ;;  %v7941_v30 = vld [vmem:[%s14136_s20 + $0x1c8] sm:$0xf]  ;;  %v9016_v28 = vld [vmem:[%s14136_s20 + $0x1cc] sm:$0xf] }
 0x6db   :  { %v3808_v38 = vsel %vm339_vm3, %v3803_v45, %v3807_v53 }
 0x6dc   :  { %v3843_v51 = vmax.f32 %v3676_v32, %v3808_v38 }
 0x6de   :  { %v3680_v49 = vpop.f32.mrf.mxu2 }
 0x6df   :  { %v3681_v12 = vadd.f32 %v3680_v49, %v3652_v8 }
 0x6e0   :  { %v12269_v52 = vpop.f32.mrf.mxu1 }
 0x6e1   :  { %v3653_v5 = vpop.f32.mrf.mxu0  ;;  %v3811_v21 = vrot.slane %v3681_v12, 1  ;;  %v3724_v43 = vadd.f32 %v12269_v52, %v12267_v0 }
 0x6e2   :  { %v3654_v47 = vadd.f32 %v3653_v5, %v3624_v1  ;;  %v3704_v1 = vpop.f32.mrf.mxu3 }
 0x6e3   :  { %v3812_v62 = vsel %vm339_vm3, %v3807_v53, %v3811_v21 }
 0x6e4   :  { %v3845_v6 = vmax.f32 %v3678_v55, %v3812_v62 }
 0x6e6   :  { %v3682_v40 = vpop.f32.mrf.mxu2  ;;  %v3859_v31 = vpack.c.bf16 %v3845_v6, %v3843_v51 }
 0x6e7   :  { %v3683_v27 = vadd.f32 %v3682_v40, %v3654_v47 }
 0x6e8   :  { %v12273_v44 = vpop.f32.mrf.mxu1 }
 0x6e9   :  { %v3815_v59 = vrot.slane %v3683_v27, 1  ;;  %v12275_v16 = vpop.f32.mrf.mxu0  ;;  %v3726_v14 = vadd.f32 %v12273_v44, %v12271_v18 }
 0x6ea   :  { %v3706_v8 = vpop.f32.mrf.mxu3 }
 0x6eb   :  { %v3816_v17 = vsel %vm339_vm3, %v3811_v21, %v3815_v59  ;;  %v3849_v57 = vmax.f32 %v3683_v27, %v3815_v59 }
 0x6ec   :  { %v3847_v35 = vmax.f32 %v3681_v12, %v3816_v17 }
 0x6ee   :  { %v3861_v63 = vpack.c.bf16 %v3849_v57, %v3847_v35 }
 0x6f0   :  { %v3728_v3 = vpop.f32.mrf.mxu1  ;;  %v3884_v60 = vand.u32 %v12282_v25, %v3861_v63 }
 0x6f1   :  { %v12287_v39 = vpop.f32.mrf.mxu0  ;;  %v3729_v35 = vadd.f32 %v3728_v3, %v12279_v13 }
 0x6f2   :  { %3893 = vmatpush.bf16.msra.mxu2 %v3884_v60  ;;  %v3709_v47 = vpop.f32.mrf.mxu3  ;;  %v3755_v51 = vadd.f32 %v12287_v39, %v3726_v14  ;;  %v7869_v14 = vld [vmem:[%s14136_s20 + $0x138] sm:$0xf] }
 0x6f4   :  { %v3793_v26 = vrot.slane %v3755_v51, 1 }
 0x6f6   :  { %3894 = vmatpush.bf16.msra.mxu2 %v3859_v31  ;;  %v3753_v31 = vadd.f32 %v12275_v16, %v3724_v43  ;;  %v7857_v43 = vld [vmem:[%s14136_s20 + $0x120] sm:$0xf] }
 0x6f8   :  { %v3730_v58 = vpop.f32.mrf.mxu1  ;;  %v3792_v52 = vrot.slane %v3753_v31, 1 }
 0x6f9   :  { %v3757_v46 = vpop.f32.mrf.mxu0  ;;  %v3731_v53 = vadd.f32 %v3730_v58, %v3701_v10 }
 0x6fa   :  { %3895 = vmatpush.bf16.msra.mxu2 %v3857_v4  ;;  %v3711_v27 = vpop.f32.mrf.mxu3  ;;  %v3758_v38 = vadd.f32 %v3757_v46, %v3729_v35  ;;  %v9017_v46 = vld [vmem:[%s14136_s20 + $0x1d0] sm:$0xf0]  ;;  %v9002_v35 = vld [vmem:[%s14136_s20 + $0x158] sm:$0xf0] }
 0x6fc   :  { %v3797_v9 = vrot.slane %v3758_v38, 1 }
 0x6fe   :  { %3896 = vmatpush.bf16.msra.mxu2 %v3855_v37  ;;  %v3798_v39 = vsel %vm339_vm3, %v3793_v26, %v3797_v9  ;;  %v7942_v37 = vor.u32 %v9017_v46, %v7941_v30  ;;  %v8067_v30 = vld [vmem:[%s14136_s20 + $0x78] sm:$0xf]  ;;  %v8975_v46 = vld [vmem:[%s14136_s20 + $0x80] sm:$0xf0] }
 0x6ff   :  { %v3838_v58 = vmax.f32 %v3755_v51, %v3798_v39  ;;  %v8996_v51 = vld [vmem:[%s14136_s20 + $0x128] sm:$0xf0] }
 0x700   :  { %v3733_v22 = vpop.f32.mrf.mxu1 }
 0x701   :  { %v3759_v23 = vpop.f32.mrf.mxu0  ;;  %7803 = vmatmul.msk.bf16.vlgmr.msra.gmra.mxu2 %vm3873_vm7, %v12298_v54  ;;  %v3734_v7 = vadd.f32 %v3733_v22, %v3704_v1  ;;  %v7943_v22 = vld [vmem:[%s14136_s20 + $0x1d4] sm:$0xf0]  ;;  %v9014_v1 = vld [vmem:[%s14136_s20 + $0x1b8] sm:$0xf0] }
 0x702   :  { %v3760_v20 = vadd.f32 %v3759_v23, %v3731_v53  ;;  %v7946_v23 = vor.u32 %v9016_v28, %v7943_v22  ;;  %4259 = vmatpush.bf16.msrb.mxu2 %v7942_v37  ;;  %v9004_v53 = vld [vmem:[%s14136_s20 + $0x16c] sm:$0xf]  ;;  %v8068_v22 = vor.u32 %v8975_v46, %v8067_v30 }
 0x704   :  { %v3801_v13 = vrot.slane %v3760_v20, 1  ;;  %4297 = vmatpush.bf16.msrb.mxu1 %v7946_v23  ;;  %v8055_v23 = vld [vmem:[%s14136_s20 + $0x60] sm:$0xf] }
 0x706   :  { %v3802_v42 = vsel %vm339_vm3, %v3797_v9, %v3801_v13 }
 0x707   :  { %v3840_v10 = vmax.f32 %v3758_v38, %v3802_v42  ;;  %v8999_v38 = vld [vmem:[%s14136_s20 + $0x140] sm:$0xf0] }
 0x708   :  { %v3735_v49 = vpop.f32.mrf.mxu1 }
 0x709   :  { %v3762_v5 = vpop.f32.mrf.mxu0  ;;  %v3736_v2 = vadd.f32 %v3735_v49, %v3706_v8  ;;  %v9013_v49 = vld [vmem:[%s14136_s20 + $0x1b4] sm:$0xf] }
 0x70a   :  { %v3763_v17 = vadd.f32 %v3762_v5, %v3734_v7  ;;  %v7931_v5 = vld [vmem:[%s14136_s20 + $0x1bc] sm:$0xf0] }
 0x70c   :  { %v3805_v60 = vrot.slane %v3763_v17, 1 }
 0x70e   :  { %v3806_v18 = vsel %vm339_vm3, %v3801_v13, %v3805_v60 }
 0x70f   :  { %v3842_v0 = vmax.f32 %v3760_v20, %v3806_v18  ;;  %v7949_v18 = vld [vmem:[%s14136_s20 + $0x1d0] sm:$0xf] }
 0x710   :  { %v3738_v12 = vpop.f32.mrf.mxu1 }
 0x711   :  { %v3764_v24 = vpop.f32.mrf.mxu0  ;;  %7804 = vmatmul.msk.bf16.gmra.mxu2 %vm3873_vm7, %v8958_v33  ;;  %v3739_v55 = vadd.f32 %v3738_v12, %v3709_v47  ;;  %v3858_v34 = vpack.c.bf16 %v3842_v0, %v3840_v10  ;;  %v9011_v12 = vld [vmem:[%s14136_s20 + $0x1a0] sm:$0xf0]  ;;  %v9010_v47 = vld [vmem:[%s14136_s20 + $0x19c] sm:$0xf]  ;;  %v7937_v0 = vld [vmem:[%s14136_s20 + $0x1b8] sm:$0xf] }
 0x712   :  { %v3765_v19 = vadd.f32 %v3764_v24, %v3736_v2  ;;  %v7917_v24 = vld [vmem:[%s14136_s20 + $0x198] sm:$0xf]  ;;  %v8079_v10 = vld [vmem:[%s14136_s20 + $0x90] sm:$0xf] }
 0x714   :  { %v3809_v45 = vrot.slane %v3765_v19, 1 }
 0x716   :  { %v3810_v3 = vsel %vm339_vm3, %v3805_v60, %v3809_v45  ;;  %v8998_v60 = vld [vmem:[%s14136_s20 + $0x13c] sm:$0xf] }
 0x717   :  { %v3844_v44 = vmax.f32 %v3763_v17, %v3810_v3  ;;  %v8995_v3 = vld [vmem:[%s14136_s20 + $0x124] sm:$0xf] }
 0x718   :  { %v3740_v40 = vpop.f32.mrf.mxu1 }
 0x719   :  { %v3767_v36 = vpop.f32.mrf.mxu0  ;;  %v3741_v32 = vadd.f32 %v3740_v40, %v3711_v27  ;;  %v7919_v40 = vld [vmem:[%s14136_s20 + $0x1a4] sm:$0xf0]  ;;  %v9008_v27 = vld [vmem:[%s14136_s20 + $0x188] sm:$0xf0] }
 0x71a   :  { %v3768_v21 = vadd.f32 %v3767_v36, %v3739_v55  ;;  %v7918_v36 = vor.u32 %v9011_v12, %v7917_v24  ;;  %v7905_v55 = vld [vmem:[%s14136_s20 + $0x180] sm:$0xf]  ;;  %v7922_v2 = vor.u32 %v9010_v47, %v7919_v40  ;;  %v7901_v12 = vld [vmem:[%s14136_s20 + $0x170] sm:$0xf]  ;;  %v9006_v47 = vld [vmem:[%s14136_s20 + $0x178] sm:$0xf0] }
 0x71b   :  { %v7902_v40 = vor.u32 %v9006_v47, %v7901_v12  ;;  %v8063_v12 = vld [vmem:[%s14136_s20 + $0x68] sm:$0xf]  ;;  %v8973_v47 = vld [vmem:[%s14136_s20 + $0x70] sm:$0xf0] }
 0x71c   :  { %v3813_v57 = vrot.slane %v3768_v21, 1 }
 0x71e   :  { %v3814_v6 = vsel %vm339_vm3, %v3809_v45, %v3813_v57  ;;  %v9001_v45 = vld [vmem:[%s14136_s20 + $0x154] sm:$0xf] }
 0x71f   :  { %v3846_v56 = vmax.f32 %v3765_v19, %v3814_v6  ;;  %v7893_v19 = vld [vmem:[%s14136_s20 + $0x168] sm:$0xf]  ;;  %v7870_v6 = vor.u32 %v8999_v38, %v7869_v14 }
 0x721   :  { %v3769_v59 = vpop.f32.mrf.mxu0  ;;  %v3860_v48 = vpack.c.bf16 %v3846_v56, %v3844_v44  ;;  %v7858_v56 = vor.u32 %v8996_v51, %v7857_v43  ;;  %v9018_v44 = vld [vmem:[%s14136_s20 + $0x1d8] sm:$0xf0]  ;;  %v8007_v43 = vld [vmem:[%s14136_s20] sm:$0xf]  ;;  %v8960_v51 = vld [vmem:[%s14136_s20 + $0x8] sm:$0xf0] }
 0x722   :  { %v3770_v41 = vadd.f32 %v3769_v59, %v3741_v32  ;;  %v9007_v32 = vld [vmem:[%s14136_s20 + $0x184] sm:$0xf]  ;;  %v7906_v59 = vor.u32 %v9008_v27, %v7905_v55  ;;  %v7950_v42 = vor.u32 %v9018_v44, %v7949_v18  ;;  %v8969_v55 = vld [vmem:[%s14136_s20 + $0x50] sm:$0xf0]  ;;  %v7889_v27 = vld [vmem:[%s14136_s20 + $0x158] sm:$0xf] }
 0x723   :  { %v8982_v44 = vld [vmem:[%s14136_s20 + $0xb8] sm:$0xf0] }
 0x724   :  { %v3817_v11 = vrot.slane %v3770_v41, 1 }
 0x726   :  { %v3818_v62 = vsel %vm339_vm3, %v3813_v57, %v3817_v11  ;;  %v3850_v63 = vmax.f32 %v3770_v41, %v3817_v11  ;;  %v9005_v41 = vld [vmem:[%s14136_s20 + $0x170] sm:$0xf0]  ;;  %v7895_v57 = vld [vmem:[%s14136_s20 + $0x174] sm:$0xf0]  ;;  %v7881_v11 = vld [vmem:[%s14136_s20 + $0x150] sm:$0xf] }
 0x727   :  { %v3848_v50 = vmax.f32 %v3768_v21, %v3818_v62  ;;  %v7907_v21 = vld [vmem:[%s14136_s20 + $0x18c] sm:$0xf0]  ;;  %v7894_v17 = vor.u32 %v9005_v41, %v7893_v19  ;;  %v7898_v20 = vor.u32 %v9004_v53, %v7895_v57  ;;  %v7883_v62 = vld [vmem:[%s14136_s20 + $0x15c] sm:$0xf0]  ;;  %v8019_v57 = vld [vmem:[%s14136_s20 + $0x18] sm:$0xf] }
 0x728   :  { %v7910_v7 = vor.u32 %v9007_v32, %v7907_v21  ;;  %v8031_v21 = vld [vmem:[%s14136_s20 + $0x30] sm:$0xf]  ;;  %v7877_v53 = vld [vmem:[%s14136_s20 + $0x140] sm:$0xf] }
 0x729   :  { %v3862_v61 = vpack.c.bf16 %v3850_v63, %v3848_v50  ;;  %v7882_v63 = vor.u32 %v9002_v35, %v7881_v11  ;;  %v7886_v50 = vor.u32 %v9001_v45, %v7883_v62  ;;  %v8963_v11 = vld [vmem:[%s14136_s20 + $0x20] sm:$0xf0] }
 0x72b   :  { %v3887_v29 = vand.u32 %v12282_v25, %v3862_v61  ;;  %v3794_v25 = vsel %vm339_vm3, %v3792_v52, %v3793_v26  ;;  %v7871_v61 = vld [vmem:[%s14136_s20 + $0x144] sm:$0xf0]  ;;  %v9015_v52 = vld [vmem:[%s14136_s20 + $0x1c0] sm:$0xf0] }
 0x72c   :  { %v3836_v16 = vmax.f32 %v3753_v31, %v3794_v25  ;;  %v7874_v13 = vor.u32 %v8998_v60, %v7871_v61  ;;  %v8091_v26 = vld [vmem:[%s14136_s20 + $0xa8] sm:$0xf]  ;;  %v8978_v25 = vld [vmem:[%s14136_s20 + $0x98] sm:$0xf0] }
 0x72d   :  { %3912 = vmatpush.bf16.msra.mxu3 %v3887_v29  ;;  %v7859_v29 = vld [vmem:[%s14136_s20 + $0x12c] sm:$0xf0]  ;;  %v7865_v60 = vld [vmem:[%s14136_s20 + $0x128] sm:$0xf] }
 0x72e   :  { %v3856_v4 = vpack.c.bf16 %v3838_v58, %v3836_v16  ;;  %v7862_v31 = vor.u32 %v8995_v3, %v7859_v29  ;;  %v8080_v58 = vor.u32 %v8978_v25, %v8079_v10  ;;  %v7925_v16 = vld [vmem:[%s14136_s20 + $0x1a0] sm:$0xf]  ;;  %v8008_v3 = vor.u32 %v8960_v51, %v8007_v43  ;;  %v8974_v10 = vld [vmem:[%s14136_s20 + $0x7c] sm:$0xf]  ;;  %v8069_v25 = vld [vmem:[%s14136_s20 + $0x84] sm:$0xf0] }
 0x72f   :  { %v9020_v51 = vld [vmem:[%s14136_s20 + $0x1e8] sm:$0xf0] }
 0x731   :  { %3913 = vmatpush.bf16.msra.mxu3 %v3860_v48  ;;  %v8981_v48 = vld [vmem:[%s14136_s20 + $0xb0] sm:$0xf0] }
 0x732   :  { %v8092_v39 = vor.u32 %v8981_v48, %v8091_v26  ;;  %v8081_v48 = vld [vmem:[%s14136_s20 + $0x9c] sm:$0xf0] }
 0x735   :  { %3914 = vmatpush.bf16.msra.mxu3 %v3858_v34  ;;  %v7938_v34 = vor.u32 %v9015_v52, %v7937_v0  ;;  %v8087_v0 = vld [vmem:[%s14136_s20 + $0x98] sm:$0xf] }
 0x739   :  { %3915 = vmatpush.bf16.msra.mxu3 %v3856_v4  ;;  %v9012_v4 = vld [vmem:[%s14136_s20 + $0x1a8] sm:$0xf0] }
 0x73a   :  { %v7926_v28 = vor.u32 %v9012_v4, %v7925_v16  ;;  %v8976_v16 = vld [vmem:[%s14136_s20 + $0x88] sm:$0xf0]  ;;  %v8072_v4 = vor.u32 %v8974_v10, %v8069_v25  ;;  %v8015_v10 = vld [vmem:[%s14136_s20 + $0x8] sm:$0xf]  ;;  %v8961_v25 = vld [vmem:[%s14136_s20 + $0x10] sm:$0xf0] }
 0x73c   :  { %7805 = vmatmul.msk.bf16.vlgmr.msra.gmra.mxu3 %vm3873_vm7, %v12298_v54  ;;  %v7929_v54 = vld [vmem:[%s14136_s20 + $0x1b0] sm:$0xf] }
 0x73d   :  { %v7930_v8 = vor.u32 %v9014_v1, %v7929_v54  ;;  %v7913_v54 = vld [vmem:[%s14136_s20 + $0x188] sm:$0xf]  ;;  %v9009_v1 = vld [vmem:[%s14136_s20 + $0x190] sm:$0xf0] }
 0x73f   :  { %4260 = vmatpush.bf16.msrb.mxu2 %v7930_v8 }
 0x743   :  { %4261 = vmatpush.bf16.msrb.mxu2 %v7918_v36  ;;  %v8043_v36 = vld [vmem:[%s14136_s20 + $0x48] sm:$0xf] }
 0x744   :  { %v8044_v32 = vor.u32 %v8969_v55, %v8043_v36  ;;  %v7977_v36 = vld [vmem:[%s14136_s20 + $0x210] sm:$0xf]  ;;  %v9026_v55 = vld [vmem:[%s14136_s20 + $0x218] sm:$0xf0] }
 0x747   :  { %4262 = vmatpush.bf16.msrb.mxu2 %v7906_v59  ;;  %v8966_v59 = vld [vmem:[%s14136_s20 + $0x38] sm:$0xf0] }
 0x748   :  { %v8032_v41 = vor.u32 %v8966_v59, %v8031_v21  ;;  %v8968_v59 = vld [vmem:[%s14136_s20 + $0x4c] sm:$0xf] }
 0x74b   :  { %4263 = vmatpush.bf16.msrb.mxu2 %v7894_v17  ;;  %v9000_v17 = vld [vmem:[%s14136_s20 + $0x148] sm:$0xf0] }
 0x74c   :  { %7806 = vmatmul.msk.bf16.gmra.mxu3 %vm3873_vm7, %v8958_v33  ;;  %v7934_v33 = vor.u32 %v9013_v49, %v7931_v5  ;;  %v8972_v49 = vld [vmem:[%s14136_s20 + $0x68] sm:$0xf0]  ;;  %v7914_v5 = vor.u32 %v9009_v1, %v7913_v54  ;;  %v7878_v45 = vor.u32 %v9000_v17, %v7877_v53  ;;  %v8970_v53 = vld [vmem:[%s14136_s20 + $0x58] sm:$0xf0]  ;;  %vm6878_vm7 = vcmask 74752  }
 0x74d   :  { %v8056_v8 = vor.u32 %v8972_v49, %v8055_v23  ;;  %v7991_v23 = vld [vmem:[%s14136_s20 + $0x234] sm:$0xf0]  ;;  %v8971_v49 = vld [vmem:[%s14136_s20 + $0x64] sm:$0xf] }
 0x74e   :  { %4298 = vmatpush.bf16.msrb.mxu1 %v7934_v33 }
 0x74f   :  { %4264 = vmatpush.bf16.msrb.mxu2 %v7882_v63  ;;  %v8020_v63 = vor.u32 %v8963_v11, %v8019_v57  ;;  %v7965_v57 = vld [vmem:[%s14136_s20 + $0x1f8] sm:$0xf]  ;;  %v9023_v11 = vld [vmem:[%s14136_s20 + $0x200] sm:$0xf0] }
 0x752   :  { %4299 = vmatpush.bf16.msrb.mxu1 %v7922_v2  ;;  %v9003_v2 = vld [vmem:[%s14136_s20 + $0x160] sm:$0xf0] }
 0x753   :  { %4265 = vmatpush.bf16.msrb.mxu2 %v7870_v6  ;;  %v7890_v19 = vor.u32 %v9003_v2, %v7889_v27  ;;  %v8997_v6 = vld [vmem:[%s14136_s20 + $0x130] sm:$0xf0]  ;;  %v7979_v2 = vld [vmem:[%s14136_s20 + $0x21c] sm:$0xf0] }
 0x754   :  { %v7866_v61 = vor.u32 %v8997_v6, %v7865_v60  ;;  %v9025_v27 = vld [vmem:[%s14136_s20 + $0x214] sm:$0xf]  ;;  %v8039_v60 = vld [vmem:[%s14136_s20 + $0x38] sm:$0xf]  ;;  %v8967_v6 = vld [vmem:[%s14136_s20 + $0x40] sm:$0xf0] }
 0x755   :  { %v7982_v21 = vor.u32 %v9025_v27, %v7979_v2  ;;  %v8040_v43 = vor.u32 %v8967_v6, %v8039_v60 }
 0x756   :  { %4300 = vmatpush.bf16.msrb.mxu1 %v7910_v7 }
 0x757   :  { %4266 = vmatpush.bf16.msrb.mxu2 %v7858_v56  ;;  %v8980_v56 = vld [vmem:[%s14136_s20 + $0xac] sm:$0xf] }
 0x75a   :  { %4301 = vmatpush.bf16.msrb.mxu1 %v7898_v20 }
 0x75b   :  { %4335 = vmatpush.bf16.msra.mxu2 %v7950_v42  ;;  %v8977_v42 = vld [vmem:[%s14136_s20 + $0x94] sm:$0xf] }
 0x75c   :  { %v8084_v52 = vor.u32 %v8977_v42, %v8081_v48  ;;  %v8964_v42 = vld [vmem:[%s14136_s20 + $0x28] sm:$0xf0] }
 0x75e   :  { %4302 = vmatpush.bf16.msrb.mxu1 %v7886_v50 }
 0x75f   :  { %4336 = vmatpush.bf16.msra.mxu2 %v7938_v34 }
 0x762   :  { %4303 = vmatpush.bf16.msrb.mxu1 %v7874_v13 }
 0x763   :  { %4337 = vmatpush.bf16.msra.mxu2 %v7926_v28  ;;  %v7989_v28 = vld [vmem:[%s14136_s20 + $0x228] sm:$0xf] }
 0x766   :  { %4304 = vmatpush.bf16.msrb.mxu1 %v7862_v31  ;;  %v8093_v31 = vld [vmem:[%s14136_s20 + $0xb4] sm:$0xf0] }
 0x767   :  { %4338 = vmatpush.bf16.msra.mxu2 %v7914_v5  ;;  %v8096_v18 = vor.u32 %v8980_v56, %v8093_v31  ;;  %v8057_v5 = vld [vmem:[%s14136_s20 + $0x6c] sm:$0xf0] }
 0x76a   :  { %4569 = vmatpush.bf16.msra.mxu1 %v8092_v39  ;;  %v8979_v39 = vld [vmem:[%s14136_s20 + $0xa0] sm:$0xf0] }
 0x76b   :  { %4339 = vmatpush.bf16.msra.mxu2 %v7902_v40  ;;  %v8088_v34 = vor.u32 %v8979_v39, %v8087_v0  ;;  %v8064_v40 = vor.u32 %v8973_v47, %v8063_v12  ;;  %v8009_v39 = vld [vmem:[%s14136_s20 + $0xc] sm:$0xf0]  ;;  %v9047_v12 = vld [vmem:[%s14136_s20 + $0x2c0] sm:$0xf0]  ;;  %v9046_v47 = vld [vmem:[%s14136_s20 + $0x2bc] sm:$0xf] }
 0x76e   :  { %4570 = vmatpush.bf16.msra.mxu1 %v8080_v58  ;;  %v8075_v58 = vld [vmem:[%s14136_s20 + $0x80] sm:$0xf] }
 0x76f   :  { %4340 = vmatpush.bf16.msra.mxu2 %v7890_v19  ;;  %v8076_v46 = vor.u32 %v8976_v16, %v8075_v58  ;;  %v8051_v19 = vld [vmem:[%s14136_s20 + $0x50] sm:$0xf]  ;;  %v8016_v58 = vor.u32 %v8961_v25, %v8015_v10  ;;  %v8289_v16 = vld [vmem:[%s14136_s20 + $0x2e8] sm:$0xf]  ;;  %v8231_v10 = vld [vmem:[%s14136_s20 + $0x27c] sm:$0xf0] }
 0x770   :  { %v8052_v17 = vor.u32 %v8970_v53, %v8051_v19  ;;  %v8253_v53 = vld [vmem:[%s14136_s20 + $0x2a0] sm:$0xf] }
 0x772   :  { %4571 = vmatpush.bf16.msra.mxu1 %v8068_v22  ;;  %v9028_v22 = vld [vmem:[%s14136_s20 + $0x22c] sm:$0xf] }
 0x773   :  { %4341 = vmatpush.bf16.msra.mxu2 %v7878_v45  ;;  %v7967_v45 = vld [vmem:[%s14136_s20 + $0x204] sm:$0xf0] }
 0x776   :  { %4572 = vmatpush.bf16.msra.mxu1 %v8056_v8  ;;  %v7994_v8 = vor.u32 %v9028_v22, %v7991_v23  ;;  %v8279_v23 = vld [vmem:[%s14136_s20 + $0x2dc] sm:$0xf0] }
 0x777   :  { %4342 = vmatpush.bf16.msra.mxu2 %v7866_v61  ;;  %v7953_v61 = vld [vmem:[%s14136_s20 + $0x1e0] sm:$0xf] }
 0x778   :  { %4320 = vmatpush.bf16.msra.mxu0 %v7994_v8  ;;  %v7954_v56 = vor.u32 %v9020_v51, %v7953_v61  ;;  %v9041_v51 = vld [vmem:[%s14136_s20 + $0x290] sm:$0xf0] }
 0x77a   :  { %4573 = vmatpush.bf16.msra.mxu1 %v8044_v32  ;;  %v7978_v32 = vor.u32 %v9026_v55, %v7977_v36  ;;  %v8267_v36 = vld [vmem:[%s14136_s20 + $0x2c4] sm:$0xf0] }
 0x77b   :  { %v8270_v27 = vor.u32 %v9046_v47, %v8267_v36 }
 0x77c   :  { %4321 = vmatpush.bf16.msra.mxu0 %v7982_v21  ;;  %v7997_v21 = vld [vmem:[%s14136_s20 + $0x230] sm:$0xf] }
 0x77e   :  { %4574 = vmatpush.bf16.msra.mxu1 %v8032_v41 }
 0x782   :  { %4575 = vmatpush.bf16.msra.mxu1 %v8020_v63  ;;  %v8033_v63 = vld [vmem:[%s14136_s20 + $0x3c] sm:$0xf0] }
 0x784   :  { %v3898_v9 = vpop.f32.mrf.mxu2 }
 0x786   :  { %4576 = vmatpush.bf16.msra.mxu1 %v8008_v3  ;;  %v7955_v3 = vld [vmem:[%s14136_s20 + $0x1ec] sm:$0xf0] }
 0x78c   :  { %v3900_v37 = vpop.f32.mrf.mxu2 }
 0x78d   :  { %v12468_v33 = vpack.c.bf16 %v3900_v37, %v3898_v9  ;;  %v8099_v9 = vld [vmem:[%s14136_s20 + $0xb0] sm:$0xf]  ;;  %v9029_v37 = vld [vmem:[%s14136_s20 + $0x230] sm:$0xf0] }
 0x78e   :  { %v8100_v26 = vor.u32 %v8982_v44, %v8099_v9  ;;  %v7990_v1 = vor.u32 %v9029_v37, %v7989_v28  ;;  %v8962_v9 = vld [vmem:[%s14136_s20 + $0x1c] sm:$0xf]  ;;  %v8027_v44 = vld [vmem:[%s14136_s20 + $0x20] sm:$0xf]  ;;  %v8277_v28 = vld [vmem:[%s14136_s20 + $0x2d0] sm:$0xf] }
 0x78f   :  { %v4031_v7 = vshll.u32 %v12468_v33, 16  ;;  %v4029_v35 = vshrl.u32 %v12468_v33, 16  ;;  %v8028_v48 = vor.u32 %v8964_v42, %v8027_v44  ;;  %v9050_v37 = vld [vmem:[%s14136_s20 + $0x2d8] sm:$0xf0]  ;;  %v8115_v44 = vld [vmem:[%s14136_s20 + $0xd8] sm:$0xf] }
 0x790   :  { %4282 = vmatpush.bf16.msrb.mxu3 %v7990_v1  ;;  %v9049_v1 = vld [vmem:[%s14136_s20 + $0x2d4] sm:$0xf]  ;;  %v8229_v42 = vld [vmem:[%s14136_s20 + $0x270] sm:$0xf] }
 0x791   :  { %v4033_v20 = vrot.slane %v4031_v7, 1  ;;  %v8045_v7 = vld [vmem:[%s14136_s20 + $0x54] sm:$0xf0]  ;;  %v8282_v8 = vor.u32 %v9049_v1, %v8279_v23  ;;  %v9034_v23 = vld [vmem:[%s14136_s20 + $0x25c] sm:$0xf] }
 0x792   :  { %v8048_v41 = vor.u32 %v8968_v59, %v8045_v7  ;;  %v9030_v59 = vld [vmem:[%s14136_s20 + $0x238] sm:$0xf0]  ;;  %v8139_v7 = vld [vmem:[%s14136_s20 + $0x108] sm:$0xf] }
 0x793   :  { %v4034_v14 = vor.u32 %v4033_v20, %v4029_v35  ;;  %v9022_v35 = vld [vmem:[%s14136_s20 + $0x1fc] sm:$0xf]  ;;  %v7966_v20 = vor.u32 %v9023_v11, %v7965_v57  ;;  %v7998_v19 = vor.u32 %v9030_v59, %v7997_v21 }
 0x794   :  { %v3903_v24 = vpop.f32.mrf.mxu2  ;;  %4283 = vmatpush.bf16.msrb.mxu3 %v7978_v32 }
 0x798   :  { %4284 = vmatpush.bf16.msrb.mxu3 %v7966_v20  ;;  %v8255_v20 = vld [vmem:[%s14136_s20 + $0x2ac] sm:$0xf0] }
 0x79c   :  { %v3905_v62 = vpop.f32.mrf.mxu2  ;;  %4285 = vmatpush.bf16.msrb.mxu3 %v7954_v56  ;;  %v7973_v56 = vld [vmem:[%s14136_s20 + $0x200] sm:$0xf] }
 0x79d   :  { %v12508_v50 = vpack.c.bf16 %v3905_v62, %v3903_v24  ;;  %v8060_v24 = vor.u32 %v8971_v49, %v8057_v5  ;;  %v8965_v62 = vld [vmem:[%s14136_s20 + $0x34] sm:$0xf]  ;;  %v8278_v5 = vor.u32 %v9050_v37, %v8277_v28  ;;  %v9035_v28 = vld [vmem:[%s14136_s20 + $0x260] sm:$0xf0] }
 0x79f   :  { %v4036_v38 = vshll.u32 %v12508_v50, 16  ;;  %v4052_v30 = vshrl.u32 %v12508_v50, 16 }
 0x7a0   :  { %4358 = vmatpush.bf16.msra.mxu3 %v7998_v19  ;;  %v9054_v19 = vld [vmem:[%s14136_s20 + $0x2f8] sm:$0xf0] }
 0x7a1   :  { %v4038_v13 = vrot.slane %v4036_v38, 1  ;;  %v8036_v38 = vor.u32 %v8965_v62, %v8033_v63  ;;  %v9027_v63 = vld [vmem:[%s14136_s20 + $0x220] sm:$0xf0] }
 0x7a3   :  { %v12524_v29 = vsel %vm112_vm1, %v4034_v14, %v4038_v13  ;;  %v12574_v54 = vor.u32 %v4052_v30, %v4038_v13  ;;  %v7970_v14 = vor.u32 %v9022_v35, %v7967_v45  ;;  %v9019_v13 = vld [vmem:[%s14136_s20 + $0x1e4] sm:$0xf]  ;;  %v9052_v30 = vld [vmem:[%s14136_s20 + $0x2ec] sm:$0xf]  ;;  %v7985_v45 = vld [vmem:[%s14136_s20 + $0x218] sm:$0xf] }
 0x7a4   :  { %4267 = vmatmul.bf16.vlgmr.msrb.gmra.mxu2 %v12524_v29  ;;  %4305 = vmatmul.bf16.vlgmr.msrb.gmra.mxu1 %v12524_v29  ;;  %v7958_v31 = vor.u32 %v9019_v13, %v7955_v3  ;;  %v9043_v35 = vld [vmem:[%s14136_s20 + $0x2a4] sm:$0xf]  ;;  %v7986_v6 = vor.u32 %v9027_v63, %v7985_v45  ;;  %v9040_v13 = vld [vmem:[%s14136_s20 + $0x28c] sm:$0xf] }
 0x7a5   :  { %4607 = vmatpush.bf16.msrb.mxu2 %v8096_v18  ;;  %4645 = vmatpush.bf16.msrb.mxu1 %v8100_v26  ;;  %v8021_v18 = vld [vmem:[%s14136_s20 + $0x24] sm:$0xf0]  ;;  %v8258_v62 = vor.u32 %v9043_v35, %v8255_v20  ;;  %v9048_v35 = vld [vmem:[%s14136_s20 + $0x2c8] sm:$0xf0] }
 0x7a6   :  { %4322 = vmatpush.bf16.msra.mxu0 %v7970_v14  ;;  %v8024_v26 = vor.u32 %v8962_v9, %v8021_v18  ;;  %v8127_v14 = vld [vmem:[%s14136_s20 + $0xf0] sm:$0xf]  ;;  %4359 = vmatpush.bf16.msra.mxu3 %v7986_v6  ;;  %v8992_v63 = vld [vmem:[%s14136_s20 + $0x10c] sm:$0xf]  ;;  %v8994_v6 = vld [vmem:[%s14136_s20 + $0x118] sm:$0xf0] }
 0x7a9   :  { %4608 = vmatpush.bf16.msrb.mxu2 %v8084_v52  ;;  %4646 = vmatpush.bf16.msrb.mxu1 %v8088_v34  ;;  %v8959_v52 = vld [vmem:[%s14136_s20 + $0x4] sm:$0xf] }
 0x7aa   :  { %4323 = vmatpush.bf16.msra.mxu0 %v7958_v31  ;;  %v8012_v34 = vor.u32 %v8959_v52, %v8009_v39  ;;  %v9024_v31 = vld [vmem:[%s14136_s20 + $0x208] sm:$0xf0]  ;;  %v9038_v52 = vld [vmem:[%s14136_s20 + $0x278] sm:$0xf0]  ;;  %v9037_v39 = vld [vmem:[%s14136_s20 + $0x274] sm:$0xf] }
 0x7ab   :  { %v7974_v18 = vor.u32 %v9024_v31, %v7973_v56  ;;  %v8135_v56 = vld [vmem:[%s14136_s20 + $0xf8] sm:$0xf] }
 0x7ad   :  { %4609 = vmatpush.bf16.msrb.mxu2 %v8072_v4  ;;  %4647 = vmatpush.bf16.msrb.mxu1 %v8076_v46  ;;  %v9053_v4 = vld [vmem:[%s14136_s20 + $0x2f0] sm:$0xf0] }
 0x7ae   :  { %v8290_v46 = vor.u32 %v9053_v4, %v8289_v16  ;;  %v9021_v16 = vld [vmem:[%s14136_s20 + $0x1f0] sm:$0xf0]  ;;  %v8103_v4 = vld [vmem:[%s14136_s20 + $0xc0] sm:$0xf]  ;;  %4360 = vmatpush.bf16.msra.mxu3 %v7974_v18 }
 0x7b1   :  { %4610 = vmatpush.bf16.msrb.mxu2 %v8060_v24  ;;  %4648 = vmatpush.bf16.msrb.mxu1 %v8064_v40  ;;  %v8265_v24 = vld [vmem:[%s14136_s20 + $0x2b8] sm:$0xf] }
 0x7b2   :  { %v8266_v55 = vor.u32 %v9047_v12, %v8265_v24 }
 0x7b4   :  { %4272 = vmatmul.bf16.gmra.mxu2 %v12574_v54  ;;  %4310 = vmatmul.bf16.gmra.mxu1 %v12574_v54 }
 0x7b5   :  { %4611 = vmatpush.bf16.msrb.mxu2 %v8048_v41  ;;  %4649 = vmatpush.bf16.msrb.mxu1 %v8052_v17  ;;  %v8993_v41 = vld [vmem:[%s14136_s20 + $0x110] sm:$0xf0]  ;;  %v9044_v17 = vld [vmem:[%s14136_s20 + $0x2a8] sm:$0xf0] }
 0x7b6   :  { %v8140_v57 = vor.u32 %v8993_v41, %v8139_v7  ;;  %v8254_v11 = vor.u32 %v9044_v17, %v8253_v53  ;;  %v8297_v7 = vld [vmem:[%s14136_s20 + $0x2f0] sm:$0xf]  ;;  %v8285_v41 = vld [vmem:[%s14136_s20 + $0x2d8] sm:$0xf]  ;;  %v9051_v17 = vld [vmem:[%s14136_s20 + $0x2e0] sm:$0xf0] }
 0x7b7   :  { %v8298_v53 = vor.u32 %v9054_v19, %v8297_v7  ;;  %v9061_v7 = vld [vmem:[%s14136_s20 + $0x334] sm:$0xf] }
 0x7b8   :  { %4592 = vmatpush.bf16.msrb.mxu0 %v8140_v57  ;;  %v8286_v57 = vor.u32 %v9051_v17, %v8285_v41  ;;  %v8327_v41 = vld [vmem:[%s14136_s20 + $0x33c] sm:$0xf0]  ;;  %v8313_v17 = vld [vmem:[%s14136_s20 + $0x318] sm:$0xf] }
 0x7b9   :  { %4612 = vmatpush.bf16.msrb.mxu2 %v8036_v38  ;;  %4650 = vmatpush.bf16.msrb.mxu1 %v8040_v43  ;;  %v8990_v38 = vld [vmem:[%s14136_s20 + $0xf8] sm:$0xf0]  ;;  %v8241_v43 = vld [vmem:[%s14136_s20 + $0x288] sm:$0xf] }
 0x7ba   :  { %v8128_v61 = vor.u32 %v8990_v38, %v8127_v14  ;;  %v8242_v3 = vor.u32 %v9041_v51, %v8241_v43  ;;  %v8141_v14 = vld [vmem:[%s14136_s20 + $0x114] sm:$0xf0]  ;;  %v8147_v38 = vld [vmem:[%s14136_s20 + $0x110] sm:$0xf]  ;;  %v9045_v43 = vld [vmem:[%s14136_s20 + $0x2b0] sm:$0xf0] }
 0x7bb   :  { %v8148_v51 = vor.u32 %v8994_v6, %v8147_v38 }
 0x7bc   :  { %4593 = vmatpush.bf16.msrb.mxu0 %v8128_v61  ;;  %v8261_v61 = vld [vmem:[%s14136_s20 + $0x2a8] sm:$0xf] }
 0x7bd   :  { %4613 = vmatpush.bf16.msrb.mxu2 %v8024_v26  ;;  %4651 = vmatpush.bf16.msrb.mxu1 %v8028_v48  ;;  %v8987_v26 = vld [vmem:[%s14136_s20 + $0xe0] sm:$0xf0] }
 0x7bf   :  { %v3917_v0 = vpop.f32.mrf.mxu3 }
 0x7c1   :  { %4614 = vmatpush.bf16.msrb.mxu2 %v8012_v34  ;;  %4652 = vmatpush.bf16.msrb.mxu1 %v8016_v58  ;;  %v8230_v34 = vor.u32 %v9038_v52, %v8229_v42  ;;  %v7961_v58 = vld [vmem:[%s14136_s20 + $0x1e8] sm:$0xf]  ;;  %v8986_v42 = vld [vmem:[%s14136_s20 + $0xdc] sm:$0xf]  ;;  %v8123_v52 = vld [vmem:[%s14136_s20 + $0xe0] sm:$0xf] }
 0x7c2   :  { %v7962_v1 = vor.u32 %v9021_v16, %v7961_v58  ;;  %v9039_v58 = vld [vmem:[%s14136_s20 + $0x280] sm:$0xf0] }
 0x7c4   :  { %4343 = vmatmul.bf16.vlgmr.msra.gmra.mxu2 %v12524_v29  ;;  %4577 = vmatmul.bf16.vlgmr.msra.gmra.mxu1 %v12468_v33  ;;  %v8291_v29 = vld [vmem:[%s14136_s20 + $0x2f4] sm:$0xf0] }
 0x7c5   :  { %v8294_v22 = vor.u32 %v9052_v30, %v8291_v29  ;;  %4942 = vmatpush.bf16.msra.mxu2 %v8290_v46  ;;  %v8234_v30 = vor.u32 %v9037_v39, %v8231_v10  ;;  %v8984_v46 = vld [vmem:[%s14136_s20 + $0xc8] sm:$0xf0]  ;;  %v8217_v29 = vld [vmem:[%s14136_s20 + $0x258] sm:$0xf]  ;;  %4361 = vmatpush.bf16.msra.mxu3 %v7962_v1 }
 0x7c6   :  { %v8104_v24 = vor.u32 %v8984_v46, %v8103_v4  ;;  %v8218_v12 = vor.u32 %v9035_v28, %v8217_v29  ;;  %v8988_v39 = vld [vmem:[%s14136_s20 + $0xe8] sm:$0xf0]  ;;  %v8983_v4 = vld [vmem:[%s14136_s20 + $0xc4] sm:$0xf]  ;;  %v8111_v29 = vld [vmem:[%s14136_s20 + $0xc8] sm:$0xf] }
 0x7c7   :  { %v3919_v49 = vpop.f32.mrf.mxu3  ;;  %4980 = vmatpush.bf16.msra.mxu1 %v8294_v22  ;;  %v8124_v16 = vor.u32 %v8988_v39, %v8123_v52  ;;  %v8985_v28 = vld [vmem:[%s14136_s20 + $0xd0] sm:$0xf0]  ;;  %v9036_v1 = vld [vmem:[%s14136_s20 + $0x268] sm:$0xf0] }
 0x7c8   :  { %v12715_v40 = vpack.c.bf16 %v3919_v49, %v3917_v0  ;;  %v8116_v0 = vor.u32 %v8987_v26, %v8115_v44  ;;  %v8219_v49 = vld [vmem:[%s14136_s20 + $0x264] sm:$0xf0]  ;;  %v8249_v44 = vld [vmem:[%s14136_s20 + $0x290] sm:$0xf]  ;;  %v9042_v26 = vld [vmem:[%s14136_s20 + $0x298] sm:$0xf0] }
 0x7c9   :  { %4943 = vmatpush.bf16.msra.mxu2 %v8278_v5  ;;  %v8222_v47 = vor.u32 %v9034_v23, %v8219_v49  ;;  %v8112_v23 = vor.u32 %v8985_v28, %v8111_v29  ;;  %v9057_v52 = vld [vmem:[%s14136_s20 + $0x310] sm:$0xf0] }
 0x7ca   :  { %v4043_v2 = vshll.u32 %v12715_v40, 16  ;;  %v4041_v37 = vshrl.u32 %v12715_v40, 16  ;;  %4594 = vmatpush.bf16.msrb.mxu0 %v8116_v0  ;;  %v8117_v0 = vld [vmem:[%s14136_s20 + $0xe4] sm:$0xf0] }
 0x7cb   :  { %4981 = vmatpush.bf16.msra.mxu1 %v8282_v8  ;;  %v8120_v10 = vor.u32 %v8986_v42, %v8117_v0  ;;  %v8309_v0 = vld [vmem:[%s14136_s20 + $0x308] sm:$0xf] }
 0x7cc   :  { %v4045_v60 = vrot.slane %v4043_v2, 1  ;;  %v9031_v2 = vld [vmem:[%s14136_s20 + $0x244] sm:$0xf] }
 0x7cd   :  { %4944 = vmatpush.bf16.msra.mxu2 %v8266_v55  ;;  %v8205_v55 = vld [vmem:[%s14136_s20 + $0x240] sm:$0xf] }
 0x7ce   :  { %v4046_v5 = vor.u32 %v4045_v60, %v4041_v37  ;;  %4595 = vmatpush.bf16.msrb.mxu0 %v8104_v24  ;;  %v8144_v60 = vor.u32 %v8992_v63, %v8141_v14  ;;  %v8213_v24 = vld [vmem:[%s14136_s20 + $0x248] sm:$0xf]  ;;  %v9056_v63 = vld [vmem:[%s14136_s20 + $0x308] sm:$0xf0]  ;;  %v9055_v14 = vld [vmem:[%s14136_s20 + $0x304] sm:$0xf] }
 0x7cf   :  { %v3922_v32 = vpop.f32.mrf.mxu3  ;;  %4982 = vmatpush.bf16.msra.mxu1 %v8270_v27  ;;  %v9032_v27 = vld [vmem:[%s14136_s20 + $0x248] sm:$0xf0] }
 0x7d0   :  { %v8206_v21 = vor.u32 %v9032_v27, %v8205_v55  ;;  %v9064_v55 = vld [vmem:[%s14136_s20 + $0x34c] sm:$0xf] }
 0x7d1   :  { %4945 = vmatpush.bf16.msra.mxu2 %v8254_v11  ;;  %v8273_v11 = vld [vmem:[%s14136_s20 + $0x2c0] sm:$0xf] }
 0x7d2   :  { %v8274_v45 = vor.u32 %v9048_v35, %v8273_v11  ;;  %v9058_v11 = vld [vmem:[%s14136_s20 + $0x31c] sm:$0xf] }
 0x7d3   :  { %4983 = vmatpush.bf16.msra.mxu1 %v8258_v62 }
 0x7d4   :  { %4348 = vmatmul.bf16.gmra.mxu2 %v12574_v54  ;;  %4582 = vmatmul.bf16.gmra.mxu1 %v12508_v50  ;;  %v8243_v54 = vld [vmem:[%s14136_s20 + $0x294] sm:$0xf0] }
 0x7d5   :  { %v8246_v9 = vor.u32 %v9040_v13, %v8243_v54  ;;  %4946 = vmatpush.bf16.msra.mxu2 %v8242_v3  ;;  %v8262_v13 = vor.u32 %v9045_v43, %v8261_v61  ;;  %v8989_v3 = vld [vmem:[%s14136_s20 + $0xf4] sm:$0xf]  ;;  %v8129_v54 = vld [vmem:[%s14136_s20 + $0xfc] sm:$0xf0]  ;;  %v8345_v43 = vld [vmem:[%s14136_s20 + $0x350] sm:$0xf] }
 0x7d6   :  { %v8132_v31 = vor.u32 %v8989_v3, %v8129_v54  ;;  %v8333_v3 = vld [vmem:[%s14136_s20 + $0x338] sm:$0xf]  ;;  %v9063_v54 = vld [vmem:[%s14136_s20 + $0x340] sm:$0xf0] }
 0x7d7   :  { %v3924_v48 = vpop.f32.mrf.mxu3  ;;  %4984 = vmatpush.bf16.msra.mxu1 %v8246_v9  ;;  %v8991_v9 = vld [vmem:[%s14136_s20 + $0x100] sm:$0xf0] }
 0x7d8   :  { %v12792_v25 = vpack.c.bf16 %v3924_v48, %v3922_v32  ;;  %v8207_v32 = vld [vmem:[%s14136_s20 + $0x24c] sm:$0xf0]  ;;  %v8136_v18 = vor.u32 %v8991_v9, %v8135_v56  ;;  %v8250_v48 = vor.u32 %v9042_v26, %v8249_v44  ;;  %v8334_v56 = vor.u32 %v9063_v54, %v8333_v3  ;;  %v9060_v9 = vld [vmem:[%s14136_s20 + $0x328] sm:$0xf0] }
 0x7d9   :  { %4947 = vmatpush.bf16.msra.mxu2 %v8230_v34  ;;  %v8210_v59 = vor.u32 %v9031_v2, %v8207_v32  ;;  %v8237_v34 = vld [vmem:[%s14136_s20 + $0x278] sm:$0xf] }
 0x7da   :  { %v4048_v22 = vshll.u32 %v12792_v25, 16  ;;  %v4055_v20 = vshrl.u32 %v12792_v25, 16  ;;  %v8238_v46 = vor.u32 %v9039_v58, %v8237_v34  ;;  %v8339_v2 = vld [vmem:[%s14136_s20 + $0x354] sm:$0xf0]  ;;  %v4740_v26 = vrot.slane %v12792_v25, 1 }
 0x7db   :  { %4985 = vmatpush.bf16.msra.mxu1 %v8234_v30  ;;  %v8105_v30 = vld [vmem:[%s14136_s20 + $0xcc] sm:$0xf0]  ;;  %v8342_v32 = vor.u32 %v9064_v55, %v8339_v2 }
 0x7dc   :  { %v4050_v8 = vrot.slane %v4048_v22, 1  ;;  %v8108_v37 = vor.u32 %v8983_v4, %v8105_v30  ;;  %v8225_v22 = vld [vmem:[%s14136_s20 + $0x260] sm:$0xf] }
 0x7dd   :  { %4948 = vmatpush.bf16.msra.mxu2 %v8218_v12  ;;  %v8226_v49 = vor.u32 %v9036_v1, %v8225_v22  ;;  %v9033_v12 = vld [vmem:[%s14136_s20 + $0x250] sm:$0xf0] }
 0x7de   :  { %v12821_v36 = vsel %vm112_vm1, %v4046_v5, %v4050_v8  ;;  %v12860_v62 = vor.u32 %v4055_v20, %v4050_v8  ;;  %v4736_v5 = vrot.slane %v12468_v33, 1  ;;  %v4737_v8 = vrot.slane %v12508_v50, 1  ;;  %v8315_v20 = vld [vmem:[%s14136_s20 + $0x324] sm:$0xf0] }
 0x7df   :  { %7999 = vmatmul.msk.bf16.vlgmr.msrb.gmra.mxu3 %vm4252_vm8, %v12821_v36  ;;  %8001 = vmatmul.msk.bf16.vlgmr.msra.gmra.mxu0 %vm4252_vm8, %v12821_v36  ;;  %vm5237_vm1 = vcmask 521216  }
 0x7e0   :  { %4986 = vmatpush.bf16.msra.mxu1 %v8222_v47  ;;  %4630 = vmatpush.bf16.msrb.mxu3 %v8144_v60  ;;  %v8214_v47 = vor.u32 %v9033_v12, %v8213_v24  ;;  %v8303_v60 = vld [vmem:[%s14136_s20 + $0x30c] sm:$0xf0] }
 0x7e1   :  { %4949 = vmatpush.bf16.msra.mxu2 %v8206_v21  ;;  %4668 = vmatpush.bf16.msra.mxu0 %v8148_v51  ;;  %v8325_v21 = vld [vmem:[%s14136_s20 + $0x330] sm:$0xf]  ;;  %v8306_v6 = vor.u32 %v9055_v14, %v8303_v60  ;;  %v9066_v51 = vld [vmem:[%s14136_s20 + $0x358] sm:$0xf0] }
 0x7e4   :  { %4615 = vmatmul.bf16.vlgmr.msrb.gmra.mxu2 %v12468_v33  ;;  %4653 = vmatmul.bf16.vlgmr.msrb.gmra.mxu1 %v12468_v33  ;;  %v8337_v33 = vld [vmem:[%s14136_s20 + $0x348] sm:$0xf] }
 0x7e5   :  { %4987 = vmatpush.bf16.msra.mxu1 %v8210_v59  ;;  %5018 = vmatpush.bf16.msrb.mxu2 %v8298_v53  ;;  %v9062_v59 = vld [vmem:[%s14136_s20 + $0x338] sm:$0xf0]  ;;  %v8330_v53 = vor.u32 %v9061_v7, %v8327_v41 }
 0x7e6   :  { %4631 = vmatpush.bf16.msrb.mxu3 %v8132_v31  ;;  %4669 = vmatpush.bf16.msra.mxu0 %v8136_v18  ;;  %v8326_v19 = vor.u32 %v9062_v59, %v8325_v21  ;;  %v8321_v31 = vld [vmem:[%s14136_s20 + $0x320] sm:$0xf] }
 0x7e7   :  { %v8322_v44 = vor.u32 %v9060_v9, %v8321_v31 }
 0x7e9   :  { %5019 = vmatpush.bf16.msrb.mxu2 %v8286_v57  ;;  %v9059_v57 = vld [vmem:[%s14136_s20 + $0x320] sm:$0xf0] }
 0x7ea   :  { %4632 = vmatpush.bf16.msrb.mxu3 %v8120_v10  ;;  %4670 = vmatpush.bf16.msra.mxu0 %v8124_v16  ;;  %v8314_v35 = vor.u32 %v9059_v57, %v8313_v17  ;;  %v8310_v10 = vor.u32 %v9057_v52, %v8309_v0 }
 0x7ed   :  { %5020 = vmatpush.bf16.msrb.mxu2 %v8274_v45  ;;  %v8318_v45 = vor.u32 %v9058_v11, %v8315_v20 }
 0x7ee   :  { %4633 = vmatpush.bf16.msrb.mxu3 %v8108_v37  ;;  %4671 = vmatpush.bf16.msra.mxu0 %v8112_v23 }
 0x7ef   :  { %8000 = vmatmul.msk.bf16.gmra.mxu3 %vm4252_vm8, %v12860_v62  ;;  %8002 = vmatmul.msk.bf16.gmra.mxu0 %vm4252_vm8, %v12860_v62 }
 0x7f1   :  { %5021 = vmatpush.bf16.msrb.mxu2 %v8262_v13  ;;  %v8346_v13 = vor.u32 %v9066_v51, %v8345_v43 }
 0x7f4   :  { %4620 = vmatmul.bf16.gmra.mxu2 %v12508_v50  ;;  %4658 = vmatmul.bf16.gmra.mxu1 %v12508_v50  ;;  %v9065_v50 = vld [vmem:[%s14136_s20 + $0x350] sm:$0xf0] }
 0x7f5   :  { %5022 = vmatpush.bf16.msrb.mxu2 %v8250_v48  ;;  %v8338_v27 = vor.u32 %v9065_v50, %v8337_v33  ;;  %v4739_v48 = vrot.slane %v12715_v40, 1 }
 0x7f7   :  { %v4741_v39 = vsel %vm339_vm3, %v4739_v48, %v4740_v26 }
 0x7f9   :  { %5023 = vmatpush.bf16.msrb.mxu2 %v8238_v46 }
 0x7fd   :  { %5024 = vmatpush.bf16.msrb.mxu2 %v8226_v49 }
 0x7ff   :  { %8003 = vmatmul.msk.bf16.vlgmr.msra.gmra.mxu3 %vm4252_vm8, %v12821_v36  ;;  %8149 = vmatmul.msk.bf16.vlgmr.msrb.gmra.mxu0 %vm4252_vm8, %v12715_v40  ;;  %v4738_v36 = vsel %vm339_vm3, %v4736_v5, %v4737_v8 }
 0x800   :  { %4965 = vmatpush.bf16.msra.mxu3 %v8338_v27  ;;  %5003 = vmatpush.bf16.msrb.mxu0 %v8342_v32 }
 0x801   :  { %5025 = vmatpush.bf16.msrb.mxu2 %v8214_v47 }
 0x804   :  { %4950 = vmatmul.bf16.vlgmr.msra.gmra.mxu2 %v4738_v36  ;;  %4988 = vmatmul.bf16.vlgmr.msra.gmra.mxu1 %v4738_v36 }
 0x805   :  { %4966 = vmatpush.bf16.msra.mxu3 %v8326_v19  ;;  %5004 = vmatpush.bf16.msrb.mxu0 %v8330_v53 }
 0x809   :  { %4967 = vmatpush.bf16.msra.mxu3 %v8314_v35  ;;  %5005 = vmatpush.bf16.msrb.mxu0 %v8318_v45 }
 0x80d   :  { %5006 = vmatpush.bf16.msrb.mxu0 %v8306_v6 }
 0x80f   :  { %8004 = vmatmul.msk.bf16.gmra.mxu3 %vm4252_vm8, %v12860_v62  ;;  %8150 = vmatmul.msk.bf16.gmra.mxu0 %vm4252_vm8, %v12792_v25  ;;  %v8301_v62 = vld [vmem:[%s14136_s20 + $0x300] sm:$0xf] }
 0x810   :  { %v8302_v38 = vor.u32 %v9056_v63, %v8301_v62 }
 0x812   :  { %4968 = vmatpush.bf16.msra.mxu3 %v8302_v38 }
 0x814   :  { %4955 = vmatmul.bf16.gmra.mxu2 %v4737_v8  ;;  %4993 = vmatmul.bf16.gmra.mxu1 %v4737_v8 }
 0x81f   :  { %8151 = vmatmul.msk.bf16.vlgmr.msrb.gmra.mxu3 %vm4252_vm8, %v12715_v40  ;;  %8153 = vmatmul.msk.bf16.vlgmr.msra.gmra.mxu0 %vm4252_vm8, %v12715_v40 }
 0x820   :  { %5041 = vmatpush.bf16.msrb.mxu3 %v8346_v13 }
 0x821   :  { %v4306_v61 = vpop.f32.mrf.mxu1 }
 0x824   :  { %5026 = vmatmul.bf16.vlgmr.msrb.gmra.mxu2 %v4738_v36  ;;  %5042 = vmatpush.bf16.msrb.mxu3 %v8334_v56 }
 0x827   :  { %v13034_v42 = vpop.f32.mrf.mxu2 }
 0x828   :  { %5043 = vmatpush.bf16.msrb.mxu3 %v8322_v44 }
 0x829   :  { %v13031_v18 = vpop.f32.mrf.mxu1 }
 0x82c   :  { %5044 = vmatpush.bf16.msrb.mxu3 %v8310_v10 }
 0x82f   :  { %8152 = vmatmul.msk.bf16.gmra.mxu3 %vm4252_vm8, %v12792_v25  ;;  %8154 = vmatmul.msk.bf16.gmra.mxu0 %vm4252_vm8, %v12792_v25  ;;  %v4270_v34 = vpop.f32.mrf.mxu2 }
 0x831   :  { %v13046_v25 = vpop.f32.mrf.mxu1 }
 0x834   :  { %5031 = vmatmul.bf16.gmra.mxu2 %v4737_v8 }
 0x837   :  { %v4273_v58 = vpop.f32.mrf.mxu2 }
 0x839   :  { %v13048_v40 = vpop.f32.mrf.mxu1 }
 0x83f   :  { %8347 = vmatmul.msk.bf16.vlgmr.msra.gmra.mxu3 %vm4252_vm8, %v4741_v39  ;;  %8349 = vmatmul.msk.bf16.vlgmr.msrb.gmra.mxu0 %vm4252_vm8, %v4741_v39  ;;  %v4275_v4 = vpop.f32.mrf.mxu2 }
 0x841   :  { %v13052_v16 = vpop.f32.mrf.mxu1 }
 0x847   :  { %v4344_v37 = vpop.f32.mrf.mxu2 }
 0x849   :  { %v4580_v29 = vpop.f32.mrf.mxu1 }
 0x84f   :  { %8348 = vmatmul.msk.bf16.gmra.mxu3 %vm4252_vm8, %v4740_v26  ;;  %8350 = vmatmul.msk.bf16.gmra.mxu0 %vm4252_vm8, %v4740_v26  ;;  %v4346_v24 = vpop.f32.mrf.mxu2 }
 0x851   :  { %v4583_v1 = vpop.f32.mrf.mxu1 }
 0x857   :  { %v4349_v55 = vpop.f32.mrf.mxu2 }
 0x859   :  { %v4585_v36 = vpop.f32.mrf.mxu1 }
 0x85c   :  { %v4325_v30 = vpop.f32.mrf.mxu0 }
 0x85d   :  { %v13054_v46 = vadd.f32 %v4325_v30, %v4306_v61 }
 0x85f   :  { %8351 = vmatmul.msk.bf16.vlgmr.msrb.gmra.mxu3 %vm4252_vm8, %v4741_v39  ;;  %v4351_v7 = vpop.f32.mrf.mxu2 }
 0x861   :  { %v4654_v59 = vpop.f32.mrf.mxu1 }
 0x862   :  { %v4287_v28 = vpop.f32.mrf.mxu3 }
 0x864   :  { %v13057_v22 = vpop.f32.mrf.mxu0 }
 0x867   :  { %v4616_v45 = vpop.f32.mrf.mxu2 }
 0x869   :  { %v4656_v11 = vpop.f32.mrf.mxu1 }
 0x86a   :  { %v4289_v23 = vpop.f32.mrf.mxu3 }
 0x86b   :  { %v4290_v49 = vadd.f32 %v4289_v23, %v4270_v34  ;;  %v4617_v23 = vadd.f32 %v4616_v45, %v13054_v46 }
 0x86c   :  { %v13059_v5 = vpop.f32.mrf.mxu0 }
 0x86d   :  { %v4581_v8 = vadd.f32 %v4580_v29, %v4290_v49 }
 0x86f   :  { %8352 = vmatmul.msk.bf16.gmra.mxu3 %vm4252_vm8, %v4740_v26  ;;  %v4618_v51 = vpop.f32.mrf.mxu2 }
 0x871   :  { %v4659_v14 = vpop.f32.mrf.mxu1 }
 0x872   :  { %v4292_v12 = vpop.f32.mrf.mxu3 }
 0x873   :  { %v4293_v47 = vadd.f32 %v4292_v12, %v4273_v58 }
 0x874   :  { %v13062_v33 = vpop.f32.mrf.mxu0 }
 0x875   :  { %v13064_v50 = vadd.f32 %v4583_v1, %v4293_v47 }
 0x877   :  { %v4621_v44 = vpop.f32.mrf.mxu2 }
 0x879   :  { %v4661_v54 = vpop.f32.mrf.mxu1 }
 0x87a   :  { %v4294_v27 = vpop.f32.mrf.mxu3 }
 0x87b   :  { %v4295_v2 = vadd.f32 %v4294_v27, %v4275_v4 }
 0x87c   :  { %v4597_v32 = vpop.f32.mrf.mxu0 }
 0x87d   :  { %v4586_v21 = vadd.f32 %v4585_v36, %v4295_v2 }
 0x87f   :  { %v13076_v52 = vpop.f32.mrf.mxu2 }
 0x882   :  { %v4363_v19 = vpop.f32.mrf.mxu3 }
 0x883   :  { %v4364_v41 = vadd.f32 %v4363_v19, %v4344_v37  ;;  %v4989_v37 = vpop.f32.mrf.mxu1 }
 0x884   :  { %v4599_v53 = vpop.f32.mrf.mxu0 }
 0x885   :  { %v13066_v17 = vadd.f32 %v4599_v53, %v4581_v8  ;;  %v4655_v57 = vadd.f32 %v4654_v59, %v4364_v41  ;;  %v4288_v8 = vadd.f32 %v4287_v28, %v13034_v42  ;;  %v5261_v42 = vld [vmem:[%s14084_s16 + $0x78] sm:$0xff] }
 0x886   :  { %5289 = vmatpush.msrb.mxu1 %v5261_v42  ;;  %5397 = vmatpush.msra.mxu3 %v5261_v42  ;;  %v5252_v42 = vld [vmem:[%s14084_s16 + $0x30] sm:$0xff] }
 0x887   :  { %v4951_v4 = vpop.f32.mrf.mxu2  ;;  %v4579_v2 = vadd.f32 %v13052_v16, %v4288_v8 }
 0x889   :  { %v4598_v46 = vadd.f32 %v4597_v32, %v4579_v2  ;;  %v5259_v32 = vld [vmem:[%s14084_s16 + $0x68] sm:$0xff] }
 0x88a   :  { %v4365_v35 = vpop.f32.mrf.mxu3 }
 0x88b   :  { %v4366_v20 = vadd.f32 %v4365_v35, %v4346_v24  ;;  %v4991_v27 = vpop.f32.mrf.mxu1 }
 0x88c   :  { %v13068_v62 = vpop.f32.mrf.mxu0 }
 0x88d   :  { %v4657_v63 = vadd.f32 %v4656_v11, %v4366_v20  ;;  %v4331_v20 = vadd.f32 %v13059_v5, %v13046_v25 }
 0x88f   :  { %v4953_v47 = vpop.f32.mrf.mxu2 }
 0x892   :  { %v4368_v38 = vpop.f32.mrf.mxu3 }
 0x893   :  { %v4369_v60 = vadd.f32 %v4368_v38, %v4349_v55  ;;  %v4328_v55 = vadd.f32 %v13057_v22, %v13031_v18  ;;  %v5260_v18 = vld [vmem:[%s14084_s16 + $0x70] sm:$0xff] }
 0x894   :  { %v4604_v6 = vpop.f32.mrf.mxu0  ;;  %5290 = vmatpush.msrb.mxu1 %v5260_v18  ;;  %5398 = vmatpush.msra.mxu3 %v5260_v18  ;;  %v13168_v18 = vld [vmem:[%s14084_s16 + $0xf0] sm:$0xff] }
 0x895   :  { %v13070_v61 = vadd.f32 %v4604_v6, %v4586_v21  ;;  %v4660_v43 = vadd.f32 %v4659_v14, %v4369_v60  ;;  %v4619_v59 = vadd.f32 %v4618_v51, %v4328_v55  ;;  %v4622_v60 = vadd.f32 %v4621_v44, %v4331_v20  ;;  %v4994_v6 = vpop.f32.mrf.mxu1  ;;  %v5257_v51 = vld [vmem:[%s14084_s16 + $0x58] sm:$0xff]  ;;  %v5250_v20 = vld [vmem:[%s14084_s16 + $0x20] sm:$0xff] }
 0x896   :  { %5291 = vmatpush.msrb.mxu1 %v5259_v32  ;;  %5399 = vmatpush.msra.mxu3 %v5259_v32 }
 0x897   :  { %v4956_v45 = vpop.f32.mrf.mxu2 }
 0x89a   :  { %v4370_v13 = vpop.f32.mrf.mxu3 }
 0x89b   :  { %v4371_v3 = vadd.f32 %v4370_v13, %v4351_v7 }
 0x89c   :  { %v4673_v56 = vpop.f32.mrf.mxu0 }
 0x89d   :  { %v13072_v31 = vadd.f32 %v4673_v56, %v4655_v57  ;;  %v4662_v9 = vadd.f32 %v4661_v54, %v4371_v3  ;;  %v5256_v56 = vld [vmem:[%s14084_s16 + $0x50] sm:$0xff] }
 0x89f   :  { %v4958_v55 = vpop.f32.mrf.mxu2 }
 0x8a2   :  { %v4635_v26 = vpop.f32.mrf.mxu3 }
 0x8a3   :  { %v4636_v24 = vadd.f32 %v4635_v26, %v4617_v23  ;;  %v5254_v23 = vld [vmem:[%s14084_s16 + $0x40] sm:$0xff] }
 0x8a4   :  { %v4675_v48 = vpop.f32.mrf.mxu0 }
 0x8a5   :  { %v13074_v0 = vadd.f32 %v4675_v48, %v4657_v63  ;;  %v5258_v63 = vld [vmem:[%s14084_s16 + $0x60] sm:$0xff] }
 0x8a6   :  { %5292 = vmatpush.msrb.mxu1 %v5258_v63  ;;  %5400 = vmatpush.msra.mxu3 %v5258_v63 }
 0x8a8   :  { %5293 = vmatpush.msrb.mxu1 %v5257_v51  ;;  %5401 = vmatpush.msra.mxu3 %v5257_v51  ;;  %v5249_v51 = vld [vmem:[%s14084_s16 + $0x18] sm:$0xff] }
 0x8aa   :  { %v4637_v39 = vpop.f32.mrf.mxu3  ;;  %5294 = vmatpush.msrb.mxu1 %v5256_v56  ;;  %5402 = vmatpush.msra.mxu3 %v5256_v56  ;;  %v5027_v56 = vpop.f32.mrf.mxu2 }
 0x8ab   :  { %v4638_v16 = vadd.f32 %v4637_v39, %v4619_v59 }
 0x8ac   :  { %v4678_v10 = vpop.f32.mrf.mxu0 }
 0x8ad   :  { %v13078_v34 = vadd.f32 %v4678_v10, %v4660_v43  ;;  %v5255_v10 = vld [vmem:[%s14084_s16 + $0x48] sm:$0xff] }
 0x8ae   :  { %5295 = vmatpush.msrb.mxu1 %v5255_v10  ;;  %5403 = vmatpush.msra.mxu3 %v5255_v10 }
 0x8b0   :  { %5296 = vmatpush.msrb.mxu1 %v5254_v23  ;;  %5404 = vmatpush.msra.mxu3 %v5254_v23 }
 0x8b2   :  { %v4640_v58 = vpop.f32.mrf.mxu3 }
 0x8b4   :  { %v4680_v30 = vpop.f32.mrf.mxu0 }
 0x8b5   :  { %v13080_v29 = vadd.f32 %v4680_v30, %v4662_v9  ;;  %v4641_v9 = vadd.f32 %v4640_v58, %v4622_v60  ;;  %v13194_v60 = vld [vmem:[%s14084_s16 + $0xe0] sm:$0xff] }
 0x8ba   :  { %v13082_v1 = vpop.f32.mrf.mxu3 }
 0x8bc   :  { %v5008_v49 = vpop.f32.mrf.mxu0 }
 0x8bd   :  { %v5009_v12 = vadd.f32 %v5008_v49, %v4989_v37 }
 0x8bf   :  { %v13086_v36 = vadd.f32 %v5009_v12, %v4636_v24 }
 0x8c1   :  { %v5069_v21 = vmul.f32 %v13086_v36, %v13086_v36 }
 0x8c2   :  { %v4970_v7 = vpop.f32.mrf.mxu3 }
 0x8c3   :  { %v5081_v28 = vmul.f32 %v5069_v21, %v13086_v36  ;;  %v4971_v19 = vadd.f32 %v4970_v7, %v4951_v4 }
 0x8c4   :  { %v5010_v41 = vpop.f32.mrf.mxu0 }
 0x8c5   :  { %v13100_v22 = vadd.f32 %v4971_v19, %v4598_v46  ;;  %v5011_v53 = vadd.f32 %v5010_v41, %v4991_v27  ;;  %v5093_v57 = vmul.f32 0.044715, %v5081_v28 }
 0x8c7   :  { %v5068_v11 = vmul.f32 %v13100_v22, %v13100_v22  ;;  %v13107_v35 = vadd.f32 %v5011_v53, %v4638_v16  ;;  %v5105_v25 = vadd.f32 %v5093_v57, %v13086_v36 }
 0x8c9   :  { %v5080_v14 = vmul.f32 %v5068_v11, %v13100_v22  ;;  %v5072_v38 = vmul.f32 %v13107_v35, %v13107_v35  ;;  %v5117_v4 = vmul.f32 0.7978846, %v5105_v25  ;;  %v13182_v11 = vld [vmem:[%s14084_s16 + $0xe8] sm:$0xff] }
 0x8ca   :  { %v4972_v43 = vpop.f32.mrf.mxu3 }
 0x8cb   :  { %v5092_v5 = vmul.f32 0.044715, %v5080_v14  ;;  %v5084_v13 = vmul.f32 %v5072_v38, %v13107_v35  ;;  %v4973_v3 = vadd.f32 %v4972_v43, %v4953_v47  ;;  %v4603_v47 = vadd.f32 %v13068_v62, %v13064_v50  ;;  %v4996_v50 = vpop.f32.mrf.mxu1 }
 0x8cc   :  { %v5013_v54 = vpop.f32.mrf.mxu0  ;;  %9345 = vtanh.f32 %v5117_v4  ;;  %v13217_v4 = vld [vmem:[%s14084_s16 + $0xd0] sm:$0xff] }
 0x8cd   :  { %v5096_v44 = vmul.f32 0.044715, %v5084_v13  ;;  %v13126_v26 = vadd.f32 %v4973_v3, %v13066_v17  ;;  %v5014_v48 = vadd.f32 %v5013_v54, %v4994_v6  ;;  %v5104_v39 = vadd.f32 %v5092_v5, %v13100_v22  ;;  %v13204_v3 = vld [vmem:[%s14084_s16 + $0xd8] sm:$0xff] }
 0x8ce   :  { %v4333_v17 = vadd.f32 %v13062_v33, %v13048_v40  ;;  %v5253_v33 = vld [vmem:[%s14084_s16 + $0x38] sm:$0xff] }
 0x8cf   :  { %v5108_v30 = vadd.f32 %v5096_v44, %v13107_v35  ;;  %v5071_v37 = vmul.f32 %v13126_v26, %v13126_v26  ;;  %v13135_v58 = vadd.f32 %v5014_v48, %v4641_v9  ;;  %v5116_v27 = vmul.f32 0.7978846, %v5104_v39  ;;  %5297 = vmatpush.msrb.mxu1 %v5253_v33  ;;  %5405 = vmatpush.msra.mxu3 %v5253_v33  ;;  %v5248_v9 = vld [vmem:[%s14084_s16 + $0x10] sm:$0xff]  ;;  %v13239_v33 = vld [vmem:[%s14084_s16 + $0xc0] sm:$0xff] }
 0x8d0   :  { %v4624_v12 = vadd.f32 %v13076_v52, %v4333_v17  ;;  %v13155_v52 = vld [vmem:[%s14084_s16 + $0xf8] sm:$0xff] }
 0x8d1   :  { %v5120_v49 = vmul.f32 0.7978846, %v5108_v30  ;;  %v5083_v8 = vmul.f32 %v5071_v37, %v13126_v26  ;;  %v5075_v24 = vmul.f32 %v13135_v58, %v13135_v58  ;;  %5309 = vmatpush.msra.mxu0 %v13155_v52  ;;  %5298 = vmatpush.msrb.mxu1 %v5252_v42  ;;  %v5247_v30 = vld [vmem:[%s14084_s16 + $0x8] sm:$0xff] }
 0x8d2   :  { %v4975_v40 = vpop.f32.mrf.mxu3  ;;  %v4643_v62 = vadd.f32 %v13082_v1, %v4624_v12  ;;  %5406 = vmatpush.msra.mxu3 %v5252_v42  ;;  %v5251_v1 = vld [vmem:[%s14084_s16 + $0x28] sm:$0xff]  ;;  %v5246_v12 = vld [vmem:[%s14084_s16] sm:$0xff]  ;;  %v13246_v42 = vld [vmem:[%s14084_s16 + $0xb8] sm:$0xff] }
 0x8d3   :  { %v5095_v2 = vmul.f32 0.044715, %v5083_v8  ;;  %v5087_v21 = vmul.f32 %v5075_v24, %v13135_v58  ;;  %v4976_v59 = vadd.f32 %v4975_v40, %v4956_v45  ;;  %9347 = vtanh.f32 %v5120_v49  ;;  %5310 = vmatpush.msra.mxu0 %v13168_v18  ;;  %5299 = vmatpush.msrb.mxu1 %v5251_v1  ;;  %v9346_v45 = vpop.eup %9345  ;;  %v13229_v8 = vld [vmem:[%s14084_s16 + $0xc8] sm:$0xff] }
 0x8d4   :  { %v5015_v7 = vpop.f32.mrf.mxu0  ;;  %9349 = vtanh.f32 %v5116_v27  ;;  %5407 = vmatpush.msra.mxu3 %v5251_v1  ;;  %v5141_v17 = vadd.f32 1.0, %v9346_v45 }
 0x8d5   :  { %v5107_v46 = vadd.f32 %v5095_v2, %v13126_v26  ;;  %v5099_v28 = vmul.f32 0.044715, %v5087_v21  ;;  %v13163_v19 = vadd.f32 %v4976_v59, %v4603_v47  ;;  %v5016_v41 = vadd.f32 %v5015_v7, %v4996_v50  ;;  %5311 = vmatpush.msra.mxu0 %v13182_v11  ;;  %5300 = vmatpush.msrb.mxu1 %v5250_v20 }
 0x8d6   :  { %5408 = vmatpush.msra.mxu3 %v5250_v20  ;;  %v5153_v50 = vmul.f32 0.5, %v5141_v17  ;;  %v13324_v17 = vld [vmem:[%s14084_s16 + $0x90] sm:$0xff] }
 0x8d7   :  { %v5119_v16 = vmul.f32 0.7978846, %v5107_v46  ;;  %v5111_v53 = vadd.f32 %v5099_v28, %v13135_v58  ;;  %v5074_v32 = vmul.f32 %v13163_v19, %v13163_v19  ;;  %v13177_v57 = vadd.f32 %v5016_v41, %v4643_v62  ;;  %5312 = vmatpush.msra.mxu0 %v13194_v60  ;;  %5301 = vmatpush.msrb.mxu1 %v5249_v51 }
 0x8d8   :  { %5409 = vmatpush.msra.mxu3 %v5249_v51 }
 0x8d9   :  { %9351 = vtanh.f32 %v5119_v16  ;;  %v5123_v63 = vmul.f32 0.7978846, %v5111_v53  ;;  %v5086_v14 = vmul.f32 %v5074_v32, %v13163_v19  ;;  %v5078_v38 = vmul.f32 %v13177_v57, %v13177_v57  ;;  %v9348_v6 = vpop.eup %9347  ;;  %5313 = vmatpush.msra.mxu0 %v13204_v3  ;;  %5302 = vmatpush.msrb.mxu1 %v5248_v9  ;;  %v13260_v16 = vld [vmem:[%s14084_s16 + $0xb0] sm:$0xff]  ;;  %v13262_v53 = vpop.permute.xlu1 %5182 }
 0x8da   :  { %v4977_v43 = vpop.f32.mrf.mxu3  ;;  %v9350_v54 = vpop.eup %9349  ;;  %v5144_v44 = vadd.f32 1.0, %v9348_v6  ;;  %5410 = vmatpush.msra.mxu3 %v5248_v9 }
 0x8db   :  { %9353 = vtanh.f32 %v5123_v63  ;;  %v5098_v25 = vmul.f32 0.044715, %v5086_v14  ;;  %v5090_v5 = vmul.f32 %v5078_v38, %v13177_v57  ;;  %v4978_v13 = vadd.f32 %v4977_v43, %v4958_v55  ;;  %5314 = vmatpush.msra.mxu0 %v13217_v4  ;;  %5303 = vmatpush.msrb.mxu1 %v5247_v30  ;;  %v5029_v32 = vpop.f32.mrf.mxu2  ;;  %v13274_v63 = vld [vmem:[%s14084_s16 + $0xa8] sm:$0xff]  ;;  %v13276_v14 = vpop.permute.xlu2 %5187 }
 0x8dc   :  { %5411 = vmatpush.msra.mxu3 %v5247_v30  ;;  %v5140_v24 = vadd.f32 1.0, %v9350_v54  ;;  %v5156_v55 = vmul.f32 0.5, %v5144_v44  ;;  %v13306_v44 = vld [vmem:[%s14084_s16 + $0x98] sm:$0xff] }
 0x8dd   :  { %v5110_v48 = vadd.f32 %v5098_v25, %v13163_v19  ;;  %v5102_v39 = vmul.f32 0.044715, %v5090_v5  ;;  %v13212_v10 = vadd.f32 %v4978_v13, %v13070_v61  ;;  %5315 = vmatpush.msra.mxu0 %v13229_v8  ;;  %5304 = vmatpush.msrb.mxu1 %v5246_v12 }
 0x8de   :  { %5412 = vmatpush.msra.mxu3 %v5246_v12  ;;  %v5152_v28 = vmul.f32 0.5, %v5140_v24  ;;  %v13251_v41 = vmul.f32 %v5156_v55, %v13107_v35  ;;  %v13340_v24 = vld [vmem:[%s14084_s16 + $0x88] sm:$0xff] }
 0x8df   :  { %v9352_v37 = vpop.eup %9351  ;;  %v5122_v23 = vmul.f32 0.7978846, %v5110_v48  ;;  %v5114_v49 = vadd.f32 %v5102_v39, %v13177_v57  ;;  %v5077_v61 = vmul.f32 %v13212_v10, %v13212_v10  ;;  %5316 = vmatpush.msra.mxu0 %v13239_v33  ;;  %5417 = vmatpush.msra.mxu1 %v13155_v52 }
 0x8e0   :  { %v5143_v2 = vadd.f32 1.0, %v9352_v37  ;;  %v5204_v43 = vmul.f32 %v13276_v14, %v13251_v41 }
 0x8e1   :  { %v9354_v47 = vpop.eup %9353  ;;  %9355 = vtanh.f32 %v5122_v23  ;;  %v5126_v27 = vmul.f32 0.7978846, %v5114_v49  ;;  %v5089_v40 = vmul.f32 %v5077_v61, %v13212_v10  ;;  %5317 = vmatpush.msra.mxu0 %v13246_v42  ;;  %5418 = vmatpush.msra.mxu1 %v13168_v18  ;;  %v13267_v18 = vmul.f32 %v5153_v50, %v13086_v36  ;;  %v13342_v12 = vpop.permute.xlu1 %5197  ;;  %v13356_v50 = vld [vmem:[%s14084_s16 + $0x80] sm:$0xff] }
 0x8e2   :  { %v5147_v21 = vadd.f32 1.0, %v9354_v47  ;;  %v5046_v59 = vpop.f32.mrf.mxu3  ;;  %v5155_v20 = vmul.f32 0.5, %v5143_v2  ;;  %v5353_v39 = vmul.f32 %v5204_v43, %v13251_v41 }
 0x8e3   :  { %9357 = vtanh.f32 %v5126_v27  ;;  %v5101_v62 = vmul.f32 0.044715, %v5089_v40  ;;  %v5047_v7 = vadd.f32 %v5046_v59, %v5027_v56  ;;  %5318 = vmatpush.msra.mxu0 %v13260_v16  ;;  %5419 = vmatpush.msra.mxu1 %v13182_v11  ;;  %v13284_v11 = vmul.f32 %v5152_v28, %v13100_v22  ;;  %v13299_v22 = vpop.permute.xlu0 %5192  ;;  %v5032_v47 = vpop.f32.mrf.mxu2 }
 0x8e4   :  { %v5159_v46 = vmul.f32 0.5, %v5147_v21  ;;  %v13295_v25 = vmul.f32 %v5155_v20, %v13126_v26  ;;  %v5201_v13 = vmul.f32 %v13262_v53, %v13267_v18 }
 0x8e5   :  { %v5113_v52 = vadd.f32 %v5101_v62, %v13212_v10  ;;  %v13255_v1 = vadd.f32 %v5047_v7, %v13072_v31  ;;  %5319 = vmatpush.msra.mxu0 %v13274_v63  ;;  %5420 = vmatpush.msra.mxu1 %v13194_v60 }
 0x8e6   :  { %v13279_v38 = vmul.f32 %v5159_v46, %v13135_v58  ;;  %v13292_v58 = vld [vmem:[%s14084_s16 + $0xa0] sm:$0xff]  ;;  %v5350_v49 = vmul.f32 %v5201_v13, %v13267_v18  ;;  %v5222_v55 = vadd.f32 %v5204_v43, %v5201_v13 }
 0x8e7   :  { %v9356_v35 = vpop.eup %9355  ;;  %v5125_v45 = vmul.f32 0.7978846, %v5113_v52  ;;  %v5070_v31 = vmul.f32 %v13255_v1, %v13255_v1  ;;  %5320 = vmatpush.msra.mxu0 %v13292_v58  ;;  %5421 = vmatpush.msra.mxu1 %v13204_v3  ;;  %v5200_v3 = vmul.f32 %v13262_v53, %v13284_v11 }
 0x8e8   :  { %v5146_v6 = vadd.f32 1.0, %v9356_v35  ;;  %v5207_v26 = vmul.f32 %v13299_v22, %v13279_v38  ;;  %v5371_v2 = vadd.f32 %v5353_v39, %v5350_v49 }
 0x8e9   :  { %v9358_v36 = vpop.eup %9357  ;;  %9359 = vtanh.f32 %v5125_v45  ;;  %v5082_v51 = vmul.f32 %v5070_v31, %v13255_v1  ;;  %5321 = vmatpush.msra.mxu0 %v13306_v44  ;;  %5422 = vmatpush.msra.mxu1 %v13217_v4 }
 0x8ea   :  { %v5158_v5 = vmul.f32 0.5, %v5146_v6  ;;  %v5048_v60 = vpop.f32.mrf.mxu3  ;;  %v5150_v54 = vadd.f32 1.0, %v9358_v36  ;;  %v5223_v7 = vadd.f32 %v5222_v55, %v5207_v26 }
 0x8eb   :  { %v5094_v56 = vmul.f32 0.044715, %v5082_v51  ;;  %v5049_v9 = vadd.f32 %v5048_v60, %v5029_v32  ;;  %5322 = vmatpush.msra.mxu0 %v13324_v17  ;;  %5423 = vmatpush.msra.mxu1 %v13229_v8  ;;  %v5356_v8 = vmul.f32 %v5207_v26, %v13279_v38 }
 0x8ec   :  { %v13311_v48 = vmul.f32 %v5158_v5, %v13163_v19  ;;  %v5162_v30 = vmul.f32 0.5, %v5150_v54  ;;  %v5203_v19 = vmul.f32 %v13276_v14, %v13295_v25 }
 0x8ed   :  { %v13319_v37 = vadd.f32 %v5049_v9, %v13074_v0  ;;  %v5106_v23 = vadd.f32 %v5094_v56, %v13255_v1  ;;  %5323 = vmatpush.msra.mxu0 %v13340_v24  ;;  %5424 = vmatpush.msra.mxu1 %v13239_v33  ;;  %v5372_v45 = vadd.f32 %v5371_v2, %v5356_v8 }
 0x8ee   :  { %v13333_v0 = vmul.f32 %v5162_v30, %v13177_v57  ;;  %v5206_v27 = vmul.f32 %v13299_v22, %v13311_v48  ;;  %v5349_v57 = vmul.f32 %v5200_v3, %v13284_v11  ;;  %v5352_v62 = vmul.f32 %v5203_v19, %v13295_v25 }
 0x8ef   :  { %v9360_v4 = vpop.eup %9359  ;;  %v5073_v61 = vmul.f32 %v13319_v37, %v13319_v37  ;;  %v5118_v28 = vmul.f32 0.7978846, %v5106_v23  ;;  %5324 = vmatpush.msra.mxu0 %v13356_v50  ;;  %5425 = vmatpush.msra.mxu1 %v13246_v42  ;;  %v5212_v43 = vadd.f32 %v5203_v19, %v5200_v3  ;;  %v5034_v23 = vpop.f32.mrf.mxu2 }
 0x8f0   :  { %v5149_v40 = vadd.f32 1.0, %v9360_v4  ;;  %v5210_v21 = vmul.f32 %v13342_v12, %v13333_v0  ;;  %v5355_v31 = vmul.f32 %v5206_v27, %v13311_v48  ;;  %v5361_v60 = vadd.f32 %v5352_v62, %v5349_v57 }
 0x8f1   :  { %v5085_v59 = vmul.f32 %v5073_v61, %v13319_v37  ;;  %5426 = vmatpush.msra.mxu1 %v13260_v16  ;;  %v5213_v56 = vadd.f32 %v5212_v43, %v5206_v27  ;;  %9361 = vtanh.f32 %v5118_v28 }
 0x8f2   :  { %v5161_v46 = vmul.f32 0.5, %v5149_v40  ;;  %v5051_v52 = vpop.f32.mrf.mxu3  ;;  %v5224_v33 = vsel %vm175_vm0, %v5210_v21, 0.0  ;;  %v5359_v32 = vmul.f32 %v5210_v21, %v13333_v0  ;;  %v5362_v26 = vadd.f32 %v5361_v60, %v5355_v31 }
 0x8f3   :  { %v5097_v20 = vmul.f32 0.044715, %v5085_v59  ;;  %v5052_v35 = vadd.f32 %v5051_v52, %v5032_v47  ;;  %v5225_v36 = vadd.f32 %v5224_v33, %v5223_v7  ;;  %5427 = vmatpush.msra.mxu1 %v13274_v63 }
 0x8f4   :  { %v13365_v6 = vmul.f32 %v5161_v46, %v13212_v10  ;;  %v5373_v51 = vsel %vm175_vm0, %v5359_v32, 0.0 }
 0x8f5   :  { %v5109_v42 = vadd.f32 %v5097_v20, %v13319_v37  ;;  %v13371_v5 = vadd.f32 %v5052_v35, %v13078_v34  ;;  %v5226_v54 = vrot.slane %v5225_v36, 4  ;;  %v5374_v10 = vadd.f32 %v5373_v51, %v5372_v45  ;;  %5428 = vmatpush.msra.mxu1 %v13292_v58 }
 0x8f6   :  { %v5209_v13 = vmul.f32 %v13342_v12, %v13365_v6 }
 0x8f7   :  { %v5121_v9 = vmul.f32 0.7978846, %v5109_v42  ;;  %v5076_v16 = vmul.f32 %v13371_v5, %v13371_v5  ;;  %v5227_v39 = vadd.f32 %v5226_v54, %v5225_v36  ;;  %v5375_v63 = vrot.slane %v5374_v10, 4  ;;  %5429 = vmatpush.msra.mxu1 %v13306_v44  ;;  %v9362_v57 = vpop.eup %9361  ;;  %v5283_v36 = vld [vmem:[%s14084_s16 + $0x128] sm:$0xff] }
 0x8f8   :  { %v5214_v3 = vsel %vm175_vm0, %v5209_v13, 0.0  ;;  %v5358_v34 = vmul.f32 %v5209_v13, %v13365_v6  ;;  %v5142_v43 = vadd.f32 1.0, %v9362_v57 }
 0x8f9   :  { %9363 = vtanh.f32 %v5121_v9  ;;  %v5088_v30 = vmul.f32 %v5076_v16, %v13371_v5  ;;  %v5215_v19 = vadd.f32 %v5214_v3, %v5213_v56  ;;  %v5228_v61 = vrot.slane %v5227_v39, 2  ;;  %5430 = vmatpush.msra.mxu1 %v13324_v17  ;;  %v5285_v17 = vld [vmem:[%s14084_s16 + $0x138] sm:$0xff] }
 0x8fa   :  { %v5363_v4 = vsel %vm175_vm0, %v5358_v34, 0.0  ;;  %v5053_v49 = vpop.f32.mrf.mxu3  ;;  %v5376_v58 = vadd.f32 %v5375_v63, %v5374_v10  ;;  %5337 = vmatpush.msra.mxu2 %v5285_v17  ;;  %5445 = vmatpush.msrb.mxu0 %v5285_v17  ;;  %v5281_v16 = vld [vmem:[%s14084_s16 + $0x118] sm:$0xff] }
 0x8fb   :  { %v5100_v47 = vmul.f32 0.044715, %v5088_v30  ;;  %v5054_v55 = vadd.f32 %v5053_v49, %v5034_v23  ;;  %v5216_v8 = vrot.slane %v5215_v19, 4  ;;  %v5364_v27 = vadd.f32 %v5363_v4, %v5362_v26  ;;  %5431 = vmatpush.msra.mxu1 %v13340_v24  ;;  %v5280_v30 = vld [vmem:[%s14084_s16 + $0x110] sm:$0xff]  ;;  %v5279_v4 = vld [vmem:[%s14084_s16 + $0x108] sm:$0xff] }
 0x8fc   :  { %v5229_v40 = vadd.f32 %v5228_v61, %v5227_v39  ;;  %v5377_v24 = vrot.slane %v5376_v58, 2  ;;  %v5154_v26 = vmul.f32 0.5, %v5142_v43 }
 0x8fd   :  { %v5112_v2 = vadd.f32 %v5100_v47, %v13371_v5  ;;  %v13387_v21 = vadd.f32 %v5054_v55, %v13080_v29  ;;  %v5217_v59 = vadd.f32 %v5216_v8, %v5215_v19  ;;  %v5365_v62 = vrot.slane %v5364_v27, 4  ;;  %v5284_v29 = vld [vmem:[%s14084_s16 + $0x130] sm:$0xff]  ;;  %5432 = vmatpush.msra.mxu1 %v13356_v50  ;;  %v5282_v50 = vld [vmem:[%s14084_s16 + $0x120] sm:$0xff] }
 0x8fe   :  { %v5230_v7 = vrot.slane %v5229_v40, 1  ;;  %5338 = vmatpush.msra.mxu2 %v5284_v29  ;;  %5446 = vmatpush.msrb.mxu0 %v5284_v29  ;;  %v5378_v9 = vadd.f32 %v5377_v24, %v5376_v58  ;;  %v13420_v49 = vmul.f32 %v5154_v26, %v13255_v1 }
 0x8ff   :  { %v9364_v44 = vpop.eup %9363  ;;  %v5124_v46 = vmul.f32 0.7978846, %v5112_v2  ;;  %v5079_v28 = vmul.f32 %v13387_v21, %v13387_v21  ;;  %v5218_v52 = vrot.slane %v5217_v59, 2  ;;  %v5366_v33 = vadd.f32 %v5365_v62, %v5364_v27 }
 0x900   :  { %v5145_v32 = vadd.f32 1.0, %v9364_v44  ;;  %v5231_v20 = vadd.f32 %v5230_v7, %v5229_v40  ;;  %5339 = vmatpush.msra.mxu2 %v5283_v36  ;;  %5447 = vmatpush.msrb.mxu0 %v5283_v36  ;;  %v5379_v23 = vrot.slane %v5378_v9, 1  ;;  %v5202_v1 = vmul.f32 %v13262_v53, %v13420_v49 }
 0x901   :  { %9365 = vtanh.f32 %v5124_v46  ;;  %v5091_v35 = vmul.f32 %v5079_v28, %v13387_v21  ;;  %v5219_v45 = vadd.f32 %v5218_v52, %v5217_v59  ;;  %v5367_v31 = vrot.slane %v5366_v33, 2 }
 0x902   :  { %5325 = vmatmul.f32.vlgmr.msra.gmra.mxu0 %v5231_v20  ;;  %v5157_v13 = vmul.f32 0.5, %v5145_v32  ;;  %5340 = vmatpush.msra.mxu2 %v5282_v50  ;;  %v5380_v8 = vadd.f32 %v5379_v23, %v5378_v9  ;;  %v5232_v62 = vsel %vm4252_vm8, %v5202_v1, 0.0 }
 0x903   :  { %v5103_v51 = vmul.f32 0.044715, %v5091_v35  ;;  %v5220_v42 = vrot.slane %v5219_v45, 1  ;;  %v5368_v60 = vadd.f32 %v5367_v31, %v5366_v33  ;;  %5448 = vmatpush.msrb.mxu0 %v5282_v50 }
 0x904   :  { %v13414_v19 = vmul.f32 %v5157_v13, %v13319_v37  ;;  %5341 = vmatpush.msra.mxu2 %v5281_v16  ;;  %v5278_v37 = vld [vmem:[%s14084_s16 + $0x100] sm:$0xff] }
 0x905   :  { %v5115_v54 = vadd.f32 %v5103_v51, %v13387_v21  ;;  %v5221_v10 = vadd.f32 %v5220_v42, %v5219_v45  ;;  %v5369_v56 = vrot.slane %v5368_v60, 1  ;;  %5449 = vmatpush.msrb.mxu0 %v5281_v16 }
 0x906   :  { %5342 = vmatpush.msra.mxu2 %v5280_v30  ;;  %v5205_v47 = vmul.f32 %v13276_v14, %v13414_v19  ;;  %v5351_v14 = vmul.f32 %v5202_v1, %v13420_v49 }
 0x907   :  { %v9366_v3 = vpop.eup %9365  ;;  %v5127_v34 = vmul.f32 0.7978846, %v5115_v54  ;;  %5305 = vmatmul.f32.vlgmr.msrb.gmra.mxu1 %v5221_v10  ;;  %v5370_v39 = vadd.f32 %v5369_v56, %v5368_v60  ;;  %5450 = vmatpush.msrb.mxu0 %v5280_v30  ;;  %v9416_v56 = vmov 200.0  }
 0x908   :  { %v5148_v63 = vadd.f32 1.0, %v9366_v3  ;;  %5343 = vmatpush.msra.mxu2 %v5279_v4  ;;  %v5354_v58 = vmul.f32 %v5205_v47, %v13414_v19  ;;  %v5381_v46 = vsel %vm4252_vm8, %v5351_v14, 0.0  ;;  %v5498_v14 = vld [vmem:[%s14137_s15 + $0x48] sm:$0xff] }
 0x909   :  { %9367 = vtanh.f32 %v5127_v34  ;;  %5413 = vmatmul.f32.vlgmr.msra.gmra.mxu3 %v5370_v39  ;;  %5451 = vmatpush.msrb.mxu0 %v5279_v4 }
 0x90a   :  { %v5160_v61 = vmul.f32 0.5, %v5148_v63  ;;  %5344 = vmatpush.msra.mxu2 %v5278_v37  ;;  %v5382_v53 = vsel %vm4252_vm8, %v5354_v58, 0.0  ;;  %9369 = vrcp.f32 %v9416_v56 }
 0x90b   :  { %5452 = vmatpush.msrb.mxu0 %v5278_v37  ;;  %v5383_v33 = vadd.f32 %v5382_v53, %v5381_v46  ;;  %v5492_v53 = vld [vmem:[%s14137_s15 + $0x18] sm:$0xff]  ;;  %v5489_v46 = vld [vmem:[%s14137_s15] sm:$0xff] }
 0x90c   :  { %v13428_v55 = vmul.f32 %v5160_v61, %v13371_v5  ;;  %v5233_v5 = vsel %vm4252_vm8, %v5205_v47, 0.0  ;;  %5517 = vmatpush.msrb.mxu2 %v5498_v14 }
 0x90d   :  { %v5234_v44 = vadd.f32 %v5233_v5, %v5232_v62  ;;  %v5500_v5 = vld [vmem:[%s14137_s15 + $0x58] sm:$0xff] }
 0x90e   :  { %v5208_v27 = vmul.f32 %v13299_v22, %v13428_v55  ;;  %5557 = vmatpush.msrb.mxu3 %v5500_v5 }
 0x90f   :  { %v9368_v40 = vpop.eup %9367  ;;  %5433 = vmatmul.f32.vlgmr.msra.gmra.mxu1 %v5380_v8 }
 0x910   :  { %v5151_v57 = vadd.f32 1.0, %v9368_v40  ;;  %v5357_v2 = vmul.f32 %v5208_v27, %v13428_v55  ;;  %v5235_v22 = vsel %vm4252_vm8, %v5208_v27, 0.0  ;;  %v9370_v9 = vpop.eup %9369 }
 0x911   :  { %v5236_v17 = vadd.f32 %v5235_v22, %v5234_v44  ;;  %v5458_v26 = vmul.f32 200.0, %v9370_v9  ;;  %vm5462_vm9 = vweird.f32 %v9370_v9  ;;  %v5494_v22 = vld [vmem:[%s14137_s15 + $0x28] sm:$0xff] }
 0x912   :  { %v5163_v59 = vmul.f32 0.5, %v5151_v57  ;;  %v5384_v28 = vsel %vm4252_vm8, %v5357_v2, 0.0  ;;  %v5495_v2 = vld [vmem:[%s14137_s15 + $0x30] sm:$0xff] }
 0x913   :  { %v5385_v20 = vadd.f32 %v5384_v28, %v5383_v33  ;;  %v5459_v34 = vsub.f32 1.0, %v5458_v26  ;;  %5518 = vmatpush.msrb.mxu2 %v5495_v2  ;;  %v5491_v28 = vld [vmem:[%s14137_s15 + $0x10] sm:$0xff] }
 0x914   :  { %v13442_v7 = vmul.f32 %v5163_v59, %v13387_v21  ;;  %v5497_v59 = vld [vmem:[%s14137_s15 + $0x40] sm:$0xff] }
 0x915   :  { %v5460_v39 = vmul.f32 %v9370_v9, %v5459_v34  ;;  %5558 = vmatpush.msrb.mxu3 %v5497_v59  ;;  %5519 = vmatpush.msrb.mxu2 %v5492_v53  ;;  %v9102_v34 = vld [vmem:[%s14092_s24 + $0x114] sm:$0xf0] }
 0x916   :  { %v5211_v52 = vmul.f32 %v13342_v12, %v13442_v7 }
 0x917   :  { %v5461_v4 = vadd.f32 %v9370_v9, %v5460_v39  ;;  %5559 = vmatpush.msrb.mxu3 %v5494_v22  ;;  %5520 = vmatpush.msrb.mxu2 %v5489_v46 }
 0x918   :  { %v5238_v29 = vsel %vm5237_vm1, %v5211_v52, 0.0  ;;  %v5360_v32 = vmul.f32 %v5211_v52, %v13442_v7  ;;  %v5499_v52 = vld [vmem:[%s14137_s15 + $0x50] sm:$0xff] }
 0x919   :  { %v5239_v24 = vadd.f32 %v5238_v29, %v5236_v17  ;;  %v5463_v27 = vsel %vm5462_vm9, %v9370_v9, %v5461_v4  ;;  %5560 = vmatpush.msrb.mxu3 %v5491_v28  ;;  %v5496_v17 = vld [vmem:[%s14137_s15 + $0x38] sm:$0xff]  ;;  %v5493_v29 = vld [vmem:[%s14137_s15 + $0x20] sm:$0xff] }
 0x91a   :  { %v5386_v35 = vsel %vm5237_vm1, %v5360_v32, 0.0  ;;  %v5490_v32 = vld [vmem:[%s14137_s15 + $0x8] sm:$0xff] }
 0x91b   :  { %v5240_v45 = vrot.slane %v5239_v24, 4  ;;  %v5387_v21 = vadd.f32 %v5386_v35, %v5385_v20 }
 0x91d   :  { %v5241_v31 = vadd.f32 %v5240_v45, %v5239_v24  ;;  %v5388_v36 = vrot.slane %v5387_v21, 4 }
 0x91f   :  { %v5389_v43 = vadd.f32 %v5388_v36, %v5387_v21  ;;  %v5242_v51 = vrot.slane %v5241_v31, 2 }
 0x921   :  { %v5243_v42 = vadd.f32 %v5242_v51, %v5241_v31  ;;  %v5390_v60 = vrot.slane %v5389_v43, 2  ;;  %v5469_v31 = vld [vmem:[%s14138_s11] sm:$0x1] }
 0x923   :  { %v5244_v50 = vrot.slane %v5243_v42, 1  ;;  %v5391_v13 = vadd.f32 %v5390_v60, %v5389_v43 }
 0x925   :  { %v5245_v54 = vadd.f32 %v5244_v50, %v5243_v42  ;;  %v5392_v12 = vrot.slane %v5391_v13, 1  ;;  %v5482_v42 = vld [vmem:[%s14138_s11 + $0x1] sm:$0x1] }
 0x927   :  { %8353 = vmatmul.msk.f32.vlgmr.msra.gmra.mxu2 %vm4252_vm8, %v5245_v54  ;;  %v5393_v10 = vadd.f32 %v5392_v12, %v5391_v13 }
 0x928   :  { %5537 = vmatpush.msra.mxu2 %v5499_v52  ;;  %v8488_v52 = vld [vmem:[%s14092_s24 + $0x100] sm:$0xf] }
 0x929   :  { %8354 = vmatmul.msk.f32.vlgmr.msrb.gmra.mxu0 %vm4252_vm8, %v5393_v10 }
 0x92a   :  { %5538 = vmatpush.msra.mxu2 %v5496_v17 }
 0x92c   :  { %5539 = vmatpush.msra.mxu2 %v5493_v29  ;;  %v8416_v29 = vld [vmem:[%s14092_s24 + $0x70] sm:$0xf] }
 0x92e   :  { %5540 = vmatpush.msra.mxu2 %v5490_v32  ;;  %v9082_v32 = vld [vmem:[%s14092_s24 + $0x74] sm:$0xf0] }
 0x97f   :  { %v5326_v3 = vpop.f32.mrf.mxu0 }
 0x984   :  { %v5306_v16 = vpop.f32.mrf.mxu1 }
 0x985   :  { %v5327_v61 = vadd.f32 %v5326_v3, %v5306_v16  ;;  %v8496_v3 = vld [vmem:[%s14092_s24 + $0x110] sm:$0xf] }
 0x986   :  { %v8497_v4 = vor.u32 %v9102_v34, %v8496_v3  ;;  %v8474_v3 = vld [vmem:[%s14092_s24 + $0xe8] sm:$0xf0]  ;;  %v8400_v34 = vld [vmem:[%s14092_s24 + $0x50] sm:$0xf] }
 0x988   :  { %5936 = vmatpush.bf16.msra.mxu3 %v8497_v4  ;;  %v9077_v4 = vld [vmem:[%s14092_s24 + $0x54] sm:$0xf] }
 0x98c   :  { %v5414_v30 = vpop.f32.mrf.mxu3  ;;  %v5434_v63 = vpop.f32.mrf.mxu1 }
 0x98d   :  { %v5435_v37 = vadd.f32 %v5434_v63, %v5414_v30 }
 0x9a6   :  { %v5454_v23 = vpop.f32.mrf.mxu0 }
 0x9a7   :  { %v5455_v8 = vadd.f32 %v5454_v23, %v5435_v37 }
 0x9a9   :  { %v5465_v58 = vmul.f32 %v5463_v27, %v5455_v8 }
 0x9aa   :  { %v5346_v47 = vpop.f32.mrf.mxu2 }
 0x9ab   :  { %v5347_v1 = vadd.f32 %v5346_v47, %v5327_v61 }
 0x9ad   :  { %v5464_v40 = vmul.f32 %v5463_v27, %v5347_v1 }
 0x9af   :  { %v5466_v57 = vmul.f32 %v5464_v40, %v5464_v40 }
 0x9b1   :  { %v5467_v62 = vsub.f32 %v5465_v58, %v5466_v57 }
 0x9b3   :  { %v5468_v44 = vmax.f32 %v5467_v62, 0.0 }
 0x9b5   :  { %v5470_v33 = vadd.f32 1e-05, %v5468_v44 }
 0x9b7   :  { %9371 = vrsqrt.f32 %v5470_v33  ;;  %vm5477_vm12 = vweird.f32 %v5470_v33 }
 0x9bd   :  { %v9372_v20 = vpop.eup %9371 }
 0x9be   :  { %v5472_v24 = vmul.f32 %v9372_v20, %v5470_v33  ;;  %vm5478_vm11 = vweird.f32 %v9372_v20  ;;  %v9100_v33 = vld [vmem:[%s14092_s24 + $0x104] sm:$0xf0] }
 0x9bf   :  { %vm5479_vm13 = vmor %vm5477_vm12, %vm5478_vm11  ;;  %v8489_v17 = vor.u32 %v9100_v33, %v8488_v52  ;;  %v9074_v52 = vld [vmem:[%s14092_s24 + $0x34] sm:$0xf0]  ;;  %v8448_v33 = vld [vmem:[%s14092_s24 + $0xb0] sm:$0xf] }
 0x9c0   :  { %v5473_v35 = vmul.f32 %v9372_v20, %v5472_v24  ;;  %v8417_v24 = vor.u32 %v9082_v32, %v8416_v29  ;;  %v9090_v29 = vld [vmem:[%s14092_s24 + $0xb4] sm:$0xf0]  ;;  %v9073_v32 = vld [vmem:[%s14092_s24 + $0x34] sm:$0xf] }
 0x9c1   :  { %5937 = vmatpush.bf16.msra.mxu3 %v8489_v17 }
 0x9c2   :  { %v5474_v45 = vmul.f32 0.5, %v5473_v35  ;;  %v9098_v35 = vld [vmem:[%s14092_s24 + $0xf4] sm:$0xf0]  ;;  %5892 = vmatpush.bf16.msra.mxu0 %v8417_v24  ;;  %v9089_v24 = vld [vmem:[%s14092_s24 + $0xb4] sm:$0xf] }
 0x9c4   :  { %v5475_v21 = vsub.f32 1.5, %v5474_v45  ;;  %v9081_v45 = vld [vmem:[%s14092_s24 + $0x74] sm:$0xf] }
 0x9c6   :  { %v5476_v36 = vmul.f32 %v9372_v20, %v5475_v21  ;;  %v8418_v21 = vld [vmem:[%s14092_s24 + $0x78] sm:$0xf0] }
 0x9c8   :  { %v5480_v43 = vsel %vm5479_vm13, %v9372_v20, %v5476_v36  ;;  %v8480_v20 = vld [vmem:[%s14092_s24 + $0xf0] sm:$0xf]  ;;  %v8421_v36 = vor.u32 %v9081_v45, %v8418_v21  ;;  %v8449_v21 = vor.u32 %v9090_v29, %v8448_v33 }
 0x9c9   :  { %v5481_v51 = vmul.f32 %v5480_v43, %v5469_v31  ;;  %v8481_v31 = vor.u32 %v9098_v35, %v8480_v20  ;;  %v9097_v43 = vld [vmem:[%s14092_s24 + $0xf4] sm:$0xf]  ;;  %v8386_v20 = vld [vmem:[%s14092_s24 + $0x38] sm:$0xf0] }
 0x9ca   :  { %5949 = vmatpush.bf16.msrb.mxu1 %v8421_v36  ;;  %v8450_v35 = vld [vmem:[%s14092_s24 + $0xb8] sm:$0xf0]  ;;  %v8376_v36 = vld [vmem:[%s14092_s24 + $0x20] sm:$0xf] }
 0x9cb   :  { %v5483_v60 = vmul.f32 %v5481_v51, %v5464_v40 }
 0x9cd   :  { %v5484_v50 = vsub.f32 %v5482_v42, %v5483_v60  ;;  %v8408_v42 = vld [vmem:[%s14092_s24 + $0x60] sm:$0xf] }
 0x9cf   :  { %v5486_v13 = vrot.slane %v5484_v50, 7  ;;  %v9080_v50 = vld [vmem:[%s14092_s24 + $0x64] sm:$0xf0] }
 0x9d1   :  { %v5488_v54 = vsel %vm896_vm10, %v5481_v51, %v5486_v13  ;;  %v8482_v51 = vld [vmem:[%s14092_s24 + $0xf8] sm:$0xf0]  ;;  %v8472_v13 = vld [vmem:[%s14092_s24 + $0xe0] sm:$0xf] }
 0x9d2   :  { %8355 = vmatmul.msk.f32.vlgmr.msrb.gmra.mxu2 %vm5501_vm14, %v5488_v54  ;;  %8357 = vmatmul.msk.f32.vlgmr.msrb.gmra.mxu3 %vm5501_vm14, %v5488_v54  ;;  %v8485_v60 = vor.u32 %v9097_v43, %v8482_v51  ;;  %v9072_v43 = vld [vmem:[%s14092_s24 + $0x24] sm:$0xf0]  ;;  %v8440_v51 = vld [vmem:[%s14092_s24 + $0xa0] sm:$0xf] }
 0x9d3   :  { %5911 = vmatpush.bf16.msrb.mxu2 %v8481_v31  ;;  %v8389_v31 = vor.u32 %v9073_v32, %v8386_v20 }
 0x9d4   :  { %5968 = vmatpush.bf16.msrb.mxu3 %v8485_v60  ;;  %v9088_v60 = vld [vmem:[%s14092_s24 + $0xa4] sm:$0xf0] }
 0x9da   :  { %8356 = vmatmul.msk.f32.vlgmr.msra.gmra.mxu2 %vm5501_vm14, %v5488_v54  ;;  %v9096_v54 = vld [vmem:[%s14092_s24 + $0xe4] sm:$0xf0] }
 0xa55   :  { %v5522_v12 = vpop.f32.mrf.mxu2  ;;  %v5562_v10 = vpop.f32.mrf.mxu3 }
 0xa56   :  { %v5567_v56 = vperm.slane %v5562_v10, 0  ;;  %v5582_v9 = vperm.slane %v5562_v10, 1  ;;  %v5565_v39 = vperm.slane %v5522_v12, 0  ;;  %v5580_v1 = vperm.slane %v5522_v12, 1 }
 0xa57   :  { %v8409_v12 = vor.u32 %v9080_v50, %v8408_v42  ;;  %v8473_v10 = vor.u32 %v9096_v54, %v8472_v13  ;;  %v8453_v42 = vor.u32 %v9089_v24, %v8450_v35  ;;  %v9071_v50 = vld [vmem:[%s14092_s24 + $0x24] sm:$0xf]  ;;  %v8378_v13 = vld [vmem:[%s14092_s24 + $0x28] sm:$0xf0]  ;;  %v9101_v35 = vld [vmem:[%s14092_s24 + $0x114] sm:$0xf] }
 0xa58   :  { %v5570_v16 = vmul.f32 %v5567_v56, %v13420_v49  ;;  %v5573_v26 = vmul.f32 %v5567_v56, %v13414_v19  ;;  %v5576_v23 = vmul.f32 %v5567_v56, %v13428_v55  ;;  %v5579_v19 = vmul.f32 %v5567_v56, %v13442_v7  ;;  %v9079_v56 = vld [vmem:[%s14092_s24 + $0x64] sm:$0xf] }
 0xa59   :  { %v5571_v47 = vmul.f32 %v5565_v39, %v13295_v25  ;;  %v5568_v8 = vmul.f32 %v5565_v39, %v13284_v11  ;;  %v5577_v62 = vmul.f32 %v5565_v39, %v13365_v6  ;;  %v5574_v53 = vmul.f32 %v5565_v39, %v13311_v48  ;;  %v6472_v48 = vld [vmem:[%s14089_s21 + $0x8] sm:$0x3f]  ;;  %v9078_v39 = vld [vmem:[%s14092_s24 + $0x54] sm:$0xf0]  ;;  %5893 = vmatpush.bf16.msra.mxu0 %v8409_v12  ;;  %v9087_v54 = vld [vmem:[%s14092_s24 + $0xa4] sm:$0xf] }
 0xa5a   :  { %v13505_v30 = vadd.f32 %v5582_v9, %v5570_v16  ;;  %v13507_v63 = vadd.f32 %v5582_v9, %v5573_v26  ;;  %v13516_v27 = vadd.f32 %v5582_v9, %v5576_v23  ;;  %v13518_v40 = vadd.f32 %v5582_v9, %v5579_v19  ;;  %v8410_v9 = vld [vmem:[%s14092_s24 + $0x68] sm:$0xf0]  ;;  %v9095_v16 = vld [vmem:[%s14092_s24 + $0xe4] sm:$0xf]  ;;  %v9094_v19 = vld [vmem:[%s14092_s24 + $0xd4] sm:$0xf0]  ;;  %5912 = vmatpush.bf16.msrb.mxu2 %v8473_v10 }
 0xa5b   :  { %v13522_v57 = vadd.f32 %v5580_v1, %v5571_v47  ;;  %v13526_v5 = vadd.f32 %v5580_v1, %v5568_v8  ;;  %v13547_v46 = vadd.f32 %v5580_v1, %v5577_v62  ;;  %v8413_v26 = vor.u32 %v9079_v56, %v8410_v9  ;;  %v9093_v47 = vld [vmem:[%s14092_s24 + $0xd4] sm:$0xf]  ;;  %v8466_v8 = vld [vmem:[%s14092_s24 + $0xd8] sm:$0xf0]  ;;  %v9091_v62 = vld [vmem:[%s14092_s24 + $0xc4] sm:$0xf] }
 0xa5c   :  { %v9226_v49 = vpack.i.bf16 %v13507_v63, %v13505_v30  ;;  %v9241_v11 = vpack.i.bf16 %v13518_v40, %v13516_v27  ;;  %v8477_v23 = vor.u32 %v9095_v16, %v8474_v3  ;;  %v8442_v12 = vld [vmem:[%s14092_s24 + $0xa8] sm:$0xf0]  ;;  %v8377_v56 = vor.u32 %v9072_v43, %v8376_v36 }
 0xa5d   :  { %v5542_v61 = vpop.f32.mrf.mxu2  ;;  %5950 = vmatpush.bf16.msrb.mxu1 %v8413_v26  ;;  %v8441_v26 = vor.u32 %v9088_v60, %v8440_v51  ;;  %v8381_v3 = vor.u32 %v9071_v50, %v8378_v13 }
 0xa5e   :  { %v5566_v37 = vperm.slane %v5542_v61, 0  ;;  %9227 = vrot.lane.b32.xlu2 %v9226_v49, %s9417_s18  ;;  %v5581_v55 = vperm.slane %v5542_v61, 1  ;;  %v8464_v49 = vld [vmem:[%s14092_s24 + $0xd0] sm:$0xf]  ;;  %v8401_v61 = vor.u32 %v9078_v39, %v8400_v34  ;;  %5969 = vmatpush.bf16.msrb.mxu3 %v8477_v23  ;;  %v8445_v34 = vor.u32 %v9087_v54, %v8442_v12 }
 0xa60   :  { %v5572_v58 = vmul.f32 %v5566_v37, %v13251_v41  ;;  %v5569_v7 = vmul.f32 %v5566_v37, %v13267_v18  ;;  %v5578_v41 = vmul.f32 %v5566_v37, %v13333_v0  ;;  %v5575_v18 = vmul.f32 %v5566_v37, %v13279_v38  ;;  %v6471_v38 = vld [vmem:[%s14089_s21] sm:$0xff]  ;;  %v8402_v37 = vld [vmem:[%s14092_s24 + $0x58] sm:$0xf0]  ;;  %5894 = vmatpush.bf16.msra.mxu0 %v8401_v61  ;;  %v9086_v61 = vld [vmem:[%s14092_s24 + $0x94] sm:$0xf0] }
 0xa61   :  { %v13552_v0 = vadd.f32 %v5580_v1, %v5574_v53  ;;  %v8465_v1 = vor.u32 %v9094_v19, %v8464_v49  ;;  %v8458_v53 = vld [vmem:[%s14092_s24 + $0xc8] sm:$0xf0]  ;;  %v8368_v19 = vld [vmem:[%s14092_s24 + $0x10] sm:$0xf] }
 0xa62   :  { %v13524_v14 = vadd.f32 %v5581_v55, %v5572_v58  ;;  %v13528_v25 = vadd.f32 %v5581_v55, %v5569_v7  ;;  %v13543_v22 = vadd.f32 %v5581_v55, %v5578_v41  ;;  %v13545_v44 = vadd.f32 %v5581_v55, %v5575_v18  ;;  %v8392_v58 = vld [vmem:[%s14092_s24 + $0x40] sm:$0xf]  ;;  %v9076_v7 = vld [vmem:[%s14092_s24 + $0x44] sm:$0xf0]  ;;  %v9075_v41 = vld [vmem:[%s14092_s24 + $0x44] sm:$0xf] }
 0xa63   :  { %v8405_v55 = vor.u32 %v9077_v4, %v8402_v37  ;;  %v8394_v18 = vld [vmem:[%s14092_s24 + $0x48] sm:$0xf0]  ;;  %5913 = vmatpush.bf16.msrb.mxu2 %v8465_v1  ;;  %v8461_v17 = vor.u32 %v9091_v62, %v8458_v53  ;;  %v9069_v37 = vld [vmem:[%s14092_s24 + $0x14] sm:$0xf]  ;;  %v9067_v53 = vld [vmem:[%s14092_s24 + $0x4] sm:$0xf] }
 0xa64   :  { %v9236_v2 = vpack.i.bf16 %v13524_v14, %v13522_v57  ;;  %v9231_v59 = vpack.i.bf16 %v13528_v25, %v13526_v5  ;;  %v9251_v28 = vpack.i.bf16 %v13543_v22, %v13547_v46  ;;  %v9246_v6 = vpack.i.bf16 %v13545_v44, %v13552_v0 }
 0xa65   :  { %5951 = vmatpush.bf16.msrb.mxu1 %v8405_v55  ;;  %v9085_v55 = vld [vmem:[%s14092_s24 + $0x94] sm:$0xf] }
 0xa66   :  { %9242 = vrot.lane.b32.xlu2 %v9241_v11, %s9417_s18  ;;  %9237 = vrot.lane.b32.xlu1 %v9236_v2, %s9417_s18  ;;  %v8456_v11 = vld [vmem:[%s14092_s24 + $0xc0] sm:$0xf]  ;;  %v8469_v2 = vor.u32 %v9093_v47, %v8466_v8  ;;  %v8370_v47 = vld [vmem:[%s14092_s24 + $0x18] sm:$0xf0] }
 0xa67   :  { %9232 = vrot.lane.b32.xlu0 %v9231_v59, %s9417_s18  ;;  %v9092_v59 = vld [vmem:[%s14092_s24 + $0xc4] sm:$0xf0]  ;;  %v8373_v1 = vor.u32 %v9069_v37, %v8370_v47 }
 0xa68   :  { %5970 = vmatpush.bf16.msrb.mxu3 %v8469_v2 }
 0xa6c   :  { %5971 = vmatpush.bf16.msrb.mxu3 %v8461_v17 }
 0xa6e   :  { %6475 = vperm.xlu2 %9165, %v6471_v38   ;;  %9252 = vrot.lane.b32.xlu1 %v9251_v28, %s9417_s18  ;;  %v8393_v38 = vor.u32 %v9076_v7, %v8392_v58  ;;  %v8457_v28 = vor.u32 %v9092_v59, %v8456_v11  ;;  %v8434_v58 = vld [vmem:[%s14092_s24 + $0x98] sm:$0xf0]  ;;  %v8360_v7 = vld [vmem:[%s14092_s24] sm:$0xf]  ;;  %v9068_v59 = vld [vmem:[%s14092_s24 + $0x4] sm:$0xf0] }
 0xa6f   :  { %9247 = vrot.lane.b32.xlu0 %v9246_v6, %s9417_s18  ;;  %v8397_v6 = vor.u32 %v9075_v41, %v8394_v18  ;;  %v8437_v2 = vor.u32 %v9085_v55, %v8434_v58  ;;  %v8424_v41 = vld [vmem:[%s14092_s24 + $0x80] sm:$0xf]  ;;  %v9084_v18 = vld [vmem:[%s14092_s24 + $0x84] sm:$0xf0]  ;;  %v8361_v62 = vor.u32 %v9068_v59, %v8360_v7 }
 0xa70   :  { %5895 = vmatpush.bf16.msra.mxu0 %v8393_v38  ;;  %5914 = vmatpush.bf16.msrb.mxu2 %v8457_v28  ;;  %v8362_v38 = vld [vmem:[%s14092_s24 + $0x8] sm:$0xf0]  ;;  %v9083_v28 = vld [vmem:[%s14092_s24 + $0x84] sm:$0xf] }
 0xa71   :  { %5952 = vmatpush.bf16.msrb.mxu1 %v8397_v6  ;;  %5972 = vmatpush.bf16.msrb.mxu3 %v8453_v42  ;;  %v8425_v6 = vor.u32 %v9084_v18, %v8424_v41 }
 0xa74   :  { %5915 = vmatpush.bf16.msrb.mxu2 %v8449_v21  ;;  %v9099_v21 = vld [vmem:[%s14092_s24 + $0x104] sm:$0xf] }
 0xa75   :  { %5953 = vmatpush.bf16.msrb.mxu1 %v8389_v31  ;;  %5973 = vmatpush.bf16.msrb.mxu3 %v8445_v34 }
 0xa77   :  { %6480 = vperm.xlu0 %9163, %v6472_v48   ;;  %v8384_v48 = vld [vmem:[%s14092_s24 + $0x30] sm:$0xf] }
 0xa78   :  { %v8385_v45 = vor.u32 %v9074_v52, %v8384_v48  ;;  %5916 = vmatpush.bf16.msrb.mxu2 %v8441_v26  ;;  %v8365_v48 = vor.u32 %v9067_v53, %v8362_v38  ;;  %v8426_v52 = vld [vmem:[%s14092_s24 + $0x88] sm:$0xf0] }
 0xa79   :  { %5954 = vmatpush.bf16.msrb.mxu1 %v8381_v3  ;;  %5974 = vmatpush.bf16.msrb.mxu3 %v8437_v2  ;;  %v8429_v29 = vor.u32 %v9083_v28, %v8426_v52 }
 0xa7a   :  { %5896 = vmatpush.bf16.msra.mxu0 %v8385_v45  ;;  %v8498_v45 = vld [vmem:[%s14092_s24 + $0x118] sm:$0xf0] }
 0xa7b   :  { %v8501_v31 = vor.u32 %v9101_v35, %v8498_v45 }
 0xa7d   :  { %5955 = vmatpush.bf16.msrb.mxu1 %v8373_v1  ;;  %5975 = vmatpush.bf16.msrb.mxu3 %v8429_v29 }
 0xa7e   :  { %5897 = vmatpush.bf16.msra.mxu0 %v8377_v56 }
 0xa81   :  { %5956 = vmatpush.bf16.msrb.mxu1 %v8365_v48 }
 0xab8   :  { %v13713_v10 = vpop.permute.xlu2 %9227 }
 0xab9   :  { %v9230_v9 = vunpack.i.h.bf16 %v13713_v10  ;;  %v9229_v16 = vunpack.i.l.bf16 %v13713_v10 }
 0xabb   :  { %v5657_v39 = vmax.f32 %v13507_v63, %v9230_v9  ;;  %v5654_v23 = vmax.f32 %v13505_v30, %v9229_v16  ;;  %v9070_v63 = vld [vmem:[%s14092_s24 + $0x14] sm:$0xf0]  ;;  %v8432_v30 = vld [vmem:[%s14092_s24 + $0x90] sm:$0xf] }
 0xabc   :  { %v8369_v4 = vor.u32 %v9070_v63, %v8368_v19  ;;  %v8433_v8 = vor.u32 %v9086_v61, %v8432_v30 }
 0xabd   :  { %v13723_v49 = vpack.c.bf16 %v5657_v39, %v5654_v23 }
 0xabe   :  { %5898 = vmatpush.bf16.msra.mxu0 %v8369_v4  ;;  %5917 = vmatpush.bf16.msrb.mxu2 %v8433_v8 }
 0xabf   :  { %8502 = vmatmul.msk.bf16.vlgmr.msra.gmra.mxu3 %vm5501_vm14, %v13723_v49 }
 0xac0   :  { %v13754_v11 = vpop.permute.xlu2 %9242 }
 0xac1   :  { %v9245_v33 = vunpack.i.h.bf16 %v13754_v11  ;;  %v9244_v17 = vunpack.i.l.bf16 %v13754_v11 }
 0xac2   :  { %5899 = vmatpush.bf16.msra.mxu0 %v8361_v62  ;;  %5918 = vmatpush.bf16.msrb.mxu2 %v8425_v6 }
 0xac3   :  { %v5663_v32 = vmax.f32 %v13518_v40, %v9245_v33  ;;  %v5660_v20 = vmax.f32 %v13516_v27, %v9244_v17  ;;  %v8490_v27 = vld [vmem:[%s14092_s24 + $0x108] sm:$0xf0] }
 0xac4   :  { %v8493_v40 = vor.u32 %v9099_v21, %v8490_v27  ;;  %v6059_v21 = vsel %vm175_vm0, 4294967295, %v9415_v15  ;;  %v9121_v15 = vld [vmem:[%s14139_s19 + $0x88] sm:$0xff]  ;;  %vm6055_vm0 = vcmask 236544  }
 0xac5   :  { %v5669_v24 = vpack.c.bf16 %v5663_v32, %v5660_v20  ;;  %6216 = vmatpush.bf16.msra.mxu3 %v9121_v15  ;;  %v9124_v15 = vld [vmem:[%s14139_s19 + $0xa0] sm:$0xff] }
 0xac6   :  { %5993 = vmatpush.bf16.msrb.mxu0 %v8501_v31 }
 0xaca   :  { %5994 = vmatpush.bf16.msrb.mxu0 %v8493_v40 }
 0xacf   :  { %8503 = vmatmul.msk.bf16.gmra.mxu3 %vm5501_vm14, %v5669_v24 }
 0xad8   :  { %v9238_v36 = vpop.permute.xlu1 %9237 }
 0xad9   :  { %v9240_v43 = vunpack.i.h.bf16 %v9238_v36  ;;  %v9239_v51 = vunpack.i.l.bf16 %v9238_v36  ;;  %v9233_v42 = vpop.permute.xlu0 %9232 }
 0xada   :  { %v9235_v60 = vunpack.i.h.bf16 %v9233_v42  ;;  %v9234_v50 = vunpack.i.l.bf16 %v9233_v42 }
 0xadb   :  { %v5635_v13 = vsel %vm5631_vm15, %v9240_v43, %v9230_v9  ;;  %v5634_v54 = vsel %vm5631_vm15, %v9239_v51, %v9240_v43  ;;  %v6060_v51 = vsel %vm339_vm3, %v6059_v21, 0 }
 0xadc   :  { %v5656_v12 = vmax.f32 %v13524_v14, %v5635_v13  ;;  %v5655_v56 = vmax.f32 %v13522_v57, %v5634_v54  ;;  %v5633_v26 = vsel %vm5631_vm15, %v9235_v60, %v9229_v16  ;;  %v5632_v3 = vsel %vm5631_vm15, %v9234_v50, %v9235_v60 }
 0xadd   :  { %v5653_v34 = vmax.f32 %v13528_v25, %v5633_v26  ;;  %v5652_v39 = vmax.f32 %v13526_v5, %v5632_v3 }
 0xadf   :  { %v5665_v23 = vpack.c.bf16 %v5656_v12, %v5653_v34  ;;  %v5664_v19 = vpack.c.bf16 %v5655_v56, %v5652_v39  ;;  %v9120_v34 = vld [vmem:[%s14139_s19 + $0x80] sm:$0xff] }
 0xae0   :  { %v9253_v63 = vpop.permute.xlu1 %9252  ;;  %6217 = vmatpush.bf16.msra.mxu3 %v9120_v34 }
 0xae1   :  { %v9248_v9 = vpop.permute.xlu0 %9247  ;;  %5900 = vmatmul.bf16.vlgmr.msra.gmra.mxu0 %v5664_v19  ;;  %5919 = vmatmul.bf16.vlgmr.msrb.gmra.mxu2 %v5665_v23  ;;  %v9255_v14 = vunpack.i.h.bf16 %v9253_v63  ;;  %v9254_v57 = vunpack.i.l.bf16 %v9253_v63  ;;  %v9119_v63 = vld [vmem:[%s14139_s19 + $0x78] sm:$0xff] }
 0xae2   :  { %5957 = vmatmul.bf16.vlgmr.msrb.gmra.mxu1 %v5664_v19  ;;  %5976 = vmatmul.bf16.vlgmr.msrb.gmra.mxu3 %v5665_v23  ;;  %v9250_v30 = vunpack.i.h.bf16 %v9248_v9  ;;  %v9249_v10 = vunpack.i.l.bf16 %v9248_v9  ;;  %v9103_v23 = vld [vmem:[%s14093_s25] sm:$0xff] }
 0xae3   :  { %v5639_v16 = vsel %vm5631_vm15, %v9255_v14, %v9245_v33  ;;  %v5638_v4 = vsel %vm5631_vm15, %v9254_v57, %v9255_v14  ;;  %v9118_v57 = vld [vmem:[%s14139_s19 + $0x70] sm:$0xff] }
 0xae4   :  { %v5637_v25 = vsel %vm5631_vm15, %v9250_v30, %v9244_v17  ;;  %v5636_v5 = vsel %vm5631_vm15, %v9249_v10, %v9250_v30  ;;  %v5661_v37 = vmax.f32 %v13547_v46, %v5638_v4  ;;  %v5662_v8 = vmax.f32 %v13543_v22, %v5639_v16  ;;  %6218 = vmatpush.bf16.msra.mxu3 %v9119_v63 }
 0xae5   :  { %v5658_v61 = vmax.f32 %v13552_v0, %v5636_v5  ;;  %v5659_v47 = vmax.f32 %v13545_v44, %v5637_v25 }
 0xae7   :  { %v5667_v1 = vpack.c.bf16 %v5661_v37, %v5658_v61  ;;  %v5668_v55 = vpack.c.bf16 %v5662_v8, %v5659_v47  ;;  %v9117_v47 = vld [vmem:[%s14139_s19 + $0x68] sm:$0xff] }
 0xae8   :  { %6219 = vmatpush.bf16.msra.mxu3 %v9118_v57 }
 0xaec   :  { %6220 = vmatpush.bf16.msra.mxu3 %v9117_v47 }
 0xaf1   :  { %5905 = vmatmul.bf16.gmra.mxu0 %v5667_v1  ;;  %5924 = vmatmul.bf16.gmra.mxu2 %v5668_v55 }
 0xaf2   :  { %5962 = vmatmul.bf16.gmra.mxu1 %v5667_v1  ;;  %5981 = vmatmul.bf16.gmra.mxu3 %v5668_v55 }
 0xb01   :  { %8504 = vmatmul.msk.bf16.vlgmr.msrb.gmra.mxu0 %vm5501_vm14, %v13723_v49 }
 0xb11   :  { %8505 = vmatmul.msk.bf16.gmra.mxu0 %vm5501_vm14, %v5669_v24 }
 0xb42   :  { %v5939_v58 = vpop.f32.mrf.mxu3 }
 0xb4a   :  { %v5941_v7 = vpop.f32.mrf.mxu3 }
 0xb52   :  { %v5944_v11 = vpop.f32.mrf.mxu3 }
 0xb5a   :  { %v5946_v44 = vpop.f32.mrf.mxu3 }
 0xb5e   :  { %v5901_v0 = vpop.f32.mrf.mxu0 }
 0xb5f   :  { %v5958_v62 = vpop.f32.mrf.mxu1 }
 0xb64   :  { %v5920_v46 = vpop.f32.mrf.mxu2 }
 0xb65   :  { %v5977_v41 = vpop.f32.mrf.mxu3  ;;  %v5921_v48 = vadd.f32 %v5920_v46, %v5901_v0 }
 0xb66   :  { %v5903_v2 = vpop.f32.mrf.mxu0  ;;  %v5978_v5 = vadd.f32 %v5977_v41, %v5958_v62  ;;  %v9115_v41 = vld [vmem:[%s14139_s19 + $0x58] sm:$0xff] }
 0xb67   :  { %v5960_v20 = vpop.f32.mrf.mxu1  ;;  %v5940_v24 = vadd.f32 %v5939_v58, %v5921_v48  ;;  %v9109_v48 = vld [vmem:[%s14139_s19 + $0x28] sm:$0xff] }
 0xb69   :  { %v6014_v43 = vrot.slane %v5940_v24, 1 }
 0xb6c   :  { %v5922_v59 = vpop.f32.mrf.mxu2 }
 0xb6d   :  { %v5923_v28 = vadd.f32 %v5922_v59, %v5903_v2  ;;  %v5979_v33 = vpop.f32.mrf.mxu3 }
 0xb6e   :  { %v5906_v22 = vpop.f32.mrf.mxu0  ;;  %v5980_v10 = vadd.f32 %v5979_v33, %v5960_v20  ;;  %v9114_v33 = vld [vmem:[%s14139_s19 + $0x50] sm:$0xff]  ;;  %v9105_v20 = vld [vmem:[%s14139_s19 + $0x8] sm:$0xff] }
 0xb6f   :  { %v5942_v29 = vadd.f32 %v5941_v7, %v5923_v28  ;;  %v5963_v26 = vpop.f32.mrf.mxu1  ;;  %v9111_v28 = vld [vmem:[%s14139_s19 + $0x38] sm:$0xff] }
 0xb70   :  { %6306 = vmatpush.bf16.msra.mxu0 %v9111_v28 }
 0xb71   :  { %v6015_v31 = vrot.slane %v5942_v29, 1 }
 0xb73   :  { %v6016_v13 = vsel %vm339_vm3, %v6014_v43, %v6015_v31  ;;  %v9133_v43 = vld [vmem:[%s14139_s19 + $0xe8] sm:$0xff] }
 0xb74   :  { %v5925_v18 = vpop.f32.mrf.mxu2  ;;  %v6036_v3 = vmax.f32 %v5940_v24, %v6016_v13  ;;  %v9129_v24 = vld [vmem:[%s14139_s19 + $0xc8] sm:$0xff] }
 0xb75   :  { %v5926_v38 = vadd.f32 %v5925_v18, %v5906_v22  ;;  %v5982_v54 = vpop.f32.mrf.mxu3 }
 0xb76   :  { %v5908_v53 = vpop.f32.mrf.mxu0  ;;  %v5983_v14 = vadd.f32 %v5982_v54, %v5963_v26  ;;  %v9112_v54 = vld [vmem:[%s14139_s19 + $0x40] sm:$0xff] }
 0xb77   :  { %v5945_v49 = vadd.f32 %v5944_v11, %v5926_v38  ;;  %v5965_v30 = vpop.f32.mrf.mxu1  ;;  %v9116_v11 = vld [vmem:[%s14139_s19 + $0x60] sm:$0xff] }
 0xb78   :  { %6221 = vmatpush.bf16.msra.mxu3 %v9116_v11 }
 0xb79   :  { %v6020_v35 = vrot.slane %v5945_v49, 1 }
 0xb7b   :  { %v6021_v42 = vsel %vm339_vm3, %v6015_v31, %v6020_v35  ;;  %v9123_v31 = vld [vmem:[%s14139_s19 + $0x98] sm:$0xff] }
 0xb7c   :  { %v5927_v6 = vpop.f32.mrf.mxu2  ;;  %v6038_v56 = vmax.f32 %v5942_v29, %v6021_v42  ;;  %6222 = vmatpush.bf16.msra.mxu3 %v9115_v41  ;;  %v9106_v29 = vld [vmem:[%s14139_s19 + $0x10] sm:$0xff]  ;;  %v9125_v42 = vld [vmem:[%s14139_s19 + $0xa8] sm:$0xff] }
 0xb7d   :  { %v5928_v52 = vadd.f32 %v5927_v6, %v5908_v53  ;;  %v5984_v9 = vpop.f32.mrf.mxu3  ;;  %v9110_v6 = vld [vmem:[%s14139_s19 + $0x30] sm:$0xff] }
 0xb7e   :  { %v5996_v17 = vpop.f32.mrf.mxu0  ;;  %v6046_v39 = vpack.c.bf16 %v6038_v56, %v6036_v3  ;;  %v5985_v16 = vadd.f32 %v5984_v9, %v5965_v30  ;;  %6307 = vmatpush.bf16.msra.mxu0 %v9110_v6 }
 0xb7f   :  { %v5947_v32 = vadd.f32 %v5946_v44, %v5928_v52  ;;  %v5997_v8 = vadd.f32 %v5996_v17, %v5978_v5  ;;  %v9107_v52 = vld [vmem:[%s14139_s19 + $0x18] sm:$0xff] }
 0xb80   :  { %v9131_v17 = vld [vmem:[%s14139_s19 + $0xd8] sm:$0xff]  ;;  %6223 = vmatpush.bf16.msra.mxu3 %v9114_v33 }
 0xb81   :  { %v6024_v45 = vrot.slane %v5947_v32, 1  ;;  %v6017_v2 = vrot.slane %v5997_v8, 1 }
 0xb82   :  { %6308 = vmatpush.bf16.msra.mxu0 %v9109_v48 }
 0xb83   :  { %v6025_v27 = vsel %vm339_vm3, %v6020_v35, %v6024_v45  ;;  %v6042_v40 = vmax.f32 %v5947_v32, %v6024_v45  ;;  %v9130_v32 = vld [vmem:[%s14139_s19 + $0xd0] sm:$0xff]  ;;  %v9104_v35 = vld [vmem:[%s14139_s19] sm:$0xff] }
 0xb84   :  { %v6040_v36 = vmax.f32 %v5945_v49, %v6025_v27  ;;  %v9108_v49 = vld [vmem:[%s14139_s19 + $0x20] sm:$0xff]  ;;  %6423 = vmatpush.bf16.msrb.mxu3 %v9131_v17  ;;  %v9127_v27 = vld [vmem:[%s14139_s19 + $0xb8] sm:$0xff]  ;;  %v6504_v17 = vld [vmem:[%s14085_s17 + $0x48] sm:$0xff] }
 0xb85   :  { %v9128_v45 = vld [vmem:[%s14139_s19 + $0xc0] sm:$0xff] }
 0xb86   :  { %v6048_v60 = vpack.c.bf16 %v6042_v40, %v6040_v36  ;;  %v5998_v50 = vpop.f32.mrf.mxu0  ;;  %6309 = vmatpush.bf16.msra.mxu0 %v9108_v49  ;;  %v9122_v40 = vld [vmem:[%s14139_s19 + $0x90] sm:$0xff]  ;;  %v6506_v49 = vld [vmem:[%s14085_s17 + $0x58] sm:$0xff] }
 0xb87   :  { %v5999_v61 = vadd.f32 %v5998_v50, %v5980_v10  ;;  %v9126_v36 = vld [vmem:[%s14139_s19 + $0xb0] sm:$0xff]  ;;  %v9132_v50 = vld [vmem:[%s14139_s19 + $0xe0] sm:$0xff] }
 0xb88   :  { %v6062_v12 = vand.u32 %v6060_v51, %v6048_v60  ;;  %6424 = vmatpush.bf16.msrb.mxu3 %v9130_v32  ;;  %v6503_v32 = vld [vmem:[%s14085_s17 + $0x40] sm:$0xff] }
 0xb89   :  { %v6018_v58 = vrot.slane %v5999_v61, 1 }
 0xb8a   :  { %6073 = vmatpush.bf16.msra.mxu2 %v6062_v12  ;;  %6310 = vmatpush.bf16.msra.mxu0 %v9107_v52  ;;  %v6505_v52 = vld [vmem:[%s14085_s17 + $0x50] sm:$0xff] }
 0xb8b   :  { %v6019_v22 = vsel %vm339_vm3, %v6017_v2, %v6018_v58 }
 0xb8c   :  { %v6037_v53 = vmax.f32 %v5997_v8, %v6019_v22  ;;  %6425 = vmatpush.bf16.msrb.mxu3 %v9129_v24  ;;  %v6502_v24 = vld [vmem:[%s14085_s17 + $0x38] sm:$0xff] }
 0xb8e   :  { %v6001_v19 = vpop.f32.mrf.mxu0  ;;  %6074 = vmatpush.bf16.msra.mxu2 %v6046_v39  ;;  %6311 = vmatpush.bf16.msra.mxu0 %v9106_v29 }
 0xb8f   :  { %v6002_v4 = vadd.f32 %v6001_v19, %v5983_v14 }
 0xb90   :  { %6426 = vmatpush.bf16.msrb.mxu3 %v9128_v45 }
 0xb91   :  { %8510 = vmatmul.msk.bf16.vlgmr.msra.gmra.mxu2 %vm6055_vm0, %v9103_v23  ;;  %v6022_v1 = vrot.slane %v6002_v4, 1 }
 0xb92   :  { %6312 = vmatpush.bf16.msra.mxu0 %v9105_v20  ;;  %6236 = vmatpush.bf16.msrb.mxu2 %v9123_v31 }
 0xb93   :  { %v6023_v44 = vsel %vm339_vm3, %v6018_v58, %v6022_v1 }
 0xb94   :  { %v6039_v62 = vmax.f32 %v5999_v61, %v6023_v44  ;;  %6427 = vmatpush.bf16.msrb.mxu3 %v9127_v27  ;;  %v6500_v27 = vld [vmem:[%s14085_s17 + $0x28] sm:$0xff] }
 0xb96   :  { %v6003_v25 = vpop.f32.mrf.mxu0  ;;  %v6047_v38 = vpack.c.bf16 %v6039_v62, %v6037_v53  ;;  %6313 = vmatpush.bf16.msra.mxu0 %v9104_v35  ;;  %6237 = vmatpush.bf16.msrb.mxu2 %v9122_v40 }
 0xb97   :  { %v6004_v37 = vadd.f32 %v6003_v25, %v5985_v16 }
 0xb98   :  { %6428 = vmatpush.bf16.msrb.mxu3 %v9126_v36  ;;  %v6499_v36 = vld [vmem:[%s14085_s17 + $0x20] sm:$0xff] }
 0xb99   :  { %v6026_v55 = vrot.slane %v6004_v37, 1 }
 0xb9a   :  { %6443 = vmatpush.bf16.msra.mxu2 %v9133_v43  ;;  %6548 = vmatpush.msrb.mxu0 %v6506_v49  ;;  %v6498_v43 = vld [vmem:[%s14085_s17 + $0x18] sm:$0xff] }
 0xb9b   :  { %v6027_v7 = vsel %vm339_vm3, %v6022_v1, %v6026_v55  ;;  %v6043_v0 = vmax.f32 %v6004_v37, %v6026_v55  ;;  %vm6486_vm3 = vcmask 783360  }
 0xb9c   :  { %v6041_v46 = vmax.f32 %v6002_v4, %v6027_v7  ;;  %6429 = vmatpush.bf16.msrb.mxu3 %v9125_v42  ;;  %6549 = vmatpush.msrb.mxu0 %v6505_v52 }
 0xb9e   :  { %v6049_v59 = vpack.c.bf16 %v6043_v0, %v6041_v46  ;;  %6444 = vmatpush.bf16.msra.mxu2 %v9132_v50  ;;  %6550 = vmatpush.msrb.mxu0 %v6504_v17 }
 0xba0   :  { %v6065_v18 = vand.u32 %v6060_v51, %v6049_v59  ;;  %v9113_v51 = vld [vmem:[%s14139_s19 + $0x48] sm:$0xff]  ;;  %6430 = vmatpush.bf16.msrb.mxu3 %v9124_v15  ;;  %6551 = vmatpush.msrb.mxu0 %v6503_v32  ;;  %v6495_v15 = vld [vmem:[%s14085_s17] sm:$0xff] }
 0xba2   :  { %6087 = vmatpush.bf16.msra.mxu1 %v6065_v18  ;;  %6552 = vmatpush.msrb.mxu0 %v6502_v24 }
 0xba6   :  { %6088 = vmatpush.bf16.msra.mxu1 %v6047_v38 }
 0xba9   :  { %8511 = vmatmul.msk.bf16.vlgmr.msra.gmra.mxu1 %vm6055_vm0, %v9103_v23 }
 0xbaa   :  { %6326 = vmatpush.bf16.msrb.mxu1 %v9113_v51 }
 0xbae   :  { %6327 = vmatpush.bf16.msrb.mxu1 %v9112_v54  ;;  %v6496_v54 = vld [vmem:[%s14085_s17 + $0x8] sm:$0xff] }
 0xbb2   :  { %6514 = vmatpush.msra.mxu1 %v6506_v49 }
 0xbb4   :  { %6515 = vmatpush.msra.mxu1 %v6505_v52  ;;  %v9139_v52 = vld [vmem:[%s14140_s29 + $0x28] sm:$0xff] }
 0xbb6   :  { %6516 = vmatpush.msra.mxu1 %v6504_v17 }
 0xbb8   :  { %6517 = vmatpush.msra.mxu1 %v6503_v32  ;;  %v9144_v32 = vld [vmem:[%s14140_s29 + $0x50] sm:$0xff] }
 0xbba   :  { %6518 = vmatpush.msra.mxu1 %v6502_v24  ;;  %v9137_v24 = vld [vmem:[%s14140_s29 + $0x18] sm:$0xff] }
 0xc14   :  { %v6076_v21 = vpop.f32.mrf.mxu2 }
 0xc1c   :  { %v6078_v60 = vpop.f32.mrf.mxu2 }
 0xc1d   :  { %v6095_v13 = vpack.c.bf16 %v6078_v60, %v6076_v21  ;;  %v6501_v21 = vld [vmem:[%s14085_s17 + $0x30] sm:$0xff] }
 0xc1e   :  { %6519 = vmatpush.msra.mxu1 %v6501_v21  ;;  %6553 = vmatpush.msrb.mxu0 %v6501_v21  ;;  %v6497_v60 = vld [vmem:[%s14085_s17 + $0x10] sm:$0xff] }
 0xc1f   :  { %v6139_v12 = vshrl.u32 %v6095_v13, 16  ;;  %v6141_v56 = vshll.u32 %v6095_v13, 16  ;;  %6314 = vmatmul.bf16.vlgmr.msra.gmra.mxu0 %v6095_v13  ;;  %v6357_v63 = vrot.slane %v6095_v13, 1  ;;  %v6476_v13 = vpop.permute.xlu2 %6475 }
 0xc20   :  { %6520 = vmatpush.msra.mxu1 %v6500_v27  ;;  %6554 = vmatpush.msrb.mxu0 %v6500_v27 }
 0xc21   :  { %v6143_v26 = vrot.slane %v6141_v56, 1 }
 0xc22   :  { %6521 = vmatpush.msra.mxu1 %v6499_v36  ;;  %6555 = vmatpush.msrb.mxu0 %v6499_v36  ;;  %v6576_v36 = vld [vmem:[%s14141_s3] sm:$0x1] }
 0xc23   :  { %v6144_v3 = vor.u32 %v6143_v26, %v6139_v12 }
 0xc24   :  { %6522 = vmatpush.msra.mxu1 %v6498_v43  ;;  %6556 = vmatpush.msrb.mxu0 %v6498_v43 }
 0xc25   :  { %6224 = vmatmul.bf16.vlgmr.msra.gmra.mxu3 %v6144_v3  ;;  %v6481_v3 = vpop.permute.xlu0 %6480 }
 0xc26   :  { %v6090_v34 = vpop.f32.mrf.mxu1  ;;  %6523 = vmatpush.msra.mxu1 %v6497_v60  ;;  %6557 = vmatpush.msrb.mxu0 %v6497_v60 }
 0xc28   :  { %6524 = vmatpush.msra.mxu1 %v6496_v54  ;;  %6558 = vmatpush.msrb.mxu0 %v6496_v54 }
 0xc2a   :  { %6525 = vmatpush.msra.mxu1 %v6495_v15  ;;  %6559 = vmatpush.msrb.mxu0 %v6495_v15  ;;  %v9143_v15 = vld [vmem:[%s14140_s29 + $0x48] sm:$0xff] }
 0xc2e   :  { %v6092_v39 = vpop.f32.mrf.mxu1 }
 0xc2f   :  { %v6096_v23 = vpack.c.bf16 %v6092_v39, %v6090_v34 }
 0xc31   :  { %v6148_v19 = vshll.u32 %v6096_v23, 16  ;;  %8613 = vmatmul.msk.bf16.vlgmr.msrb.gmra.mxu1 %vm5501_vm14, %v6096_v23  ;;  %v6146_v9 = vshrl.u32 %v6096_v23, 16  ;;  %v6358_v30 = vrot.slane %v6096_v23, 1 }
 0xc32   :  { %6755 = vmatpush.bf16.msrb.mxu1 %v9139_v52 }
 0xc33   :  { %v6150_v14 = vrot.slane %v6148_v19, 1 }
 0xc35   :  { %v6151_v57 = vor.u32 %v6150_v14, %v6146_v9  ;;  %6431 = vmatmul.bf16.vlgmr.msrb.gmra.mxu3 %v6357_v63 }
 0xc37   :  { %8572 = vmatmul.msk.bf16.vlgmr.msrb.gmra.mxu2 %vm5501_vm14, %v6151_v57 }
 0xc47   :  { %8674 = vmatmul.msk.bf16.vlgmr.msra.gmra.mxu2 %vm5501_vm14, %v6358_v30 }
 0xc9c   :  { %v6315_v61 = vpop.f32.mrf.mxu0 }
 0xca4   :  { %v6317_v11 = vpop.f32.mrf.mxu0 }
 0xca8   :  { %v6225_v10 = vpop.f32.mrf.mxu3 }
 0xcae   :  { %v6329_v47 = vpop.f32.mrf.mxu1 }
 0xcb0   :  { %v6227_v4 = vpop.f32.mrf.mxu3 }
 0xcb6   :  { %v6331_v59 = vpop.f32.mrf.mxu1 }
 0xcb8   :  { %v6432_v8 = vpop.f32.mrf.mxu3 }
 0xcba   :  { %v6239_v16 = vpop.f32.mrf.mxu2 }
 0xcbb   :  { %v6240_v5 = vadd.f32 %v6239_v16, %v6225_v10 }
 0xcbd   :  { %v6316_v37 = vadd.f32 %v6315_v61, %v6240_v5 }
 0xcbf   :  { %v6330_v58 = vadd.f32 %v6329_v47, %v6316_v37 }
 0xcc0   :  { %v6434_v22 = vpop.f32.mrf.mxu3 }
 0xcc2   :  { %v6241_v25 = vpop.f32.mrf.mxu2 }
 0xcc3   :  { %v6242_v55 = vadd.f32 %v6241_v25, %v6227_v4 }
 0xcc5   :  { %v6318_v2 = vadd.f32 %v6317_v11, %v6242_v55 }
 0xcc7   :  { %v6332_v62 = vadd.f32 %v6331_v59, %v6318_v2 }
 0xcca   :  { %v6446_v1 = vpop.f32.mrf.mxu2 }
 0xccb   :  { %v6447_v7 = vadd.f32 %v6446_v1, %v6432_v8 }
 0xccd   :  { %v6451_v0 = vadd.f32 %v6447_v7, %v6330_v58  ;;  %v9418_v7 = vmov 18.0  }
 0xccf   :  { %v6453_v46 = vmul.f32 %v6451_v0, %v6451_v0 }
 0xcd1   :  { %v6455_v44 = vmul.f32 %v6453_v46, %v6451_v0 }
 0xcd2   :  { %v6448_v41 = vpop.f32.mrf.mxu2 }
 0xcd3   :  { %v6457_v18 = vmul.f32 0.044715, %v6455_v44  ;;  %v6449_v53 = vadd.f32 %v6448_v41, %v6434_v22  ;;  %v6599_v22 = vld [vmem:[%s14081_s13 + $0x18] sm:$0xff]  ;;  %v6598_v41 = vld [vmem:[%s14081_s13 + $0x10] sm:$0xff] }
 0xcd4   :  { %6615 = vmatpush.msrb.mxu2 %v6599_v22 }
 0xcd5   :  { %v6459_v38 = vadd.f32 %v6457_v18, %v6451_v0  ;;  %v6452_v28 = vadd.f32 %v6449_v53, %v6332_v62  ;;  %v6597_v53 = vld [vmem:[%s14081_s13 + $0x8] sm:$0xff] }
 0xcd6   :  { %6616 = vmatpush.msrb.mxu2 %v6598_v41 }
 0xcd7   :  { %v6461_v6 = vmul.f32 0.7978846, %v6459_v38  ;;  %v6454_v48 = vmul.f32 %v6452_v28, %v6452_v28 }
 0xcd8   :  { %6617 = vmatpush.msrb.mxu2 %v6597_v53 }
 0xcd9   :  { %9373 = vtanh.f32 %v6461_v6  ;;  %v6456_v33 = vmul.f32 %v6454_v48, %v6452_v28  ;;  %v6596_v48 = vld [vmem:[%s14081_s13] sm:$0xff] }
 0xcda   :  { %6618 = vmatpush.msrb.mxu2 %v6596_v48 }
 0xcdb   :  { %v6458_v29 = vmul.f32 0.044715, %v6456_v33  ;;  %v9145_v33 = vld [vmem:[%s14140_s29 + $0x58] sm:$0xff] }
 0xcdc   :  { %6703 = vmatpush.bf16.msra.mxu3 %v9145_v33 }
 0xcdd   :  { %v6460_v20 = vadd.f32 %v6458_v29, %v6452_v28  ;;  %v9138_v29 = vld [vmem:[%s14140_s29 + $0x20] sm:$0xff] }
 0xcde   :  { %6756 = vmatpush.bf16.msrb.mxu1 %v9138_v29 }
 0xcdf   :  { %v9374_v35 = vpop.eup %9373  ;;  %v6462_v45 = vmul.f32 0.7978846, %v6460_v20 }
 0xce0   :  { %v6465_v31 = vadd.f32 1.0, %v9374_v35  ;;  %6704 = vmatpush.bf16.msra.mxu3 %v9144_v32  ;;  %v9136_v35 = vld [vmem:[%s14140_s29 + $0x10] sm:$0xff] }
 0xce1   :  { %9375 = vtanh.f32 %v6462_v45 }
 0xce2   :  { %v6467_v40 = vmul.f32 0.5, %v6465_v31  ;;  %9377 = vrcp.f32 %v9418_v7  ;;  %6757 = vmatpush.bf16.msrb.mxu1 %v9137_v24  ;;  %v9150_v7 = vld [vmem:[%s14094_s26 + $0x20] sm:$0xff] }
 0xce4   :  { %v13951_v51 = vmul.f32 %v6467_v40, %v6451_v0  ;;  %6705 = vmatpush.bf16.msra.mxu3 %v9143_v15 }
 0xce6   :  { %v6483_v12 = vmul.f32 %v6476_v13, %v13951_v51  ;;  %6758 = vmatpush.bf16.msrb.mxu1 %v9136_v35 }
 0xce7   :  { %v9376_v42 = vpop.eup %9375 }
 0xce8   :  { %v6466_v50 = vadd.f32 1.0, %v9376_v42  ;;  %v6530_v34 = vmul.f32 %v6483_v12, %v13951_v51  ;;  %v6485_v23 = vsel %vm5631_vm15, %v6483_v12, 0.0  ;;  %v9378_v0 = vpop.eup %9377 }
 0xce9   :  { %v6565_v11 = vmul.f32 18.0, %v9378_v0  ;;  %vm6569_vm2 = vweird.f32 %v9378_v0 }
 0xcea   :  { %v6468_v56 = vmul.f32 0.5, %v6466_v50  ;;  %v6532_v14 = vsel %vm5631_vm15, %v6530_v34, 0.0  ;;  %v6589_v50 = vld [vmem:[%s14141_s3 + $0x1] sm:$0x1] }
 0xceb   :  { %v6566_v46 = vsub.f32 1.0, %v6565_v11  ;;  %v9142_v34 = vld [vmem:[%s14140_s29 + $0x40] sm:$0xff] }
 0xcec   :  { %v13963_v26 = vmul.f32 %v6468_v56, %v6452_v28  ;;  %6706 = vmatpush.bf16.msra.mxu3 %v9142_v34 }
 0xced   :  { %v6567_v2 = vmul.f32 %v9378_v0, %v6566_v46 }
 0xcee   :  { %v6484_v39 = vmul.f32 %v6481_v3, %v13963_v26  ;;  %v9135_v3 = vld [vmem:[%s14140_s29 + $0x8] sm:$0xff] }
 0xcef   :  { %v6568_v44 = vadd.f32 %v9378_v0, %v6567_v2  ;;  %6759 = vmatpush.bf16.msrb.mxu1 %v9135_v3 }
 0xcf0   :  { %v6487_v19 = vsel %vm6486_vm3, %v6484_v39, 0.0  ;;  %v6531_v63 = vmul.f32 %v6484_v39, %v13963_v26  ;;  %v9134_v39 = vld [vmem:[%s14140_s29] sm:$0xff] }
 0xcf1   :  { %v6488_v9 = vadd.f32 %v6487_v19, %v6485_v23  ;;  %v6570_v59 = vsel %vm6569_vm2, %v9378_v0, %v6568_v44  ;;  %v9141_v23 = vld [vmem:[%s14140_s29 + $0x38] sm:$0xff]  ;;  %v9140_v19 = vld [vmem:[%s14140_s29 + $0x30] sm:$0xff] }
 0xcf2   :  { %v6533_v57 = vsel %vm6486_vm3, %v6531_v63, 0.0  ;;  %6707 = vmatpush.bf16.msra.mxu3 %v9141_v23 }
 0xcf3   :  { %v6489_v30 = vrot.slane %v6488_v9, 4  ;;  %v6534_v10 = vadd.f32 %v6533_v57, %v6532_v14  ;;  %6760 = vmatpush.bf16.msrb.mxu1 %v9134_v39 }
 0xcf5   :  { %v6490_v16 = vadd.f32 %v6489_v30, %v6488_v9  ;;  %v6535_v4 = vrot.slane %v6534_v10, 4 }
 0xcf6   :  { %6708 = vmatpush.bf16.msra.mxu3 %v9140_v19 }
 0xcf7   :  { %v6536_v25 = vadd.f32 %v6535_v4, %v6534_v10  ;;  %v6491_v5 = vrot.slane %v6490_v16, 2 }
 0xcf9   :  { %v6492_v61 = vadd.f32 %v6491_v5, %v6490_v16  ;;  %v6537_v37 = vrot.slane %v6536_v25, 2 }
 0xcfb   :  { %v6493_v47 = vrot.slane %v6492_v61, 1  ;;  %v6538_v8 = vadd.f32 %v6537_v37, %v6536_v25 }
 0xcfd   :  { %v6494_v1 = vadd.f32 %v6493_v47, %v6492_v61  ;;  %v6539_v55 = vrot.slane %v6538_v8, 1  ;;  %v9149_v47 = vld [vmem:[%s14094_s26 + $0x18] sm:$0xff] }
 0xcfe   :  { %6812 = vmatpush.bf16.msra.mxu2 %v9149_v47 }
 0xcff   :  { %8675 = vmatmul.msk.f32.vlgmr.msra.gmra.mxu1 %vm5631_vm15, %v6494_v1  ;;  %v6540_v58 = vadd.f32 %v6539_v55, %v6538_v8  ;;  %v9152_v8 = vld [vmem:[%s14094_s26 + $0x30] sm:$0xff]  ;;  %v9147_v1 = vld [vmem:[%s14094_s26 + $0x8] sm:$0xff] }
 0xd00   :  { %v9151_v55 = vld [vmem:[%s14094_s26 + $0x28] sm:$0xff] }
 0xd01   :  { %8676 = vmatmul.msk.f32.vlgmr.msrb.gmra.mxu0 %vm5631_vm15, %v6540_v58  ;;  %v9146_v58 = vld [vmem:[%s14094_s26] sm:$0xff] }
 0xd7c   :  { %v6527_v18 = vpop.f32.mrf.mxu1 }
 0xd7d   :  { %v6571_v62 = vmul.f32 %v6570_v59, %v6527_v18 }
 0xd7e   :  { %v6561_v38 = vpop.f32.mrf.mxu0 }
 0xd7f   :  { %v6573_v28 = vmul.f32 %v6571_v62, %v6571_v62  ;;  %v6572_v6 = vmul.f32 %v6570_v59, %v6561_v38  ;;  %v9256_v38 = vld [vmem:[%s14095_s27] ss:$0 sm:$0xff]  ;;  %s9419_s27 = smov [#allocation3]  }
 0xd80   :  { %s6897_s0 = sshll.u32 %s9419_s27, 4  ;;  %s6898_s0 = int_to_ptr.vmem [resolvable:$true] %s6897_s0 }
 0xd81   :  { %v6574_v49 = vsub.f32 %v6572_v6, %v6573_v28 }
 0xd83   :  { %v6575_v17 = vmax.f32 %v6574_v49, 0.0 }
 0xd85   :  { %v6577_v20 = vadd.f32 1e-05, %v6575_v17 }
 0xd87   :  { %9379 = vrsqrt.f32 %v6577_v20  ;;  %vm6584_vm5 = vweird.f32 %v6577_v20 }
 0xd8d   :  { %v9380_v45 = vpop.eup %9379 }
 0xd8e   :  { %v6579_v21 = vmul.f32 %v9380_v45, %v6577_v20  ;;  %vm6585_vm4 = vweird.f32 %v9380_v45 }
 0xd8f   :  { %vm6586_vm6 = vmor %vm6584_vm5, %vm6585_vm4 }
 0xd90   :  { %v6580_v31 = vmul.f32 %v9380_v45, %v6579_v21 }
 0xd92   :  { %v6581_v27 = vmul.f32 0.5, %v6580_v31 }
 0xd94   :  { %v6582_v40 = vsub.f32 1.5, %v6581_v27 }
 0xd96   :  { %v6583_v43 = vmul.f32 %v9380_v45, %v6582_v40 }
 0xd98   :  { %v6587_v42 = vsel %vm6586_vm6, %v9380_v45, %v6583_v43 }
 0xd99   :  { %v6588_v60 = vmul.f32 %v6587_v42, %v6576_v36 }
 0xd9b   :  { %v6590_v13 = vmul.f32 %v6588_v60, %v6571_v62 }
 0xd9d   :  { %v6591_v54 = vsub.f32 %v6589_v50, %v6590_v13 }
 0xd9f   :  { %v6593_v12 = vrot.slane %v6591_v54, 7 }
 0xda1   :  { %v6595_v56 = vsel %vm896_vm10, %v6588_v60, %v6593_v12  ;;  %vm6768_vm10 = vcmask 520192  }
 0xda2   :  { %8677 = vmatmul.msk.f32.vlgmr.msrb.gmra.mxu2 %vm5501_vm14, %v6595_v56 }
 0xe25   :  { %v6620_v63 = vpop.f32.mrf.mxu2 }
 0xe26   :  { %v6623_v9 = vperm.slane %v6620_v63, 0  ;;  %v6626_v30 = vperm.slane %v6620_v63, 1 }
 0xe28   :  { %v6624_v14 = vmul.f32 %v6623_v9, %v13951_v51  ;;  %v6625_v57 = vmul.f32 %v6623_v9, %v13963_v26  ;;  %v9153_v51 = vld [vmem:[%s14094_s26 + $0x38] sm:$0xff]  ;;  %v9148_v26 = vld [vmem:[%s14094_s26 + $0x10] sm:$0xff] }
 0xe29   :  { %6868 = vmatpush.bf16.msra.mxu0 %v9153_v51  ;;  %6813 = vmatpush.bf16.msra.mxu2 %v9148_v26 }
 0xe2a   :  { %v6627_v10 = vadd.f32 %v6626_v30, %v6624_v14  ;;  %v6628_v16 = vadd.f32 %v6626_v30, %v6625_v57 }
 0xe2c   :  { %v6629_v4 = vpack.c.bf16 %v6628_v16, %v6627_v10 }
 0xe2d   :  { %6869 = vmatpush.bf16.msra.mxu0 %v9152_v8  ;;  %6814 = vmatpush.bf16.msra.mxu2 %v9147_v1 }
 0xe2e   :  { %v6658_v25 = vshll.u32 %v6629_v4, 16  ;;  %8739 = vmatmul.msk.bf16.vlgmr.msrb.gmra.mxu1 %vm5631_vm15, %v6629_v4  ;;  %v6656_v5 = vshrl.u32 %v6629_v4, 16 }
 0xe30   :  { %v6660_v61 = vrot.slane %v6658_v25, 1 }
 0xe31   :  { %6870 = vmatpush.bf16.msra.mxu0 %v9151_v55  ;;  %6815 = vmatpush.bf16.msra.mxu2 %v9146_v58 }
 0xe32   :  { %v6661_v37 = vor.u32 %v6660_v61, %v6656_v5 }
 0xe34   :  { %8714 = vmatmul.msk.bf16.vlgmr.msra.gmra.mxu3 %vm5631_vm15, %v6661_v37 }
 0xe35   :  { %6871 = vmatpush.bf16.msra.mxu0 %v9150_v7 }
 0xeab   :  { %v6762_v0 = vpop.f32.mrf.mxu1 }
 0xeb3   :  { %v6764_v2 = vpop.f32.mrf.mxu1 }
 0xeb7   :  { %v6710_v11 = vpop.f32.mrf.mxu3 }
 0xeb8   :  { %v6763_v46 = vadd.f32 %v6762_v0, %v6710_v11 }
 0xeba   :  { %6767 = vst.msk [vmem:[#allocation2] sm:$0xff] %vm4252_vm8, %v6763_v46 }
 0xebf   :  { %v6712_v44 = vpop.f32.mrf.mxu3 }
 0xec0   :  { %v6765_v59 = vadd.f32 %v6764_v2, %v6712_v44 }
 0xec2   :  { %6769 = vst.msk [vmem:[#allocation2 + $0x8] sm:$0x1f] %vm6768_vm10, %v6765_v59 }
 0xec9   :  { %v6771_v22 = vld [vmem:[#allocation2] ss:$8 sm:$0x3]  ;;  %v6826_v41 = vld [vmem:[#allocation2 + $0x1] ss:$8 sm:$0x3] }
 0xeca   :  { %v6772_v18 = vpack.c.bf16 %v6771_v22, %v6771_v22  ;;  %v6827_v62 = vpack.c.bf16 %v6826_v41, %v6826_v41 }
 0xecc   :  { %8756 = vmatmul.msk.bf16.vlgmr.msra.gmra.mxu2 %vm4252_vm8, %v6772_v18  ;;  %8781 = vmatmul.msk.bf16.vlgmr.msra.gmra.mxu0 %vm4252_vm8, %v6827_v62 }
 0xf49   :  { %v6873_v53 = vpop.f32.mrf.mxu0 }
 0xf4f   :  { %v6817_v28 = vpop.f32.mrf.mxu2 }
 0xf50   :  { %v6824_v6 = vadd.f32 %v9256_v38, %v6817_v28 }
 0xf51   :  { %v6875_v48 = vpop.f32.mrf.mxu0 }
 0xf52   :  { %v6877_v49 = vadd.f32 %v6873_v53, %v6824_v6 }
 0xf54   :  { %v6879_v52 = vsel %vm6878_vm7, %v6877_v49, -inf }
 0xf55   :  { %6880 = vmax.xlane.f32.xlu1 %v6879_v52 }
 0xf57   :  { %v6819_v33 = vpop.f32.mrf.mxu2 }
 0xfc8   :  { %v6881_v17 = vpop.xlane.xlu1 %6880 }
 0xfc9   :  { %v6882_v29 = vsub.f32 %v6877_v49, %v6881_v17 }
 0xfcb   :  { %v6883_v32 = vmul.f32 1.442695, %v6882_v29 }
 0xfcd   :  { %9381 = vpow2.f32 %v6883_v32 }
 0xfd3   :  { %v9382_v20 = vpop.eup %9381 }
 0xfd4   :  { %v6885_v24 = vsel %vm6878_vm7, %v9382_v20, 0.0 }
 0xfd5   :  { %6886 = vadd.xlane.f32.xlu2 %v6885_v24 }
0x1048   :  { %v6887_v35 = vpop.xlane.xlu2 %6886 }
0x1049   :  { %9383 = vlog2.f32 %v6887_v35 }
0x104f   :  { %v9384_v45 = vpop.eup %9383 }
0x1050   :  { %v6889_v21 = vmul.f32 0.6931472, %v9384_v45 }
0x1052   :  { %v6890_v31 = vsub.f32 %v6882_v29, %v6889_v21 }
0x1054   :  { %6891 = vst.msk [vmem:[#allocation3] sm:$0x3] %vm6878_vm7, %v6890_v31 }
0x1055   :  { %6902 = dma.vmem_to_hbm [thread:$0]  %s6898_s0, 32, %s6900_s5, [#allocation4]  }
0x1056   :  { %9409 = dma.done.wait [#allocation4], 32  }
0x1057   :  { %9410 = vsyncadd [#allocation4], 4294967264 }
0x1058   :  { %6907 = vsyncpa [#allocation4], 1 }

</bundles_post_ra>
